<compile_context>
chip_gen: v7x
topology: tpu7x:2x2x1
jax: 0.10.0
libtpu: 0.0.40
codegen_flags: <defaults>
</compile_context>

<pallas_src>
import functools

import jax
import jax.numpy as jnp
from jax.experimental import pallas as pl
from jax.experimental.pallas import tpu as pltpu


def _mm_relu_bf16(w_ref, x, b_ref):
    """(C_out, C_in) @ (C_in, T) on the MXU (bf16 in, f32 acc) + bias + ReLU -> bf16."""
    y = jnp.dot(w_ref[...], x, preferred_element_type=jnp.float32) + b_ref[...]
    return jnp.maximum(y, 0.0).astype(jnp.bfloat16)


def _pool_kernel(x_ref, w1, b1, w2, b2, w3, b3, w4, b4, sum_ref):
    """Pass 1: conv1..conv4 per point tile; accumulate sum over points of x4 in f32."""
    t = pl.program_id(1)

    @pl.when(t == 0)
    def _init():
        sum_ref[...] = jnp.zeros_like(sum_ref)

    x = x_ref[...]                                    # (9, T) bf16
    pf1 = _mm_relu_bf16(w1, x, b1)                    # (128, T)  fused conv1 | e_conv1
    pf2 = _mm_relu_bf16(w2, pf1, b2)                  # (256, T)  fused conv2 | e_conv2
    x3 = _mm_relu_bf16(w3, pf2, b3)                   # (512, T)
    x4 = jnp.maximum(
        jnp.dot(w4[...], x3, preferred_element_type=jnp.float32) + b4[...], 0.0
    )                                                 # (1024, T) f32 (kept f32 for exact pooling)
    sum_ref[...] += jnp.sum(x4, axis=1, keepdims=True)  # (1024, 1) f32 accumulator


def _out_kernel(x_ref, apb_ref, w1, b1, w2, b2, w5a, w5b, out_ref):
    """Pass 2: recompute pf1/pf2 per tile (cheap) and apply the factored conv5."""
    x = x_ref[...]                                    # (9, T) bf16
    pf1 = _mm_relu_bf16(w1, x, b1)                    # (128, T)
    pf2 = _mm_relu_bf16(w2, pf1, b2)                  # (256, T)
    y = (
        jnp.dot(w5a[...], pf1, preferred_element_type=jnp.float32)
        + jnp.dot(w5b[...], pf2, preferred_element_type=jnp.float32)
        + apb_ref[...]                                # (512, 1) pooled term + b5, acts as bias
    )                                                 # (512, T) f32
    out_ref[...] = jnp.maximum(y, 0.0).astype(out_ref.dtype)


def _choose_point_tile(n, max_tile):
    """Largest multiple of 128 that divides n and is <= max_tile; fall back to full n."""
    best = n
    t = 128
    while t <= min(n, max_tile):
        if n % t == 0:
            best = t
        t += 128
    return best


def init_params(key):
    """Deterministic params, PyTorch Conv1d(k=1) layout: weight (C_out, C_in), bias (C_out,)."""
    dims = {
        "conv1": (64, 6),
        "e_conv1": (64, 3),
        "conv2": (128, 64),
        "e_conv2": (128, 64),
        "conv3": (512, 256),
        "conv4": (1024, 512),
        "conv5": (512, 1408),
    }
    params = {}
    keys = jax.random.split(key, 2 * len(dims))
    for i, (name, (cout, cin)) in enumerate(sorted(dims.items())):
        bound = 1.0 / (cin ** 0.5)  # PyTorch default uniform init bound
        w = jax.random.uniform(keys[2 * i], (cout, cin), jnp.float32, -bound, bound)
        b = jax.random.uniform(keys[2 * i + 1], (cout,), jnp.float32, -bound, bound)
        params[name] = (w, b)
    return params


@functools.partial(jax.jit, static_argnames=("num_points", "max_point_tile"))
def modelfeat_forward(cad, params, num_points, max_point_tile=1024):
    """cad: (B, 9, num_points) float32 (PyTorch NCL). Returns (B, 512, num_points) float32."""
    B, C, N = cad.shape
    assert C == 9 and N == num_points

    T = _choose_point_tile(N, max_point_tile)
    n_tiles = N // T

    f32, bf16 = jnp.float32, jnp.bfloat16

    w1, b1 = params["conv1"]        # (64, 6), (64,)
    we1, be1 = params["e_conv1"]    # (64, 3), (64,)
    w2, b2 = params["conv2"]        # (128, 64), (128,)
    we2, be2 = params["e_conv2"]    # (128, 64), (128,)
    w3, b3 = params["conv3"]        # (512, 256), (512,)
    w4, b4 = params["conv4"]        # (1024, 512), (1024,)
    w5, b5 = params["conv5"]        # (512, 1408), (512,)

    # Fuse conv1/e_conv1 and conv2/e_conv2 into block-diagonal matmuls so the
    # channel concatenations never materialize.
    w1blk = jnp.zeros((128, 9), f32).at[:64, :6].set(w1).at[64:, 6:].set(we1)
    b1blk = jnp.concatenate([b1, be1])[:, None]                       # (128, 1)
    w2blk = jnp.zeros((256, 128), f32).at[:128, :64].set(w2).at[128:, 64:].set(we2)
    b2blk = jnp.concatenate([b2, be2])[:, None]                       # (256, 1)

    # conv5 split over feat1 = [pf1 | pf2 | ap].
    w5a = w5[:, :128]
    w5b = w5[:, 128:384]
    w5ap = w5[:, 384:]                                                # (512, 1024), stays f32

    # bf16 weights / activations on the MXU, f32 accumulation & biases.
    cad_bf = cad.astype(bf16)
    w1blk_bf, w2blk_bf = w1blk.astype(bf16), w2blk.astype(bf16)
    w3_bf, w4_bf = w3.astype(bf16), w4.astype(bf16)
    w5a_bf, w5b_bf = w5a.astype(bf16), w5b.astype(bf16)
    b3c, b4c = b3[:, None], b4[:, None]

    def _const_spec(arr):
        nd = arr.ndim
        return pl.BlockSpec(arr.shape, lambda b, t: (0,) * nd)

    vmem_limit = 48 * 1024 * 1024  # safe ceiling on v5e/v6e (128 MiB) and v7x (64 MiB)

    # ---- Pass 1: exact f32 sum of x4 over all points (AvgPool1d numerator). ----
    pool_weights = (w1blk_bf, b1blk, w2blk_bf, b2blk, w3_bf, b3c, w4_bf, b4c)
    sum_x4 = pl.pallas_call(
        _pool_kernel,
        out_shape=jax.ShapeDtypeStruct((B, 1024, 1), f32),
        grid=(B, n_tiles),
        in_specs=[pl.BlockSpec((None, 9, T), lambda b, t: (b, 0, t))]
        + [_const_spec(a) for a in pool_weights],
        out_specs=pl.BlockSpec((None, 1024, 1), lambda b, t: (b, 0, 0)),
        compiler_params=pltpu.CompilerParams(
            dimension_semantics=("parallel", "arbitrary"),
            vmem_limit_bytes=vmem_limit,
        ),
    )(cad_bf, *pool_weights)

    # Pooled conv5 term, computed once per batch element (tiny matvec) and
    # folded into the conv5 bias:  ap_bias = w5_ap @ mean(x4) + b5.
    ap = sum_x4[:, :, 0] * (1.0 / N)                                  # (B, 1024) f32
    ap_bias = (jnp.einsum("bk,ck->bc", ap, w5ap) + b5)[:, :, None]    # (B, 512, 1) f32

    # ---- Pass 2: recompute pf1/pf2 per tile and apply the factored conv5. ----
    out_weights = (w1blk_bf, b1blk, w2blk_bf, b2blk, w5a_bf, w5b_bf)
    out = pl.pallas_call(
        _out_kernel,
        out_shape=jax.ShapeDtypeStruct((B, 512, N), f32),
        grid=(B, n_tiles),
        in_specs=[
            pl.BlockSpec((None, 9, T), lambda b, t: (b, 0, t)),
            pl.BlockSpec((None, 512, 1), lambda b, t: (b, 0, 0)),
        ]
        + [_const_spec(a) for a in out_weights],
        out_specs=pl.BlockSpec((None, 512, T), lambda b, t: (b, 0, t)),
        compiler_params=pltpu.CompilerParams(
            dimension_semantics=("parallel", "parallel"),
            vmem_limit_bytes=vmem_limit,
        ),
    )(cad_bf, ap_bias, *out_weights)

    return out


def modelfeat_reference(cad, params):
    """Pure-JAX f32 reference of the PyTorch ModelFeat.forward (for checking)."""
    def conv(x_ncl, name):
        w, b = params[name]
        return jnp.einsum("oc,bcn->bon", w, x_ncl) + b[None, :, None]

    x = cad[:, 0:6, :]
    emb = cad[:, 6:9, :]
    x = jax.nn.relu(conv(x, "conv1"))
    emb = jax.nn.relu(conv(emb, "e_conv1"))
    pf1 = jnp.concatenate([x, emb], axis=1)
    x = jax.nn.relu(conv(x, "conv2"))
    emb = jax.nn.relu(conv(emb, "e_conv2"))
    pf2 = jnp.concatenate([x, emb], axis=1)
    x = jax.nn.relu(conv(pf2, "conv3"))
    x = jax.nn.relu(conv(x, "conv4"))
    ap = jnp.mean(x, axis=2, keepdims=True)                        # AvgPool1d(num_points)
    ap = jnp.broadcast_to(ap, (x.shape[0], 1024, cad.shape[2]))    # repeat
    feat1 = jnp.concatenate([pf1, pf2, ap], axis=1)
    return jax.nn.relu(conv(feat1, "conv5"))


if __name__ == "__main__":
    B = 2
    NUM_POINTS = 512  # small demo; tile of 128 points -> 4 tiles, exercises the tiled pool

    key = jax.random.PRNGKey(0)
    k_data, k_params = jax.random.split(key)
    cad = jax.random.normal(k_data, (B, 9, NUM_POINTS), dtype=jnp.float32)
    params = init_params(k_params)

    out = modelfeat_forward(cad, params, NUM_POINTS, max_point_tile=128)
    out = jax.block_until_ready(out)
    assert out.shape == (B, 512, NUM_POINTS), out.shape

    ref = modelfeat_reference(cad, params)
    rel_err = float(jnp.max(jnp.abs(out - ref)) / (jnp.max(jnp.abs(ref)) + 1e-6))
    assert rel_err < 5e-2, f"relative error too large: {rel_err}"  # bf16 MXU tolerance

    print("KERNEL_OK")
</pallas_src>

<mosaic_0001>
module attributes {stable_mosaic.version = 11 : i64} {
  func.func @_pool_kernel(%arg0: i32, %arg1: i32, %arg2: memref<1x9x128xbf16, #tpu.memory_space<vmem>>, %arg3: memref<128x9xbf16, #tpu.memory_space<vmem>>, %arg4: memref<128x1xf32, #tpu.memory_space<vmem>>, %arg5: memref<256x128xbf16, #tpu.memory_space<vmem>>, %arg6: memref<256x1xf32, #tpu.memory_space<vmem>>, %arg7: memref<512x256xbf16, #tpu.memory_space<vmem>>, %arg8: memref<512x1xf32, #tpu.memory_space<vmem>>, %arg9: memref<1024x512xbf16, #tpu.memory_space<vmem>>, %arg10: memref<1024x1xf32, #tpu.memory_space<vmem>>, %arg11: memref<1x1024x1xf32, #tpu.memory_space<vmem>>) attributes {dimension_semantics = [#tpu.dimension_semantics<parallel>, #tpu.dimension_semantics<arbitrary>], iteration_bounds = array<i64: 2, 4>, scalar_prefetch = 0 : i64, scratch_operands = 0 : i64, tpu.core_type = #tpu.core_type<tc>, window_params = [{transform_indices = @transform_0, window_bounds = array<i64: 1, 9, 128>}, {pipeline_mode = #tpu.pipeline_mode<synchronous>, transform_indices = @transform_1, window_bounds = array<i64: 128, 9>}, {pipeline_mode = #tpu.pipeline_mode<synchronous>, transform_indices = @transform_2, window_bounds = array<i64: 128, 1>}, {pipeline_mode = #tpu.pipeline_mode<synchronous>, transform_indices = @transform_3, window_bounds = array<i64: 256, 128>}, {pipeline_mode = #tpu.pipeline_mode<synchronous>, transform_indices = @transform_4, window_bounds = array<i64: 256, 1>}, {pipeline_mode = #tpu.pipeline_mode<synchronous>, transform_indices = @transform_5, window_bounds = array<i64: 512, 256>}, {pipeline_mode = #tpu.pipeline_mode<synchronous>, transform_indices = @transform_6, window_bounds = array<i64: 512, 1>}, {pipeline_mode = #tpu.pipeline_mode<synchronous>, transform_indices = @transform_7, window_bounds = array<i64: 1024, 512>}, {pipeline_mode = #tpu.pipeline_mode<synchronous>, transform_indices = @transform_8, window_bounds = array<i64: 1024, 1>}, {transform_indices = @transform_9, window_bounds = array<i64: 1, 1024, 1>}]} {
    %c0_i32 = arith.constant 0 : i32
    %0 = arith.cmpi eq, %arg1, %c0_i32 : i32
    %1 = arith.extui %0 : i1 to i32
    %c0_i32_0 = arith.constant 0 : i32
    %2 = arith.cmpi ne, %1, %c0_i32_0 : i32
    scf.if %2 {
      %cst_33 = arith.constant 0.000000e+00 : f32
      %44 = vector.broadcast %cst_33 : f32 to vector<1024x1xf32>
      %c0_34 = arith.constant 0 : index
      %c0_35 = arith.constant 0 : index
      %c0_36 = arith.constant 0 : index
      %45 = vector.load %arg11[%c0_34, %c0_35, %c0_36] : memref<1x1024x1xf32, #tpu.memory_space<vmem>>, vector<1x1024x1xf32>
      %46 = vector.shape_cast %45 : vector<1x1024x1xf32> to vector<1024x1xf32>
      %47 = vector.shape_cast %44 : vector<1024x1xf32> to vector<1x1024x1xf32>
      tpu.vector_store %arg11[%c0_34, %c0_35, %c0_36], %47 {strides = array<i32>} : memref<1x1024x1xf32, #tpu.memory_space<vmem>>, vector<1x1024x1xf32>,
    } else {
    }
    %c0 = arith.constant 0 : index
    %c0_1 = arith.constant 0 : index
    %c0_2 = arith.constant 0 : index
    %3 = vector.load %arg2[%c0, %c0_1, %c0_2] : memref<1x9x128xbf16, #tpu.memory_space<vmem>>, vector<1x9x128xbf16>
    %4 = vector.shape_cast %3 : vector<1x9x128xbf16> to vector<9x128xbf16>
    %c0_3 = arith.constant 0 : index
    %c0_4 = arith.constant 0 : index
    %5 = vector.load %arg3[%c0_3, %c0_4] : memref<128x9xbf16, #tpu.memory_space<vmem>>, vector<128x9xbf16>
    %cst = arith.constant dense<0.000000e+00> : vector<128x128xf32>
    %6 = tpu.matmul %5, %4, %cst {dimension_numbers = #tpu.dot_dimension_numbers<[1], [0], [0], [1], [0, 0, 1, 1], [], []>} : vector<128x9xbf16>, vector<9x128xbf16>, vector<128x128xf32> -> vector<128x128xf32>
    %c0_5 = arith.constant 0 : index
    %c0_6 = arith.constant 0 : index
    %7 = vector.load %arg4[%c0_5, %c0_6] : memref<128x1xf32, #tpu.memory_space<vmem>>, vector<128x1xf32>
    %8 = vector.broadcast %7 : vector<128x1xf32> to vector<128x128xf32>
    %9 = arith.addf %6, %8 : vector<128x128xf32>
    %cst_7 = arith.constant 0.000000e+00 : f32
    %10 = vector.broadcast %cst_7 : f32 to vector<128x128xf32>
    %11 = arith.maximumf %9, %10 : vector<128x128xf32>
    %12 = arith.truncf %11 : vector<128x128xf32> to vector<128x128xbf16>
    %c0_8 = arith.constant 0 : index
    %c0_9 = arith.constant 0 : index
    %13 = vector.load %arg5[%c0_8, %c0_9] : memref<256x128xbf16, #tpu.memory_space<vmem>>, vector<256x128xbf16>
    %cst_10 = arith.constant dense<0.000000e+00> : vector<256x128xf32>
    %14 = tpu.matmul %13, %12, %cst_10 {dimension_numbers = #tpu.dot_dimension_numbers<[1], [0], [0], [1], [0, 0, 1, 1], [], []>} : vector<256x128xbf16>, vector<128x128xbf16>, vector<256x128xf32> -> vector<256x128xf32>
    %c0_11 = arith.constant 0 : index
    %c0_12 = arith.constant 0 : index
    %15 = vector.load %arg6[%c0_11, %c0_12] : memref<256x1xf32, #tpu.memory_space<vmem>>, vector<256x1xf32>
    %16 = vector.broadcast %15 : vector<256x1xf32> to vector<256x128xf32>
    %17 = arith.addf %14, %16 : vector<256x128xf32>
    %cst_13 = arith.constant 0.000000e+00 : f32
    %18 = vector.broadcast %cst_13 : f32 to vector<256x128xf32>
    %19 = arith.maximumf %17, %18 : vector<256x128xf32>
    %20 = arith.truncf %19 : vector<256x128xf32> to vector<256x128xbf16>
    %c0_14 = arith.constant 0 : index
    %c0_15 = arith.constant 0 : index
    %21 = vector.load %arg7[%c0_14, %c0_15] : memref<512x256xbf16, #tpu.memory_space<vmem>>, vector<512x256xbf16>
    %cst_16 = arith.constant dense<0.000000e+00> : vector<512x128xf32>
    %22 = tpu.matmul %21, %20, %cst_16 {dimension_numbers = #tpu.dot_dimension_numbers<[1], [0], [0], [1], [0, 0, 1, 1], [], []>} : vector<512x256xbf16>, vector<256x128xbf16>, vector<512x128xf32> -> vector<512x128xf32>
    %c0_17 = arith.constant 0 : index
    %c0_18 = arith.constant 0 : index
    %23 = vector.load %arg8[%c0_17, %c0_18] : memref<512x1xf32, #tpu.memory_space<vmem>>, vector<512x1xf32>
    %24 = vector.broadcast %23 : vector<512x1xf32> to vector<512x128xf32>
    %25 = arith.addf %22, %24 : vector<512x128xf32>
    %cst_19 = arith.constant 0.000000e+00 : f32
    %26 = vector.broadcast %cst_19 : f32 to vector<512x128xf32>
    %27 = arith.maximumf %25, %26 : vector<512x128xf32>
    %28 = arith.truncf %27 : vector<512x128xf32> to vector<512x128xbf16>
    %c0_20 = arith.constant 0 : index
    %c0_21 = arith.constant 0 : index
    %29 = vector.load %arg9[%c0_20, %c0_21] : memref<1024x512xbf16, #tpu.memory_space<vmem>>, vector<1024x512xbf16>
    %cst_22 = arith.constant dense<0.000000e+00> : vector<1024x128xf32>
    %30 = tpu.matmul %29, %28, %cst_22 {dimension_numbers = #tpu.dot_dimension_numbers<[1], [0], [0], [1], [0, 0, 1, 1], [], []>} : vector<1024x512xbf16>, vector<512x128xbf16>, vector<1024x128xf32> -> vector<1024x128xf32>
    %c0_23 = arith.constant 0 : index
    %c0_24 = arith.constant 0 : index
    %31 = vector.load %arg10[%c0_23, %c0_24] : memref<1024x1xf32, #tpu.memory_space<vmem>>, vector<1024x1xf32>
    %32 = vector.broadcast %31 : vector<1024x1xf32> to vector<1024x128xf32>
    %33 = arith.addf %30, %32 : vector<1024x128xf32>
    %cst_25 = arith.constant 0.000000e+00 : f32
    %34 = vector.broadcast %cst_25 : f32 to vector<1024x128xf32>
    %35 = arith.maximumf %33, %34 : vector<1024x128xf32>
    %c0_26 = arith.constant 0 : index
    %c0_27 = arith.constant 0 : index
    %c0_28 = arith.constant 0 : index
    %36 = vector.load %arg11[%c0_26, %c0_27, %c0_28] : memref<1x1024x1xf32, #tpu.memory_space<vmem>>, vector<1x1024x1xf32>
    %37 = vector.shape_cast %36 : vector<1x1024x1xf32> to vector<1024x1xf32>
    %cst_29 = arith.constant dense<0.000000e+00> : vector<1024xf32>
    %38 = vector.multi_reduction <add>, %35, %cst_29 [1] : vector<1024x128xf32> to vector<1024xf32>
    %39 = vector.shape_cast %38 : vector<1024xf32> to vector<1024x1xf32>
    %40 = arith.addf %37, %39 : vector<1024x1xf32>
    %c0_30 = arith.constant 0 : index
    %c0_31 = arith.constant 0 : index
    %c0_32 = arith.constant 0 : index
    %41 = vector.load %arg11[%c0_30, %c0_31, %c0_32] : memref<1x1024x1xf32, #tpu.memory_space<vmem>>, vector<1x1024x1xf32>
    %42 = vector.shape_cast %41 : vector<1x1024x1xf32> to vector<1024x1xf32>
    %43 = vector.shape_cast %40 : vector<1024x1xf32> to vector<1x1024x1xf32>
    tpu.vector_store %arg11[%c0_30, %c0_31, %c0_32], %43 {strides = array<i32>} : memref<1x1024x1xf32, #tpu.memory_space<vmem>>, vector<1x1024x1xf32>,
    return
  }
  func.func @transform_0(%arg0: i32, %arg1: i32) -> (i32, i32, i32) {
    %c0_i32 = arith.constant 0 : i32
    %c0_i32_0 = arith.constant 0 : i32
    return %arg0, %c0_i32, %arg1 : i32, i32, i32
  }
  func.func @transform_1(%arg0: i32, %arg1: i32) -> (i32, i32) {
    %c0_i32 = arith.constant 0 : i32
    %c0_i32_0 = arith.constant 0 : i32
    %c0_i32_1 = arith.constant 0 : i32
    return %c0_i32, %c0_i32_0 : i32, i32
  }
  func.func @transform_2(%arg0: i32, %arg1: i32) -> (i32, i32) {
    %c0_i32 = arith.constant 0 : i32
    %c0_i32_0 = arith.constant 0 : i32
    %c0_i32_1 = arith.constant 0 : i32
    return %c0_i32, %c0_i32_0 : i32, i32
  }
  func.func @transform_3(%arg0: i32, %arg1: i32) -> (i32, i32) {
    %c0_i32 = arith.constant 0 : i32
    %c0_i32_0 = arith.constant 0 : i32
    %c0_i32_1 = arith.constant 0 : i32
    return %c0_i32, %c0_i32_0 : i32, i32
  }
  func.func @transform_4(%arg0: i32, %arg1: i32) -> (i32, i32) {
    %c0_i32 = arith.constant 0 : i32
    %c0_i32_0 = arith.constant 0 : i32
    %c0_i32_1 = arith.constant 0 : i32
    return %c0_i32, %c0_i32_0 : i32, i32
  }
  func.func @transform_5(%arg0: i32, %arg1: i32) -> (i32, i32) {
    %c0_i32 = arith.constant 0 : i32
    %c0_i32_0 = arith.constant 0 : i32
    %c0_i32_1 = arith.constant 0 : i32
    return %c0_i32, %c0_i32_0 : i32, i32
  }
  func.func @transform_6(%arg0: i32, %arg1: i32) -> (i32, i32) {
    %c0_i32 = arith.constant 0 : i32
    %c0_i32_0 = arith.constant 0 : i32
    %c0_i32_1 = arith.constant 0 : i32
    return %c0_i32, %c0_i32_0 : i32, i32
  }
  func.func @transform_7(%arg0: i32, %arg1: i32) -> (i32, i32) {
    %c0_i32 = arith.constant 0 : i32
    %c0_i32_0 = arith.constant 0 : i32
    %c0_i32_1 = arith.constant 0 : i32
    return %c0_i32, %c0_i32_0 : i32, i32
  }
  func.func @transform_8(%arg0: i32, %arg1: i32) -> (i32, i32) {
    %c0_i32 = arith.constant 0 : i32
    %c0_i32_0 = arith.constant 0 : i32
    %c0_i32_1 = arith.constant 0 : i32
    return %c0_i32, %c0_i32_0 : i32, i32
  }
  func.func @transform_9(%arg0: i32, %arg1: i32) -> (i32, i32, i32) {
    %c0_i32 = arith.constant 0 : i32
    %c0_i32_0 = arith.constant 0 : i32
    %c0_i32_1 = arith.constant 0 : i32
    return %arg0, %c0_i32, %c0_i32_0 : i32, i32, i32
  }
}

module attributes {stable_mosaic.version = 11 : i64} {
  func.func @_out_kernel(%arg0: i32, %arg1: i32, %arg2: memref<1x9x128xbf16, #tpu.memory_space<vmem>>, %arg3: memref<1x512x1xf32, #tpu.memory_space<vmem>>, %arg4: memref<128x9xbf16, #tpu.memory_space<vmem>>, %arg5: memref<128x1xf32, #tpu.memory_space<vmem>>, %arg6: memref<256x128xbf16, #tpu.memory_space<vmem>>, %arg7: memref<256x1xf32, #tpu.memory_space<vmem>>, %arg8: memref<512x128xbf16, #tpu.memory_space<vmem>>, %arg9: memref<512x256xbf16, #tpu.memory_space<vmem>>, %arg10: memref<1x512x128xf32, #tpu.memory_space<vmem>>) attributes {dimension_semantics = [#tpu.dimension_semantics<parallel>, #tpu.dimension_semantics<parallel>], iteration_bounds = array<i64: 2, 4>, scalar_prefetch = 0 : i64, scratch_operands = 0 : i64, tpu.core_type = #tpu.core_type<tc>, window_params = [{transform_indices = @transform_0, window_bounds = array<i64: 1, 9, 128>}, {transform_indices = @transform_1, window_bounds = array<i64: 1, 512, 1>}, {pipeline_mode = #tpu.pipeline_mode<synchronous>, transform_indices = @transform_2, window_bounds = array<i64: 128, 9>}, {pipeline_mode = #tpu.pipeline_mode<synchronous>, transform_indices = @transform_3, window_bounds = array<i64: 128, 1>}, {pipeline_mode = #tpu.pipeline_mode<synchronous>, transform_indices = @transform_4, window_bounds = array<i64: 256, 128>}, {pipeline_mode = #tpu.pipeline_mode<synchronous>, transform_indices = @transform_5, window_bounds = array<i64: 256, 1>}, {pipeline_mode = #tpu.pipeline_mode<synchronous>, transform_indices = @transform_6, window_bounds = array<i64: 512, 128>}, {pipeline_mode = #tpu.pipeline_mode<synchronous>, transform_indices = @transform_7, window_bounds = array<i64: 512, 256>}, {transform_indices = @transform_8, window_bounds = array<i64: 1, 512, 128>}]} {
    %c0 = arith.constant 0 : index
    %c0_0 = arith.constant 0 : index
    %c0_1 = arith.constant 0 : index
    %0 = vector.load %arg2[%c0, %c0_0, %c0_1] : memref<1x9x128xbf16, #tpu.memory_space<vmem>>, vector<1x9x128xbf16>
    %1 = vector.shape_cast %0 : vector<1x9x128xbf16> to vector<9x128xbf16>
    %c0_2 = arith.constant 0 : index
    %c0_3 = arith.constant 0 : index
    %2 = vector.load %arg4[%c0_2, %c0_3] : memref<128x9xbf16, #tpu.memory_space<vmem>>, vector<128x9xbf16>
    %cst = arith.constant dense<0.000000e+00> : vector<128x128xf32>
    %3 = tpu.matmul %2, %1, %cst {dimension_numbers = #tpu.dot_dimension_numbers<[1], [0], [0], [1], [0, 0, 1, 1], [], []>} : vector<128x9xbf16>, vector<9x128xbf16>, vector<128x128xf32> -> vector<128x128xf32>
    %c0_4 = arith.constant 0 : index
    %c0_5 = arith.constant 0 : index
    %4 = vector.load %arg5[%c0_4, %c0_5] : memref<128x1xf32, #tpu.memory_space<vmem>>, vector<128x1xf32>
    %5 = vector.broadcast %4 : vector<128x1xf32> to vector<128x128xf32>
    %6 = arith.addf %3, %5 : vector<128x128xf32>
    %cst_6 = arith.constant 0.000000e+00 : f32
    %7 = vector.broadcast %cst_6 : f32 to vector<128x128xf32>
    %8 = arith.maximumf %6, %7 : vector<128x128xf32>
    %9 = arith.truncf %8 : vector<128x128xf32> to vector<128x128xbf16>
    %c0_7 = arith.constant 0 : index
    %c0_8 = arith.constant 0 : index
    %10 = vector.load %arg6[%c0_7, %c0_8] : memref<256x128xbf16, #tpu.memory_space<vmem>>, vector<256x128xbf16>
    %cst_9 = arith.constant dense<0.000000e+00> : vector<256x128xf32>
    %11 = tpu.matmul %10, %9, %cst_9 {dimension_numbers = #tpu.dot_dimension_numbers<[1], [0], [0], [1], [0, 0, 1, 1], [], []>} : vector<256x128xbf16>, vector<128x128xbf16>, vector<256x128xf32> -> vector<256x128xf32>
    %c0_10 = arith.constant 0 : index
    %c0_11 = arith.constant 0 : index
    %12 = vector.load %arg7[%c0_10, %c0_11] : memref<256x1xf32, #tpu.memory_space<vmem>>, vector<256x1xf32>
    %13 = vector.broadcast %12 : vector<256x1xf32> to vector<256x128xf32>
    %14 = arith.addf %11, %13 : vector<256x128xf32>
    %cst_12 = arith.constant 0.000000e+00 : f32
    %15 = vector.broadcast %cst_12 : f32 to vector<256x128xf32>
    %16 = arith.maximumf %14, %15 : vector<256x128xf32>
    %17 = arith.truncf %16 : vector<256x128xf32> to vector<256x128xbf16>
    %c0_13 = arith.constant 0 : index
    %c0_14 = arith.constant 0 : index
    %18 = vector.load %arg8[%c0_13, %c0_14] : memref<512x128xbf16, #tpu.memory_space<vmem>>, vector<512x128xbf16>
    %cst_15 = arith.constant dense<0.000000e+00> : vector<512x128xf32>
    %19 = tpu.matmul %18, %9, %cst_15 {dimension_numbers = #tpu.dot_dimension_numbers<[1], [0], [0], [1], [0, 0, 1, 1], [], []>} : vector<512x128xbf16>, vector<128x128xbf16>, vector<512x128xf32> -> vector<512x128xf32>
    %c0_16 = arith.constant 0 : index
    %c0_17 = arith.constant 0 : index
    %20 = vector.load %arg9[%c0_16, %c0_17] : memref<512x256xbf16, #tpu.memory_space<vmem>>, vector<512x256xbf16>
    %cst_18 = arith.constant dense<0.000000e+00> : vector<512x128xf32>
    %21 = tpu.matmul %20, %17, %cst_18 {dimension_numbers = #tpu.dot_dimension_numbers<[1], [0], [0], [1], [0, 0, 1, 1], [], []>} : vector<512x256xbf16>, vector<256x128xbf16>, vector<512x128xf32> -> vector<512x128xf32>
    %22 = arith.addf %19, %21 : vector<512x128xf32>
    %c0_19 = arith.constant 0 : index
    %c0_20 = arith.constant 0 : index
    %c0_21 = arith.constant 0 : index
    %23 = vector.load %arg3[%c0_19, %c0_20, %c0_21] : memref<1x512x1xf32, #tpu.memory_space<vmem>>, vector<1x512x1xf32>
    %24 = vector.shape_cast %23 : vector<1x512x1xf32> to vector<512x1xf32>
    %25 = vector.broadcast %24 : vector<512x1xf32> to vector<512x128xf32>
    %26 = arith.addf %22, %25 : vector<512x128xf32>
    %cst_22 = arith.constant 0.000000e+00 : f32
    %27 = vector.broadcast %cst_22 : f32 to vector<512x128xf32>
    %28 = arith.maximumf %26, %27 : vector<512x128xf32>
    %c0_23 = arith.constant 0 : index
    %c0_24 = arith.constant 0 : index
    %c0_25 = arith.constant 0 : index
    %29 = vector.load %arg10[%c0_23, %c0_24, %c0_25] : memref<1x512x128xf32, #tpu.memory_space<vmem>>, vector<1x512x128xf32>
    %30 = vector.shape_cast %29 : vector<1x512x128xf32> to vector<512x128xf32>
    %31 = vector.shape_cast %28 : vector<512x128xf32> to vector<1x512x128xf32>
    tpu.vector_store %arg10[%c0_23, %c0_24, %c0_25], %31 {strides = array<i32>} : memref<1x512x128xf32, #tpu.memory_space<vmem>>, vector<1x512x128xf32>,
    return
  }
  func.func @transform_0(%arg0: i32, %arg1: i32) -> (i32, i32, i32) {
    %c0_i32 = arith.constant 0 : i32
    %c0_i32_0 = arith.constant 0 : i32
    return %arg0, %c0_i32, %arg1 : i32, i32, i32
  }
  func.func @transform_1(%arg0: i32, %arg1: i32) -> (i32, i32, i32) {
    %c0_i32 = arith.constant 0 : i32
    %c0_i32_0 = arith.constant 0 : i32
    %c0_i32_1 = arith.constant 0 : i32
    return %arg0, %c0_i32, %c0_i32_0 : i32, i32, i32
  }
  func.func @transform_2(%arg0: i32, %arg1: i32) -> (i32, i32) {
    %c0_i32 = arith.constant 0 : i32
    %c0_i32_0 = arith.constant 0 : i32
    %c0_i32_1 = arith.constant 0 : i32
    return %c0_i32, %c0_i32_0 : i32, i32
  }
  func.func @transform_3(%arg0: i32, %arg1: i32) -> (i32, i32) {
    %c0_i32 = arith.constant 0 : i32
    %c0_i32_0 = arith.constant 0 : i32
    %c0_i32_1 = arith.constant 0 : i32
    return %c0_i32, %c0_i32_0 : i32, i32
  }
  func.func @transform_4(%arg0: i32, %arg1: i32) -> (i32, i32) {
    %c0_i32 = arith.constant 0 : i32
    %c0_i32_0 = arith.constant 0 : i32
    %c0_i32_1 = arith.constant 0 : i32
    return %c0_i32, %c0_i32_0 : i32, i32
  }
  func.func @transform_5(%arg0: i32, %arg1: i32) -> (i32, i32) {
    %c0_i32 = arith.constant 0 : i32
    %c0_i32_0 = arith.constant 0 : i32
    %c0_i32_1 = arith.constant 0 : i32
    return %c0_i32, %c0_i32_0 : i32, i32
  }
  func.func @transform_6(%arg0: i32, %arg1: i32) -> (i32, i32) {
    %c0_i32 = arith.constant 0 : i32
    %c0_i32_0 = arith.constant 0 : i32
    %c0_i32_1 = arith.constant 0 : i32
    return %c0_i32, %c0_i32_0 : i32, i32
  }
  func.func @transform_7(%arg0: i32, %arg1: i32) -> (i32, i32) {
    %c0_i32 = arith.constant 0 : i32
    %c0_i32_0 = arith.constant 0 : i32
    %c0_i32_1 = arith.constant 0 : i32
    return %c0_i32, %c0_i32_0 : i32, i32
  }
  func.func @transform_8(%arg0: i32, %arg1: i32) -> (i32, i32, i32) {
    %c0_i32 = arith.constant 0 : i32
    %c0_i32_0 = arith.constant 0 : i32
    return %arg0, %c0_i32, %arg1 : i32, i32, i32
  }
}

</mosaic_0001>

<bundles_post_ra>
// kernel: modelfeat_forward.2
= control target key start
LH: loop header
LB: loop body
LE: loop exit
PB: predicated region body
PF: predicated region fallthrough
CT: control target
= control target key end

     0   :  { %s8204_s30 = smov 0   ;;  %s8206_s10 = smov 0   ;;  %s11954_s0 = inlined_call_operand.vmem [shape: bf16[2,9,512], index: 0, kind: input, shape index: {}]   ;;  %s11955_s1 = inlined_call_operand.vmem [shape: bf16[128,9], index: 1, kind: input, shape index: {}]   ;;  %s11956_s2 = inlined_call_operand.vmem [shape: f32[128,1], index: 2, kind: input, shape index: {}]   ;;  %s11957_s3 = inlined_call_operand.vmem [shape: bf16[256,128], index: 3, kind: input, shape index: {}]   ;;  %s11958_s4 = inlined_call_operand.vmem [shape: f32[256,1], index: 4, kind: input, shape index: {}]   ;;  %s11959_s5 = inlined_call_operand.vmem [shape: bf16[512,256], index: 5, kind: input, shape index: {}]   ;;  %s11960_s6 = inlined_call_operand.vmem [shape: f32[512,1], index: 6, kind: input, shape index: {}]   ;;  %s11961_s7 = inlined_call_operand.vmem [shape: bf16[1024,512], index: 7, kind: input, shape index: {}]   ;;  %s11962_s8 = inlined_call_operand.vmem [shape: f32[1024,1], index: 8, kind: input, shape index: {}]   ;;  %s11963_s9 = inlined_call_operand.vmem [shape: f32[2,1024,1], index: 9, kind: output, shape index: {}]  }
   0x1   :  { %s8208_s11 = smov 0   ;;  %s8210_s12 = smov 0  }
   0x2   :  { %s8212_s13 = smov 0   ;;  %s8214_s14 = smov 0  }
   0x3   :  { %s8216_s15 = smov 0  }
   0x4 LB: > { %s28_s16 = sadd.s32 1, %s8141_s13  ;;  %s31_s17 = sadd.s32 1, %s8145_s14  ;;  %s8149_s15 = sphi %s8216_s15, %s19_s15   ;;  %s8145_s14 = sphi %s8214_s14, %s12276_s14   ;;  %s8141_s13 = sphi %s8212_s13, %s12275_s13   ;;  %s8137_s12 = sphi %s8210_s12, %s12274_s12   ;;  %s8133_s11 = sphi %s8208_s11, %s12273_s11   ;;  %s8129_s10 = sphi %s8206_s10, %s12272_s10   ;;  %s8125_s30 = sphi %s8204_s30, %s12271_s30  }
   0x5   : > { %p29_p0 = scmp.ge.s32.totalorder %s28_s16, 4  ;;  %p47_p1 = scmp.ne.s32.totalorder %s8129_s10, %s8125_s30 }
   0x6   : > { %p48_p2 = scmp.eq.s32.totalorder %s8149_s15, 0  ;;  %s40_s21 = sadd.s32 1, %s8129_s10 }
   0x7   : > { %s12278_s16 = smov (%p29_p0, %s28_s16), 0  ;;  %s12280_s17 = smov (!%p29_p0, %s31_s17), %s8145_s14 }
   0x8   : > { %p49_p3 = por %p48_p2, %p47_p1  ;;  %p33_p4 = scmp.ge.s32.totalorder %s12280_s17, 2 }
   0x9   : > { %s36_s18 = ssub.s32 %s8141_s13, %s12278_s16  ;;  %p6762_p6 = scmp.ge.s32.totalorder %s8149_s15, 8 }
   0xa   : > { %s12282_s17 = smov (%p33_p4, %s12280_s17), 0 }
   0xb   : > { %s35_s19 = ssub.s32 %s8145_s14, %s12282_s17  ;;  %291 = sbr.rel (%p6762_p6) target bundleno = 25 (0x19), region = 48 }
   0xc   : > { %s37_s20 = sor.u32 %s36_s18, %s35_s19 }
   0xd   : > { %p38_p5 = scmp.eq.s32.totalorder %s37_s20, 0 }
   0xf   : > { %s8255_s22 = scalar_select %p38_p5, %s8129_s10, %s40_s21  }
  0x12   : > { %294 = sbr.rel (!%p49_p3) target bundleno = 25 (0x19), region = 52  ;;  %s296_s23 = sand.u32 (%p49_p3), 1, %s8129_s10  }
  0x13   : > { %s6764_s24 = sshll.u32 (%p49_p3), %s8145_s14, 3  ;;  %s6763_s25 = sshll.u32 (%p49_p3), %s296_s23, 3 }
  0x14   : > { %s300_s26 = sadd.s32 (%p49_p3), %s8141_s13, %s6764_s24  ;;  %s298_s19 = scalar_lea.vmem (%p49_p3), [#allocation2], %s6763_s25 }
  0x15   : > { %s6765_s27 = sshll.u32 (%p49_p3), %s300_s26, 2 }
  0x16   : > { %s302_s18 = scalar_lea.vmem (%p49_p3), %s11954_s0, %s6765_s27 }
  0x17   : > { %v318_v0 = vld [vmem:[%s302_s18] sm:$0xf] (%p49_p3)  ;;  %v320_v1 = vld [vmem:[%s302_s18 + $0x10] sm:$0xf] (%p49_p3) }
  0x18   : > { %319 = vst [vmem:[%s298_s19] sm:$0xf] (%p49_p3), %v318_v0  ;;  %321 = vst [vmem:[%s298_s19 + $0x4] sm:$0xf] (%p49_p3), %v320_v1 }
  0x19 PF: > { %p6766_p7 = scmp.ge.s32.totalorder %s8149_s15, 1  ;;  %p347_p8 = scmp.lt.s32.totalorder %s8149_s15, 9 }
  0x1b   : > { %p348_p9 = pnand %p6766_p7, %p347_p8 }
  0x1d   : > { %351 = sbr.rel (%p348_p9) target bundleno = 1990 (0x7c6), region = 93 }
  0x24   : > { %s354_s20 = sand.u32 1, %s8125_s30   ;;  %p389_p10 = scmp.lt.s32.totalorder %s8137_s12, 1 }
  0x25   : > { %s8268_s21 = sshll.u32 %s354_s20, 3  ;;  %p6770_p11 = scmp.ne.s32.totalorder %s8133_s11, 0 }
  0x26   : > { %s12284_s12 = smov (!%p389_p10, %s8137_s12), 1  ;;  %s356_s27 = scalar_lea.vmem [#allocation2], %s8268_s21  ;;  %vm399_vm0 = vcmask (!%p6770_p11), 7168   ;;  %v8151_v2 = vmov (!%p6770_p11), 0.0  }
  0x27   : > { %s7126_s23 = sshll.u32 %s12284_s12, 10  ;;  %398 = sbr.rel (%p6770_p11) target bundleno = 105 (0x69), region = 101 }
  0x28   : > { %s8274_s26 = scalar_lea.vmem %s11963_s9, %s7126_s23 }
  0x29   : > { %400 = vst.msk [vmem:[%s8274_s26] sm:$0xff] (!%p6770_p11), %vm399_vm0, %v8151_v2  ;;  %401 = vst.msk [vmem:[%s8274_s26 + $0x8] sm:$0xff] (!%p6770_p11), %vm399_vm0, %v8151_v2 }
  0x2a   : > { %402 = vst.msk [vmem:[%s8274_s26 + $0x10] sm:$0xff] (!%p6770_p11), %vm399_vm0, %v8151_v2  ;;  %403 = vst.msk [vmem:[%s8274_s26 + $0x18] sm:$0xff] (!%p6770_p11), %vm399_vm0, %v8151_v2 }
  0x2b   : > { %404 = vst.msk [vmem:[%s8274_s26 + $0x20] sm:$0xff] (!%p6770_p11), %vm399_vm0, %v8151_v2  ;;  %405 = vst.msk [vmem:[%s8274_s26 + $0x28] sm:$0xff] (!%p6770_p11), %vm399_vm0, %v8151_v2 }
  0x2c   : > { %406 = vst.msk [vmem:[%s8274_s26 + $0x30] sm:$0xff] (!%p6770_p11), %vm399_vm0, %v8151_v2  ;;  %407 = vst.msk [vmem:[%s8274_s26 + $0x38] sm:$0xff] (!%p6770_p11), %vm399_vm0, %v8151_v2 }
  0x2d   : > { %408 = vst.msk [vmem:[%s8274_s26 + $0x40] sm:$0xff] (!%p6770_p11), %vm399_vm0, %v8151_v2  ;;  %409 = vst.msk [vmem:[%s8274_s26 + $0x48] sm:$0xff] (!%p6770_p11), %vm399_vm0, %v8151_v2 }
  0x2e   : > { %410 = vst.msk [vmem:[%s8274_s26 + $0x50] sm:$0xff] %vm399_vm0, %v8151_v2  ;;  %411 = vst.msk [vmem:[%s8274_s26 + $0x58] sm:$0xff] %vm399_vm0, %v8151_v2 }
  0x2f   : > { %412 = vst.msk [vmem:[%s8274_s26 + $0x60] sm:$0xff] %vm399_vm0, %v8151_v2  ;;  %413 = vst.msk [vmem:[%s8274_s26 + $0x68] sm:$0xff] %vm399_vm0, %v8151_v2 }
  0x30   : > { %414 = vst.msk [vmem:[%s8274_s26 + $0x70] sm:$0xff] %vm399_vm0, %v8151_v2  ;;  %415 = vst.msk [vmem:[%s8274_s26 + $0x78] sm:$0xff] %vm399_vm0, %v8151_v2 }
  0x31   : > { %416 = vst.msk [vmem:[%s8274_s26 + $0x80] sm:$0xff] %vm399_vm0, %v8151_v2  ;;  %417 = vst.msk [vmem:[%s8274_s26 + $0x88] sm:$0xff] %vm399_vm0, %v8151_v2 }
  0x32   : > { %418 = vst.msk [vmem:[%s8274_s26 + $0x90] sm:$0xff] %vm399_vm0, %v8151_v2  ;;  %419 = vst.msk [vmem:[%s8274_s26 + $0x98] sm:$0xff] %vm399_vm0, %v8151_v2 }
  0x33   : > { %420 = vst.msk [vmem:[%s8274_s26 + $0xa0] sm:$0xff] %vm399_vm0, %v8151_v2  ;;  %421 = vst.msk [vmem:[%s8274_s26 + $0xa8] sm:$0xff] %vm399_vm0, %v8151_v2 }
  0x34   : > { %422 = vst.msk [vmem:[%s8274_s26 + $0xb0] sm:$0xff] %vm399_vm0, %v8151_v2  ;;  %423 = vst.msk [vmem:[%s8274_s26 + $0xb8] sm:$0xff] %vm399_vm0, %v8151_v2 }
  0x35   : > { %424 = vst.msk [vmem:[%s8274_s26 + $0xc0] sm:$0xff] %vm399_vm0, %v8151_v2  ;;  %425 = vst.msk [vmem:[%s8274_s26 + $0xc8] sm:$0xff] %vm399_vm0, %v8151_v2 }
  0x36   : > { %426 = vst.msk [vmem:[%s8274_s26 + $0xd0] sm:$0xff] %vm399_vm0, %v8151_v2  ;;  %427 = vst.msk [vmem:[%s8274_s26 + $0xd8] sm:$0xff] %vm399_vm0, %v8151_v2 }
  0x37   : > { %428 = vst.msk [vmem:[%s8274_s26 + $0xe0] sm:$0xff] %vm399_vm0, %v8151_v2  ;;  %429 = vst.msk [vmem:[%s8274_s26 + $0xe8] sm:$0xff] %vm399_vm0, %v8151_v2 }
  0x38   : > { %430 = vst.msk [vmem:[%s8274_s26 + $0xf0] sm:$0xff] %vm399_vm0, %v8151_v2  ;;  %431 = vst.msk [vmem:[%s8274_s26 + $0xf8] sm:$0xff] %vm399_vm0, %v8151_v2 }
  0x39   : > { %432 = vst.msk [vmem:[%s8274_s26 + $0x100] sm:$0xff] %vm399_vm0, %v8151_v2  ;;  %433 = vst.msk [vmem:[%s8274_s26 + $0x108] sm:$0xff] %vm399_vm0, %v8151_v2 }
  0x3a   : > { %434 = vst.msk [vmem:[%s8274_s26 + $0x110] sm:$0xff] %vm399_vm0, %v8151_v2  ;;  %435 = vst.msk [vmem:[%s8274_s26 + $0x118] sm:$0xff] %vm399_vm0, %v8151_v2 }
  0x3b   : > { %436 = vst.msk [vmem:[%s8274_s26 + $0x120] sm:$0xff] %vm399_vm0, %v8151_v2  ;;  %437 = vst.msk [vmem:[%s8274_s26 + $0x128] sm:$0xff] %vm399_vm0, %v8151_v2 }
  0x3c   : > { %438 = vst.msk [vmem:[%s8274_s26 + $0x130] sm:$0xff] %vm399_vm0, %v8151_v2  ;;  %439 = vst.msk [vmem:[%s8274_s26 + $0x138] sm:$0xff] %vm399_vm0, %v8151_v2 }
  0x3d   : > { %440 = vst.msk [vmem:[%s8274_s26 + $0x140] sm:$0xff] %vm399_vm0, %v8151_v2  ;;  %441 = vst.msk [vmem:[%s8274_s26 + $0x148] sm:$0xff] %vm399_vm0, %v8151_v2 }
  0x3e   : > { %442 = vst.msk [vmem:[%s8274_s26 + $0x150] sm:$0xff] %vm399_vm0, %v8151_v2  ;;  %443 = vst.msk [vmem:[%s8274_s26 + $0x158] sm:$0xff] %vm399_vm0, %v8151_v2 }
  0x3f   : > { %444 = vst.msk [vmem:[%s8274_s26 + $0x160] sm:$0xff] %vm399_vm0, %v8151_v2  ;;  %445 = vst.msk [vmem:[%s8274_s26 + $0x168] sm:$0xff] %vm399_vm0, %v8151_v2 }
  0x40   : > { %446 = vst.msk [vmem:[%s8274_s26 + $0x170] sm:$0xff] %vm399_vm0, %v8151_v2  ;;  %447 = vst.msk [vmem:[%s8274_s26 + $0x178] sm:$0xff] %vm399_vm0, %v8151_v2 }
  0x41   : > { %448 = vst.msk [vmem:[%s8274_s26 + $0x180] sm:$0xff] %vm399_vm0, %v8151_v2  ;;  %449 = vst.msk [vmem:[%s8274_s26 + $0x188] sm:$0xff] %vm399_vm0, %v8151_v2 }
  0x42   : > { %450 = vst.msk [vmem:[%s8274_s26 + $0x190] sm:$0xff] %vm399_vm0, %v8151_v2  ;;  %451 = vst.msk [vmem:[%s8274_s26 + $0x198] sm:$0xff] %vm399_vm0, %v8151_v2 }
  0x43   : > { %452 = vst.msk [vmem:[%s8274_s26 + $0x1a0] sm:$0xff] %vm399_vm0, %v8151_v2  ;;  %453 = vst.msk [vmem:[%s8274_s26 + $0x1a8] sm:$0xff] %vm399_vm0, %v8151_v2 }
  0x44   : > { %454 = vst.msk [vmem:[%s8274_s26 + $0x1b0] sm:$0xff] %vm399_vm0, %v8151_v2  ;;  %455 = vst.msk [vmem:[%s8274_s26 + $0x1b8] sm:$0xff] %vm399_vm0, %v8151_v2 }
  0x45   : > { %456 = vst.msk [vmem:[%s8274_s26 + $0x1c0] sm:$0xff] %vm399_vm0, %v8151_v2  ;;  %457 = vst.msk [vmem:[%s8274_s26 + $0x1c8] sm:$0xff] %vm399_vm0, %v8151_v2 }
  0x46   : > { %458 = vst.msk [vmem:[%s8274_s26 + $0x1d0] sm:$0xff] %vm399_vm0, %v8151_v2  ;;  %459 = vst.msk [vmem:[%s8274_s26 + $0x1d8] sm:$0xff] %vm399_vm0, %v8151_v2 }
  0x47   : > { %460 = vst.msk [vmem:[%s8274_s26 + $0x1e0] sm:$0xff] %vm399_vm0, %v8151_v2  ;;  %461 = vst.msk [vmem:[%s8274_s26 + $0x1e8] sm:$0xff] %vm399_vm0, %v8151_v2 }
  0x48   : > { %462 = vst.msk [vmem:[%s8274_s26 + $0x1f0] sm:$0xff] %vm399_vm0, %v8151_v2  ;;  %463 = vst.msk [vmem:[%s8274_s26 + $0x1f8] sm:$0xff] %vm399_vm0, %v8151_v2 }
  0x49   : > { %464 = vst.msk [vmem:[%s8274_s26 + $0x200] sm:$0xff] %vm399_vm0, %v8151_v2  ;;  %465 = vst.msk [vmem:[%s8274_s26 + $0x208] sm:$0xff] %vm399_vm0, %v8151_v2 }
  0x4a   : > { %466 = vst.msk [vmem:[%s8274_s26 + $0x210] sm:$0xff] %vm399_vm0, %v8151_v2  ;;  %467 = vst.msk [vmem:[%s8274_s26 + $0x218] sm:$0xff] %vm399_vm0, %v8151_v2 }
  0x4b   : > { %468 = vst.msk [vmem:[%s8274_s26 + $0x220] sm:$0xff] %vm399_vm0, %v8151_v2  ;;  %469 = vst.msk [vmem:[%s8274_s26 + $0x228] sm:$0xff] %vm399_vm0, %v8151_v2 }
  0x4c   : > { %470 = vst.msk [vmem:[%s8274_s26 + $0x230] sm:$0xff] %vm399_vm0, %v8151_v2  ;;  %471 = vst.msk [vmem:[%s8274_s26 + $0x238] sm:$0xff] %vm399_vm0, %v8151_v2 }
  0x4d   : > { %472 = vst.msk [vmem:[%s8274_s26 + $0x240] sm:$0xff] %vm399_vm0, %v8151_v2  ;;  %473 = vst.msk [vmem:[%s8274_s26 + $0x248] sm:$0xff] %vm399_vm0, %v8151_v2 }
  0x4e   : > { %474 = vst.msk [vmem:[%s8274_s26 + $0x250] sm:$0xff] %vm399_vm0, %v8151_v2  ;;  %475 = vst.msk [vmem:[%s8274_s26 + $0x258] sm:$0xff] %vm399_vm0, %v8151_v2 }
  0x4f   : > { %476 = vst.msk [vmem:[%s8274_s26 + $0x260] sm:$0xff] %vm399_vm0, %v8151_v2  ;;  %477 = vst.msk [vmem:[%s8274_s26 + $0x268] sm:$0xff] %vm399_vm0, %v8151_v2 }
  0x50   : > { %478 = vst.msk [vmem:[%s8274_s26 + $0x270] sm:$0xff] %vm399_vm0, %v8151_v2  ;;  %479 = vst.msk [vmem:[%s8274_s26 + $0x278] sm:$0xff] %vm399_vm0, %v8151_v2 }
  0x51   : > { %480 = vst.msk [vmem:[%s8274_s26 + $0x280] sm:$0xff] %vm399_vm0, %v8151_v2  ;;  %481 = vst.msk [vmem:[%s8274_s26 + $0x288] sm:$0xff] %vm399_vm0, %v8151_v2 }
  0x52   : > { %482 = vst.msk [vmem:[%s8274_s26 + $0x290] sm:$0xff] %vm399_vm0, %v8151_v2  ;;  %483 = vst.msk [vmem:[%s8274_s26 + $0x298] sm:$0xff] %vm399_vm0, %v8151_v2 }
  0x53   : > { %484 = vst.msk [vmem:[%s8274_s26 + $0x2a0] sm:$0xff] %vm399_vm0, %v8151_v2  ;;  %485 = vst.msk [vmem:[%s8274_s26 + $0x2a8] sm:$0xff] %vm399_vm0, %v8151_v2 }
  0x54   : > { %486 = vst.msk [vmem:[%s8274_s26 + $0x2b0] sm:$0xff] %vm399_vm0, %v8151_v2  ;;  %487 = vst.msk [vmem:[%s8274_s26 + $0x2b8] sm:$0xff] %vm399_vm0, %v8151_v2 }
  0x55   : > { %488 = vst.msk [vmem:[%s8274_s26 + $0x2c0] sm:$0xff] %vm399_vm0, %v8151_v2  ;;  %489 = vst.msk [vmem:[%s8274_s26 + $0x2c8] sm:$0xff] %vm399_vm0, %v8151_v2 }
  0x56   : > { %490 = vst.msk [vmem:[%s8274_s26 + $0x2d0] sm:$0xff] %vm399_vm0, %v8151_v2  ;;  %491 = vst.msk [vmem:[%s8274_s26 + $0x2d8] sm:$0xff] %vm399_vm0, %v8151_v2 }
  0x57   : > { %492 = vst.msk [vmem:[%s8274_s26 + $0x2e0] sm:$0xff] %vm399_vm0, %v8151_v2  ;;  %493 = vst.msk [vmem:[%s8274_s26 + $0x2e8] sm:$0xff] %vm399_vm0, %v8151_v2 }
  0x58   : > { %494 = vst.msk [vmem:[%s8274_s26 + $0x2f0] sm:$0xff] %vm399_vm0, %v8151_v2  ;;  %495 = vst.msk [vmem:[%s8274_s26 + $0x2f8] sm:$0xff] %vm399_vm0, %v8151_v2 }
  0x59   : > { %496 = vst.msk [vmem:[%s8274_s26 + $0x300] sm:$0xff] %vm399_vm0, %v8151_v2  ;;  %497 = vst.msk [vmem:[%s8274_s26 + $0x308] sm:$0xff] %vm399_vm0, %v8151_v2 }
  0x5a   : > { %498 = vst.msk [vmem:[%s8274_s26 + $0x310] sm:$0xff] %vm399_vm0, %v8151_v2  ;;  %499 = vst.msk [vmem:[%s8274_s26 + $0x318] sm:$0xff] %vm399_vm0, %v8151_v2 }
  0x5b   : > { %500 = vst.msk [vmem:[%s8274_s26 + $0x320] sm:$0xff] %vm399_vm0, %v8151_v2  ;;  %501 = vst.msk [vmem:[%s8274_s26 + $0x328] sm:$0xff] %vm399_vm0, %v8151_v2 }
  0x5c   : > { %502 = vst.msk [vmem:[%s8274_s26 + $0x330] sm:$0xff] %vm399_vm0, %v8151_v2  ;;  %503 = vst.msk [vmem:[%s8274_s26 + $0x338] sm:$0xff] %vm399_vm0, %v8151_v2 }
  0x5d   : > { %504 = vst.msk [vmem:[%s8274_s26 + $0x340] sm:$0xff] %vm399_vm0, %v8151_v2  ;;  %505 = vst.msk [vmem:[%s8274_s26 + $0x348] sm:$0xff] %vm399_vm0, %v8151_v2 }
  0x5e   : > { %506 = vst.msk [vmem:[%s8274_s26 + $0x350] sm:$0xff] %vm399_vm0, %v8151_v2  ;;  %507 = vst.msk [vmem:[%s8274_s26 + $0x358] sm:$0xff] %vm399_vm0, %v8151_v2 }
  0x5f   : > { %508 = vst.msk [vmem:[%s8274_s26 + $0x360] sm:$0xff] %vm399_vm0, %v8151_v2  ;;  %509 = vst.msk [vmem:[%s8274_s26 + $0x368] sm:$0xff] %vm399_vm0, %v8151_v2 }
  0x60   : > { %510 = vst.msk [vmem:[%s8274_s26 + $0x370] sm:$0xff] %vm399_vm0, %v8151_v2  ;;  %511 = vst.msk [vmem:[%s8274_s26 + $0x378] sm:$0xff] %vm399_vm0, %v8151_v2 }
  0x61   : > { %512 = vst.msk [vmem:[%s8274_s26 + $0x380] sm:$0xff] %vm399_vm0, %v8151_v2  ;;  %513 = vst.msk [vmem:[%s8274_s26 + $0x388] sm:$0xff] %vm399_vm0, %v8151_v2 }
  0x62   : > { %514 = vst.msk [vmem:[%s8274_s26 + $0x390] sm:$0xff] %vm399_vm0, %v8151_v2  ;;  %515 = vst.msk [vmem:[%s8274_s26 + $0x398] sm:$0xff] %vm399_vm0, %v8151_v2 }
  0x63   : > { %516 = vst.msk [vmem:[%s8274_s26 + $0x3a0] sm:$0xff] %vm399_vm0, %v8151_v2  ;;  %517 = vst.msk [vmem:[%s8274_s26 + $0x3a8] sm:$0xff] %vm399_vm0, %v8151_v2 }
  0x64   : > { %518 = vst.msk [vmem:[%s8274_s26 + $0x3b0] sm:$0xff] %vm399_vm0, %v8151_v2  ;;  %519 = vst.msk [vmem:[%s8274_s26 + $0x3b8] sm:$0xff] %vm399_vm0, %v8151_v2 }
  0x65   : > { %520 = vst.msk [vmem:[%s8274_s26 + $0x3c0] sm:$0xff] %vm399_vm0, %v8151_v2  ;;  %521 = vst.msk [vmem:[%s8274_s26 + $0x3c8] sm:$0xff] %vm399_vm0, %v8151_v2 }
  0x66   : > { %522 = vst.msk [vmem:[%s8274_s26 + $0x3d0] sm:$0xff] %vm399_vm0, %v8151_v2  ;;  %523 = vst.msk [vmem:[%s8274_s26 + $0x3d8] sm:$0xff] %vm399_vm0, %v8151_v2 }
  0x67   : > { %524 = vst.msk [vmem:[%s8274_s26 + $0x3e0] sm:$0xff] %vm399_vm0, %v8151_v2  ;;  %525 = vst.msk [vmem:[%s8274_s26 + $0x3e8] sm:$0xff] %vm399_vm0, %v8151_v2 }
  0x68   : > { %526 = vst.msk [vmem:[%s8274_s26 + $0x3f0] sm:$0xff] %vm399_vm0, %v8151_v2  ;;  %527 = vst.msk [vmem:[%s8274_s26 + $0x3f8] sm:$0xff] %vm399_vm0, %v8151_v2 }
  0x69 PF: > { %v548_v3 = vld [vmem:[%s11956_s2 + $0x10] sm:$0xff]  ;;  %v546_v4 = vld [vmem:[%s11956_s2] sm:$0xff]  ;;  %vm712_vm1 = vcmask 1043456   ;;  %v11964_v5 = vmov 0   ;;  %vm713_vm2 = vcmask 1044480   ;;  %v8153_v7 = vmov 65535  }
  0x6a   : > { %7604 = vset.pattern.permute.xlu1 %v11964_v5  ;;  %7603 = vset.pattern.permute.xlu0 %v11964_v5  ;;  %v7605_v6 = vld [vmem:[%s356_s27] sm:$0x1f]   ;;  %v714_v8 = vsel %vm712_vm1, 4294967295, %v8153_v7  ;;  %v549_v9 = vld [vmem:[%s11956_s2 + $0x18] sm:$0xff]  ;;  %vm687_vm3 = vcmask 72704   ;;  %v7608_v16 = vld [vmem:[%s11955_s1 + $0x10] sm:$0xff]  }
  0x6b   : > { %574 = vperm.xlu1 %7604, %v548_v3   ;;  %564 = vperm.xlu0 %7603, %v546_v4   ;;  %v715_v10 = vsel %vm713_vm2, %v714_v8, 0  ;;  %v7606_v11 = vld [vmem:[%s11955_s1] sm:$0xff]   ;;  %v547_v13 = vld [vmem:[%s11956_s2 + $0x8] sm:$0xff]  ;;  %v553_v18 = vld [vmem:[%s11956_s2 + $0x38] sm:$0xff]  ;;  %vm6556_vm4 = vcmask 7168  }
  0x6c   : > { %v717_v12 = vand.u32 %v7605_v6, %v715_v10  ;;  %7162 = vmatprep.mubr.msk.bf16.mxu0 %vm687_vm3, %v7606_v11  ;;  %v7607_v14 = vld [vmem:[%s11955_s1 + $0x8] sm:$0xff]   ;;  %v550_v17 = vld [vmem:[%s11956_s2 + $0x20] sm:$0xff]  ;;  %v552_v19 = vld [vmem:[%s11956_s2 + $0x30] sm:$0xff] }
  0x6d   : > { %v551_v15 = vld [vmem:[%s11956_s2 + $0x28] sm:$0xff]  ;;  %v7609_v20 = vld [vmem:[%s11955_s1 + $0x18] sm:$0xff]   ;;  %v7610_v22 = vld [vmem:[%s11955_s1 + $0x20] sm:$0xff]  }
  0x6e   : > { %7160 = vmatprep.subr.bf16.mxu0 %v717_v12  ;;  %v555_v21 = vld [vmem:[%s11956_s2 + $0x48] sm:$0xff]  ;;  %v554_v23 = vld [vmem:[%s11956_s2 + $0x40] sm:$0xff]  ;;  %v557_v24 = vld [vmem:[%s11956_s2 + $0x58] sm:$0xff] }
  0x6f   : > { %579 = vperm.xlu1 %7604, %v549_v9   ;;  %569 = vperm.xlu0 %7603, %v547_v13   ;;  %v556_v25 = vld [vmem:[%s11956_s2 + $0x50] sm:$0xff]  ;;  %v7611_v26 = vld [vmem:[%s11955_s1 + $0x28] sm:$0xff]   ;;  %v558_v29 = vld [vmem:[%s11956_s2 + $0x60] sm:$0xff] }
  0x70   : > { %7161 = vmatpush3.bf16.msra.mxu0 %v717_v12  ;;  %v559_v27 = vld [vmem:[%s11956_s2 + $0x68] sm:$0xff]  ;;  %v7612_v28 = vld [vmem:[%s11955_s1 + $0x30] sm:$0xff]   ;;  %v561_v30 = vld [vmem:[%s11956_s2 + $0x78] sm:$0xff] }
  0x71   : > { %2137 = vmatprep.subr.bf16.mxu0 %v11964_v5  ;;  %v560_v31 = vld [vmem:[%s11956_s2 + $0x70] sm:$0xff]  ;;  %v7613_v32 = vld [vmem:[%s11955_s1 + $0x38] sm:$0xff]   ;;  %v873_v33 = vld [vmem:[%s11958_s4 + $0x8] sm:$0xff] }
  0x72   : > { %v872_v34 = vld [vmem:[%s11958_s4] sm:$0xff]  ;;  %v875_v35 = vld [vmem:[%s11958_s4 + $0x18] sm:$0xff]  ;;  %v874_v36 = vld [vmem:[%s11958_s4 + $0x10] sm:$0xff] }
  0x73   : > { %7163 = vmatmul.mubr.msk.bf16.vlgmr.msra.gmra.mrb[0].mxu0 %vm687_vm3, %v7607_v14  ;;  %589 = vperm.xlu1 %7604, %v551_v15   ;;  %v877_v37 = vld [vmem:[%s11958_s4 + $0x28] sm:$0xff]  ;;  %v876_v38 = vld [vmem:[%s11958_s4 + $0x20] sm:$0xff]  ;;  %v879_v39 = vld [vmem:[%s11958_s4 + $0x38] sm:$0xff] }
  0x74   : > { %584 = vperm.xlu0 %7603, %v550_v17   ;;  %7166 = vmatprep.mubr.msk.bf16.mxu0 %vm687_vm3, %v7608_v16  ;;  %v878_v40 = vld [vmem:[%s11958_s4 + $0x30] sm:$0xff]  ;;  %v881_v41 = vld [vmem:[%s11958_s4 + $0x48] sm:$0xff]  ;;  %v880_v42 = vld [vmem:[%s11958_s4 + $0x40] sm:$0xff] }
  0x75   : > { %v883_v43 = vld [vmem:[%s11958_s4 + $0x58] sm:$0xff]  ;;  %v882_v44 = vld [vmem:[%s11958_s4 + $0x50] sm:$0xff]  ;;  %v885_v45 = vld [vmem:[%s11958_s4 + $0x68] sm:$0xff] }
  0x76   : > { %v884_v46 = vld [vmem:[%s11958_s4 + $0x60] sm:$0xff]  ;;  %v887_v47 = vld [vmem:[%s11958_s4 + $0x78] sm:$0xff]  ;;  %v886_v48 = vld [vmem:[%s11958_s4 + $0x70] sm:$0xff] }
  0x77   : > { %599 = vperm.xlu1 %7604, %v553_v18   ;;  %v889_v49 = vld [vmem:[%s11958_s4 + $0x88] sm:$0xff]  ;;  %v888_v50 = vld [vmem:[%s11958_s4 + $0x80] sm:$0xff]  ;;  %v891_v51 = vld [vmem:[%s11958_s4 + $0x98] sm:$0xff] }
  0x78   : > { %594 = vperm.xlu0 %7603, %v552_v19   ;;  %v890_v52 = vld [vmem:[%s11958_s4 + $0x90] sm:$0xff]  ;;  %v893_v53 = vld [vmem:[%s11958_s4 + $0xa8] sm:$0xff]  ;;  %v892_v54 = vld [vmem:[%s11958_s4 + $0xa0] sm:$0xff] }
  0x79   : > { %v895_v55 = vld [vmem:[%s11958_s4 + $0xb8] sm:$0xff]  ;;  %v894_v56 = vld [vmem:[%s11958_s4 + $0xb0] sm:$0xff]  ;;  %v897_v57 = vld [vmem:[%s11958_s4 + $0xc8] sm:$0xff] }
  0x7a   : > { %v896_v58 = vld [vmem:[%s11958_s4 + $0xc0] sm:$0xff]  ;;  %v899_v59 = vld [vmem:[%s11958_s4 + $0xd8] sm:$0xff]  ;;  %v898_v60 = vld [vmem:[%s11958_s4 + $0xd0] sm:$0xff] }
  0x7b   : > { %7167 = vmatmul.mubr.msk.bf16.gmra.mrb[4].mxu0 %vm687_vm3, %v7609_v20  ;;  %609 = vperm.xlu1 %7604, %v555_v21   ;;  %v901_v61 = vld [vmem:[%s11958_s4 + $0xe8] sm:$0xff]  ;;  %v900_v62 = vld [vmem:[%s11958_s4 + $0xe0] sm:$0xff]  ;;  %v903_v63 = vld [vmem:[%s11958_s4 + $0xf8] sm:$0xff] }
  0x7c   : > { %604 = vperm.xlu0 %7603, %v554_v23   ;;  %7170 = vmatprep.mubr.msk.bf16.mxu0 %vm687_vm3, %v7610_v22  ;;  %v902_v0 = vld [vmem:[%s11958_s4 + $0xf0] sm:$0xff]  ;;  %v1434_v1 = vld [vmem:[%s11960_s6 + $0x8] sm:$0xff]  ;;  %v1433_v2 = vld [vmem:[%s11960_s6] sm:$0xff] }
  0x7d   : > { %v1436_v3 = vld [vmem:[%s11960_s6 + $0x18] sm:$0xff]  ;;  %v1435_v4 = vld [vmem:[%s11960_s6 + $0x10] sm:$0xff]  ;;  %v1438_v6 = vld [vmem:[%s11960_s6 + $0x28] sm:$0xff] }
  0x7e   : > { %v1437_v7 = vld [vmem:[%s11960_s6 + $0x20] sm:$0xff]  ;;  %v1440_v8 = vld [vmem:[%s11960_s6 + $0x38] sm:$0xff]  ;;  %v1439_v9 = vld [vmem:[%s11960_s6 + $0x30] sm:$0xff] }
  0x7f   : > { %619 = vperm.xlu1 %7604, %v557_v24   ;;  %v1442_v10 = vld [vmem:[%s11960_s6 + $0x48] sm:$0xff]  ;;  %v1441_v11 = vld [vmem:[%s11960_s6 + $0x40] sm:$0xff]  ;;  %v1444_v12 = vld [vmem:[%s11960_s6 + $0x58] sm:$0xff] }
  0x80   : > { %614 = vperm.xlu0 %7603, %v556_v25   ;;  %v1443_v13 = vld [vmem:[%s11960_s6 + $0x50] sm:$0xff]  ;;  %v1446_v14 = vld [vmem:[%s11960_s6 + $0x68] sm:$0xff]  ;;  %v1445_v15 = vld [vmem:[%s11960_s6 + $0x60] sm:$0xff] }
  0x81   : > { %v1448_v16 = vld [vmem:[%s11960_s6 + $0x78] sm:$0xff]  ;;  %v1447_v17 = vld [vmem:[%s11960_s6 + $0x70] sm:$0xff]  ;;  %v1450_v18 = vld [vmem:[%s11960_s6 + $0x88] sm:$0xff] }
  0x82   : > { %v1449_v19 = vld [vmem:[%s11960_s6 + $0x80] sm:$0xff]  ;;  %v1452_v22 = vld [vmem:[%s11960_s6 + $0x98] sm:$0xff]  ;;  %v1451_v23 = vld [vmem:[%s11960_s6 + $0x90] sm:$0xff] }
  0x83   : > { %7171 = vmatmul.mubr.msk.bf16.gmra.mrb[8].mxu0 %vm687_vm3, %v7611_v26  ;;  %629 = vperm.xlu1 %7604, %v559_v27   ;;  %v7614_v24 = vld [vmem:[%s11957_s3] sm:$0xff]   ;;  %v1454_v27 = vld [vmem:[%s11960_s6 + $0xa8] sm:$0xff] }
  0x84   : > { %624 = vperm.xlu0 %7603, %v558_v29   ;;  %7174 = vmatprep.mubr.msk.bf16.mxu0 %vm687_vm3, %v7612_v28  ;;  %v1453_v28 = vld [vmem:[%s11960_s6 + $0xa0] sm:$0xff] }
  0x85   : > { %7194 = vmatprep.mubr.bf16.mxu1 %v7614_v24 }
  0x87   : > { %639 = vperm.xlu1 %7604, %v561_v30  }
  0x88   : > { %634 = vperm.xlu0 %7603, %v560_v31   ;;  %v1456_v31 = vld [vmem:[%s11960_s6 + $0xb8] sm:$0xff] }
  0x8b   : > { %7175 = vmatmul.mubr.msk.bf16.gmra.mrb[12].mxu0 %vm687_vm3, %v7613_v32  ;;  %911 = vperm.xlu1 %7604, %v873_v33   ;;  %v1455_v32 = vld [vmem:[%s11960_s6 + $0xb0] sm:$0xff] }
  0x8c   : > { %906 = vperm.xlu0 %7603, %v872_v34  }
  0x8f   : > { %921 = vperm.xlu1 %7604, %v875_v35   ;;  %v1458_v35 = vld [vmem:[%s11960_s6 + $0xc8] sm:$0xff] }
  0x90   : > { %916 = vperm.xlu0 %7603, %v874_v36   ;;  %v1457_v36 = vld [vmem:[%s11960_s6 + $0xc0] sm:$0xff] }
  0x93   : > { %931 = vperm.xlu1 %7604, %v877_v37  }
  0x94   : > { %926 = vperm.xlu0 %7603, %v876_v38  }
  0x97   : > { %941 = vperm.xlu1 %7604, %v879_v39   ;;  %v1460_v39 = vld [vmem:[%s11960_s6 + $0xd8] sm:$0xff] }
  0x98   : > { %936 = vperm.xlu0 %7603, %v878_v40   ;;  %v1459_v40 = vld [vmem:[%s11960_s6 + $0xd0] sm:$0xff] }
  0x9b   : > { %951 = vperm.xlu1 %7604, %v881_v41  }
  0x9c   : > { %946 = vperm.xlu0 %7603, %v880_v42  }
  0x9f   : > { %961 = vperm.xlu1 %7604, %v883_v43   ;;  %v1462_v43 = vld [vmem:[%s11960_s6 + $0xe8] sm:$0xff] }
  0xa0   : > { %956 = vperm.xlu0 %7603, %v882_v44   ;;  %v1461_v44 = vld [vmem:[%s11960_s6 + $0xe0] sm:$0xff] }
  0xa3   : > { %971 = vperm.xlu1 %7604, %v885_v45  }
  0xa4   : > { %966 = vperm.xlu0 %7603, %v884_v46  }
  0xa7   : > { %981 = vperm.xlu1 %7604, %v887_v47   ;;  %v1464_v47 = vld [vmem:[%s11960_s6 + $0xf8] sm:$0xff] }
  0xa8   : > { %976 = vperm.xlu0 %7603, %v886_v48   ;;  %v1463_v48 = vld [vmem:[%s11960_s6 + $0xf0] sm:$0xff] }
  0xab   : > { %991 = vperm.xlu1 %7604, %v889_v49  }
  0xac   : > { %986 = vperm.xlu0 %7603, %v888_v50  }
  0xaf   : > { %1001 = vperm.xlu1 %7604, %v891_v51   ;;  %v1466_v51 = vld [vmem:[%s11960_s6 + $0x108] sm:$0xff] }
  0xb0   : > { %996 = vperm.xlu0 %7603, %v890_v52   ;;  %v1465_v52 = vld [vmem:[%s11960_s6 + $0x100] sm:$0xff] }
  0xb3   : > { %1011 = vperm.xlu1 %7604, %v893_v53  }
  0xb4   : > { %1006 = vperm.xlu0 %7603, %v892_v54  }
  0xb7   : > { %1021 = vperm.xlu1 %7604, %v895_v55   ;;  %v1468_v55 = vld [vmem:[%s11960_s6 + $0x118] sm:$0xff] }
  0xb8   : > { %1016 = vperm.xlu0 %7603, %v894_v56   ;;  %v1467_v56 = vld [vmem:[%s11960_s6 + $0x110] sm:$0xff] }
  0xbb   : > { %1031 = vperm.xlu1 %7604, %v897_v57  }
  0xbc   : > { %1026 = vperm.xlu0 %7603, %v896_v58  }
  0xbf   : > { %1041 = vperm.xlu1 %7604, %v899_v59   ;;  %v1470_v59 = vld [vmem:[%s11960_s6 + $0x128] sm:$0xff] }
  0xc0   : > { %1036 = vperm.xlu0 %7603, %v898_v60   ;;  %v1469_v60 = vld [vmem:[%s11960_s6 + $0x120] sm:$0xff] }
  0xc3   : > { %1051 = vperm.xlu1 %7604, %v901_v61  }
  0xc4   : > { %1046 = vperm.xlu0 %7603, %v900_v62  }
  0xc7   : > { %1061 = vperm.xlu1 %7604, %v903_v63   ;;  %v1472_v63 = vld [vmem:[%s11960_s6 + $0x138] sm:$0xff] }
  0xc8   : > { %1056 = vperm.xlu0 %7603, %v902_v0   ;;  %v1471_v0 = vld [vmem:[%s11960_s6 + $0x130] sm:$0xff] }
  0xcb   : > { %1504 = vperm.xlu1 %7604, %v1434_v1  }
  0xcc   : > { %1499 = vperm.xlu0 %7603, %v1433_v2  }
  0xcf   : > { %1514 = vperm.xlu1 %7604, %v1436_v3   ;;  %v1474_v3 = vld [vmem:[%s11960_s6 + $0x148] sm:$0xff] }
  0xd0   : > { %1509 = vperm.xlu0 %7603, %v1435_v4   ;;  %v1473_v4 = vld [vmem:[%s11960_s6 + $0x140] sm:$0xff] }
  0xd3   : > { %1524 = vperm.xlu1 %7604, %v1438_v6  }
  0xd4   : > { %1519 = vperm.xlu0 %7603, %v1437_v7  }
  0xd7   : > { %1534 = vperm.xlu1 %7604, %v1440_v8   ;;  %v1476_v8 = vld [vmem:[%s11960_s6 + $0x158] sm:$0xff] }
  0xd8   : > { %1529 = vperm.xlu0 %7603, %v1439_v9   ;;  %v1475_v9 = vld [vmem:[%s11960_s6 + $0x150] sm:$0xff] }
  0xdb   : > { %1544 = vperm.xlu1 %7604, %v1442_v10  }
  0xdc   : > { %1539 = vperm.xlu0 %7603, %v1441_v11  }
  0xdf   : > { %1554 = vperm.xlu1 %7604, %v1444_v12   ;;  %v1478_v12 = vld [vmem:[%s11960_s6 + $0x168] sm:$0xff] }
  0xe0   : > { %1549 = vperm.xlu0 %7603, %v1443_v13   ;;  %v1477_v13 = vld [vmem:[%s11960_s6 + $0x160] sm:$0xff] }
  0xe3   : > { %1564 = vperm.xlu1 %7604, %v1446_v14  }
  0xe4   : > { %1559 = vperm.xlu0 %7603, %v1445_v15  }
  0xe7   : > { %1574 = vperm.xlu1 %7604, %v1448_v16   ;;  %v1480_v16 = vld [vmem:[%s11960_s6 + $0x178] sm:$0xff] }
  0xe8   : > { %1569 = vperm.xlu0 %7603, %v1447_v17   ;;  %v1479_v17 = vld [vmem:[%s11960_s6 + $0x170] sm:$0xff] }
  0xea   : > { %v8897_v20 = vpop.permute.xlu1 %574  ;;  %v8899_v21 = vpop.permute.xlu0 %564 }
  0xeb   : > { %1584 = vperm.xlu1 %7604, %v1450_v18  }
  0xec   : > { %1579 = vperm.xlu0 %7603, %v1449_v19  }
  0xee   : > { %v8910_v25 = vpop.permute.xlu1 %579  ;;  %v8912_v26 = vpop.permute.xlu0 %569 }
  0xef   : > { %1594 = vperm.xlu1 %7604, %v1452_v22   ;;  %v1482_v22 = vld [vmem:[%s11960_s6 + $0x188] sm:$0xff] }
  0xf0   : > { %1589 = vperm.xlu0 %7603, %v1451_v23   ;;  %v1481_v23 = vld [vmem:[%s11960_s6 + $0x180] sm:$0xff] }
  0xf2   : > { %v8920_v29 = vpop.permute.xlu1 %589 }
  0xf3   : > { %v8922_v30 = vpop.permute.xlu0 %584  ;;  %1604 = vperm.xlu1 %7604, %v1454_v27  }
  0xf4   : > { %1599 = vperm.xlu0 %7603, %v1453_v28   ;;  %v1484_v28 = vld [vmem:[%s11960_s6 + $0x198] sm:$0xff] }
  0xf6   : > { %v8930_v33 = vpop.permute.xlu1 %599 }
  0xf7   : > { %v8932_v34 = vpop.permute.xlu0 %594  ;;  %1614 = vperm.xlu1 %7604, %v1456_v31   ;;  %v1483_v31 = vld [vmem:[%s11960_s6 + $0x190] sm:$0xff] }
  0xf8   : > { %1609 = vperm.xlu0 %7603, %v1455_v32  }
  0xfa   : > { %v8940_v37 = vpop.permute.xlu1 %609 }
  0xfb   : > { %v8942_v38 = vpop.permute.xlu0 %604  ;;  %1624 = vperm.xlu1 %7604, %v1458_v35  }
  0xfc   : > { %1619 = vperm.xlu0 %7603, %v1457_v36   ;;  %v1486_v36 = vld [vmem:[%s11960_s6 + $0x1a8] sm:$0xff] }
  0xfe   : > { %v8950_v41 = vpop.permute.xlu1 %619 }
  0xff   : > { %v8952_v42 = vpop.permute.xlu0 %614  ;;  %1634 = vperm.xlu1 %7604, %v1460_v39   ;;  %v1485_v39 = vld [vmem:[%s11960_s6 + $0x1a0] sm:$0xff] }
 0x100   : > { %1629 = vperm.xlu0 %7603, %v1459_v40  }
 0x102   : > { %v8960_v45 = vpop.permute.xlu1 %629 }
 0x103   : > { %v8962_v46 = vpop.permute.xlu0 %624  ;;  %1644 = vperm.xlu1 %7604, %v1462_v43  }
 0x104   : > { %1639 = vperm.xlu0 %7603, %v1461_v44   ;;  %v1488_v44 = vld [vmem:[%s11960_s6 + $0x1b8] sm:$0xff] }
 0x106   : > { %v8970_v49 = vpop.permute.xlu1 %639 }
 0x107   : > { %v8972_v50 = vpop.permute.xlu0 %634  ;;  %1654 = vperm.xlu1 %7604, %v1464_v47   ;;  %v1487_v47 = vld [vmem:[%s11960_s6 + $0x1b0] sm:$0xff] }
 0x108   : > { %1649 = vperm.xlu0 %7603, %v1463_v48  }
 0x10a   : > { %v8980_v53 = vpop.permute.xlu1 %911 }
 0x10b   : > { %v8982_v54 = vpop.permute.xlu0 %906  ;;  %1664 = vperm.xlu1 %7604, %v1466_v51  }
 0x10c   : > { %1659 = vperm.xlu0 %7603, %v1465_v52   ;;  %v1490_v52 = vld [vmem:[%s11960_s6 + $0x1c8] sm:$0xff] }
 0x10e   : > { %v8990_v57 = vpop.permute.xlu1 %921 }
 0x10f   : > { %v8992_v58 = vpop.permute.xlu0 %916  ;;  %1674 = vperm.xlu1 %7604, %v1468_v55   ;;  %v1489_v55 = vld [vmem:[%s11960_s6 + $0x1c0] sm:$0xff] }
 0x110   : > { %1669 = vperm.xlu0 %7603, %v1467_v56  }
 0x112   : > { %v9000_v61 = vpop.permute.xlu1 %931 }
 0x113   : > { %v9002_v62 = vpop.permute.xlu0 %926  ;;  %1684 = vperm.xlu1 %7604, %v1470_v59  }
 0x114   : > { %1679 = vperm.xlu0 %7603, %v1469_v60   ;;  %v1492_v60 = vld [vmem:[%s11960_s6 + $0x1d8] sm:$0xff] }
 0x116   : > { %v9010_v1 = vpop.permute.xlu1 %941 }
 0x117   : > { %v9012_v2 = vpop.permute.xlu0 %936  ;;  %1694 = vperm.xlu1 %7604, %v1472_v63   ;;  %v1491_v63 = vld [vmem:[%s11960_s6 + $0x1d0] sm:$0xff] }
 0x118   : > { %1689 = vperm.xlu0 %7603, %v1471_v0  }
 0x11a   : > { %v9020_v6 = vpop.permute.xlu1 %951 }
 0x11b   : > { %v9022_v7 = vpop.permute.xlu0 %946  ;;  %1704 = vperm.xlu1 %7604, %v1474_v3  }
 0x11c   : > { %1699 = vperm.xlu0 %7603, %v1473_v4   ;;  %v1494_v4 = vld [vmem:[%s11960_s6 + $0x1e8] sm:$0xff] }
 0x11e   : > { %v9030_v10 = vpop.permute.xlu1 %961 }
 0x11f   : > { %v9032_v11 = vpop.permute.xlu0 %956  ;;  %1714 = vperm.xlu1 %7604, %v1476_v8   ;;  %v1493_v8 = vld [vmem:[%s11960_s6 + $0x1e0] sm:$0xff] }
 0x120   : > { %1709 = vperm.xlu0 %7603, %v1475_v9  }
 0x122   : > { %v9040_v14 = vpop.permute.xlu1 %971 }
 0x123   : > { %v9042_v15 = vpop.permute.xlu0 %966  ;;  %1724 = vperm.xlu1 %7604, %v1478_v12  }
 0x124   : > { %1719 = vperm.xlu0 %7603, %v1477_v13   ;;  %v1496_v13 = vld [vmem:[%s11960_s6 + $0x1f8] sm:$0xff] }
 0x126   : > { %v9050_v18 = vpop.permute.xlu1 %981 }
 0x127   : > { %v9052_v19 = vpop.permute.xlu0 %976  ;;  %1734 = vperm.xlu1 %7604, %v1480_v16   ;;  %v1495_v16 = vld [vmem:[%s11960_s6 + $0x1f0] sm:$0xff] }
 0x128   : > { %1729 = vperm.xlu0 %7603, %v1479_v17  }
 0x12a   : > { %v9060_v24 = vpop.permute.xlu1 %991 }
 0x12b   : > { %v9062_v27 = vpop.permute.xlu0 %986  ;;  %1744 = vperm.xlu1 %7604, %v1482_v22  }
 0x12c   : > { %1739 = vperm.xlu0 %7603, %v1481_v23  }
 0x12e   : > { %v9070_v32 = vpop.permute.xlu1 %1001 }
 0x12f   : > { %v9072_v35 = vpop.permute.xlu0 %996  ;;  %1754 = vperm.xlu1 %7604, %v1484_v28  }
 0x130   : > { %1749 = vperm.xlu0 %7603, %v1483_v31  }
 0x132   : > { %v9080_v40 = vpop.permute.xlu1 %1011 }
 0x133   : > { %v9082_v43 = vpop.permute.xlu0 %1006  ;;  %1764 = vperm.xlu1 %7604, %v1486_v36  }
 0x134   : > { %1759 = vperm.xlu0 %7603, %v1485_v39  }
 0x136   : > { %v9090_v48 = vpop.permute.xlu1 %1021 }
 0x137   : > { %v9092_v51 = vpop.permute.xlu0 %1016  ;;  %1774 = vperm.xlu1 %7604, %v1488_v44   ;;  %v2779_v44 = vld [vmem:[%s11962_s8 + $0x8] sm:$0xff] }
 0x138   : > { %1769 = vperm.xlu0 %7603, %v1487_v47  }
 0x13a   : > { %v9100_v56 = vpop.permute.xlu1 %1031 }
 0x13b   : > { %v9102_v59 = vpop.permute.xlu0 %1026  ;;  %1784 = vperm.xlu1 %7604, %v1490_v52  }
 0x13c   : > { %1779 = vperm.xlu0 %7603, %v1489_v55   ;;  %v2778_v55 = vld [vmem:[%s11962_s8] sm:$0xff] }
 0x13e   : > { %v9110_v0 = vpop.permute.xlu1 %1041 }
 0x13f   : > { %v9112_v3 = vpop.permute.xlu0 %1036  ;;  %1794 = vperm.xlu1 %7604, %v1492_v60  }
 0x140   : > { %1789 = vperm.xlu0 %7603, %v1491_v63  }
 0x142   : > { %v9120_v9 = vpop.permute.xlu1 %1051 }
 0x143   : > { %v9122_v12 = vpop.permute.xlu0 %1046  ;;  %1804 = vperm.xlu1 %7604, %v1494_v4  }
 0x144   : > { %1799 = vperm.xlu0 %7603, %v1493_v8   ;;  %v2781_v8 = vld [vmem:[%s11962_s8 + $0x18] sm:$0xff] }
 0x146   : > { %v7164_v17 = vpop.f32.mrb[0].mxu0  ;;  %v9130_v22 = vpop.permute.xlu1 %1061 }
 0x147   : > { %v762_v23 = vadd.f32 %v7164_v17, %v8897_v20  ;;  %v9133_v28 = vpop.permute.xlu0 %1056  ;;  %v753_v31 = vpop.f32.mrb[1].mxu0  ;;  %1814 = vperm.xlu1 %7604, %v1496_v13  }
 0x148   : > { %v754_v36 = vadd.f32 %v753_v31, %v8899_v21  ;;  %1809 = vperm.xlu0 %7603, %v1495_v16   ;;  %v7165_v39 = vpop.f32.mrb[2].mxu0  ;;  %v2780_v16 = vld [vmem:[%s11962_s8 + $0x10] sm:$0xff] }
 0x149   : > { %v765_v47 = vadd.f32 %v7165_v39, %v8910_v25  ;;  %v756_v52 = vpop.f32.mrb[3].mxu0  ;;  %v818_v63 = vmax.f32 %v762_v23, 0.0 }
 0x14a   : > { %v757_v20 = vadd.f32 %v756_v52, %v8912_v26  ;;  %v9144_v60 = vpop.permute.xlu1 %1504  ;;  %v816_v25 = vmax.f32 %v754_v36, 0.0 }
 0x14b   : > { %v819_v4 = vmax.f32 %v765_v47, 0.0  ;;  %v9146_v21 = vpop.permute.xlu0 %1499  ;;  %2913 = vperm.xlu1 %7604, %v2779_v44  }
 0x14c   : > { %2908 = vperm.xlu0 %7603, %v2778_v55   ;;  %v817_v13 = vmax.f32 %v757_v20, 0.0  ;;  %v2783_v55 = vld [vmem:[%s11962_s8 + $0x28] sm:$0xff] }
 0x14d   : > { %v833_v17 = vpack.c.bf16 %v819_v4, %v818_v63 }
 0x14e   : > { %v7168_v26 = vpop.f32.mrb[4].mxu0  ;;  %v9154_v31 = vpop.permute.xlu1 %1514  ;;  %v832_v23 = vpack.c.bf16 %v817_v13, %v816_v25 }
 0x14f   : > { %v778_v39 = vadd.f32 %v7168_v26, %v8932_v34  ;;  %v9157_v47 = vpop.permute.xlu0 %1509  ;;  %v769_v44 = vpop.f32.mrb[5].mxu0  ;;  %2923 = vperm.xlu1 %7604, %v2781_v8   ;;  %v2782_v34 = vld [vmem:[%s11962_s8 + $0x20] sm:$0xff] }
 0x150   : > { %v770_v52 = vadd.f32 %v769_v44, %v8922_v30  ;;  %2918 = vperm.xlu0 %7603, %v2780_v16   ;;  %v7169_v36 = vpop.f32.mrb[6].mxu0  ;;  %7178 = vmatprep.subr.bf16.mxu1 %v832_v23 }
 0x151   : > { %v781_v20 = vadd.f32 %v7169_v36, %v8930_v33  ;;  %v772_v63 = vpop.f32.mrb[7].mxu0  ;;  %7179 = vmatpush3.bf16.msra.mxu1 %v832_v23  ;;  %v822_v30 = vmax.f32 %v778_v39, 0.0  ;;  %v2785_v33 = vld [vmem:[%s11962_s8 + $0x38] sm:$0xff] }
 0x152   : > { %v773_v4 = vadd.f32 %v772_v63, %v8920_v29  ;;  %7180 = vmatprep.subr.bf16.mxu1 %v833_v17  ;;  %v9168_v8 = vpop.permute.xlu1 %1524  ;;  %v820_v16 = vmax.f32 %v770_v52, 0.0  ;;  %v2784_v29 = vld [vmem:[%s11962_s8 + $0x30] sm:$0xff] }
 0x153   : > { %v823_v25 = vmax.f32 %v781_v20, 0.0  ;;  %v9170_v13 = vpop.permute.xlu0 %1519  ;;  %2933 = vperm.xlu1 %7604, %v2783_v55  }
 0x154   : > { %v821_v26 = vmax.f32 %v773_v4, 0.0  ;;  %2928 = vperm.xlu0 %7603, %v2782_v34  }
 0x155   : > { %7181 = vmatpush3.bf16.msra.mxu1 %v833_v17  ;;  %v835_v23 = vpack.c.bf16 %v823_v25, %v822_v30  ;;  %v2787_v17 = vld [vmem:[%s11962_s8 + $0x48] sm:$0xff] }
 0x156   : > { %v7172_v44 = vpop.f32.mrb[8].mxu0  ;;  %v9178_v36 = vpop.permute.xlu1 %1534  ;;  %v834_v39 = vpack.c.bf16 %v821_v26, %v820_v16 }
 0x157   : > { %v794_v20 = vadd.f32 %v7172_v44, %v8952_v42  ;;  %v9181_v55 = vpop.permute.xlu0 %1529  ;;  %v785_v52 = vpop.f32.mrb[9].mxu0  ;;  %2943 = vperm.xlu1 %7604, %v2785_v33   ;;  %v2786_v42 = vld [vmem:[%s11962_s8 + $0x40] sm:$0xff] }
 0x158   : > { %v786_v63 = vadd.f32 %v785_v52, %v8942_v38  ;;  %2938 = vperm.xlu0 %7603, %v2784_v29   ;;  %v7173_v34 = vpop.f32.mrb[10].mxu0  ;;  %7182 = vmatprep.subr.bf16.mxu1 %v834_v39 }
 0x159   : > { %v797_v4 = vadd.f32 %v7173_v34, %v8950_v41  ;;  %v788_v30 = vpop.f32.mrb[11].mxu0  ;;  %7183 = vmatpush3.bf16.msra.mxu1 %v834_v39  ;;  %v826_v38 = vmax.f32 %v794_v20, 0.0  ;;  %v2789_v41 = vld [vmem:[%s11962_s8 + $0x58] sm:$0xff] }
 0x15a   : > { %v789_v25 = vadd.f32 %v788_v30, %v8940_v37  ;;  %7184 = vmatprep.subr.bf16.mxu1 %v835_v23  ;;  %v9192_v16 = vpop.permute.xlu1 %1544  ;;  %v824_v29 = vmax.f32 %v786_v63, 0.0  ;;  %v2788_v37 = vld [vmem:[%s11962_s8 + $0x50] sm:$0xff] }
 0x15b   : > { %v827_v26 = vmax.f32 %v797_v4, 0.0  ;;  %v9194_v33 = vpop.permute.xlu0 %1539  ;;  %2953 = vperm.xlu1 %7604, %v2787_v17  }
 0x15c   : > { %v825_v44 = vmax.f32 %v789_v25, 0.0  ;;  %2948 = vperm.xlu0 %7603, %v2786_v42  }
 0x15d   : > { %7185 = vmatpush3.bf16.msra.mxu1 %v835_v23  ;;  %v837_v39 = vpack.c.bf16 %v827_v26, %v826_v38  ;;  %v2791_v23 = vld [vmem:[%s11962_s8 + $0x68] sm:$0xff] }
 0x15e   : > { %v7176_v52 = vpop.f32.mrb[12].mxu0  ;;  %v9202_v34 = vpop.permute.xlu1 %1554  ;;  %v836_v20 = vpack.c.bf16 %v825_v44, %v824_v29 }
 0x15f   : > { %v810_v4 = vadd.f32 %v7176_v52, %v8972_v50  ;;  %v9205_v17 = vpop.permute.xlu0 %1549  ;;  %v801_v63 = vpop.f32.mrb[13].mxu0  ;;  %2963 = vperm.xlu1 %7604, %v2789_v41   ;;  %v2790_v50 = vld [vmem:[%s11962_s8 + $0x60] sm:$0xff] }
 0x160   : > { %v802_v30 = vadd.f32 %v801_v63, %v8962_v46  ;;  %2958 = vperm.xlu0 %7603, %v2788_v37   ;;  %v7177_v42 = vpop.f32.mrb[14].mxu0  ;;  %7186 = vmatprep.subr.bf16.mxu1 %v836_v20 }
 0x161   : > { %v813_v25 = vadd.f32 %v7177_v42, %v8970_v49  ;;  %v804_v38 = vpop.f32.mrb[15].mxu0  ;;  %7187 = vmatpush3.bf16.msra.mxu1 %v836_v20  ;;  %v830_v46 = vmax.f32 %v810_v4, 0.0  ;;  %v2793_v49 = vld [vmem:[%s11962_s8 + $0x78] sm:$0xff] }
 0x162   : > { %v805_v26 = vadd.f32 %v804_v38, %v8960_v45  ;;  %7188 = vmatprep.subr.bf16.mxu1 %v837_v39  ;;  %v9216_v29 = vpop.permute.xlu1 %1564  ;;  %v828_v37 = vmax.f32 %v802_v30, 0.0  ;;  %v2792_v45 = vld [vmem:[%s11962_s8 + $0x70] sm:$0xff]  ;;  %v2795_v30 = vld [vmem:[%s11962_s8 + $0x88] sm:$0xff]  ;;  %v2797_v38 = vld [vmem:[%s11962_s8 + $0x98] sm:$0xff] }
 0x163   : > { %v831_v44 = vmax.f32 %v813_v25, 0.0  ;;  %v9218_v41 = vpop.permute.xlu0 %1559  ;;  %2973 = vperm.xlu1 %7604, %v2791_v23  }
 0x164   : > { %v829_v52 = vmax.f32 %v805_v26, 0.0  ;;  %2968 = vperm.xlu0 %7603, %v2790_v50   ;;  %v7615_v50 = vld [vmem:[%s11957_s3 + $0x8] sm:$0xff]   ;;  %v2796_v26 = vld [vmem:[%s11962_s8 + $0x90] sm:$0xff] }
 0x165   : > { %7189 = vmatpush3.bf16.msra.mxu1 %v837_v39  ;;  %v839_v20 = vpack.c.bf16 %v831_v44, %v830_v46  ;;  %v2794_v39 = vld [vmem:[%s11962_s8 + $0x80] sm:$0xff]  ;;  %v7616_v46 = vld [vmem:[%s11957_s3 + $0x10] sm:$0xff]  }
 0x166   : > { %v9226_v63 = vpop.permute.xlu1 %1574  ;;  %v838_v4 = vpack.c.bf16 %v829_v52, %v828_v37  ;;  %v2799_v52 = vld [vmem:[%s11962_s8 + $0xa8] sm:$0xff] }
 0x167   : > { %11966 = vst [vmem:[#allocation3_spill] sm:$0xff] %v9226_v63  ;;  %v9228_v42 = vpop.permute.xlu0 %1569  ;;  %2983 = vperm.xlu1 %7604, %v2793_v49   ;;  %v2798_v49 = vld [vmem:[%s11962_s8 + $0xa0] sm:$0xff] }
 0x168   : > { %2978 = vperm.xlu0 %7603, %v2792_v45   ;;  %7190 = vmatprep.subr.bf16.mxu1 %v838_v4 }
 0x169   : > { %7191 = vmatpush3.bf16.msra.mxu1 %v838_v4  ;;  %v2801_v4 = vld [vmem:[%s11962_s8 + $0xb8] sm:$0xff] }
 0x16a   : > { %7192 = vmatprep.subr.bf16.mxu1 %v839_v20  ;;  %v9236_v23 = vpop.permute.xlu1 %1584 }
 0x16b   : > { %11967 = vst [vmem:[#allocation4_spill] sm:$0xff] %v9236_v23  ;;  %v9238_v25 = vpop.permute.xlu0 %1579  ;;  %2993 = vperm.xlu1 %7604, %v2795_v30   ;;  %v7617_v30 = vld [vmem:[%s11957_s3 + $0x18] sm:$0xff]  }
 0x16c   : > { %11968 = vst [vmem:[#allocation5_spill] sm:$0xff] %v9238_v25  ;;  %2988 = vperm.xlu0 %7603, %v2794_v39   ;;  %v2800_v39 = vld [vmem:[%s11962_s8 + $0xb0] sm:$0xff] }
 0x16d   : > { %7193 = vmatpush3.bf16.msra.mxu1 %v839_v20 }
 0x16e   : > { %v9252_v44 = vpop.permute.xlu1 %1594  ;;  %7226 = vmatprep.subr.bf16.mxu1 %v11964_v5 }
 0x16f   : > { %11969 = vst [vmem:[#allocation6_spill] sm:$0xff] %v9252_v44  ;;  %v9255_v37 = vpop.permute.xlu0 %1589  ;;  %3003 = vperm.xlu1 %7604, %v2797_v38   ;;  %v7618_v38 = vld [vmem:[%s11957_s3 + $0x20] sm:$0xff]  }
 0x170   : > { %11970 = vst [vmem:[#allocation7_spill] sm:$0xff] %v9255_v37  ;;  %2998 = vperm.xlu0 %7603, %v2796_v26   ;;  %7195 = vmatmul.mubr.bf16.vlgmr.msra.gmra.mrb[0].mxu1 %v7615_v50 }
 0x171   : > { %7198 = vmatprep.mubr.bf16.mxu1 %v7616_v46  ;;  %v2803_v46 = vld [vmem:[%s11962_s8 + $0xc8] sm:$0xff] }
 0x172   : > { %v9263_v45 = vpop.permute.xlu1 %1604 }
 0x173   : > { %11971 = vst [vmem:[#allocation8_spill] sm:$0xff] %v9263_v45  ;;  %v9265_v20 = vpop.permute.xlu0 %1599  ;;  %3013 = vperm.xlu1 %7604, %v2799_v52   ;;  %v2802_v52 = vld [vmem:[%s11962_s8 + $0xc0] sm:$0xff] }
 0x174   : > { %11972 = vst [vmem:[#allocation9_spill] sm:$0xff] %v9265_v20  ;;  %3008 = vperm.xlu0 %7603, %v2798_v49  }
 0x176   : > { %v9279_v50 = vpop.permute.xlu1 %1614 }
 0x177   : > { %11973 = vst [vmem:[#allocation10_spill] sm:$0xff] %v9279_v50  ;;  %v9281_v26 = vpop.permute.xlu0 %1609  ;;  %3023 = vperm.xlu1 %7604, %v2801_v4   ;;  %v2805_v4 = vld [vmem:[%s11962_s8 + $0xd8] sm:$0xff] }
 0x178   : > { %11974 = vst [vmem:[#allocation11_spill] sm:$0xff] %v9281_v26  ;;  %3018 = vperm.xlu0 %7603, %v2800_v39   ;;  %7199 = vmatmul.mubr.bf16.gmra.mrb[4].mxu1 %v7617_v30  ;;  %v7619_v30 = vld [vmem:[%s11957_s3 + $0x28] sm:$0xff]   ;;  %v2804_v39 = vld [vmem:[%s11962_s8 + $0xd0] sm:$0xff] }
 0x179   : > { %7202 = vmatprep.mubr.bf16.mxu1 %v7618_v38  ;;  %v7620_v38 = vld [vmem:[%s11957_s3 + $0x30] sm:$0xff]  }
 0x17a   : > { %v9289_v49 = vpop.permute.xlu1 %1624 }
 0x17b   : > { %11975 = vst [vmem:[#allocation12_spill] sm:$0xff] %v9289_v49  ;;  %3033 = vperm.xlu1 %7604, %v2803_v46   ;;  %v9291_v5 = vpop.permute.xlu0 %1619  ;;  %v2807_v46 = vld [vmem:[%s11962_s8 + $0xe8] sm:$0xff]  ;;  %v2806_v49 = vld [vmem:[%s11962_s8 + $0xe0] sm:$0xff] }
 0x17c   : > { %11976 = vst [vmem:[#allocation13_spill] sm:$0xff] %v9291_v5  ;;  %3028 = vperm.xlu0 %7603, %v2802_v52  }
 0x17e   : > { %v9308_v52 = vpop.permute.xlu1 %1634 }
 0x17f   : > { %3043 = vperm.xlu1 %7604, %v2805_v4   ;;  %11977 = vst [vmem:[#allocation14_spill] sm:$0xff] %v9308_v52  ;;  %v9313_v5 = vpop.permute.xlu0 %1629  ;;  %v2809_v4 = vld [vmem:[%s11962_s8 + $0xf8] sm:$0xff] }
 0x180   : > { %3038 = vperm.xlu0 %7603, %v2804_v39   ;;  %7203 = vmatmul.mubr.bf16.gmra.mrb[8].mxu1 %v7619_v30  ;;  %11978 = vst [vmem:[#allocation15_spill] sm:$0xff] %v9313_v5  ;;  %v7621_v30 = vld [vmem:[%s11957_s3 + $0x38] sm:$0xff]   ;;  %v2808_v39 = vld [vmem:[%s11962_s8 + $0xf0] sm:$0xff]  ;;  %v2810_v5 = vld [vmem:[%s11962_s8 + $0x100] sm:$0xff] }
 0x181   : > { %7206 = vmatprep.mubr.bf16.mxu1 %v7620_v38  ;;  %v7622_v38 = vld [vmem:[%s11957_s3 + $0x40] sm:$0xff]  }
 0x182   : > { %v9327_v52 = vpop.permute.xlu1 %1644 }
 0x183   : > { %3053 = vperm.xlu1 %7604, %v2807_v46   ;;  %11979 = vst [vmem:[#allocation16_spill] sm:$0xff] %v9327_v52  ;;  %v2811_v46 = vld [vmem:[%s11962_s8 + $0x108] sm:$0xff]  ;;  %v2813_v52 = vld [vmem:[%s11962_s8 + $0x118] sm:$0xff] }
 0x184   : > { %3048 = vperm.xlu0 %7603, %v2806_v49   ;;  %v9329_v49 = vpop.permute.xlu0 %1639 }
 0x185   : > { %11980 = vst [vmem:[#allocation17_spill] sm:$0xff] %v9329_v49 }
 0x187   : > { %3063 = vperm.xlu1 %7604, %v2809_v4   ;;  %v7623_v4 = vld [vmem:[%s11957_s3 + $0x48] sm:$0xff]  }
 0x188   : > { %3058 = vperm.xlu0 %7603, %v2808_v39   ;;  %7207 = vmatmul.mubr.bf16.gmra.mrb[12].mxu1 %v7621_v30  ;;  %v9343_v30 = vpop.permute.xlu1 %1654  ;;  %v2812_v39 = vld [vmem:[%s11962_s8 + $0x110] sm:$0xff] }
 0x189   : > { %7210 = vmatprep.mubr.bf16.mxu1 %v7622_v38  ;;  %11981 = vst [vmem:[#allocation18_spill] sm:$0xff] %v9343_v30  ;;  %v7624_v38 = vld [vmem:[%s11957_s3 + $0x50] sm:$0xff]   ;;  %v2814_v30 = vld [vmem:[%s11962_s8 + $0x120] sm:$0xff] }
 0x18b   : > { %3073 = vperm.xlu1 %7604, %v2811_v46   ;;  %v9351_v46 = vpop.permute.xlu0 %1649 }
 0x18c   : > { %3068 = vperm.xlu0 %7603, %v2810_v5   ;;  %11982 = vst [vmem:[#allocation19_spill] sm:$0xff] %v9351_v46  ;;  %v2815_v5 = vld [vmem:[%s11962_s8 + $0x128] sm:$0xff]  ;;  %v9359_v49 = vpop.permute.xlu1 %1664 }
 0x18d   : > { %11983 = vst [vmem:[#allocation20_spill] sm:$0xff] %v9359_v49  ;;  %v2818_v49 = vld [vmem:[%s11962_s8 + $0x140] sm:$0xff] }
 0x18f   : > { %3083 = vperm.xlu1 %7604, %v2813_v52   ;;  %v9361_v50 = vpop.permute.xlu0 %1659  ;;  %v2817_v52 = vld [vmem:[%s11962_s8 + $0x138] sm:$0xff] }
 0x190   : > { %3078 = vperm.xlu0 %7603, %v2812_v39   ;;  %7211 = vmatmul.mubr.bf16.gmra.mrb[16].mxu1 %v7623_v4  ;;  %11984 = vst [vmem:[#allocation21_spill] sm:$0xff] %v9361_v50  ;;  %v7625_v4 = vld [vmem:[%s11957_s3 + $0x58] sm:$0xff]   ;;  %v2816_v39 = vld [vmem:[%s11962_s8 + $0x130] sm:$0xff] }
 0x191   : > { %7214 = vmatprep.mubr.bf16.mxu1 %v7624_v38  ;;  %v7626_v38 = vld [vmem:[%s11957_s3 + $0x60] sm:$0xff]  }
 0x193   : > { %3093 = vperm.xlu1 %7604, %v2815_v5   ;;  %v9378_v5 = vpop.permute.xlu1 %1674  ;;  %v9383_v50 = vpop.permute.xlu0 %1669 }
 0x194   : > { %3088 = vperm.xlu0 %7603, %v2814_v30   ;;  %v2819_v30 = vld [vmem:[%s11962_s8 + $0x148] sm:$0xff]  ;;  %11985 = vst [vmem:[#allocation22_spill] sm:$0xff] %v9378_v5  ;;  %11986 = vst [vmem:[#allocation23_spill] sm:$0xff] %v9383_v50  ;;  %v2822_v50 = vld [vmem:[%s11962_s8 + $0x160] sm:$0xff] }
 0x197   : > { %3103 = vperm.xlu1 %7604, %v2817_v52   ;;  %v2821_v52 = vld [vmem:[%s11962_s8 + $0x158] sm:$0xff]  ;;  %v9397_v5 = vpop.permute.xlu1 %1684 }
 0x198   : > { %3098 = vperm.xlu0 %7603, %v2816_v39   ;;  %7215 = vmatmul.mubr.bf16.gmra.mrb[20].mxu1 %v7625_v4  ;;  %v7627_v4 = vld [vmem:[%s11957_s3 + $0x68] sm:$0xff]   ;;  %v2820_v39 = vld [vmem:[%s11962_s8 + $0x150] sm:$0xff]  ;;  %11987 = vst [vmem:[#allocation24_spill] sm:$0xff] %v9397_v5  ;;  %v2825_v5 = vld [vmem:[%s11962_s8 + $0x178] sm:$0xff] }
 0x199   : > { %7218 = vmatprep.mubr.bf16.mxu1 %v7626_v38  ;;  %v7628_v38 = vld [vmem:[%s11957_s3 + $0x70] sm:$0xff]  }
 0x19b   : > { %3113 = vperm.xlu1 %7604, %v2819_v30   ;;  %v2823_v30 = vld [vmem:[%s11962_s8 + $0x168] sm:$0xff] }
 0x19c   : > { %3108 = vperm.xlu0 %7603, %v2818_v49   ;;  %v9399_v49 = vpop.permute.xlu0 %1679 }
 0x19d   : > { %11988 = vst [vmem:[#allocation25_spill] sm:$0xff] %v9399_v49 }
 0x19f   : > { %3123 = vperm.xlu1 %7604, %v2821_v52   ;;  %v7629_v52 = vld [vmem:[%s11957_s3 + $0x78] sm:$0xff]  }
 0x1a0   : > { %3118 = vperm.xlu0 %7603, %v2820_v39   ;;  %7219 = vmatmul.mubr.bf16.gmra.mrb[24].mxu1 %v7627_v4  ;;  %v9413_v4 = vpop.permute.xlu1 %1694  ;;  %v2824_v39 = vld [vmem:[%s11962_s8 + $0x170] sm:$0xff]  ;;  %v9418_v49 = vpop.permute.xlu0 %1689 }
 0x1a1   : > { %7222 = vmatprep.mubr.bf16.mxu1 %v7628_v38  ;;  %11989 = vst [vmem:[#allocation26_spill] sm:$0xff] %v9413_v4  ;;  %11990 = vst [vmem:[#allocation27_spill] sm:$0xff] %v9418_v49  ;;  %v2826_v38 = vld [vmem:[%s11962_s8 + $0x180] sm:$0xff] }
 0x1a3   : > { %3133 = vperm.xlu1 %7604, %v2823_v30  }
 0x1a4   : > { %3128 = vperm.xlu0 %7603, %v2822_v50   ;;  %v2827_v50 = vld [vmem:[%s11962_s8 + $0x188] sm:$0xff]  ;;  %v9426_v30 = vpop.permute.xlu1 %1704  ;;  %v9428_v4 = vpop.permute.xlu0 %1699 }
 0x1a5   : > { %11991 = vst [vmem:[#allocation28_spill] sm:$0xff] %v9426_v30  ;;  %11992 = vst [vmem:[#allocation29_spill] sm:$0xff] %v9428_v4  ;;  %v2833_v30 = vld [vmem:[%s11962_s8 + $0x1b8] sm:$0xff] }
 0x1a7   : > { %3143 = vperm.xlu1 %7604, %v2825_v5   ;;  %v2829_v5 = vld [vmem:[%s11962_s8 + $0x198] sm:$0xff] }
 0x1a8   : > { %3138 = vperm.xlu0 %7603, %v2824_v39   ;;  %7223 = vmatmul.mubr.bf16.gmra.mrb[28].mxu1 %v7629_v52  ;;  %v2828_v52 = vld [vmem:[%s11962_s8 + $0x190] sm:$0xff]  ;;  %v2831_v39 = vld [vmem:[%s11962_s8 + $0x1a8] sm:$0xff]  ;;  %v9439_v49 = vpop.permute.xlu1 %1714 }
 0x1a9   : > { %11993 = vst [vmem:[#allocation30_spill] sm:$0xff] %v9439_v49 }
 0x1ab   : > { %3153 = vperm.xlu1 %7604, %v2827_v50   ;;  %v2830_v50 = vld [vmem:[%s11962_s8 + $0x1a0] sm:$0xff] }
 0x1ac   : > { %3148 = vperm.xlu0 %7603, %v2826_v38   ;;  %v9444_v38 = vpop.permute.xlu0 %1709 }
 0x1ad   : > { %11994 = vst [vmem:[#allocation31_spill] sm:$0xff] %v9444_v38  ;;  %v2835_v38 = vld [vmem:[%s11962_s8 + $0x1c8] sm:$0xff] }
 0x1af   : > { %3163 = vperm.xlu1 %7604, %v2829_v5   ;;  %v2832_v5 = vld [vmem:[%s11962_s8 + $0x1b0] sm:$0xff] }
 0x1b0   : > { %3158 = vperm.xlu0 %7603, %v2828_v52   ;;  %v9452_v52 = vpop.permute.xlu1 %1724  ;;  %v9454_v49 = vpop.permute.xlu0 %1719 }
 0x1b1   : > { %11995 = vst [vmem:[#allocation32_spill] sm:$0xff] %v9452_v52  ;;  %11996 = vst [vmem:[#allocation33_spill] sm:$0xff] %v9454_v49  ;;  %v2839_v52 = vld [vmem:[%s11962_s8 + $0x1e8] sm:$0xff] }
 0x1b3   : > { %3173 = vperm.xlu1 %7604, %v2831_v39   ;;  %v2834_v39 = vld [vmem:[%s11962_s8 + $0x1c0] sm:$0xff] }
 0x1b4   : > { %3168 = vperm.xlu0 %7603, %v2830_v50   ;;  %v2837_v50 = vld [vmem:[%s11962_s8 + $0x1d8] sm:$0xff]  ;;  %v9465_v4 = vpop.permute.xlu1 %1734 }
 0x1b5   : > { %11997 = vst [vmem:[#allocation34_spill] sm:$0xff] %v9465_v4 }
 0x1b7   : > { %3183 = vperm.xlu1 %7604, %v2833_v30   ;;  %v2836_v30 = vld [vmem:[%s11962_s8 + $0x1d0] sm:$0xff] }
 0x1b8   : > { %3178 = vperm.xlu0 %7603, %v2832_v5   ;;  %v9470_v5 = vpop.permute.xlu0 %1729 }
 0x1b9   : > { %11998 = vst [vmem:[#allocation35_spill] sm:$0xff] %v9470_v5  ;;  %v2841_v5 = vld [vmem:[%s11962_s8 + $0x1f8] sm:$0xff] }
 0x1bb   : > { %3193 = vperm.xlu1 %7604, %v2835_v38   ;;  %v2838_v38 = vld [vmem:[%s11962_s8 + $0x1e0] sm:$0xff] }
 0x1bc   : > { %3188 = vperm.xlu0 %7603, %v2834_v39   ;;  %v9478_v39 = vpop.permute.xlu1 %1744  ;;  %v9480_v4 = vpop.permute.xlu0 %1739 }
 0x1bd   : > { %11999 = vst [vmem:[#allocation36_spill] sm:$0xff] %v9478_v39  ;;  %12000 = vst [vmem:[#allocation37_spill] sm:$0xff] %v9480_v4  ;;  %v2845_v39 = vld [vmem:[%s11962_s8 + $0x218] sm:$0xff] }
 0x1bf   : > { %3203 = vperm.xlu1 %7604, %v2837_v50   ;;  %v2840_v50 = vld [vmem:[%s11962_s8 + $0x1f0] sm:$0xff] }
 0x1c0   : > { %3198 = vperm.xlu0 %7603, %v2836_v30   ;;  %v2843_v30 = vld [vmem:[%s11962_s8 + $0x208] sm:$0xff]  ;;  %v9491_v49 = vpop.permute.xlu1 %1754 }
 0x1c1   : > { %12001 = vst [vmem:[#allocation38_spill] sm:$0xff] %v9491_v49 }
 0x1c3   : > { %3213 = vperm.xlu1 %7604, %v2839_v52   ;;  %v2842_v52 = vld [vmem:[%s11962_s8 + $0x200] sm:$0xff] }
 0x1c4   : > { %3208 = vperm.xlu0 %7603, %v2838_v38   ;;  %v9496_v38 = vpop.permute.xlu0 %1749 }
 0x1c5   : > { %12002 = vst [vmem:[#allocation39_spill] sm:$0xff] %v9496_v38  ;;  %v2847_v38 = vld [vmem:[%s11962_s8 + $0x228] sm:$0xff] }
 0x1c7   : > { %3223 = vperm.xlu1 %7604, %v2841_v5   ;;  %v2844_v5 = vld [vmem:[%s11962_s8 + $0x210] sm:$0xff] }
 0x1c8   : > { %3218 = vperm.xlu0 %7603, %v2840_v50   ;;  %v9504_v50 = vpop.permute.xlu1 %1764  ;;  %v9506_v49 = vpop.permute.xlu0 %1759 }
 0x1c9   : > { %12003 = vst [vmem:[#allocation40_spill] sm:$0xff] %v9504_v50  ;;  %12004 = vst [vmem:[#allocation41_spill] sm:$0xff] %v9506_v49  ;;  %v2851_v50 = vld [vmem:[%s11962_s8 + $0x248] sm:$0xff] }
 0x1cb   : > { %3233 = vperm.xlu1 %7604, %v2843_v30   ;;  %v2846_v30 = vld [vmem:[%s11962_s8 + $0x220] sm:$0xff] }
 0x1cc   : > { %3228 = vperm.xlu0 %7603, %v2842_v52   ;;  %v2849_v52 = vld [vmem:[%s11962_s8 + $0x238] sm:$0xff]  ;;  %v9517_v4 = vpop.permute.xlu1 %1774 }
 0x1cd   : > { %12005 = vst [vmem:[#allocation42_spill] sm:$0xff] %v9517_v4 }
 0x1cf   : > { %3243 = vperm.xlu1 %7604, %v2845_v39   ;;  %v2848_v39 = vld [vmem:[%s11962_s8 + $0x230] sm:$0xff] }
 0x1d0   : > { %3238 = vperm.xlu0 %7603, %v2844_v5   ;;  %v9522_v5 = vpop.permute.xlu0 %1769 }
 0x1d1   : > { %12006 = vst [vmem:[#allocation43_spill] sm:$0xff] %v9522_v5  ;;  %v2853_v5 = vld [vmem:[%s11962_s8 + $0x258] sm:$0xff] }
 0x1d3   : > { %3253 = vperm.xlu1 %7604, %v2847_v38   ;;  %v2850_v38 = vld [vmem:[%s11962_s8 + $0x240] sm:$0xff] }
 0x1d4   : > { %3248 = vperm.xlu0 %7603, %v2846_v30   ;;  %v9530_v30 = vpop.permute.xlu1 %1784  ;;  %v9532_v4 = vpop.permute.xlu0 %1779 }
 0x1d5   : > { %12007 = vst [vmem:[#allocation44_spill] sm:$0xff] %v9530_v30  ;;  %12008 = vst [vmem:[#allocation45_spill] sm:$0xff] %v9532_v4  ;;  %v2857_v30 = vld [vmem:[%s11962_s8 + $0x278] sm:$0xff] }
 0x1d7   : > { %3263 = vperm.xlu1 %7604, %v2849_v52   ;;  %v2852_v52 = vld [vmem:[%s11962_s8 + $0x250] sm:$0xff] }
 0x1d8   : > { %3258 = vperm.xlu0 %7603, %v2848_v39   ;;  %v2855_v39 = vld [vmem:[%s11962_s8 + $0x268] sm:$0xff]  ;;  %v9543_v49 = vpop.permute.xlu1 %1794 }
 0x1d9   : > { %12009 = vst [vmem:[#allocation46_spill] sm:$0xff] %v9543_v49 }
 0x1db   : > { %3273 = vperm.xlu1 %7604, %v2851_v50   ;;  %v2854_v50 = vld [vmem:[%s11962_s8 + $0x260] sm:$0xff] }
 0x1dc   : > { %3268 = vperm.xlu0 %7603, %v2850_v38   ;;  %v9548_v38 = vpop.permute.xlu0 %1789 }
 0x1dd   : > { %12010 = vst [vmem:[#allocation47_spill] sm:$0xff] %v9548_v38  ;;  %v2859_v38 = vld [vmem:[%s11962_s8 + $0x288] sm:$0xff] }
 0x1df   : > { %3283 = vperm.xlu1 %7604, %v2853_v5   ;;  %v2856_v5 = vld [vmem:[%s11962_s8 + $0x270] sm:$0xff] }
 0x1e0   : > { %3278 = vperm.xlu0 %7603, %v2852_v52   ;;  %v9556_v52 = vpop.permute.xlu1 %1804  ;;  %v9558_v49 = vpop.permute.xlu0 %1799 }
 0x1e1   : > { %12011 = vst [vmem:[#allocation48_spill] sm:$0xff] %v9556_v52  ;;  %12012 = vst [vmem:[#allocation49_spill] sm:$0xff] %v9558_v49  ;;  %v2863_v52 = vld [vmem:[%s11962_s8 + $0x2a8] sm:$0xff] }
 0x1e3   : > { %3293 = vperm.xlu1 %7604, %v2855_v39   ;;  %v2858_v39 = vld [vmem:[%s11962_s8 + $0x280] sm:$0xff] }
 0x1e4   : > { %3288 = vperm.xlu0 %7603, %v2854_v50   ;;  %v2861_v50 = vld [vmem:[%s11962_s8 + $0x298] sm:$0xff]  ;;  %v9569_v4 = vpop.permute.xlu1 %1814 }
 0x1e5   : > { %12013 = vst [vmem:[#allocation50_spill] sm:$0xff] %v9569_v4 }
 0x1e7   : > { %3303 = vperm.xlu1 %7604, %v2857_v30   ;;  %v2860_v30 = vld [vmem:[%s11962_s8 + $0x290] sm:$0xff] }
 0x1e8   : > { %3298 = vperm.xlu0 %7603, %v2856_v5   ;;  %v9574_v5 = vpop.permute.xlu0 %1809 }
 0x1e9   : > { %12014 = vst [vmem:[#allocation51_spill] sm:$0xff] %v9574_v5  ;;  %v2865_v5 = vld [vmem:[%s11962_s8 + $0x2b8] sm:$0xff] }
 0x1eb   : > { %3313 = vperm.xlu1 %7604, %v2859_v38   ;;  %v2862_v38 = vld [vmem:[%s11962_s8 + $0x2a0] sm:$0xff] }
 0x1ec   : > { %3308 = vperm.xlu0 %7603, %v2858_v39   ;;  %v9582_v39 = vpop.permute.xlu1 %2913  ;;  %v9584_v4 = vpop.permute.xlu0 %2908 }
 0x1ed   : > { %12015 = vst [vmem:[#allocation52_spill] sm:$0xff] %v9582_v39  ;;  %12016 = vst [vmem:[#allocation53_spill] sm:$0xff] %v9584_v4  ;;  %v2869_v39 = vld [vmem:[%s11962_s8 + $0x2d8] sm:$0xff] }
 0x1ef   : > { %3323 = vperm.xlu1 %7604, %v2861_v50   ;;  %v2864_v50 = vld [vmem:[%s11962_s8 + $0x2b0] sm:$0xff] }
 0x1f0   : > { %3318 = vperm.xlu0 %7603, %v2860_v30   ;;  %v2867_v30 = vld [vmem:[%s11962_s8 + $0x2c8] sm:$0xff]  ;;  %v9595_v49 = vpop.permute.xlu1 %2923 }
 0x1f1   : > { %12017 = vst [vmem:[#allocation54_spill] sm:$0xff] %v9595_v49 }
 0x1f3   : > { %3333 = vperm.xlu1 %7604, %v2863_v52   ;;  %v2866_v52 = vld [vmem:[%s11962_s8 + $0x2c0] sm:$0xff] }
 0x1f4   : > { %3328 = vperm.xlu0 %7603, %v2862_v38   ;;  %v9600_v38 = vpop.permute.xlu0 %2918 }
 0x1f5   : > { %12018 = vst [vmem:[#allocation55_spill] sm:$0xff] %v9600_v38  ;;  %v2871_v38 = vld [vmem:[%s11962_s8 + $0x2e8] sm:$0xff] }
 0x1f7   : > { %3343 = vperm.xlu1 %7604, %v2865_v5   ;;  %v2868_v5 = vld [vmem:[%s11962_s8 + $0x2d0] sm:$0xff] }
 0x1f8   : > { %3338 = vperm.xlu0 %7603, %v2864_v50   ;;  %v9608_v50 = vpop.permute.xlu1 %2933  ;;  %v9610_v49 = vpop.permute.xlu0 %2928 }
 0x1f9   : > { %12019 = vst [vmem:[#allocation56_spill] sm:$0xff] %v9608_v50  ;;  %12020 = vst [vmem:[#allocation57_spill] sm:$0xff] %v9610_v49  ;;  %v2875_v50 = vld [vmem:[%s11962_s8 + $0x308] sm:$0xff] }
 0x1fb   : > { %3353 = vperm.xlu1 %7604, %v2867_v30   ;;  %v2870_v30 = vld [vmem:[%s11962_s8 + $0x2e0] sm:$0xff] }
 0x1fc   : > { %3348 = vperm.xlu0 %7603, %v2866_v52   ;;  %v2873_v52 = vld [vmem:[%s11962_s8 + $0x2f8] sm:$0xff]  ;;  %v9621_v4 = vpop.permute.xlu1 %2943 }
 0x1fd   : > { %12021 = vst [vmem:[#allocation58_spill] sm:$0xff] %v9621_v4 }
 0x1ff   : > { %3363 = vperm.xlu1 %7604, %v2869_v39   ;;  %v2872_v39 = vld [vmem:[%s11962_s8 + $0x2f0] sm:$0xff] }
 0x200   : > { %3358 = vperm.xlu0 %7603, %v2868_v5   ;;  %v9626_v5 = vpop.permute.xlu0 %2938  ;;  %v9637_v4 = vpop.permute.xlu1 %2953 }
 0x201   : > { %12022 = vst [vmem:[#allocation59_spill] sm:$0xff] %v9626_v5  ;;  %12023 = vst [vmem:[#allocation60_spill] sm:$0xff] %v9637_v4  ;;  %v2879_v5 = vld [vmem:[%s11962_s8 + $0x328] sm:$0xff] }
 0x203   : > { %3373 = vperm.xlu1 %7604, %v2871_v38   ;;  %v2874_v38 = vld [vmem:[%s11962_s8 + $0x300] sm:$0xff] }
 0x204   : > { %3368 = vperm.xlu0 %7603, %v2870_v30   ;;  %v7632_v30 = vld [vmem:[%s11959_s5 + $0x4] ss:$8 sps:$4 sm:$0xff]   ;;  %v9639_v49 = vpop.permute.xlu0 %2948  ;;  %v9650_v4 = vpop.permute.xlu1 %2963 }
 0x205   : > { %2169 = vmatprep.mubr.bf16.mxu0 %v7632_v30  ;;  %12024 = vst [vmem:[#allocation61_spill] sm:$0xff] %v9639_v49  ;;  %12025 = vst [vmem:[#allocation62_spill] sm:$0xff] %v9650_v4  ;;  %v2881_v30 = vld [vmem:[%s11962_s8 + $0x338] sm:$0xff] }
 0x207   : > { %3383 = vperm.xlu1 %7604, %v2873_v52   ;;  %v2877_v52 = vld [vmem:[%s11962_s8 + $0x318] sm:$0xff] }
 0x208   : > { %3378 = vperm.xlu0 %7603, %v2872_v39   ;;  %v2876_v39 = vld [vmem:[%s11962_s8 + $0x310] sm:$0xff] }
 0x20b   : > { %3393 = vperm.xlu1 %7604, %v2875_v50   ;;  %v2878_v50 = vld [vmem:[%s11962_s8 + $0x320] sm:$0xff] }
 0x20c   : > { %3388 = vperm.xlu0 %7603, %v2874_v38   ;;  %v9655_v38 = vpop.permute.xlu0 %2958 }
 0x20d   : > { %12026 = vst [vmem:[#allocation63_spill] sm:$0xff] %v9655_v38  ;;  %v2883_v38 = vld [vmem:[%s11962_s8 + $0x348] sm:$0xff] }
 0x20f   : > { %3403 = vperm.xlu1 %7604, %v2877_v52   ;;  %v2880_v52 = vld [vmem:[%s11962_s8 + $0x330] sm:$0xff] }
 0x210   : > { %3398 = vperm.xlu0 %7603, %v2876_v39   ;;  %v9663_v39 = vpop.permute.xlu1 %2973  ;;  %v9665_v4 = vpop.permute.xlu0 %2968 }
 0x211   : > { %12027 = vst [vmem:[#allocation64_spill] sm:$0xff] %v9663_v39  ;;  %12028 = vst [vmem:[#allocation65_spill] sm:$0xff] %v9665_v4  ;;  %v2887_v39 = vld [vmem:[%s11962_s8 + $0x368] sm:$0xff] }
 0x213   : > { %3413 = vperm.xlu1 %7604, %v2879_v5   ;;  %v2882_v5 = vld [vmem:[%s11962_s8 + $0x340] sm:$0xff] }
 0x214   : > { %3408 = vperm.xlu0 %7603, %v2878_v50   ;;  %v2885_v50 = vld [vmem:[%s11962_s8 + $0x358] sm:$0xff]  ;;  %v9676_v49 = vpop.permute.xlu1 %2983 }
 0x215   : > { %12029 = vst [vmem:[#allocation66_spill] sm:$0xff] %v9676_v49 }
 0x217   : > { %3423 = vperm.xlu1 %7604, %v2881_v30   ;;  %v2884_v30 = vld [vmem:[%s11962_s8 + $0x350] sm:$0xff] }
 0x218   : > { %3418 = vperm.xlu0 %7603, %v2880_v52   ;;  %v9681_v52 = vpop.permute.xlu0 %2978 }
 0x219   : > { %12030 = vst [vmem:[#allocation67_spill] sm:$0xff] %v9681_v52  ;;  %v2889_v52 = vld [vmem:[%s11962_s8 + $0x378] sm:$0xff] }
 0x21b   : > { %3433 = vperm.xlu1 %7604, %v2883_v38   ;;  %v2886_v38 = vld [vmem:[%s11962_s8 + $0x360] sm:$0xff] }
 0x21c   : > { %3428 = vperm.xlu0 %7603, %v2882_v5   ;;  %v9689_v5 = vpop.permute.xlu1 %2993  ;;  %v9691_v49 = vpop.permute.xlu0 %2988 }
 0x21d   : > { %12031 = vst [vmem:[#allocation68_spill] sm:$0xff] %v9689_v5  ;;  %12032 = vst [vmem:[#allocation69_spill] sm:$0xff] %v9691_v49  ;;  %v2893_v5 = vld [vmem:[%s11962_s8 + $0x398] sm:$0xff] }
 0x21f   : > { %3443 = vperm.xlu1 %7604, %v2885_v50   ;;  %v2888_v50 = vld [vmem:[%s11962_s8 + $0x370] sm:$0xff] }
 0x220   : > { %3438 = vperm.xlu0 %7603, %v2884_v30   ;;  %v2891_v30 = vld [vmem:[%s11962_s8 + $0x388] sm:$0xff]  ;;  %v9702_v4 = vpop.permute.xlu1 %3003 }
 0x221   : > { %12033 = vst [vmem:[#allocation70_spill] sm:$0xff] %v9702_v4 }
 0x223   : > { %3453 = vperm.xlu1 %7604, %v2887_v39   ;;  %v2890_v39 = vld [vmem:[%s11962_s8 + $0x380] sm:$0xff] }
 0x224   : > { %3448 = vperm.xlu0 %7603, %v2886_v38   ;;  %v9707_v38 = vpop.permute.xlu0 %2998 }
 0x225   : > { %12034 = vst [vmem:[#allocation71_spill] sm:$0xff] %v9707_v38  ;;  %v2895_v38 = vld [vmem:[%s11962_s8 + $0x3a8] sm:$0xff] }
 0x227   : > { %3463 = vperm.xlu1 %7604, %v2889_v52   ;;  %v2892_v52 = vld [vmem:[%s11962_s8 + $0x390] sm:$0xff] }
 0x228   : > { %3458 = vperm.xlu0 %7603, %v2888_v50   ;;  %v9715_v50 = vpop.permute.xlu1 %3013  ;;  %v9717_v4 = vpop.permute.xlu0 %3008 }
 0x229   : > { %12035 = vst [vmem:[#allocation72_spill] sm:$0xff] %v9715_v50  ;;  %12036 = vst [vmem:[#allocation73_spill] sm:$0xff] %v9717_v4  ;;  %v2899_v50 = vld [vmem:[%s11962_s8 + $0x3c8] sm:$0xff] }
 0x22b   : > { %3473 = vperm.xlu1 %7604, %v2891_v30   ;;  %v2894_v30 = vld [vmem:[%s11962_s8 + $0x3a0] sm:$0xff] }
 0x22c   : > { %3468 = vperm.xlu0 %7603, %v2890_v39   ;;  %v2897_v39 = vld [vmem:[%s11962_s8 + $0x3b8] sm:$0xff]  ;;  %v9728_v49 = vpop.permute.xlu1 %3023 }
 0x22d   : > { %12037 = vst [vmem:[#allocation74_spill] sm:$0xff] %v9728_v49 }
 0x22f   : > { %3483 = vperm.xlu1 %7604, %v2893_v5   ;;  %v2896_v5 = vld [vmem:[%s11962_s8 + $0x3b0] sm:$0xff] }
 0x230   : > { %3478 = vperm.xlu0 %7603, %v2892_v52   ;;  %v9733_v52 = vpop.permute.xlu0 %3018 }
 0x231   : > { %12038 = vst [vmem:[#allocation75_spill] sm:$0xff] %v9733_v52  ;;  %v2901_v52 = vld [vmem:[%s11962_s8 + $0x3d8] sm:$0xff] }
 0x233   : > { %3493 = vperm.xlu1 %7604, %v2895_v38   ;;  %v2898_v38 = vld [vmem:[%s11962_s8 + $0x3c0] sm:$0xff] }
 0x234   : > { %3488 = vperm.xlu0 %7603, %v2894_v30   ;;  %v9741_v30 = vpop.permute.xlu1 %3033  ;;  %v9743_v49 = vpop.permute.xlu0 %3028 }
 0x235   : > { %12039 = vst [vmem:[#allocation76_spill] sm:$0xff] %v9741_v30  ;;  %12040 = vst [vmem:[#allocation77_spill] sm:$0xff] %v9743_v49 }
 0x237   : > { %3503 = vperm.xlu1 %7604, %v2897_v39   ;;  %v2900_v39 = vld [vmem:[%s11962_s8 + $0x3d0] sm:$0xff] }
 0x238   : > { %3498 = vperm.xlu0 %7603, %v2896_v5   ;;  %v2903_v5 = vld [vmem:[%s11962_s8 + $0x3e8] sm:$0xff]  ;;  %v9754_v4 = vpop.permute.xlu1 %3043 }
 0x239   : > { %12041 = vst [vmem:[#allocation78_spill] sm:$0xff] %v9754_v4  ;;  %v2904_v4 = vld [vmem:[%s11962_s8 + $0x3f0] sm:$0xff] }
 0x23b   : > { %3513 = vperm.xlu1 %7604, %v2899_v50   ;;  %v2902_v50 = vld [vmem:[%s11962_s8 + $0x3e0] sm:$0xff] }
 0x23c   : > { %3508 = vperm.xlu0 %7603, %v2898_v38   ;;  %v9759_v38 = vpop.permute.xlu0 %3038  ;;  %v9770_v20 = vpop.permute.xlu1 %3053 }
 0x23d   : > { %12042 = vst [vmem:[#allocation79_spill] sm:$0xff] %v9759_v38 }
 0x23f   : > { %3523 = vperm.xlu1 %7604, %v2901_v52   ;;  %v2905_v52 = vld [vmem:[%s11962_s8 + $0x3f8] sm:$0xff] }
 0x240   : > { %3518 = vperm.xlu0 %7603, %v2900_v39  }
 0x243   : > { %v7196_v30 = vpop.f32.mrb[0].mxu1  ;;  %3533 = vperm.xlu1 %7604, %v2903_v5  }
 0x244   : > { %v1203_v49 = vadd.f32 %v7196_v30, %v8992_v58  ;;  %3528 = vperm.xlu0 %7603, %v2902_v50   ;;  %v1194_v46 = vpop.f32.mrb[1].mxu1  ;;  %v9773_v30 = vpop.permute.xlu0 %3048 }
 0x245   : > { %v1195_v39 = vadd.f32 %v1194_v46, %v8982_v54  ;;  %v7197_v26 = vpop.f32.mrb[2].mxu1 }
 0x246   : > { %v1206_v45 = vadd.f32 %v7197_v26, %v8990_v57  ;;  %v1197_v38 = vpop.f32.mrb[3].mxu1  ;;  %v1323_v5 = vmax.f32 %v1203_v49, 0.0 }
 0x247   : > { %v1198_v58 = vadd.f32 %v1197_v38, %v8980_v53  ;;  %3543 = vperm.xlu1 %7604, %v2905_v52   ;;  %v1321_v44 = vmax.f32 %v1195_v39, 0.0  ;;  %v12043_v52 = vmov 0  }
 0x248   : > { %v1324_v50 = vmax.f32 %v1206_v45, 0.0  ;;  %3538 = vperm.xlu0 %7603, %v2904_v4  }
 0x249   : > { %v1322_v54 = vmax.f32 %v1198_v58, 0.0 }
 0x24a   : > { %v1354_v46 = vpack.c.bf16 %v1324_v50, %v1323_v5 }
 0x24b   : > { %v1353_v37 = vpack.c.bf16 %v1322_v54, %v1321_v44  ;;  %v7200_v23 = vpop.f32.mrb[4].mxu1 }
 0x24c   : > { %v1219_v25 = vadd.f32 %v7200_v23, %v9012_v2  ;;  %v1210_v63 = vpop.f32.mrb[5].mxu1 }
 0x24d   : > { %v1211_v57 = vadd.f32 %v1210_v63, %v9002_v62  ;;  %v7201_v26 = vpop.f32.mrb[6].mxu1  ;;  %2138 = vmatpush1.bf16.msra.mxu0 %v1353_v37 }
 0x24e   : > { %v1222_v53 = vadd.f32 %v7201_v26, %v9010_v1  ;;  %v1213_v38 = vpop.f32.mrb[7].mxu1  ;;  %2139 = vmatprep.subr.bf16.mxu0 %v12043_v52  ;;  %v1327_v49 = vmax.f32 %v1219_v25, 0.0 }
 0x24f   : > { %v1214_v45 = vadd.f32 %v1213_v38, %v9000_v61  ;;  %v1325_v39 = vmax.f32 %v1211_v57, 0.0 }
 0x250   : > { %v1328_v4 = vmax.f32 %v1222_v53, 0.0 }
 0x251   : > { %v1326_v58 = vmax.f32 %v1214_v45, 0.0  ;;  %2140 = vmatpush1.bf16.msra.mxu0 %v1354_v46 }
 0x252   : > { %v1356_v44 = vpack.c.bf16 %v1328_v4, %v1327_v49  ;;  %2141 = vmatprep.subr.bf16.mxu0 %v12043_v52 }
 0x253   : > { %v1355_v2 = vpack.c.bf16 %v1326_v58, %v1325_v39  ;;  %v7204_v23 = vpop.f32.mrb[8].mxu1 }
 0x254   : > { %v1235_v62 = vadd.f32 %v7204_v23, %v9032_v11  ;;  %v1226_v63 = vpop.f32.mrb[9].mxu1 }
 0x255   : > { %v1227_v1 = vadd.f32 %v1226_v63, %v9022_v7  ;;  %v7205_v37 = vpop.f32.mrb[10].mxu1  ;;  %2142 = vmatpush1.bf16.msra.mxu0 %v1355_v2 }
 0x256   : > { %v1238_v5 = vadd.f32 %v7205_v37, %v9030_v10  ;;  %v1229_v61 = vpop.f32.mrb[11].mxu1  ;;  %2143 = vmatprep.subr.bf16.mxu0 %v12043_v52  ;;  %v1331_v50 = vmax.f32 %v1235_v62, 0.0 }
 0x257   : > { %v1230_v25 = vadd.f32 %v1229_v61, %v9020_v6  ;;  %v1329_v46 = vmax.f32 %v1227_v1, 0.0 }
 0x258   : > { %v1332_v54 = vmax.f32 %v1238_v5, 0.0 }
 0x259   : > { %v1330_v57 = vmax.f32 %v1230_v25, 0.0  ;;  %2144 = vmatpush1.bf16.msra.mxu0 %v1356_v44 }
 0x25a   : > { %v1358_v26 = vpack.c.bf16 %v1332_v54, %v1331_v50  ;;  %2145 = vmatprep.subr.bf16.mxu0 %v12043_v52 }
 0x25b   : > { %v1357_v11 = vpack.c.bf16 %v1330_v57, %v1329_v46  ;;  %v7208_v53 = vpop.f32.mrb[12].mxu1 }
 0x25c   : > { %v1251_v7 = vadd.f32 %v7208_v53, %v9052_v19  ;;  %v1242_v38 = vpop.f32.mrb[13].mxu1 }
 0x25d   : > { %v1243_v10 = vadd.f32 %v1242_v38, %v9042_v15  ;;  %v7209_v45 = vpop.f32.mrb[14].mxu1  ;;  %2146 = vmatpush1.bf16.msra.mxu0 %v1357_v11 }
 0x25e   : > { %v1254_v49 = vadd.f32 %v7209_v45, %v9050_v18  ;;  %v1245_v6 = vpop.f32.mrb[15].mxu1  ;;  %2147 = vmatprep.subr.bf16.mxu0 %v12043_v52  ;;  %v1335_v39 = vmax.f32 %v1251_v7, 0.0 }
 0x25f   : > { %v1246_v4 = vadd.f32 %v1245_v6, %v9040_v14  ;;  %v1333_v44 = vmax.f32 %v1243_v10, 0.0 }
 0x260   : > { %v1336_v58 = vmax.f32 %v1254_v49, 0.0 }
 0x261   : > { %v1334_v2 = vmax.f32 %v1246_v4, 0.0  ;;  %2148 = vmatpush1.bf16.msra.mxu0 %v1358_v26 }
 0x262   : > { %v1360_v23 = vpack.c.bf16 %v1336_v58, %v1335_v39  ;;  %2149 = vmatprep.subr.bf16.mxu0 %v12043_v52 }
 0x263   : > { %v1359_v19 = vpack.c.bf16 %v1334_v2, %v1333_v44  ;;  %v7212_v62 = vpop.f32.mrb[16].mxu1 }
 0x264   : > { %v1267_v15 = vadd.f32 %v7212_v62, %v9072_v35  ;;  %v1258_v63 = vpop.f32.mrb[17].mxu1 }
 0x265   : > { %v1259_v18 = vadd.f32 %v1258_v63, %v9062_v27  ;;  %v7213_v1 = vpop.f32.mrb[18].mxu1  ;;  %2150 = vmatpush1.bf16.msra.mxu0 %v1359_v19 }
 0x266   : > { %v1270_v37 = vadd.f32 %v7213_v1, %v9070_v32  ;;  %v1261_v14 = vpop.f32.mrb[19].mxu1  ;;  %2151 = vmatprep.subr.bf16.mxu0 %v12043_v52  ;;  %v1339_v61 = vmax.f32 %v1267_v15, 0.0 }
 0x267   : > { %v1262_v5 = vadd.f32 %v1261_v14, %v9060_v24  ;;  %v1337_v50 = vmax.f32 %v1259_v18, 0.0 }
 0x268   : > { %v1340_v25 = vmax.f32 %v1270_v37, 0.0 }
 0x269   : > { %v1338_v54 = vmax.f32 %v1262_v5, 0.0  ;;  %2152 = vmatpush1.bf16.msra.mxu0 %v1360_v23 }
 0x26a   : > { %v1362_v46 = vpack.c.bf16 %v1340_v25, %v1339_v61  ;;  %2153 = vmatprep.subr.bf16.mxu0 %v12043_v52 }
 0x26b   : > { %v1361_v35 = vpack.c.bf16 %v1338_v54, %v1337_v50  ;;  %v7216_v57 = vpop.f32.mrb[20].mxu1 }
 0x26c   : > { %v1283_v27 = vadd.f32 %v7216_v57, %v9092_v51  ;;  %v1274_v26 = vpop.f32.mrb[21].mxu1  ;;  %v7638_v57 = vld [vmem:[%s11959_s5 + $0x20] ss:$8 sps:$4 sm:$0xff]  }
 0x26d   : > { %v1275_v32 = vadd.f32 %v1274_v26, %v9082_v43  ;;  %v7217_v11 = vpop.f32.mrb[22].mxu1  ;;  %2154 = vmatpush1.bf16.msra.mxu0 %v1361_v35  ;;  %v7636_v35 = vld [vmem:[%s11959_s5 + $0x24] ss:$8 sps:$4 sm:$0xff]   ;;  %v7641_v26 = vld [vmem:[%s11959_s5 + $0x30] ss:$8 sps:$4 sm:$0xff]  }
 0x26e   : > { %v1286_v53 = vadd.f32 %v7217_v11, %v9090_v48  ;;  %v1277_v24 = vpop.f32.mrb[23].mxu1  ;;  %2155 = vmatprep.subr.bf16.mxu0 %v12043_v52  ;;  %v1343_v38 = vmax.f32 %v1283_v27, 0.0  ;;  %v7639_v27 = vld [vmem:[%s11959_s5 + $0x34] ss:$8 sps:$4 sm:$0xff]   ;;  %v7644_v11 = vld [vmem:[%s11959_s5 + $0x40] ss:$8 sps:$4 sm:$0xff]  }
 0x26f   : > { %v1278_v7 = vadd.f32 %v1277_v24, %v9080_v40  ;;  %v1341_v45 = vmax.f32 %v1275_v32, 0.0  ;;  %v7642_v32 = vld [vmem:[%s11959_s5 + $0x44] ss:$8 sps:$4 sm:$0xff]   ;;  %v7647_v24 = vld [vmem:[%s11959_s5 + $0x50] ss:$8 sps:$4 sm:$0xff]  }
 0x270   : > { %v1344_v10 = vmax.f32 %v1286_v53, 0.0  ;;  %v7645_v53 = vld [vmem:[%s11959_s5 + $0x54] ss:$8 sps:$4 sm:$0xff]  }
 0x271   : > { %v1342_v49 = vmax.f32 %v1278_v7, 0.0  ;;  %2156 = vmatpush1.bf16.msra.mxu0 %v1362_v46  ;;  %v7648_v7 = vld [vmem:[%s11959_s5 + $0x64] ss:$8 sps:$4 sm:$0xff]  }
 0x272   : > { %v1364_v6 = vpack.c.bf16 %v1344_v10, %v1343_v38  ;;  %2157 = vmatprep.subr.bf16.mxu0 %v12043_v52  ;;  %v7650_v38 = vld [vmem:[%s11959_s5 + $0x60] ss:$8 sps:$4 sm:$0xff]   ;;  %v7651_v10 = vld [vmem:[%s11959_s5 + $0x74] ss:$8 sps:$4 sm:$0xff]  }
 0x273   : > { %v1363_v51 = vpack.c.bf16 %v1342_v49, %v1341_v45  ;;  %v7220_v4 = vpop.f32.mrb[24].mxu1  ;;  %v7653_v45 = vld [vmem:[%s11959_s5 + $0x70] ss:$8 sps:$4 sm:$0xff]   ;;  %v7654_v49 = vld [vmem:[%s11959_s5 + $0x84] ss:$8 sps:$4 sm:$0xff]  }
 0x274   : > { %v1299_v43 = vadd.f32 %v7220_v4, %v9112_v3  ;;  %v1290_v39 = vpop.f32.mrb[25].mxu1  ;;  %v7659_v4 = vld [vmem:[%s11959_s5 + $0x90] ss:$8 sps:$4 sm:$0xff]  }
 0x275   : > { %v1291_v48 = vadd.f32 %v1290_v39, %v9102_v59  ;;  %v7221_v58 = vpop.f32.mrb[26].mxu1  ;;  %2158 = vmatpush1.bf16.msra.mxu0 %v1363_v51  ;;  %v7657_v51 = vld [vmem:[%s11959_s5 + $0x94] ss:$8 sps:$4 sm:$0xff]   ;;  %v7662_v39 = vld [vmem:[%s11959_s5 + $0xa0] ss:$8 sps:$4 sm:$0xff]  }
 0x276   : > { %v1302_v44 = vadd.f32 %v7221_v58, %v9110_v0  ;;  %v1293_v40 = vpop.f32.mrb[27].mxu1  ;;  %2159 = vmatprep.subr.bf16.mxu0 %v12043_v52  ;;  %v1347_v23 = vmax.f32 %v1299_v43, 0.0  ;;  %v7660_v43 = vld [vmem:[%s11959_s5 + $0xa4] ss:$8 sps:$4 sm:$0xff]   ;;  %v7665_v58 = vld [vmem:[%s11959_s5 + $0xb0] ss:$8 sps:$4 sm:$0xff]  }
 0x277   : > { %v1294_v2 = vadd.f32 %v1293_v40, %v9100_v56  ;;  %v1345_v62 = vmax.f32 %v1291_v48, 0.0  ;;  %v7663_v48 = vld [vmem:[%s11959_s5 + $0xb4] ss:$8 sps:$4 sm:$0xff]   ;;  %v7668_v40 = vld [vmem:[%s11959_s5 + $0xc0] ss:$8 sps:$4 sm:$0xff]  }
 0x278   : > { %v1348_v19 = vmax.f32 %v1302_v44, 0.0  ;;  %v7666_v44 = vld [vmem:[%s11959_s5 + $0xc4] ss:$8 sps:$4 sm:$0xff]  }
 0x279   : > { %v1346_v15 = vmax.f32 %v1294_v2, 0.0  ;;  %2160 = vmatpush1.bf16.msra.mxu0 %v1364_v6  ;;  %v7656_v6 = vld [vmem:[%s11959_s5 + $0x80] ss:$8 sps:$4 sm:$0xff]   ;;  %v7669_v2 = vld [vmem:[%s11959_s5 + $0xd4] ss:$8 sps:$4 sm:$0xff]  }
 0x27a   : > { %v1366_v63 = vpack.c.bf16 %v1348_v19, %v1347_v23  ;;  %2161 = vmatprep.subr.bf16.mxu0 %v12043_v52  ;;  %v7671_v23 = vld [vmem:[%s11959_s5 + $0xd0] ss:$8 sps:$4 sm:$0xff]   ;;  %v7672_v19 = vld [vmem:[%s11959_s5 + $0xe4] ss:$8 sps:$4 sm:$0xff]  }
 0x27b   : > { %v1365_v3 = vpack.c.bf16 %v1346_v15, %v1345_v62  ;;  %v7224_v18 = vpop.f32.mrb[28].mxu1  ;;  %v7674_v62 = vld [vmem:[%s11959_s5 + $0xe0] ss:$8 sps:$4 sm:$0xff]   ;;  %v7675_v15 = vld [vmem:[%s11959_s5 + $0xf4] ss:$8 sps:$4 sm:$0xff]  }
 0x27c   : > { %v1315_v59 = vadd.f32 %v7224_v18, %v9133_v28  ;;  %v1306_v1 = vpop.f32.mrb[29].mxu1  ;;  %v7680_v18 = vld [vmem:[%s11959_s5 + $0x100] ss:$8 sps:$4 sm:$0xff]  }
 0x27d   : > { %v1307_v0 = vadd.f32 %v1306_v1, %v9122_v12  ;;  %v7225_v37 = vpop.f32.mrb[30].mxu1  ;;  %2162 = vmatpush1.bf16.msra.mxu0 %v1365_v3  ;;  %v7630_v12 = vld [vmem:[%s11959_s5] ss:$8 sps:$4 sm:$0xff]   ;;  %v7678_v3 = vld [vmem:[%s11959_s5 + $0x104] ss:$8 sps:$4 sm:$0xff]  }
 0x27e   : > { %v1318_v14 = vadd.f32 %v7225_v37, %v9130_v22  ;;  %v1309_v56 = vpop.f32.mrb[31].mxu1  ;;  %2163 = vmatprep.subr.bf16.mxu0 %v12043_v52  ;;  %v1351_v61 = vmax.f32 %v1315_v59, 0.0  ;;  %v7635_v22 = vld [vmem:[%s11959_s5 + $0x10] ss:$8 sps:$4 sm:$0xff]   ;;  %v7681_v59 = vld [vmem:[%s11959_s5 + $0x114] ss:$8 sps:$4 sm:$0xff]  }
 0x27f   : > { %v1310_v5 = vadd.f32 %v1309_v56, %v9120_v9  ;;  %v1349_v50 = vmax.f32 %v1307_v0, 0.0  ;;  %v7633_v9 = vld [vmem:[%s11959_s5 + $0x14] ss:$8 sps:$4 sm:$0xff]   ;;  %v7683_v1 = vld [vmem:[%s11959_s5 + $0x110] ss:$8 sps:$4 sm:$0xff]  }
 0x280   : > { %v1352_v25 = vmax.f32 %v1318_v14, 0.0  ;;  %v7684_v0 = vld [vmem:[%s11959_s5 + $0x124] ss:$8 sps:$4 sm:$0xff]   ;;  %v7686_v37 = vld [vmem:[%s11959_s5 + $0x120] ss:$8 sps:$4 sm:$0xff]  }
 0x281   : > { %v1350_v54 = vmax.f32 %v1310_v5, 0.0  ;;  %2164 = vmatpush1.bf16.msra.mxu0 %v1366_v63  ;;  %v7677_v63 = vld [vmem:[%s11959_s5 + $0xf0] ss:$8 sps:$4 sm:$0xff]   ;;  %v7687_v14 = vld [vmem:[%s11959_s5 + $0x134] ss:$8 sps:$4 sm:$0xff]  }
 0x282   : > { %v1368_v46 = vpack.c.bf16 %v1352_v25, %v1351_v61  ;;  %2165 = vmatprep.subr.bf16.mxu0 %v12043_v52  ;;  %v7689_v56 = vld [vmem:[%s11959_s5 + $0x130] ss:$8 sps:$4 sm:$0xff]   ;;  %v7690_v5 = vld [vmem:[%s11959_s5 + $0x144] ss:$8 sps:$4 sm:$0xff]   ;;  %v7692_v61 = vld [vmem:[%s11959_s5 + $0x140] ss:$8 sps:$4 sm:$0xff]  }
 0x283   : > { %v1367_v28 = vpack.c.bf16 %v1350_v54, %v1349_v50  ;;  %v7693_v25 = vld [vmem:[%s11959_s5 + $0x154] ss:$8 sps:$4 sm:$0xff]   ;;  %v7695_v50 = vld [vmem:[%s11959_s5 + $0x150] ss:$8 sps:$4 sm:$0xff]   ;;  %v7696_v54 = vld [vmem:[%s11959_s5 + $0x164] ss:$8 sps:$4 sm:$0xff]  }
 0x285   : > { %2166 = vmatpush1.bf16.msra.mxu0 %v1367_v28  ;;  %v7699_v28 = vld [vmem:[%s11959_s5 + $0x174] ss:$8 sps:$4 sm:$0xff]  }
 0x286   : > { %2167 = vmatprep.subr.bf16.mxu0 %v12043_v52 }
 0x289   : > { %2168 = vmatpush1.bf16.msra.mxu0 %v1368_v46  ;;  %v7698_v46 = vld [vmem:[%s11959_s5 + $0x160] ss:$8 sps:$4 sm:$0xff]  }
 0x28a   : > { %4826 = vmatprep.subr.bf16.mxu0 %v12043_v52 }
 0x28c   : > { %2170 = vmatmul.mubr.bf16.vlgmr.msra.gmra.mrb[16].mxu0 %v7630_v12  ;;  %v7701_v12 = vld [vmem:[%s11959_s5 + $0x170] ss:$8 sps:$4 sm:$0xff]  }
 0x28d   : > { %2177 = vmatprep.mubr.bf16.mxu0 %v7633_v9  ;;  %v7702_v9 = vld [vmem:[%s11959_s5 + $0x184] ss:$8 sps:$4 sm:$0xff]  }
 0x294   : > { %2178 = vmatmul.mubr.bf16.gmra.mrb[20].mxu0 %v7635_v22  ;;  %v7704_v22 = vld [vmem:[%s11959_s5 + $0x180] ss:$8 sps:$4 sm:$0xff]  }
 0x295   : > { %2185 = vmatprep.mubr.bf16.mxu0 %v7636_v35  ;;  %v7705_v35 = vld [vmem:[%s11959_s5 + $0x194] ss:$8 sps:$4 sm:$0xff]  }
 0x29c   : > { %2186 = vmatmul.mubr.bf16.gmra.mrb[24].mxu0 %v7638_v57  ;;  %v7707_v57 = vld [vmem:[%s11959_s5 + $0x190] ss:$8 sps:$4 sm:$0xff]  }
 0x29d   : > { %2193 = vmatprep.mubr.bf16.mxu0 %v7639_v27  ;;  %v7708_v27 = vld [vmem:[%s11959_s5 + $0x1a4] ss:$8 sps:$4 sm:$0xff]  }
 0x2a4   : > { %2194 = vmatmul.mubr.bf16.gmra.mrb[28].mxu0 %v7641_v26  ;;  %v7710_v26 = vld [vmem:[%s11959_s5 + $0x1a0] ss:$8 sps:$4 sm:$0xff]  }
 0x2a5   : > { %2201 = vmatprep.mubr.bf16.mxu0 %v7642_v32  ;;  %v7711_v32 = vld [vmem:[%s11959_s5 + $0x1b4] ss:$8 sps:$4 sm:$0xff]  }
 0x2ac   : > { %2202 = vmatmul.mubr.bf16.gmra.mrb[32].mxu0 %v7644_v11 }
 0x2ad   : > { %2209 = vmatprep.mubr.bf16.mxu0 %v7645_v53 }
 0x2b4   : > { %2210 = vmatmul.mubr.bf16.gmra.mrb[36].mxu0 %v7647_v24 }
 0x2b5   : > { %2217 = vmatprep.mubr.bf16.mxu0 %v7648_v7  ;;  %v7713_v7 = vld [vmem:[%s11959_s5 + $0x1b0] ss:$8 sps:$4 sm:$0xff]  }
 0x2bc   : > { %2218 = vmatmul.mubr.bf16.gmra.mrb[40].mxu0 %v7650_v38 }
 0x2bd   : > { %2225 = vmatprep.mubr.bf16.mxu0 %v7651_v10  ;;  %v7714_v10 = vld [vmem:[%s11959_s5 + $0x1c4] ss:$8 sps:$4 sm:$0xff]  }
 0x2c4   : > { %2226 = vmatmul.mubr.bf16.gmra.mrb[44].mxu0 %v7653_v45 }
 0x2c5   : > { %2233 = vmatprep.mubr.bf16.mxu0 %v7654_v49 }
 0x2cc   : > { %2234 = vmatmul.mubr.bf16.gmra.mrb[48].mxu0 %v7656_v6 }
 0x2cd   : > { %2241 = vmatprep.mubr.bf16.mxu0 %v7657_v51 }
 0x2d4   : > { %2242 = vmatmul.mubr.bf16.gmra.mrb[52].mxu0 %v7659_v4 }
 0x2d5   : > { %2249 = vmatprep.mubr.bf16.mxu0 %v7660_v43 }
 0x2dc   : > { %2250 = vmatmul.mubr.bf16.gmra.mrb[56].mxu0 %v7662_v39 }
 0x2dd   : > { %2257 = vmatprep.mubr.bf16.mxu0 %v7663_v48 }
 0x2e4   : > { %2258 = vmatmul.mubr.bf16.gmra.mrb[60].mxu0 %v7665_v58 }
 0x2e5   : > { %2265 = vmatprep.mubr.bf16.mxu0 %v7666_v44  ;;  %v7717_v44 = vld [vmem:[%s11959_s5 + $0x1d4] ss:$8 sps:$4 sm:$0xff]  }
 0x2ec   : > { %2266 = vmatmul.mubr.bf16.gmra.mrb[64].mxu0 %v7668_v40 }
 0x2ed   : > { %2273 = vmatprep.mubr.bf16.mxu0 %v7669_v2 }
 0x2f4   : > { %2274 = vmatmul.mubr.bf16.gmra.mrb[68].mxu0 %v7671_v23 }
 0x2f5   : > { %2281 = vmatprep.mubr.bf16.mxu0 %v7672_v19 }
 0x2fc   : > { %2282 = vmatmul.mubr.bf16.gmra.mrb[72].mxu0 %v7674_v62 }
 0x2fd   : > { %2289 = vmatprep.mubr.bf16.mxu0 %v7675_v15 }
 0x304   : > { %2290 = vmatmul.mubr.bf16.gmra.mrb[76].mxu0 %v7677_v63 }
 0x305   : > { %2297 = vmatprep.mubr.bf16.mxu0 %v7678_v3  ;;  %v7719_v3 = vld [vmem:[%s11959_s5 + $0x1d0] ss:$8 sps:$4 sm:$0xff]  }
 0x30c   : > { %2298 = vmatmul.mubr.bf16.gmra.mrb[80].mxu0 %v7680_v18 }
 0x30d   : > { %2305 = vmatprep.mubr.bf16.mxu0 %v7681_v59 }
 0x314   : > { %2306 = vmatmul.mubr.bf16.gmra.mrb[84].mxu0 %v7683_v1 }
 0x315   : > { %2313 = vmatprep.mubr.bf16.mxu0 %v7684_v0 }
 0x31c   : > { %2314 = vmatmul.mubr.bf16.gmra.mrb[88].mxu0 %v7686_v37 }
 0x31d   : > { %2321 = vmatprep.mubr.bf16.mxu0 %v7687_v14 }
 0x324   : > { %2322 = vmatmul.mubr.bf16.gmra.mrb[92].mxu0 %v7689_v56 }
 0x325   : > { %2329 = vmatprep.mubr.bf16.mxu0 %v7690_v5 }
 0x32c   : > { %2330 = vmatmul.mubr.bf16.gmra.mrb[96].mxu0 %v7692_v61  ;;  %v7722_v61 = vld [vmem:[%s11959_s5 + $0x1e0] ss:$8 sps:$4 sm:$0xff]  }
 0x32d   : > { %2337 = vmatprep.mubr.bf16.mxu0 %v7693_v25 }
 0x334   : > { %2338 = vmatmul.mubr.bf16.gmra.mrb[100].mxu0 %v7695_v50 }
 0x335   : > { %2345 = vmatprep.mubr.bf16.mxu0 %v7696_v54 }
 0x33c   : > { %2346 = vmatmul.mubr.bf16.gmra.mrb[104].mxu0 %v7698_v46 }
 0x33d   : > { %2353 = vmatprep.mubr.bf16.mxu0 %v7699_v28 }
 0x344   : > { %2354 = vmatmul.mubr.bf16.gmra.mrb[108].mxu0 %v7701_v12 }
 0x345   : > { %2361 = vmatprep.mubr.bf16.mxu0 %v7702_v9 }
 0x34c   : > { %2362 = vmatmul.mubr.bf16.gmra.mrb[112].mxu0 %v7704_v22 }
 0x34d   : > { %2369 = vmatprep.mubr.bf16.mxu0 %v7705_v35  ;;  %v7725_v35 = vld [vmem:[%s11959_s5 + $0x1f0] ss:$8 sps:$4 sm:$0xff]  }
 0x354   : > { %2370 = vmatmul.mubr.bf16.gmra.mrb[116].mxu0 %v7707_v57 }
 0x355   : > { %2377 = vmatprep.mubr.bf16.mxu0 %v7708_v27 }
 0x35c   : > { %2378 = vmatmul.mubr.bf16.gmra.mrb[120].mxu0 %v7710_v26 }
 0x35d   : > { %2385 = vmatprep.mubr.bf16.mxu0 %v7711_v32 }
 0x35f   : > { %v2171_v11 = vpop.f32.mrb[16].mxu0 }
 0x360   : > { %v2172_v53 = vadd.f32 %v2171_v11, %v9146_v21  ;;  %v2173_v24 = vpop.f32.mrb[17].mxu0  ;;  %v7731_v21 = vld [vmem:[%s11961_s7 + $0x624] ss:$16 sps:$4 sm:$0xff]  }
 0x361   : > { %v2174_v38 = vpop.f32.mrb[18].mxu0  ;;  %5250 = vmatprep.mubr.bf16.mxu1 %v7731_v21 }
 0x362   : > { %v2175_v45 = vadd.f32 %v2174_v38, %v9144_v60  ;;  %v2176_v49 = vpop.f32.mrb[19].mxu0  ;;  %v2426_v6 = vmax.f32 %v2172_v53, 0.0  ;;  %v7716_v60 = vld [vmem:[%s11959_s5 + $0x1c0] ss:$8 sps:$4 sm:$0xff]  }
 0x364   : > { %v2427_v51 = vmax.f32 %v2175_v45, 0.0  ;;  %2386 = vmatmul.mubr.bf16.gmra.mrb[124].mxu0 %v7713_v7 }
 0x365   : > { %2393 = vmatprep.mubr.bf16.mxu0 %v7714_v10 }
 0x366   : > { %v2490_v4 = vpack.c.bf16 %v2427_v51, %v2426_v6 }
 0x367   : > { %v2179_v43 = vpop.f32.mrb[20].mxu0 }
 0x368   : > { %v2180_v39 = vadd.f32 %v2179_v43, %v9157_v47  ;;  %v2181_v48 = vpop.f32.mrb[21].mxu0  ;;  %4827 = vmatpush1.bf16.msra.mxu0 %v2490_v4  ;;  %7242 = vmatpush1.bf16.msra.mxu1 %v2490_v4 }
 0x369   : > { %v2182_v58 = vpop.f32.mrb[22].mxu0  ;;  %4828 = vmatprep.subr.bf16.mxu0 %v12043_v52  ;;  %7227 = vmatprep.subr.bf16.mxu1 %v12043_v52 }
 0x36a   : > { %v2183_v40 = vadd.f32 %v2182_v58, %v9154_v31  ;;  %v2184_v2 = vpop.f32.mrb[23].mxu0  ;;  %v2428_v47 = vmax.f32 %v2180_v39, 0.0  ;;  %v7720_v31 = vld [vmem:[%s11959_s5 + $0x1e4] ss:$8 sps:$4 sm:$0xff]  }
 0x36b   : > { %v12044_v2 = vld [vmem:[#allocation3_spill] sm:$0xff] }
 0x36c   : > { %v2429_v23 = vmax.f32 %v2183_v40, 0.0  ;;  %2394 = vmatmul.mubr.bf16.gmra.mrb[128].mxu0 %v7716_v60 }
 0x36d   : > { %2401 = vmatprep.mubr.bf16.mxu0 %v7717_v44 }
 0x36e   : > { %v2491_v19 = vpack.c.bf16 %v2429_v23, %v2428_v47 }
 0x36f   : > { %v2187_v62 = vpop.f32.mrb[24].mxu0 }
 0x370   : > { %v2188_v15 = vadd.f32 %v2187_v62, %v9170_v13  ;;  %v2189_v63 = vpop.f32.mrb[25].mxu0  ;;  %4829 = vmatpush1.bf16.msra.mxu0 %v2491_v19  ;;  %7243 = vmatpush1.bf16.msra.mxu1 %v2491_v19 }
 0x371   : > { %v2190_v18 = vpop.f32.mrb[26].mxu0  ;;  %4830 = vmatprep.subr.bf16.mxu0 %v12043_v52  ;;  %7228 = vmatprep.subr.bf16.mxu1 %v12043_v52  ;;  %v12045_v63 = vld [vmem:[#allocation5_spill] sm:$0xff] }
 0x372   : > { %v2191_v59 = vadd.f32 %v2190_v18, %v9168_v8  ;;  %v2192_v1 = vpop.f32.mrb[27].mxu0  ;;  %v2430_v13 = vmax.f32 %v2188_v15, 0.0  ;;  %v7723_v8 = vld [vmem:[%s11959_s5 + $0x1f4] ss:$8 sps:$4 sm:$0xff]  }
 0x374   : > { %v2431_v0 = vmax.f32 %v2191_v59, 0.0  ;;  %2402 = vmatmul.mubr.bf16.gmra.mrb[132].mxu0 %v7719_v3 }
 0x375   : > { %2409 = vmatprep.mubr.bf16.mxu0 %v7720_v31  ;;  %v12046_v31 = vld [vmem:[#allocation4_spill] sm:$0xff] }
 0x376   : > { %v2492_v37 = vpack.c.bf16 %v2431_v0, %v2430_v13 }
 0x377   : > { %v2195_v14 = vpop.f32.mrb[28].mxu0 }
 0x378   : > { %v2196_v56 = vadd.f32 %v2195_v14, %v9181_v55  ;;  %v2197_v5 = vpop.f32.mrb[29].mxu0  ;;  %4831 = vmatpush1.bf16.msra.mxu0 %v2492_v37  ;;  %7244 = vmatpush1.bf16.msra.mxu1 %v2492_v37 }
 0x379   : > { %v2198_v25 = vpop.f32.mrb[30].mxu0  ;;  %4832 = vmatprep.subr.bf16.mxu0 %v12043_v52  ;;  %7229 = vmatprep.subr.bf16.mxu1 %v12043_v52 }
 0x37a   : > { %v2199_v50 = vadd.f32 %v2198_v25, %v9178_v36  ;;  %v2200_v54 = vpop.f32.mrb[31].mxu0  ;;  %v2432_v55 = vmax.f32 %v2196_v56, 0.0  ;;  %v7728_v36 = vld [vmem:[%s11961_s7 + $0x4] ss:$16 sps:$4 sm:$0xff]  }
 0x37b   : > { %v12047_v56 = vld [vmem:[#allocation7_spill] sm:$0xff] }
 0x37c   : > { %v2433_v46 = vmax.f32 %v2199_v50, 0.0  ;;  %2410 = vmatmul.mubr.bf16.gmra.mrb[136].mxu0 %v7722_v61 }
 0x37d   : > { %2417 = vmatprep.mubr.bf16.mxu0 %v7723_v8  ;;  %v12048_v8 = vld [vmem:[#allocation6_spill] sm:$0xff] }
 0x37e   : > { %v2493_v28 = vpack.c.bf16 %v2433_v46, %v2432_v55 }
 0x37f   : > { %v2203_v12 = vpop.f32.mrb[32].mxu0 }
 0x380   : > { %v2204_v9 = vadd.f32 %v2203_v12, %v9194_v33  ;;  %v2205_v22 = vpop.f32.mrb[33].mxu0  ;;  %4833 = vmatpush1.bf16.msra.mxu0 %v2493_v28  ;;  %7245 = vmatpush1.bf16.msra.mxu1 %v2493_v28 }
 0x381   : > { %v2206_v57 = vpop.f32.mrb[34].mxu0  ;;  %4834 = vmatprep.subr.bf16.mxu0 %v12043_v52  ;;  %7230 = vmatprep.subr.bf16.mxu1 %v12043_v52 }
 0x382   : > { %v2207_v27 = vadd.f32 %v2206_v57, %v9192_v16  ;;  %v2208_v26 = vpop.f32.mrb[35].mxu0  ;;  %v2434_v33 = vmax.f32 %v2204_v9, 0.0  ;;  %v12049_v9 = vld [vmem:[#allocation9_spill] sm:$0xff] }
 0x384   : > { %v2435_v32 = vmax.f32 %v2207_v27, 0.0  ;;  %2418 = vmatmul.mubr.bf16.gmra.mrb[140].mxu0 %v7725_v35 }
 0x385   : > { %4858 = vmatprep.mubr.bf16.mxu0 %v7728_v36  ;;  %v12050_v36 = vld [vmem:[#allocation8_spill] sm:$0xff] }
 0x386   : > { %v2494_v11 = vpack.c.bf16 %v2435_v32, %v2434_v33 }
 0x387   : > { %v2211_v53 = vpop.f32.mrb[36].mxu0 }
 0x388   : > { %v2212_v24 = vadd.f32 %v2211_v53, %v9205_v17  ;;  %v2213_v7 = vpop.f32.mrb[37].mxu0  ;;  %4835 = vmatpush1.bf16.msra.mxu0 %v2494_v11  ;;  %7246 = vmatpush1.bf16.msra.mxu1 %v2494_v11 }
 0x389   : > { %v2214_v38 = vpop.f32.mrb[38].mxu0  ;;  %4836 = vmatprep.subr.bf16.mxu0 %v12043_v52  ;;  %7231 = vmatprep.subr.bf16.mxu1 %v12043_v52 }
 0x38a   : > { %v2215_v10 = vadd.f32 %v2214_v38, %v9202_v34  ;;  %v2216_v16 = vpop.f32.mrb[39].mxu0  ;;  %v2436_v45 = vmax.f32 %v2212_v24, 0.0  ;;  %v12051_v24 = vld [vmem:[#allocation11_spill] sm:$0xff] }
 0x38b   : > { %v12052_v16 = vld [vmem:[#allocation10_spill] sm:$0xff] }
 0x38c   : > { %v2437_v49 = vmax.f32 %v2215_v10, 0.0 }
 0x38e   : > { %v2495_v6 = vpack.c.bf16 %v2437_v49, %v2436_v45 }
 0x38f   : > { %v2219_v51 = vpop.f32.mrb[40].mxu0 }
 0x390   : > { %v2220_v21 = vadd.f32 %v2219_v51, %v9218_v41  ;;  %v2221_v4 = vpop.f32.mrb[41].mxu0  ;;  %4837 = vmatpush1.bf16.msra.mxu0 %v2495_v6  ;;  %7247 = vmatpush1.bf16.msra.mxu1 %v2495_v6 }
 0x391   : > { %v2222_v17 = vpop.f32.mrb[42].mxu0  ;;  %4838 = vmatprep.subr.bf16.mxu0 %v12043_v52  ;;  %7232 = vmatprep.subr.bf16.mxu1 %v12043_v52 }
 0x392   : > { %v2223_v43 = vadd.f32 %v2222_v17, %v9216_v29  ;;  %v2224_v39 = vpop.f32.mrb[43].mxu0  ;;  %v2438_v48 = vmax.f32 %v2220_v21, 0.0  ;;  %v12053_v17 = vld [vmem:[#allocation13_spill] sm:$0xff] }
 0x394   : > { %v2439_v34 = vmax.f32 %v2223_v43, 0.0 }
 0x396   : > { %v2496_v60 = vpack.c.bf16 %v2439_v34, %v2438_v48  ;;  %v12054_v34 = vld [vmem:[#allocation12_spill] sm:$0xff] }
 0x397   : > { %v2227_v58 = vpop.f32.mrb[44].mxu0 }
 0x398   : > { %v2228_v44 = vadd.f32 %v2227_v58, %v9228_v42  ;;  %v2229_v40 = vpop.f32.mrb[45].mxu0  ;;  %4839 = vmatpush1.bf16.msra.mxu0 %v2496_v60  ;;  %7248 = vmatpush1.bf16.msra.mxu1 %v2496_v60 }
 0x399   : > { %v2230_v41 = vpop.f32.mrb[46].mxu0  ;;  %4840 = vmatprep.subr.bf16.mxu0 %v12043_v52  ;;  %7233 = vmatprep.subr.bf16.mxu1 %v12043_v52 }
 0x39a   : > { %v2231_v47 = vadd.f32 %v2230_v41, %v12044_v2  ;;  %v2232_v23 = vpop.f32.mrb[47].mxu0  ;;  %v2440_v19 = vmax.f32 %v2228_v44, 0.0 }
 0x39c   : > { %v2441_v29 = vmax.f32 %v2231_v47, 0.0  ;;  %v12055_v47 = vld [vmem:[#allocation15_spill] sm:$0xff] }
 0x39e   : > { %v2497_v62 = vpack.c.bf16 %v2441_v29, %v2440_v19 }
 0x39f   : > { %v2235_v15 = vpop.f32.mrb[48].mxu0 }
 0x3a0   : > { %v2236_v3 = vadd.f32 %v2235_v15, %v12045_v63  ;;  %v2237_v18 = vpop.f32.mrb[49].mxu0  ;;  %4841 = vmatpush1.bf16.msra.mxu0 %v2497_v62  ;;  %7249 = vmatpush1.bf16.msra.mxu1 %v2497_v62  ;;  %v12056_v62 = vld [vmem:[#allocation14_spill] sm:$0xff] }
 0x3a1   : > { %v2238_v42 = vpop.f32.mrb[50].mxu0  ;;  %4842 = vmatprep.subr.bf16.mxu0 %v12043_v52  ;;  %7234 = vmatprep.subr.bf16.mxu1 %v12043_v52 }
 0x3a2   : > { %v2239_v59 = vadd.f32 %v2238_v42, %v12046_v31  ;;  %v2240_v1 = vpop.f32.mrb[51].mxu0  ;;  %v2442_v13 = vmax.f32 %v2236_v3, 0.0 }
 0x3a4   : > { %v2443_v0 = vmax.f32 %v2239_v59, 0.0  ;;  %v12057_v59 = vld [vmem:[#allocation17_spill] sm:$0xff] }
 0x3a6   : > { %v2498_v37 = vpack.c.bf16 %v2443_v0, %v2442_v13 }
 0x3a7   : > { %v2243_v14 = vpop.f32.mrb[52].mxu0 }
 0x3a8   : > { %v2244_v5 = vadd.f32 %v2243_v14, %v12047_v56  ;;  %v2245_v61 = vpop.f32.mrb[53].mxu0  ;;  %4843 = vmatpush1.bf16.msra.mxu0 %v2498_v37  ;;  %7250 = vmatpush1.bf16.msra.mxu1 %v2498_v37  ;;  %v12058_v37 = vld [vmem:[#allocation16_spill] sm:$0xff] }
 0x3a9   : > { %v2246_v25 = vpop.f32.mrb[54].mxu0  ;;  %4844 = vmatprep.subr.bf16.mxu0 %v12043_v52  ;;  %7235 = vmatprep.subr.bf16.mxu1 %v12043_v52 }
 0x3aa   : > { %v2247_v50 = vadd.f32 %v2246_v25, %v12048_v8  ;;  %v2248_v54 = vpop.f32.mrb[55].mxu0  ;;  %v2444_v55 = vmax.f32 %v2244_v5, 0.0 }
 0x3ac   : > { %v2445_v46 = vmax.f32 %v2247_v50, 0.0  ;;  %v12059_v50 = vld [vmem:[#allocation19_spill] sm:$0xff] }
 0x3ae   : > { %v2499_v28 = vpack.c.bf16 %v2445_v46, %v2444_v55 }
 0x3af   : > { %v2251_v12 = vpop.f32.mrb[56].mxu0 }
 0x3b0   : > { %v2252_v22 = vadd.f32 %v2251_v12, %v12049_v9  ;;  %v2253_v35 = vpop.f32.mrb[57].mxu0  ;;  %4845 = vmatpush1.bf16.msra.mxu0 %v2499_v28  ;;  %7251 = vmatpush1.bf16.msra.mxu1 %v2499_v28  ;;  %v12060_v28 = vld [vmem:[#allocation18_spill] sm:$0xff] }
 0x3b1   : > { %v2254_v57 = vpop.f32.mrb[58].mxu0  ;;  %4846 = vmatprep.subr.bf16.mxu0 %v12043_v52  ;;  %7236 = vmatprep.subr.bf16.mxu1 %v12043_v52 }
 0x3b2   : > { %v2255_v27 = vadd.f32 %v2254_v57, %v12050_v36  ;;  %v2256_v26 = vpop.f32.mrb[59].mxu0  ;;  %v2446_v33 = vmax.f32 %v2252_v22, 0.0 }
 0x3b3   : > { %v7729_v26 = vld [vmem:[%s11961_s7 + $0x620] ss:$16 sps:$4 sm:$0xff]  }
 0x3b4   : > { %v2447_v32 = vmax.f32 %v2255_v27, 0.0  ;;  %v7726_v27 = vld [vmem:[%s11961_s7] ss:$16 sps:$4 sm:$0xff]  }
 0x3b6   : > { %v2500_v11 = vpack.c.bf16 %v2447_v32, %v2446_v33  ;;  %v12061_v33 = vld [vmem:[#allocation21_spill] sm:$0xff] }
 0x3b7   : > { %v2259_v53 = vpop.f32.mrb[60].mxu0 }
 0x3b8   : > { %v2260_v7 = vadd.f32 %v2259_v53, %v12051_v24  ;;  %v2261_v38 = vpop.f32.mrb[61].mxu0  ;;  %4847 = vmatpush1.bf16.msra.mxu0 %v2500_v11  ;;  %7252 = vmatpush1.bf16.msra.mxu1 %v2500_v11  ;;  %v7732_v53 = vld [vmem:[%s11961_s7 + $0x24] ss:$16 sps:$4 sm:$0xff]  }
 0x3b9   : > { %v2262_v10 = vpop.f32.mrb[62].mxu0  ;;  %4848 = vmatprep.subr.bf16.mxu0 %v12043_v52  ;;  %7237 = vmatprep.subr.bf16.mxu1 %v12043_v52  ;;  %v7737_v24 = vld [vmem:[%s11961_s7 + $0x644] ss:$16 sps:$4 sm:$0xff]   ;;  %v12062_v38 = vld [vmem:[#allocation20_spill] sm:$0xff] }
 0x3ba   : > { %v2263_v45 = vadd.f32 %v2262_v10, %v12052_v16  ;;  %v2264_v49 = vpop.f32.mrb[63].mxu0  ;;  %v2448_v6 = vmax.f32 %v2260_v7, 0.0 }
 0x3bc   : > { %v2449_v51 = vmax.f32 %v2263_v45, 0.0 }
 0x3be   : > { %v2501_v21 = vpack.c.bf16 %v2449_v51, %v2448_v6 }
 0x3bf   : > { %v2267_v4 = vpop.f32.mrb[64].mxu0 }
 0x3c0   : > { %v2268_v43 = vadd.f32 %v2267_v4, %v12053_v17  ;;  %v2269_v39 = vpop.f32.mrb[65].mxu0  ;;  %4849 = vmatpush1.bf16.msra.mxu0 %v2501_v21  ;;  %7253 = vmatpush1.bf16.msra.mxu1 %v2501_v21  ;;  %v7734_v21 = vld [vmem:[%s11961_s7 + $0x20] ss:$16 sps:$4 sm:$0xff]  }
 0x3c1   : > { %v2270_v48 = vpop.f32.mrb[66].mxu0  ;;  %4850 = vmatprep.subr.bf16.mxu0 %v12043_v52  ;;  %7238 = vmatprep.subr.bf16.mxu1 %v12043_v52  ;;  %v7740_v4 = vld [vmem:[%s11961_s7 + $0x640] ss:$16 sps:$4 sm:$0xff]  }
 0x3c2   : > { %v2271_v60 = vadd.f32 %v2270_v48, %v12054_v34  ;;  %v2272_v58 = vpop.f32.mrb[67].mxu0  ;;  %v2450_v44 = vmax.f32 %v2268_v43, 0.0  ;;  %v12063_v17 = vld [vmem:[#allocation23_spill] sm:$0xff] }
 0x3c3   : > { %v7735_v48 = vld [vmem:[%s11961_s7 + $0x44] ss:$16 sps:$4 sm:$0xff]   ;;  %v12064_v58 = vld [vmem:[#allocation22_spill] sm:$0xff] }
 0x3c4   : > { %v2451_v40 = vmax.f32 %v2271_v60, 0.0  ;;  %v7743_v34 = vld [vmem:[%s11961_s7 + $0x664] ss:$16 sps:$4 sm:$0xff]  }
 0x3c6   : > { %v2502_v41 = vpack.c.bf16 %v2451_v40, %v2450_v44 }
 0x3c7   : > { %v2275_v2 = vpop.f32.mrb[68].mxu0 }
 0x3c8   : > { %v2276_v23 = vadd.f32 %v2275_v2, %v12055_v47  ;;  %v2277_v19 = vpop.f32.mrb[69].mxu0  ;;  %4851 = vmatpush1.bf16.msra.mxu0 %v2502_v41  ;;  %7254 = vmatpush1.bf16.msra.mxu1 %v2502_v41 }
 0x3c9   : > { %v2278_v29 = vpop.f32.mrb[70].mxu0  ;;  %4852 = vmatprep.subr.bf16.mxu0 %v12043_v52  ;;  %7239 = vmatprep.subr.bf16.mxu1 %v12043_v52  ;;  %v7739_v19 = vld [vmem:[%s11961_s7 + $0x40] ss:$16 sps:$4 sm:$0xff]  }
 0x3ca   : > { %v2279_v15 = vadd.f32 %v2278_v29, %v12056_v62  ;;  %v2280_v63 = vpop.f32.mrb[71].mxu0  ;;  %v2452_v3 = vmax.f32 %v2276_v23, 0.0  ;;  %v7746_v29 = vld [vmem:[%s11961_s7 + $0x660] ss:$16 sps:$4 sm:$0xff]  }
 0x3cb   : > { %v12065_v62 = vld [vmem:[#allocation25_spill] sm:$0xff] }
 0x3cc   : > { %v2453_v18 = vmax.f32 %v2279_v15, 0.0 }
 0x3ce   : > { %v2503_v42 = vpack.c.bf16 %v2453_v18, %v2452_v3  ;;  %v7741_v3 = vld [vmem:[%s11961_s7 + $0x64] ss:$16 sps:$4 sm:$0xff]  }
 0x3cf   : > { %v2283_v31 = vpop.f32.mrb[72].mxu0  ;;  %v7749_v18 = vld [vmem:[%s11961_s7 + $0x684] ss:$16 sps:$4 sm:$0xff]  }
 0x3d0   : > { %v2284_v1 = vadd.f32 %v2283_v31, %v12057_v59  ;;  %v2285_v13 = vpop.f32.mrb[73].mxu0  ;;  %4853 = vmatpush1.bf16.msra.mxu0 %v2503_v42  ;;  %7255 = vmatpush1.bf16.msra.mxu1 %v2503_v42  ;;  %v12066_v31 = vld [vmem:[#allocation24_spill] sm:$0xff] }
 0x3d1   : > { %v2286_v0 = vpop.f32.mrb[74].mxu0  ;;  %4854 = vmatprep.subr.bf16.mxu0 %v12043_v52  ;;  %7240 = vmatprep.subr.bf16.mxu1 %v12043_v52 }
 0x3d2   : > { %v2287_v14 = vadd.f32 %v2286_v0, %v12058_v37  ;;  %v2288_v56 = vpop.f32.mrb[75].mxu0  ;;  %v2454_v5 = vmax.f32 %v2284_v1, 0.0 }
 0x3d3   : > { %v7745_v56 = vld [vmem:[%s11961_s7 + $0x60] ss:$16 sps:$4 sm:$0xff]  }
 0x3d4   : > { %v2455_v61 = vmax.f32 %v2287_v14, 0.0 }
 0x3d6   : > { %v2504_v25 = vpack.c.bf16 %v2455_v61, %v2454_v5  ;;  %v7752_v5 = vld [vmem:[%s11961_s7 + $0x680] ss:$16 sps:$4 sm:$0xff]  }
 0x3d7   : > { %v2291_v8 = vpop.f32.mrb[76].mxu0  ;;  %v12067_v61 = vld [vmem:[#allocation27_spill] sm:$0xff] }
 0x3d8   : > { %v2292_v54 = vadd.f32 %v2291_v8, %v12059_v50  ;;  %v2293_v55 = vpop.f32.mrb[77].mxu0  ;;  %4855 = vmatpush1.bf16.msra.mxu0 %v2504_v25  ;;  %7256 = vmatpush1.bf16.msra.mxu1 %v2504_v25  ;;  %v7747_v50 = vld [vmem:[%s11961_s7 + $0x84] ss:$16 sps:$4 sm:$0xff]  }
 0x3d9   : > { %v2294_v46 = vpop.f32.mrb[78].mxu0  ;;  %4856 = vmatprep.subr.bf16.mxu0 %v12043_v52  ;;  %7241 = vmatprep.subr.bf16.mxu1 %v12043_v52 }
 0x3da   : > { %v2295_v12 = vadd.f32 %v2294_v46, %v12060_v28  ;;  %v2296_v9 = vpop.f32.mrb[79].mxu0  ;;  %v2456_v22 = vmax.f32 %v2292_v54, 0.0  ;;  %v7755_v54 = vld [vmem:[%s11961_s7 + $0x6a4] ss:$16 sps:$4 sm:$0xff]   ;;  %v12068_v46 = vld [vmem:[#allocation26_spill] sm:$0xff] }
 0x3dc   : > { %v2457_v35 = vmax.f32 %v2295_v12, 0.0 }
 0x3de   : > { %v2505_v57 = vpack.c.bf16 %v2457_v35, %v2456_v22 }
 0x3df   : > { %v2299_v36 = vpop.f32.mrb[80].mxu0 }
 0x3e0   : > { %v2300_v32 = vadd.f32 %v2299_v36, %v12061_v33  ;;  %v2301_v11 = vpop.f32.mrb[81].mxu0  ;;  %4857 = vmatpush1.bf16.msra.mxu0 %v2505_v57  ;;  %7257 = vmatpush1.bf16.msra.mxu1 %v2505_v57  ;;  %v7751_v36 = vld [vmem:[%s11961_s7 + $0x80] ss:$16 sps:$4 sm:$0xff]  }
 0x3e1   : > { %v2302_v7 = vpop.f32.mrb[82].mxu0  ;;  %5371 = vmatprep.subr.bf16.mxu1 %v12043_v52  ;;  %v7753_v11 = vld [vmem:[%s11961_s7 + $0xa4] ss:$16 sps:$4 sm:$0xff]  }
 0x3e2   : > { %v2303_v10 = vadd.f32 %v2302_v7, %v12062_v38  ;;  %v2304_v16 = vpop.f32.mrb[83].mxu0  ;;  %v2458_v45 = vmax.f32 %v2300_v32, 0.0  ;;  %v12070_v7 = vld [vmem:[#allocation28_spill] sm:$0xff] }
 0x3e3   : > { %4859 = vmatmul.mubr.bf16.vlgmr.msra.gmra.mrb[144].mxu0 %v7726_v27  ;;  %5251 = vmatmul.mubr.bf16.vlgmr.msra.gmra.mrb[32].mxu1 %v7729_v26  ;;  %v7758_v27 = vld [vmem:[%s11961_s7 + $0x6a0] ss:$16 sps:$4 sm:$0xff]  }
 0x3e4   : > { %v2459_v49 = vmax.f32 %v2303_v10, 0.0  ;;  %4866 = vmatprep.mubr.bf16.mxu0 %v7732_v53  ;;  %5258 = vmatprep.mubr.bf16.mxu1 %v7737_v24  ;;  %v12069_v26 = vld [vmem:[#allocation29_spill] sm:$0xff] }
 0x3e5   : > { %v7761_v53 = vld [vmem:[%s11961_s7 + $0x6c4] ss:$16 sps:$4 sm:$0xff]  }
 0x3e6   : > { %v2506_v6 = vpack.c.bf16 %v2459_v49, %v2458_v45 }
 0x3e7   : > { %v2307_v51 = vpop.f32.mrb[84].mxu0 }
 0x3e8   : > { %v2308_v43 = vadd.f32 %v2307_v51, %v12063_v17  ;;  %v2309_v39 = vpop.f32.mrb[85].mxu0  ;;  %5372 = vmatpush1.bf16.msra.mxu1 %v2506_v6  ;;  %v7757_v51 = vld [vmem:[%s11961_s7 + $0xa0] ss:$16 sps:$4 sm:$0xff]  }
 0x3e9   : > { %v2310_v60 = vpop.f32.mrb[86].mxu0  ;;  %5373 = vmatprep.subr.bf16.mxu1 %v12043_v52  ;;  %v7759_v39 = vld [vmem:[%s11961_s7 + $0xc4] ss:$16 sps:$4 sm:$0xff]  }
 0x3ea   : > { %v2311_v44 = vadd.f32 %v2310_v60, %v12064_v58  ;;  %v2312_v40 = vpop.f32.mrb[87].mxu0  ;;  %v2460_v41 = vmax.f32 %v2308_v43, 0.0  ;;  %v12072_v60 = vld [vmem:[#allocation30_spill] sm:$0xff] }
 0x3eb   : > { %4867 = vmatmul.mubr.bf16.gmra.mrb[148].mxu0 %v7734_v21  ;;  %5259 = vmatmul.mubr.bf16.gmra.mrb[36].mxu1 %v7740_v4  ;;  %v7764_v21 = vld [vmem:[%s11961_s7 + $0x6c0] ss:$16 sps:$4 sm:$0xff]  }
 0x3ec   : > { %v2461_v2 = vmax.f32 %v2311_v44, 0.0  ;;  %4874 = vmatprep.mubr.bf16.mxu0 %v7735_v48  ;;  %5266 = vmatprep.mubr.bf16.mxu1 %v7743_v34  ;;  %v12071_v4 = vld [vmem:[#allocation31_spill] sm:$0xff] }
 0x3ed   : > { %v7767_v48 = vld [vmem:[%s11961_s7 + $0x6e4] ss:$16 sps:$4 sm:$0xff]  }
 0x3ee   : > { %v2507_v47 = vpack.c.bf16 %v2461_v2, %v2460_v41 }
 0x3ef   : > { %v2315_v23 = vpop.f32.mrb[88].mxu0 }
 0x3f0   : > { %v2316_v15 = vadd.f32 %v2315_v23, %v12065_v62  ;;  %v2317_v63 = vpop.f32.mrb[89].mxu0  ;;  %5374 = vmatpush1.bf16.msra.mxu1 %v2507_v47  ;;  %v7763_v23 = vld [vmem:[%s11961_s7 + $0xc0] ss:$16 sps:$4 sm:$0xff]  }
 0x3f1   : > { %v2318_v42 = vpop.f32.mrb[90].mxu0  ;;  %5375 = vmatprep.subr.bf16.mxu1 %v12043_v52  ;;  %v7765_v63 = vld [vmem:[%s11961_s7 + $0xe4] ss:$16 sps:$4 sm:$0xff]  }
 0x3f2   : > { %v2319_v59 = vadd.f32 %v2318_v42, %v12066_v31  ;;  %v2320_v1 = vpop.f32.mrb[91].mxu0  ;;  %v2462_v13 = vmax.f32 %v2316_v15, 0.0  ;;  %v12074_v42 = vld [vmem:[#allocation32_spill] sm:$0xff] }
 0x3f3   : > { %4875 = vmatmul.mubr.bf16.gmra.mrb[152].mxu0 %v7739_v19  ;;  %5267 = vmatmul.mubr.bf16.gmra.mrb[40].mxu1 %v7746_v29  ;;  %v7770_v19 = vld [vmem:[%s11961_s7 + $0x6e0] ss:$16 sps:$4 sm:$0xff]  }
 0x3f4   : > { %v2463_v0 = vmax.f32 %v2319_v59, 0.0  ;;  %4882 = vmatprep.mubr.bf16.mxu0 %v7741_v3  ;;  %5274 = vmatprep.mubr.bf16.mxu1 %v7749_v18  ;;  %v12073_v29 = vld [vmem:[#allocation33_spill] sm:$0xff] }
 0x3f5   : > { %v7773_v3 = vld [vmem:[%s11961_s7 + $0x704] ss:$16 sps:$4 sm:$0xff]  }
 0x3f6   : > { %v2508_v37 = vpack.c.bf16 %v2463_v0, %v2462_v13 }
 0x3f7   : > { %v2323_v14 = vpop.f32.mrb[92].mxu0 }
 0x3f8   : > { %v2324_v25 = vadd.f32 %v2323_v14, %v12067_v61  ;;  %v2325_v8 = vpop.f32.mrb[93].mxu0  ;;  %5376 = vmatpush1.bf16.msra.mxu1 %v2508_v37  ;;  %v7769_v14 = vld [vmem:[%s11961_s7 + $0xe0] ss:$16 sps:$4 sm:$0xff]  }
 0x3f9   : > { %v2326_v55 = vpop.f32.mrb[94].mxu0  ;;  %5377 = vmatprep.subr.bf16.mxu1 %v12043_v52  ;;  %v7771_v8 = vld [vmem:[%s11961_s7 + $0x104] ss:$16 sps:$4 sm:$0xff]  }
 0x3fa   : > { %v2327_v28 = vadd.f32 %v2326_v55, %v12068_v46  ;;  %v2328_v12 = vpop.f32.mrb[95].mxu0  ;;  %v2464_v9 = vmax.f32 %v2324_v25, 0.0  ;;  %v12076_v55 = vld [vmem:[#allocation34_spill] sm:$0xff] }
 0x3fb   : > { %4883 = vmatmul.mubr.bf16.gmra.mrb[156].mxu0 %v7745_v56  ;;  %5275 = vmatmul.mubr.bf16.gmra.mrb[44].mxu1 %v7752_v5  ;;  %v7776_v56 = vld [vmem:[%s11961_s7 + $0x700] ss:$16 sps:$4 sm:$0xff]  }
 0x3fc   : > { %v2465_v22 = vmax.f32 %v2327_v28, 0.0  ;;  %4890 = vmatprep.mubr.bf16.mxu0 %v7747_v50  ;;  %5282 = vmatprep.mubr.bf16.mxu1 %v7755_v54  ;;  %v12075_v5 = vld [vmem:[#allocation35_spill] sm:$0xff] }
 0x3fd   : > { %v7779_v50 = vld [vmem:[%s11961_s7 + $0x724] ss:$16 sps:$4 sm:$0xff]  }
 0x3fe   : > { %v2509_v35 = vpack.c.bf16 %v2465_v22, %v2464_v9 }
 0x3ff   : > { %v2331_v57 = vpop.f32.mrb[96].mxu0 }
 0x400   : > { %v2332_v33 = vadd.f32 %v2331_v57, %v12069_v26  ;;  %v2333_v32 = vpop.f32.mrb[97].mxu0  ;;  %5378 = vmatpush1.bf16.msra.mxu1 %v2509_v35  ;;  %v7775_v57 = vld [vmem:[%s11961_s7 + $0x100] ss:$16 sps:$4 sm:$0xff]  }
 0x401   : > { %v2334_v24 = vpop.f32.mrb[98].mxu0  ;;  %5379 = vmatprep.subr.bf16.mxu1 %v12043_v52  ;;  %v7777_v32 = vld [vmem:[%s11961_s7 + $0x124] ss:$16 sps:$4 sm:$0xff]  }
 0x402   : > { %v2335_v38 = vadd.f32 %v2334_v24, %v12070_v7  ;;  %v2336_v10 = vpop.f32.mrb[99].mxu0  ;;  %v2466_v16 = vmax.f32 %v2332_v33, 0.0  ;;  %v12078_v24 = vld [vmem:[#allocation36_spill] sm:$0xff] }
 0x403   : > { %4891 = vmatmul.mubr.bf16.gmra.mrb[160].mxu0 %v7751_v36  ;;  %5283 = vmatmul.mubr.bf16.gmra.mrb[48].mxu1 %v7758_v27  ;;  %v7782_v36 = vld [vmem:[%s11961_s7 + $0x720] ss:$16 sps:$4 sm:$0xff]  }
 0x404   : > { %v2467_v45 = vmax.f32 %v2335_v38, 0.0  ;;  %4898 = vmatprep.mubr.bf16.mxu0 %v7753_v11  ;;  %5290 = vmatprep.mubr.bf16.mxu1 %v7761_v53  ;;  %v12077_v27 = vld [vmem:[#allocation37_spill] sm:$0xff] }
 0x405   : > { %v7785_v11 = vld [vmem:[%s11961_s7 + $0x744] ss:$16 sps:$4 sm:$0xff]  }
 0x406   : > { %v2510_v49 = vpack.c.bf16 %v2467_v45, %v2466_v16 }
 0x407   : > { %v2339_v6 = vpop.f32.mrb[100].mxu0 }
 0x408   : > { %v2340_v17 = vadd.f32 %v2339_v6, %v12071_v4  ;;  %v2341_v43 = vpop.f32.mrb[101].mxu0  ;;  %5380 = vmatpush1.bf16.msra.mxu1 %v2510_v49  ;;  %v7781_v6 = vld [vmem:[%s11961_s7 + $0x120] ss:$16 sps:$4 sm:$0xff]  }
 0x409   : > { %v2342_v34 = vpop.f32.mrb[102].mxu0  ;;  %5381 = vmatprep.subr.bf16.mxu1 %v12043_v52  ;;  %v7783_v43 = vld [vmem:[%s11961_s7 + $0x144] ss:$16 sps:$4 sm:$0xff]  }
 0x40a   : > { %v2343_v58 = vadd.f32 %v2342_v34, %v12072_v60  ;;  %v2344_v44 = vpop.f32.mrb[103].mxu0  ;;  %v2468_v40 = vmax.f32 %v2340_v17, 0.0  ;;  %v12080_v34 = vld [vmem:[#allocation38_spill] sm:$0xff] }
 0x40b   : > { %4899 = vmatmul.mubr.bf16.gmra.mrb[164].mxu0 %v7757_v51  ;;  %5291 = vmatmul.mubr.bf16.gmra.mrb[52].mxu1 %v7764_v21  ;;  %v7788_v51 = vld [vmem:[%s11961_s7 + $0x740] ss:$16 sps:$4 sm:$0xff]  }
 0x40c   : > { %v2469_v41 = vmax.f32 %v2343_v58, 0.0  ;;  %4906 = vmatprep.mubr.bf16.mxu0 %v7759_v39  ;;  %5298 = vmatprep.mubr.bf16.mxu1 %v7767_v48  ;;  %v12079_v21 = vld [vmem:[#allocation39_spill] sm:$0xff] }
 0x40d   : > { %v7791_v39 = vld [vmem:[%s11961_s7 + $0x764] ss:$16 sps:$4 sm:$0xff]  }
 0x40e   : > { %v2511_v2 = vpack.c.bf16 %v2469_v41, %v2468_v40 }
 0x40f   : > { %v2347_v47 = vpop.f32.mrb[104].mxu0 }
 0x410   : > { %v2348_v62 = vadd.f32 %v2347_v47, %v12073_v29  ;;  %v2349_v15 = vpop.f32.mrb[105].mxu0  ;;  %5382 = vmatpush1.bf16.msra.mxu1 %v2511_v2  ;;  %v7787_v47 = vld [vmem:[%s11961_s7 + $0x140] ss:$16 sps:$4 sm:$0xff]  }
 0x411   : > { %v2350_v18 = vpop.f32.mrb[106].mxu0  ;;  %5383 = vmatprep.subr.bf16.mxu1 %v12043_v52  ;;  %v7789_v15 = vld [vmem:[%s11961_s7 + $0x164] ss:$16 sps:$4 sm:$0xff]  }
 0x412   : > { %v2351_v31 = vadd.f32 %v2350_v18, %v12074_v42  ;;  %v2352_v59 = vpop.f32.mrb[107].mxu0  ;;  %v2470_v1 = vmax.f32 %v2348_v62, 0.0  ;;  %v12082_v18 = vld [vmem:[#allocation40_spill] sm:$0xff] }
 0x413   : > { %4907 = vmatmul.mubr.bf16.gmra.mrb[168].mxu0 %v7763_v23  ;;  %5299 = vmatmul.mubr.bf16.gmra.mrb[56].mxu1 %v7770_v19  ;;  %v7794_v23 = vld [vmem:[%s11961_s7 + $0x760] ss:$16 sps:$4 sm:$0xff]  }
 0x414   : > { %v2471_v13 = vmax.f32 %v2351_v31, 0.0  ;;  %4914 = vmatprep.mubr.bf16.mxu0 %v7765_v63  ;;  %5306 = vmatprep.mubr.bf16.mxu1 %v7773_v3  ;;  %v12081_v19 = vld [vmem:[#allocation41_spill] sm:$0xff] }
 0x415   : > { %v7797_v63 = vld [vmem:[%s11961_s7 + $0x784] ss:$16 sps:$4 sm:$0xff]  }
 0x416   : > { %v2512_v0 = vpack.c.bf16 %v2471_v13, %v2470_v1 }
 0x417   : > { %v2355_v37 = vpop.f32.mrb[108].mxu0 }
 0x418   : > { %v2356_v61 = vadd.f32 %v2355_v37, %v12075_v5  ;;  %v2357_v25 = vpop.f32.mrb[109].mxu0  ;;  %5384 = vmatpush1.bf16.msra.mxu1 %v2512_v0  ;;  %v7793_v37 = vld [vmem:[%s11961_s7 + $0x160] ss:$16 sps:$4 sm:$0xff]  }
 0x419   : > { %v2358_v54 = vpop.f32.mrb[110].mxu0  ;;  %5385 = vmatprep.subr.bf16.mxu1 %v12043_v52  ;;  %v7795_v25 = vld [vmem:[%s11961_s7 + $0x184] ss:$16 sps:$4 sm:$0xff]  }
 0x41a   : > { %v2359_v46 = vadd.f32 %v2358_v54, %v12076_v55  ;;  %v2360_v28 = vpop.f32.mrb[111].mxu0  ;;  %v2472_v12 = vmax.f32 %v2356_v61, 0.0  ;;  %v12084_v54 = vld [vmem:[#allocation42_spill] sm:$0xff] }
 0x41b   : > { %4915 = vmatmul.mubr.bf16.gmra.mrb[172].mxu0 %v7769_v14  ;;  %5307 = vmatmul.mubr.bf16.gmra.mrb[60].mxu1 %v7776_v56  ;;  %v7800_v14 = vld [vmem:[%s11961_s7 + $0x780] ss:$16 sps:$4 sm:$0xff]  }
 0x41c   : > { %v2473_v9 = vmax.f32 %v2359_v46, 0.0  ;;  %4922 = vmatprep.mubr.bf16.mxu0 %v7771_v8  ;;  %5314 = vmatprep.mubr.bf16.mxu1 %v7779_v50  ;;  %v12083_v56 = vld [vmem:[#allocation43_spill] sm:$0xff] }
 0x41d   : > { %v7803_v8 = vld [vmem:[%s11961_s7 + $0x7a4] ss:$16 sps:$4 sm:$0xff]  }
 0x41e   : > { %v2513_v22 = vpack.c.bf16 %v2473_v9, %v2472_v12 }
 0x41f   : > { %v2363_v35 = vpop.f32.mrb[112].mxu0 }
 0x420   : > { %v2364_v26 = vadd.f32 %v2363_v35, %v12077_v27  ;;  %v2365_v33 = vpop.f32.mrb[113].mxu0  ;;  %5386 = vmatpush1.bf16.msra.mxu1 %v2513_v22  ;;  %v7799_v35 = vld [vmem:[%s11961_s7 + $0x180] ss:$16 sps:$4 sm:$0xff]  }
 0x421   : > { %v2366_v53 = vpop.f32.mrb[114].mxu0  ;;  %5387 = vmatprep.subr.bf16.mxu1 %v12043_v52  ;;  %v7801_v33 = vld [vmem:[%s11961_s7 + $0x1a4] ss:$16 sps:$4 sm:$0xff]  }
 0x422   : > { %v2367_v7 = vadd.f32 %v2366_v53, %v12078_v24  ;;  %v2368_v38 = vpop.f32.mrb[115].mxu0  ;;  %v2474_v10 = vmax.f32 %v2364_v26, 0.0  ;;  %v12086_v53 = vld [vmem:[#allocation44_spill] sm:$0xff] }
 0x423   : > { %4923 = vmatmul.mubr.bf16.gmra.mrb[176].mxu0 %v7775_v57  ;;  %5315 = vmatmul.mubr.bf16.gmra.mrb[64].mxu1 %v7782_v36  ;;  %v7806_v57 = vld [vmem:[%s11961_s7 + $0x7a0] ss:$16 sps:$4 sm:$0xff]  }
 0x424   : > { %v2475_v16 = vmax.f32 %v2367_v7, 0.0  ;;  %4930 = vmatprep.mubr.bf16.mxu0 %v7777_v32  ;;  %5322 = vmatprep.mubr.bf16.mxu1 %v7785_v11  ;;  %v12085_v36 = vld [vmem:[#allocation45_spill] sm:$0xff] }
 0x425   : > { %v7809_v32 = vld [vmem:[%s11961_s7 + $0x7c4] ss:$16 sps:$4 sm:$0xff]  }
 0x426   : > { %v2514_v45 = vpack.c.bf16 %v2475_v16, %v2474_v10 }
 0x427   : > { %v2371_v49 = vpop.f32.mrb[116].mxu0 }
 0x428   : > { %v2372_v4 = vadd.f32 %v2371_v49, %v12079_v21  ;;  %v2373_v17 = vpop.f32.mrb[117].mxu0  ;;  %5388 = vmatpush1.bf16.msra.mxu1 %v2514_v45  ;;  %v7805_v49 = vld [vmem:[%s11961_s7 + $0x1a0] ss:$16 sps:$4 sm:$0xff]  }
 0x429   : > { %v2374_v48 = vpop.f32.mrb[118].mxu0  ;;  %5389 = vmatprep.subr.bf16.mxu1 %v12043_v52  ;;  %v7807_v17 = vld [vmem:[%s11961_s7 + $0x1c4] ss:$16 sps:$4 sm:$0xff]  }
 0x42a   : > { %v2375_v60 = vadd.f32 %v2374_v48, %v12080_v34  ;;  %v2376_v58 = vpop.f32.mrb[119].mxu0  ;;  %v2476_v44 = vmax.f32 %v2372_v4, 0.0  ;;  %v12088_v48 = vld [vmem:[#allocation46_spill] sm:$0xff] }
 0x42b   : > { %4931 = vmatmul.mubr.bf16.gmra.mrb[180].mxu0 %v7781_v6  ;;  %5323 = vmatmul.mubr.bf16.gmra.mrb[68].mxu1 %v7788_v51  ;;  %v7812_v6 = vld [vmem:[%s11961_s7 + $0x7c0] ss:$16 sps:$4 sm:$0xff]  }
 0x42c   : > { %v2477_v40 = vmax.f32 %v2375_v60, 0.0  ;;  %4938 = vmatprep.mubr.bf16.mxu0 %v7783_v43  ;;  %5330 = vmatprep.mubr.bf16.mxu1 %v7791_v39  ;;  %v12087_v51 = vld [vmem:[#allocation47_spill] sm:$0xff] }
 0x42d   : > { %v7815_v43 = vld [vmem:[%s11961_s7 + $0x7e4] ss:$16 sps:$4 sm:$0xff]  }
 0x42e   : > { %v2515_v41 = vpack.c.bf16 %v2477_v40, %v2476_v44 }
 0x42f   : > { %v2379_v2 = vpop.f32.mrb[120].mxu0 }
 0x430   : > { %v2380_v29 = vadd.f32 %v2379_v2, %v12081_v19  ;;  %v2381_v62 = vpop.f32.mrb[121].mxu0  ;;  %5390 = vmatpush1.bf16.msra.mxu1 %v2515_v41  ;;  %v7811_v2 = vld [vmem:[%s11961_s7 + $0x1c0] ss:$16 sps:$4 sm:$0xff]  }
 0x431   : > { %v2382_v3 = vpop.f32.mrb[122].mxu0  ;;  %5391 = vmatprep.subr.bf16.mxu1 %v12043_v52  ;;  %v7813_v62 = vld [vmem:[%s11961_s7 + $0x1e4] ss:$16 sps:$4 sm:$0xff]  }
 0x432   : > { %v2383_v42 = vadd.f32 %v2382_v3, %v12082_v18  ;;  %v2384_v31 = vpop.f32.mrb[123].mxu0  ;;  %v2478_v59 = vmax.f32 %v2380_v29, 0.0  ;;  %v12090_v3 = vld [vmem:[#allocation48_spill] sm:$0xff] }
 0x433   : > { %4939 = vmatmul.mubr.bf16.gmra.mrb[184].mxu0 %v7787_v47  ;;  %5331 = vmatmul.mubr.bf16.gmra.mrb[72].mxu1 %v7794_v23  ;;  %v7818_v47 = vld [vmem:[%s11961_s7 + $0x7e0] ss:$16 sps:$4 sm:$0xff]  }
 0x434   : > { %v2479_v1 = vmax.f32 %v2383_v42, 0.0  ;;  %4946 = vmatprep.mubr.bf16.mxu0 %v7789_v15  ;;  %5338 = vmatprep.mubr.bf16.mxu1 %v7797_v63  ;;  %v12089_v23 = vld [vmem:[#allocation49_spill] sm:$0xff]  ;;  %v7823_v15 = vld [vmem:[%s11961_s7 + $0xc] ss:$16 sps:$4 sm:$0xff]  }
 0x436   : > { %v2516_v13 = vpack.c.bf16 %v2479_v1, %v2478_v59 }
 0x437   : > { %v2387_v0 = vpop.f32.mrb[124].mxu0 }
 0x438   : > { %v2388_v5 = vadd.f32 %v2387_v0, %v12083_v56  ;;  %v2389_v61 = vpop.f32.mrb[125].mxu0  ;;  %5392 = vmatpush1.bf16.msra.mxu1 %v2516_v13  ;;  %v7817_v0 = vld [vmem:[%s11961_s7 + $0x1e0] ss:$16 sps:$4 sm:$0xff]  }
 0x439   : > { %v2390_v50 = vpop.f32.mrb[126].mxu0  ;;  %5393 = vmatprep.subr.bf16.mxu1 %v12043_v52 }
 0x43a   : > { %v2391_v55 = vadd.f32 %v2390_v50, %v12084_v54  ;;  %v2392_v46 = vpop.f32.mrb[127].mxu0  ;;  %v2480_v28 = vmax.f32 %v2388_v5, 0.0  ;;  %v7819_v5 = vld [vmem:[%s11961_s7 + $0x204] ss:$16 sps:$4 sm:$0xff]  }
 0x43b   : > { %4947 = vmatmul.mubr.bf16.gmra.mrb[188].mxu0 %v7793_v37  ;;  %5339 = vmatmul.mubr.bf16.gmra.mrb[76].mxu1 %v7800_v14  ;;  %v12091_v37 = vld [vmem:[#allocation51_spill] sm:$0xff] }
 0x43c   : > { %v2481_v12 = vmax.f32 %v2391_v55, 0.0  ;;  %4954 = vmatprep.mubr.bf16.mxu0 %v7795_v25  ;;  %5346 = vmatprep.mubr.bf16.mxu1 %v7803_v8  ;;  %v12092_v25 = vld [vmem:[#allocation50_spill] sm:$0xff] }
 0x43e   : > { %v2517_v9 = vpack.c.bf16 %v2481_v12, %v2480_v28  ;;  %v7821_v28 = vld [vmem:[%s11961_s7 + $0x8] ss:$16 sps:$4 sm:$0xff]   ;;  %v7824_v12 = vld [vmem:[%s11961_s7 + $0x200] ss:$16 sps:$4 sm:$0xff]  }
 0x43f   : > { %v2395_v22 = vpop.f32.mrb[128].mxu0 }
 0x440   : > { %v2396_v27 = vadd.f32 %v2395_v22, %v12085_v36  ;;  %v2397_v26 = vpop.f32.mrb[129].mxu0  ;;  %5394 = vmatpush1.bf16.msra.mxu1 %v2517_v9  ;;  %v7827_v9 = vld [vmem:[%s11961_s7 + $0x2c] ss:$16 sps:$4 sm:$0xff]   ;;  %v7829_v22 = vld [vmem:[%s11961_s7 + $0x220] ss:$16 sps:$4 sm:$0xff]  }
 0x441   : > { %v2398_v11 = vpop.f32.mrb[130].mxu0  ;;  %5395 = vmatprep.subr.bf16.mxu1 %v12043_v52  ;;  %v7833_v36 = vld [vmem:[%s11961_s7 + $0x4c] ss:$16 sps:$4 sm:$0xff]   ;;  %v7836_v26 = vld [vmem:[%s11961_s7 + $0x48] ss:$16 sps:$4 sm:$0xff]  }
 0x442   : > { %v2399_v24 = vadd.f32 %v2398_v11, %v12086_v53  ;;  %v2400_v7 = vpop.f32.mrb[131].mxu0  ;;  %v2482_v38 = vmax.f32 %v2396_v27, 0.0  ;;  %v7835_v27 = vld [vmem:[%s11961_s7 + $0x240] ss:$16 sps:$4 sm:$0xff]   ;;  %v7842_v53 = vld [vmem:[%s11961_s7 + $0x68] ss:$16 sps:$4 sm:$0xff]  }
 0x443   : > { %4955 = vmatmul.mubr.bf16.gmra.mrb[192].mxu0 %v7799_v35  ;;  %5347 = vmatmul.mubr.bf16.gmra.mrb[80].mxu1 %v7806_v57  ;;  %v7830_v35 = vld [vmem:[%s11961_s7 + $0x28] ss:$16 sps:$4 sm:$0xff]   ;;  %v7831_v57 = vld [vmem:[%s11961_s7 + $0x244] ss:$16 sps:$4 sm:$0xff]   ;;  %v7841_v11 = vld [vmem:[%s11961_s7 + $0x260] ss:$16 sps:$4 sm:$0xff]  }
 0x444   : > { %v2483_v10 = vmax.f32 %v2399_v24, 0.0  ;;  %4962 = vmatprep.mubr.bf16.mxu0 %v7801_v33  ;;  %5354 = vmatprep.mubr.bf16.mxu1 %v7809_v32  ;;  %v7837_v33 = vld [vmem:[%s11961_s7 + $0x264] ss:$16 sps:$4 sm:$0xff]   ;;  %v7839_v32 = vld [vmem:[%s11961_s7 + $0x6c] ss:$16 sps:$4 sm:$0xff]  }
 0x445   : > { %v7843_v24 = vld [vmem:[%s11961_s7 + $0x284] ss:$16 sps:$4 sm:$0xff]   ;;  %v7845_v7 = vld [vmem:[%s11961_s7 + $0x8c] ss:$16 sps:$4 sm:$0xff]  }
 0x446   : > { %v2518_v16 = vpack.c.bf16 %v2483_v10, %v2482_v38  ;;  %v7847_v38 = vld [vmem:[%s11961_s7 + $0x280] ss:$16 sps:$4 sm:$0xff]   ;;  %v7848_v10 = vld [vmem:[%s11961_s7 + $0x88] ss:$16 sps:$4 sm:$0xff]  }
 0x447   : > { %v2403_v45 = vpop.f32.mrb[132].mxu0 }
 0x448   : > { %v2404_v21 = vadd.f32 %v2403_v45, %v12087_v51  ;;  %v2405_v4 = vpop.f32.mrb[133].mxu0  ;;  %5396 = vmatpush1.bf16.msra.mxu1 %v2518_v16  ;;  %v10364_v16 = vpop.permute.xlu1 %3063  ;;  %v7849_v45 = vld [vmem:[%s11961_s7 + $0x2a4] ss:$16 sps:$4 sm:$0xff]  }
 0x449   : > { %v2406_v39 = vpop.f32.mrb[134].mxu0  ;;  %5397 = vmatprep.subr.bf16.mxu1 %v12043_v52  ;;  %v7853_v4 = vld [vmem:[%s11961_s7 + $0x2a0] ss:$16 sps:$4 sm:$0xff]  }
 0x44a   : > { %v2407_v34 = vadd.f32 %v2406_v39, %v12088_v48  ;;  %v2408_v60 = vpop.f32.mrb[135].mxu0  ;;  %v2484_v58 = vmax.f32 %v2404_v21, 0.0  ;;  %v7857_v39 = vld [vmem:[%s11961_s7 + $0xcc] ss:$16 sps:$4 sm:$0xff]  }
 0x44b   : > { %4963 = vmatmul.mubr.bf16.gmra.mrb[196].mxu0 %v7805_v49  ;;  %5355 = vmatmul.mubr.bf16.gmra.mrb[84].mxu1 %v7812_v6  ;;  %v7851_v49 = vld [vmem:[%s11961_s7 + $0xac] ss:$16 sps:$4 sm:$0xff]   ;;  %v10372_v6 = vpop.permute.xlu0 %3058  ;;  %v7859_v60 = vld [vmem:[%s11961_s7 + $0x2c0] ss:$16 sps:$4 sm:$0xff]  }
 0x44c   : > { %v2485_v44 = vmax.f32 %v2407_v34, 0.0  ;;  %4970 = vmatprep.mubr.bf16.mxu0 %v7807_v17  ;;  %5362 = vmatprep.mubr.bf16.mxu1 %v7815_v43  ;;  %v10374_v51 = vpop.permute.xlu1 %3073  ;;  %v7854_v17 = vld [vmem:[%s11961_s7 + $0xa8] ss:$16 sps:$4 sm:$0xff]   ;;  %v7855_v43 = vld [vmem:[%s11961_s7 + $0x2c4] ss:$16 sps:$4 sm:$0xff]  }
 0x44e   : > { %v2519_v40 = vpack.c.bf16 %v2485_v44, %v2484_v58  ;;  %v7860_v58 = vld [vmem:[%s11961_s7 + $0xc8] ss:$16 sps:$4 sm:$0xff]   ;;  %v7861_v44 = vld [vmem:[%s11961_s7 + $0x2e4] ss:$16 sps:$4 sm:$0xff]  }
 0x44f   : > { %v2411_v41 = vpop.f32.mrb[136].mxu0  ;;  %v10376_v21 = vpop.permute.xlu0 %3068 }
 0x450   : > { %v2412_v19 = vadd.f32 %v2411_v41, %v12089_v23  ;;  %v2413_v29 = vpop.f32.mrb[137].mxu0  ;;  %5398 = vmatpush1.bf16.msra.mxu1 %v2519_v40  ;;  %v10390_v48 = vpop.permute.xlu1 %3083  ;;  %v7863_v40 = vld [vmem:[%s11961_s7 + $0xec] ss:$16 sps:$4 sm:$0xff]   ;;  %v7866_v23 = vld [vmem:[%s11961_s7 + $0xe8] ss:$16 sps:$4 sm:$0xff]  }
 0x451   : > { %v2414_v63 = vpop.f32.mrb[138].mxu0  ;;  %5399 = vmatprep.subr.bf16.mxu1 %v12043_v52  ;;  %v7867_v29 = vld [vmem:[%s11961_s7 + $0x304] ss:$16 sps:$4 sm:$0xff]  }
 0x452   : > { %v2415_v18 = vadd.f32 %v2414_v63, %v12090_v3  ;;  %v2416_v42 = vpop.f32.mrb[139].mxu0  ;;  %v2486_v31 = vmax.f32 %v2412_v19, 0.0 }
 0x453   : > { %4971 = vmatmul.mubr.bf16.gmra.mrb[200].mxu0 %v7811_v2  ;;  %5363 = vmatmul.mubr.bf16.gmra.mrb[88].mxu1 %v7818_v47  ;;  %v10392_v34 = vpop.permute.xlu0 %3078  ;;  %v7865_v47 = vld [vmem:[%s11961_s7 + $0x2e0] ss:$16 sps:$4 sm:$0xff]   ;;  %v7872_v42 = vld [vmem:[%s11961_s7 + $0x108] ss:$16 sps:$4 sm:$0xff]  }
 0x454   : > { %v2487_v59 = vmax.f32 %v2415_v18, 0.0  ;;  %4978 = vmatprep.mubr.bf16.mxu0 %v7813_v62  ;;  %5403 = vmatprep.mubr.bf16.mxu1 %v7823_v15  ;;  %v10406_v41 = vpop.permute.xlu1 %3093  ;;  %v7869_v62 = vld [vmem:[%s11961_s7 + $0x10c] ss:$16 sps:$4 sm:$0xff]   ;;  %v7871_v18 = vld [vmem:[%s11961_s7 + $0x300] ss:$16 sps:$4 sm:$0xff]  }
 0x456   : > { %v2520_v1 = vpack.c.bf16 %v2487_v59, %v2486_v31  ;;  %v7873_v31 = vld [vmem:[%s11961_s7 + $0x324] ss:$16 sps:$4 sm:$0xff]   ;;  %v7875_v59 = vld [vmem:[%s11961_s7 + $0x12c] ss:$16 sps:$4 sm:$0xff]  }
 0x457   : > { %v2419_v13 = vpop.f32.mrb[140].mxu0  ;;  %v10408_v2 = vpop.permute.xlu0 %3088 }
 0x458   : > { %v2420_v14 = vadd.f32 %v2419_v13, %v12091_v37  ;;  %v2421_v56 = vpop.f32.mrb[141].mxu0  ;;  %5400 = vmatpush1.bf16.msra.mxu1 %v2520_v1  ;;  %v10416_v19 = vpop.permute.xlu1 %3103  ;;  %v7878_v37 = vld [vmem:[%s11961_s7 + $0x128] ss:$16 sps:$4 sm:$0xff]  }
 0x459   : > { %v2422_v61 = vpop.f32.mrb[142].mxu0  ;;  %5401 = vmatprep.subr.bf16.mxu1 %v12043_v52  ;;  %v7825_v52 = vld [vmem:[%s11961_s7 + $0x224] ss:$16 sps:$4 sm:$0xff]   ;;  %v7881_v56 = vld [vmem:[%s11961_s7 + $0x14c] ss:$16 sps:$4 sm:$0xff]  }
 0x45a   : > { %v2423_v8 = vadd.f32 %v2422_v61, %v12092_v25  ;;  %v2424_v50 = vpop.f32.mrb[143].mxu0  ;;  %v2488_v54 = vmax.f32 %v2420_v14, 0.0  ;;  %v7879_v14 = vld [vmem:[%s11961_s7 + $0x344] ss:$16 sps:$4 sm:$0xff]   ;;  %v7883_v25 = vld [vmem:[%s11961_s7 + $0x340] ss:$16 sps:$4 sm:$0xff]  }
 0x45b   : > { %4979 = vmatmul.mubr.bf16.gmra.mrb[204].mxu0 %v7817_v0  ;;  %v10424_v15 = vpop.permute.xlu0 %3098  ;;  %v7877_v0 = vld [vmem:[%s11961_s7 + $0x320] ss:$16 sps:$4 sm:$0xff]  }
 0x45c   : > { %v2489_v55 = vmax.f32 %v2423_v8, 0.0  ;;  %4986 = vmatprep.mubr.bf16.mxu0 %v7819_v5  ;;  %v10426_v63 = vpop.permute.xlu1 %3113  ;;  %v7884_v8 = vld [vmem:[%s11961_s7 + $0x148] ss:$16 sps:$4 sm:$0xff]  }
 0x45e   : > { %v2521_v46 = vpack.c.bf16 %v2489_v55, %v2488_v54  ;;  %v7885_v54 = vld [vmem:[%s11961_s7 + $0x364] ss:$16 sps:$4 sm:$0xff]   ;;  %v7887_v55 = vld [vmem:[%s11961_s7 + $0x16c] ss:$16 sps:$4 sm:$0xff]  }
 0x45f   : > { %v10428_v3 = vpop.permute.xlu0 %3108 }
 0x460   : > { %5402 = vmatpush1.bf16.msra.mxu1 %v2521_v46  ;;  %v10442_v1 = vpop.permute.xlu1 %3123 }
 0x463   : > { %4987 = vmatmul.mubr.bf16.gmra.mrb[208].mxu0 %v7824_v12  ;;  %5404 = vmatmul.mubr.bf16.vlgmr.msra.gmra.mrb[92].mxu1 %v7821_v28  ;;  %v10444_v13 = vpop.permute.xlu0 %3118 }
 0x464   : > { %4994 = vmatprep.mubr.bf16.mxu0 %v7825_v52  ;;  %5411 = vmatprep.mubr.bf16.mxu1 %v7827_v9  ;;  %v10458_v5 = vpop.permute.xlu1 %3133 }
 0x465   : > { %12093 = vst [vmem:[#allocation3_spill] sm:$0xff] %v10458_v5 }
 0x467   : > { %v10460_v61 = vpop.permute.xlu0 %3128 }
 0x468   : > { %12094 = vst [vmem:[#allocation5_spill] sm:$0xff] %v10460_v61  ;;  %v10468_v50 = vpop.permute.xlu1 %3143 }
 0x469   : > { %12095 = vst [vmem:[#allocation4_spill] sm:$0xff] %v10468_v50 }
 0x46b   : > { %4995 = vmatmul.mubr.bf16.gmra.mrb[212].mxu0 %v7829_v22  ;;  %5412 = vmatmul.mubr.bf16.gmra.mrb[96].mxu1 %v7830_v35  ;;  %v10476_v46 = vpop.permute.xlu0 %3138  ;;  %v7889_v22 = vld [vmem:[%s11961_s7 + $0x360] ss:$16 sps:$4 sm:$0xff]   ;;  %v7890_v35 = vld [vmem:[%s11961_s7 + $0x168] ss:$16 sps:$4 sm:$0xff]  }
 0x46c   : > { %5002 = vmatprep.mubr.bf16.mxu0 %v7831_v57  ;;  %5419 = vmatprep.mubr.bf16.mxu1 %v7833_v36  ;;  %12096 = vst [vmem:[#allocation7_spill] sm:$0xff] %v10476_v46  ;;  %v10478_v28 = vpop.permute.xlu1 %3153  ;;  %v7893_v36 = vld [vmem:[%s11961_s7 + $0x384] ss:$16 sps:$4 sm:$0xff]  }
 0x46d   : > { %12097 = vst [vmem:[#allocation6_spill] sm:$0xff] %v10478_v28 }
 0x46f   : > { %v10482_v52 = vpop.permute.xlu0 %3148 }
 0x470   : > { %12098 = vst [vmem:[#allocation9_spill] sm:$0xff] %v10482_v52  ;;  %v12142_v52 = vld [vmem:[#allocation52_spill] sm:$0xff] }
 0x473   : > { %5003 = vmatmul.mubr.bf16.gmra.mrb[216].mxu0 %v7835_v27  ;;  %5420 = vmatmul.mubr.bf16.gmra.mrb[100].mxu1 %v7836_v26  ;;  %v7894_v27 = vld [vmem:[%s11961_s7 + $0x18c] ss:$16 sps:$4 sm:$0xff]  }
 0x474   : > { %5010 = vmatprep.mubr.bf16.mxu0 %v7837_v33  ;;  %5427 = vmatprep.mubr.bf16.mxu1 %v7839_v32  ;;  %v10498_v33 = vpop.permute.xlu1 %3163  ;;  %v10500_v32 = vpop.permute.xlu0 %3158 }
 0x475   : > { %12099 = vst [vmem:[#allocation8_spill] sm:$0xff] %v10498_v33  ;;  %12100 = vst [vmem:[#allocation11_spill] sm:$0xff] %v10500_v32  ;;  %v7975_v33 = vld [vmem:[%s11961_s7 + $0x540] ss:$16 sps:$4 sm:$0xff]  }
 0x47b   : > { %5011 = vmatmul.mubr.bf16.gmra.mrb[220].mxu0 %v7841_v11  ;;  %5428 = vmatmul.mubr.bf16.gmra.mrb[104].mxu1 %v7842_v53 }
 0x47c   : > { %5018 = vmatprep.mubr.bf16.mxu0 %v7843_v24  ;;  %5435 = vmatprep.mubr.bf16.mxu1 %v7845_v7  ;;  %v7891_v24 = vld [vmem:[%s11961_s7 + $0x380] ss:$16 sps:$4 sm:$0xff]   ;;  %v7896_v7 = vld [vmem:[%s11961_s7 + $0x188] ss:$16 sps:$4 sm:$0xff]  }
 0x483   : > { %5019 = vmatmul.mubr.bf16.gmra.mrb[224].mxu0 %v7847_v38  ;;  %5436 = vmatmul.mubr.bf16.gmra.mrb[108].mxu1 %v7848_v10  ;;  %v7899_v10 = vld [vmem:[%s11961_s7 + $0x3a4] ss:$16 sps:$4 sm:$0xff]  }
 0x484   : > { %5026 = vmatprep.mubr.bf16.mxu0 %v7849_v45  ;;  %5443 = vmatprep.mubr.bf16.mxu1 %v7851_v49  ;;  %v7900_v45 = vld [vmem:[%s11961_s7 + $0x1ac] ss:$16 sps:$4 sm:$0xff]  }
 0x48b   : > { %5027 = vmatmul.mubr.bf16.gmra.mrb[228].mxu0 %v7853_v4  ;;  %5444 = vmatmul.mubr.bf16.gmra.mrb[112].mxu1 %v7854_v17  ;;  %v10518_v4 = vpop.permute.xlu1 %3173  ;;  %v10520_v17 = vpop.permute.xlu0 %3168 }
 0x48c   : > { %5034 = vmatprep.mubr.bf16.mxu0 %v7855_v43  ;;  %5451 = vmatprep.mubr.bf16.mxu1 %v7857_v39  ;;  %12101 = vst [vmem:[#allocation10_spill] sm:$0xff] %v10518_v4  ;;  %12102 = vst [vmem:[#allocation13_spill] sm:$0xff] %v10520_v17  ;;  %v7974_v4 = vld [vmem:[%s11961_s7 + $0x328] ss:$16 sps:$4 sm:$0xff]  }
 0x493   : > { %5035 = vmatmul.mubr.bf16.gmra.mrb[232].mxu0 %v7859_v60  ;;  %5452 = vmatmul.mubr.bf16.gmra.mrb[116].mxu1 %v7860_v58  ;;  %v7897_v60 = vld [vmem:[%s11961_s7 + $0x3a0] ss:$16 sps:$4 sm:$0xff]   ;;  %v7902_v58 = vld [vmem:[%s11961_s7 + $0x1a8] ss:$16 sps:$4 sm:$0xff]  }
 0x494   : > { %5042 = vmatprep.mubr.bf16.mxu0 %v7861_v44  ;;  %5459 = vmatprep.mubr.bf16.mxu1 %v7863_v40  ;;  %v10530_v44 = vpop.permute.xlu1 %3183 }
 0x495   : > { %12103 = vst [vmem:[#allocation12_spill] sm:$0xff] %v10530_v44  ;;  %v7968_v44 = vld [vmem:[%s11961_s7 + $0x308] ss:$16 sps:$4 sm:$0xff]  }
 0x49b   : > { %5043 = vmatmul.mubr.bf16.gmra.mrb[236].mxu0 %v7865_v47  ;;  %5460 = vmatmul.mubr.bf16.gmra.mrb[120].mxu1 %v7866_v23  ;;  %v7905_v47 = vld [vmem:[%s11961_s7 + $0x3c4] ss:$16 sps:$4 sm:$0xff]   ;;  %v7906_v23 = vld [vmem:[%s11961_s7 + $0x1cc] ss:$16 sps:$4 sm:$0xff]  }
 0x49c   : > { %5050 = vmatprep.mubr.bf16.mxu0 %v7867_v29  ;;  %5467 = vmatprep.mubr.bf16.mxu1 %v7869_v62  ;;  %v10540_v29 = vpop.permute.xlu0 %3178 }
 0x49d   : > { %12104 = vst [vmem:[#allocation15_spill] sm:$0xff] %v10540_v29  ;;  %v7969_v29 = vld [vmem:[%s11961_s7 + $0x520] ss:$16 sps:$4 sm:$0xff]  }
 0x4a3   : > { %5051 = vmatmul.mubr.bf16.gmra.mrb[240].mxu0 %v7871_v18  ;;  %5468 = vmatmul.mubr.bf16.gmra.mrb[124].mxu1 %v7872_v42  ;;  %v10542_v18 = vpop.permute.xlu1 %3193 }
 0x4a4   : > { %5058 = vmatprep.mubr.bf16.mxu0 %v7873_v31  ;;  %5475 = vmatprep.mubr.bf16.mxu1 %v7875_v59  ;;  %12105 = vst [vmem:[#allocation14_spill] sm:$0xff] %v10542_v18  ;;  %v10546_v31 = vpop.permute.xlu0 %3188  ;;  %v7957_v18 = vld [vmem:[%s11961_s7 + $0x4e0] ss:$16 sps:$4 sm:$0xff]  }
 0x4a5   : > { %12106 = vst [vmem:[#allocation17_spill] sm:$0xff] %v10546_v31  ;;  %v7963_v31 = vld [vmem:[%s11961_s7 + $0x500] ss:$16 sps:$4 sm:$0xff]  }
 0x4ab   : > { %5059 = vmatmul.mubr.bf16.gmra.mrb[244].mxu0 %v7877_v0  ;;  %5476 = vmatmul.mubr.bf16.gmra.mrb[128].mxu1 %v7878_v37  ;;  %v7903_v0 = vld [vmem:[%s11961_s7 + $0x3c0] ss:$16 sps:$4 sm:$0xff]   ;;  %v7908_v37 = vld [vmem:[%s11961_s7 + $0x1c8] ss:$16 sps:$4 sm:$0xff]  }
 0x4ac   : > { %5066 = vmatprep.mubr.bf16.mxu0 %v7879_v14  ;;  %5483 = vmatprep.mubr.bf16.mxu1 %v7881_v56  ;;  %v7911_v56 = vld [vmem:[%s11961_s7 + $0x3e4] ss:$16 sps:$4 sm:$0xff]  }
 0x4b3   : > { %5067 = vmatmul.mubr.bf16.gmra.mrb[248].mxu0 %v7883_v25  ;;  %5484 = vmatmul.mubr.bf16.gmra.mrb[132].mxu1 %v7884_v8  ;;  %v7912_v25 = vld [vmem:[%s11961_s7 + $0x1ec] ss:$16 sps:$4 sm:$0xff]  }
 0x4b4   : > { %5074 = vmatprep.mubr.bf16.mxu0 %v7885_v54  ;;  %5491 = vmatprep.mubr.bf16.mxu1 %v7887_v55  ;;  %v10562_v54 = vpop.permute.xlu1 %3203  ;;  %v10564_v55 = vpop.permute.xlu0 %3198 }
 0x4b5   : > { %12107 = vst [vmem:[#allocation16_spill] sm:$0xff] %v10562_v54  ;;  %12108 = vst [vmem:[#allocation19_spill] sm:$0xff] %v10564_v55  ;;  %v7956_v54 = vld [vmem:[%s11961_s7 + $0x2c8] ss:$16 sps:$4 sm:$0xff]  }
 0x4b6   : > { %v10480_v12 = vpop.f32.mrb[144].mxu0 }
 0x4b7   : > { %v4862_v9 = vpop.f32.mrb[145].mxu0 }
 0x4b8   : > { %v10490_v57 = vpop.f32.mrb[146].mxu0 }
 0x4b9   : > { %v4865_v26 = vpop.f32.mrb[147].mxu0  ;;  %v4864_v50 = vadd.f32 %v10490_v57, %v12142_v52  ;;  %v7990_v57 = vld [vmem:[%s11961_s7 + $0x38c] ss:$16 sps:$4 sm:$0xff]  }
 0x4ba   : > { %v7917_v26 = vld [vmem:[%s11961_s7 + $0x404] ss:$16 sps:$4 sm:$0xff]  }
 0x4bb   : > { %5075 = vmatmul.mubr.bf16.gmra.mrb[252].mxu0 %v7889_v22  ;;  %5492 = vmatmul.mubr.bf16.gmra.mrb[136].mxu1 %v7890_v35  ;;  %v7909_v35 = vld [vmem:[%s11961_s7 + $0x3e0] ss:$16 sps:$4 sm:$0xff]  }
 0x4bc   : > { %5082 = vmatprep.mubr.bf16.mxu0 %v7893_v36  ;;  %5499 = vmatprep.mubr.bf16.mxu1 %v7894_v27  ;;  %v7914_v36 = vld [vmem:[%s11961_s7 + $0x1e8] ss:$16 sps:$4 sm:$0xff]  }
 0x4be   : > { %v10502_v11 = vpop.f32.mrb[148].mxu0 }
 0x4bf   : > { %v4870_v53 = vpop.f32.mrb[149].mxu0 }
 0x4c0   : > { %v10510_v38 = vpop.f32.mrb[150].mxu0  ;;  %v7918_v53 = vld [vmem:[%s11961_s7 + $0x20c] ss:$16 sps:$4 sm:$0xff]  }
 0x4c1   : > { %v4873_v49 = vpop.f32.mrb[151].mxu0 }
 0x4c3   : > { %5083 = vmatmul.mubr.bf16.gmra.mrb[0].mxu0 %v7891_v24  ;;  %5500 = vmatmul.mubr.bf16.gmra.mrb[140].mxu1 %v7896_v7  ;;  %v10582_v7 = vpop.permute.xlu1 %3213 }
 0x4c4   : > { %5090 = vmatprep.mubr.bf16.mxu0 %v7899_v10  ;;  %5507 = vmatprep.mubr.bf16.mxu1 %v7900_v45  ;;  %12109 = vst [vmem:[#allocation18_spill] sm:$0xff] %v10582_v7  ;;  %v10584_v10 = vpop.permute.xlu0 %3208  ;;  %v7950_v7 = vld [vmem:[%s11961_s7 + $0x2a8] ss:$16 sps:$4 sm:$0xff]  }
 0x4c5   : > { %12110 = vst [vmem:[#allocation21_spill] sm:$0xff] %v10584_v10  ;;  %v7951_v10 = vld [vmem:[%s11961_s7 + $0x4c0] ss:$16 sps:$4 sm:$0xff]  }
 0x4c6   : > { %v10522_v43 = vpop.f32.mrb[152].mxu0 }
 0x4c7   : > { %v4878_v39 = vpop.f32.mrb[153].mxu0 }
 0x4c8   : > { %v10532_v40 = vpop.f32.mrb[154].mxu0  ;;  %v7915_v39 = vld [vmem:[%s11961_s7 + $0x400] ss:$16 sps:$4 sm:$0xff]  }
 0x4c9   : > { %v4881_v62 = vpop.f32.mrb[155].mxu0 }
 0x4ca   : > { %v7924_v62 = vld [vmem:[%s11961_s7 + $0x22c] ss:$16 sps:$4 sm:$0xff]  }
 0x4cb   : > { %5091 = vmatmul.mubr.bf16.gmra.mrb[4].mxu0 %v7897_v60  ;;  %5508 = vmatmul.mubr.bf16.gmra.mrb[144].mxu1 %v7902_v58  ;;  %v7920_v60 = vld [vmem:[%s11961_s7 + $0x208] ss:$16 sps:$4 sm:$0xff]   ;;  %v10594_v58 = vpop.permute.xlu1 %3223 }
 0x4cc   : > { %5098 = vmatprep.mubr.bf16.mxu0 %v7905_v47  ;;  %5515 = vmatprep.mubr.bf16.mxu1 %v7906_v23  ;;  %12111 = vst [vmem:[#allocation20_spill] sm:$0xff] %v10594_v58  ;;  %v7923_v23 = vld [vmem:[%s11961_s7 + $0x424] ss:$16 sps:$4 sm:$0xff]   ;;  %v7939_v58 = vld [vmem:[%s11961_s7 + $0x480] ss:$16 sps:$4 sm:$0xff]  }
 0x4ce   : > { %v10544_v42 = vpop.f32.mrb[156].mxu0 }
 0x4cf   : > { %v4886_v59 = vpop.f32.mrb[157].mxu0 }
 0x4d0   : > { %v10554_v14 = vpop.f32.mrb[158].mxu0  ;;  %v10604_v59 = vpop.permute.xlu0 %3218 }
 0x4d1   : > { %v4889_v8 = vpop.f32.mrb[159].mxu0  ;;  %12112 = vst [vmem:[#allocation23_spill] sm:$0xff] %v10604_v59  ;;  %v7945_v59 = vld [vmem:[%s11961_s7 + $0x4a0] ss:$16 sps:$4 sm:$0xff]  }
 0x4d3   : > { %5099 = vmatmul.mubr.bf16.gmra.mrb[8].mxu0 %v7903_v0  ;;  %5516 = vmatmul.mubr.bf16.gmra.mrb[148].mxu1 %v7908_v37  ;;  %v10606_v37 = vpop.permute.xlu1 %3233 }
 0x4d4   : > { %5106 = vmatprep.mubr.bf16.mxu0 %v7911_v56  ;;  %5523 = vmatprep.mubr.bf16.mxu1 %v7912_v25  ;;  %12113 = vst [vmem:[#allocation22_spill] sm:$0xff] %v10606_v37  ;;  %v10610_v25 = vpop.permute.xlu0 %3228  ;;  %v7938_v37 = vld [vmem:[%s11961_s7 + $0x268] ss:$16 sps:$4 sm:$0xff]  }
 0x4d5   : > { %12114 = vst [vmem:[#allocation25_spill] sm:$0xff] %v10610_v25 }
 0x4d6   : > { %v10566_v9 = vpop.f32.mrb[160].mxu0 }
 0x4d7   : > { %v4894_v22 = vpop.f32.mrb[161].mxu0 }
 0x4d8   : > { %v10574_v27 = vpop.f32.mrb[162].mxu0  ;;  %v7921_v22 = vld [vmem:[%s11961_s7 + $0x420] ss:$16 sps:$4 sm:$0xff]  }
 0x4d9   : > { %v4897_v24 = vpop.f32.mrb[163].mxu0 }
 0x4db   : > { %5107 = vmatmul.mubr.bf16.gmra.mrb[12].mxu0 %v7909_v35  ;;  %5524 = vmatmul.mubr.bf16.gmra.mrb[152].mxu1 %v7914_v36  ;;  %v7926_v35 = vld [vmem:[%s11961_s7 + $0x228] ss:$16 sps:$4 sm:$0xff]  }
 0x4dc   : > { %5114 = vmatprep.mubr.bf16.mxu0 %v7917_v26  ;;  %5531 = vmatprep.mubr.bf16.mxu1 %v7918_v53  ;;  %v7929_v26 = vld [vmem:[%s11961_s7 + $0x444] ss:$16 sps:$4 sm:$0xff]   ;;  %v7930_v53 = vld [vmem:[%s11961_s7 + $0x24c] ss:$16 sps:$4 sm:$0xff]  }
 0x4de   : > { %v10586_v45 = vpop.f32.mrb[164].mxu0 }
 0x4df   : > { %v4902_v49 = vpop.f32.mrb[165].mxu0 }
 0x4e0   : > { %v10596_v47 = vpop.f32.mrb[166].mxu0  ;;  %v10626_v49 = vpop.permute.xlu1 %3243 }
 0x4e1   : > { %v4905_v0 = vpop.f32.mrb[167].mxu0  ;;  %12115 = vst [vmem:[#allocation24_spill] sm:$0xff] %v10626_v49 }
 0x4e2   : > { %v7932_v0 = vld [vmem:[%s11961_s7 + $0x248] ss:$16 sps:$4 sm:$0xff]  }
 0x4e3   : > { %5115 = vmatmul.mubr.bf16.gmra.mrb[16].mxu0 %v7915_v39  ;;  %5532 = vmatmul.mubr.bf16.gmra.mrb[156].mxu1 %v7920_v60  ;;  %v10628_v39 = vpop.permute.xlu0 %3238 }
 0x4e4   : > { %5122 = vmatprep.mubr.bf16.mxu0 %v7923_v23  ;;  %5539 = vmatprep.mubr.bf16.mxu1 %v7924_v62  ;;  %12116 = vst [vmem:[#allocation27_spill] sm:$0xff] %v10628_v39  ;;  %v7927_v62 = vld [vmem:[%s11961_s7 + $0x440] ss:$16 sps:$4 sm:$0xff]  }
 0x4e5   : > { %v7933_v39 = vld [vmem:[%s11961_s7 + $0x460] ss:$16 sps:$4 sm:$0xff]  }
 0x4e6   : > { %v10608_v56 = vpop.f32.mrb[168].mxu0 }
 0x4e7   : > { %v4910_v8 = vpop.f32.mrb[169].mxu0 }
 0x4e8   : > { %v10618_v36 = vpop.f32.mrb[170].mxu0 }
 0x4e9   : > { %v4913_v24 = vpop.f32.mrb[171].mxu0 }
 0x4ea   : > { %v10648_v24 = vpop.permute.xlu0 %3248 }
 0x4eb   : > { %5123 = vmatmul.mubr.bf16.gmra.mrb[20].mxu0 %v7921_v22  ;;  %5540 = vmatmul.mubr.bf16.gmra.mrb[160].mxu1 %v7926_v35  ;;  %v7935_v22 = vld [vmem:[%s11961_s7 + $0x464] ss:$16 sps:$4 sm:$0xff]   ;;  %v7936_v35 = vld [vmem:[%s11961_s7 + $0x26c] ss:$16 sps:$4 sm:$0xff]   ;;  %12118 = vst [vmem:[#allocation29_spill] sm:$0xff] %v10648_v24 }
 0x4ec   : > { %5130 = vmatprep.mubr.bf16.mxu0 %v7929_v26  ;;  %5547 = vmatprep.mubr.bf16.mxu1 %v7930_v53  ;;  %v10646_v53 = vpop.permute.xlu1 %3253 }
 0x4ed   : > { %12117 = vst [vmem:[#allocation26_spill] sm:$0xff] %v10646_v53 }
 0x4ee   : > { %v10630_v60 = vpop.f32.mrb[172].mxu0 }
 0x4ef   : > { %v4918_v23 = vpop.f32.mrb[173].mxu0 }
 0x4f0   : > { %v10638_v8 = vpop.f32.mrb[174].mxu0 }
 0x4f1   : > { %v4921_v26 = vpop.f32.mrb[175].mxu0 }
 0x4f2   : > { %v10658_v26 = vpop.permute.xlu1 %3263 }
 0x4f3   : > { %5131 = vmatmul.mubr.bf16.gmra.mrb[24].mxu0 %v7927_v62  ;;  %5548 = vmatmul.mubr.bf16.gmra.mrb[164].mxu1 %v7932_v0  ;;  %12119 = vst [vmem:[#allocation28_spill] sm:$0xff] %v10658_v26  ;;  %v7941_v62 = vld [vmem:[%s11961_s7 + $0x484] ss:$16 sps:$4 sm:$0xff]   ;;  %v10668_v0 = vpop.permute.xlu0 %3258 }
 0x4f4   : > { %5138 = vmatprep.mubr.bf16.mxu0 %v7935_v22  ;;  %5555 = vmatprep.mubr.bf16.mxu1 %v7936_v35  ;;  %12120 = vst [vmem:[#allocation31_spill] sm:$0xff] %v10668_v0  ;;  %v7944_v0 = vld [vmem:[%s11961_s7 + $0x288] ss:$16 sps:$4 sm:$0xff]  }
 0x4f6   : > { %v10650_v23 = vpop.f32.mrb[176].mxu0  ;;  %v10670_v35 = vpop.permute.xlu1 %3273 }
 0x4f7   : > { %v4926_v49 = vpop.f32.mrb[177].mxu0  ;;  %12121 = vst [vmem:[#allocation30_spill] sm:$0xff] %v10670_v35  ;;  %v10674_v24 = vpop.permute.xlu0 %3268 }
 0x4f8   : > { %v10660_v53 = vpop.f32.mrb[178].mxu0  ;;  %v7942_v49 = vld [vmem:[%s11961_s7 + $0x28c] ss:$16 sps:$4 sm:$0xff]   ;;  %12122 = vst [vmem:[#allocation33_spill] sm:$0xff] %v10674_v24 }
 0x4f9   : > { %v4929_v22 = vpop.f32.mrb[179].mxu0 }
 0x4fb   : > { %5139 = vmatmul.mubr.bf16.gmra.mrb[28].mxu0 %v7933_v39  ;;  %5556 = vmatmul.mubr.bf16.gmra.mrb[168].mxu1 %v7938_v37  ;;  %v7947_v37 = vld [vmem:[%s11961_s7 + $0x4a4] ss:$16 sps:$4 sm:$0xff]   ;;  %v7948_v39 = vld [vmem:[%s11961_s7 + $0x2ac] ss:$16 sps:$4 sm:$0xff]  }
 0x4fc   : > { %5146 = vmatprep.mubr.bf16.mxu0 %v7941_v62  ;;  %5563 = vmatprep.mubr.bf16.mxu1 %v7942_v49  ;;  %v10692_v49 = vpop.permute.xlu0 %3278 }
 0x4fd   : > { %12124 = vst [vmem:[#allocation35_spill] sm:$0xff] %v10692_v49 }
 0x4fe   : > { %v10672_v26 = vpop.f32.mrb[180].mxu0 }
 0x4ff   : > { %v4934_v25 = vpop.f32.mrb[181].mxu0 }
 0x500   : > { %v10682_v22 = vpop.f32.mrb[182].mxu0  ;;  %v10690_v25 = vpop.permute.xlu1 %3283 }
 0x501   : > { %v4937_v62 = vpop.f32.mrb[183].mxu0  ;;  %12123 = vst [vmem:[#allocation32_spill] sm:$0xff] %v10690_v25 }
 0x503   : > { %5147 = vmatmul.mubr.bf16.gmra.mrb[32].mxu0 %v7939_v58  ;;  %5564 = vmatmul.mubr.bf16.gmra.mrb[172].mxu1 %v7944_v0  ;;  %v7953_v58 = vld [vmem:[%s11961_s7 + $0x4c4] ss:$16 sps:$4 sm:$0xff]   ;;  %v7954_v0 = vld [vmem:[%s11961_s7 + $0x2cc] ss:$16 sps:$4 sm:$0xff]  }
 0x504   : > { %5154 = vmatprep.mubr.bf16.mxu0 %v7947_v37  ;;  %5571 = vmatprep.mubr.bf16.mxu1 %v7948_v39  ;;  %v10712_v39 = vpop.permute.xlu0 %3288 }
 0x505   : > { %12126 = vst [vmem:[#allocation37_spill] sm:$0xff] %v10712_v39 }
 0x506   : > { %v10694_v35 = vpop.f32.mrb[184].mxu0 }
 0x507   : > { %v4942_v24 = vpop.f32.mrb[185].mxu0 }
 0x508   : > { %v10702_v62 = vpop.f32.mrb[186].mxu0  ;;  %v10710_v24 = vpop.permute.xlu1 %3293 }
 0x509   : > { %v4945_v37 = vpop.f32.mrb[187].mxu0  ;;  %12125 = vst [vmem:[#allocation34_spill] sm:$0xff] %v10710_v24 }
 0x50b   : > { %5155 = vmatmul.mubr.bf16.gmra.mrb[36].mxu0 %v7945_v59  ;;  %5572 = vmatmul.mubr.bf16.gmra.mrb[176].mxu1 %v7950_v7  ;;  %v7959_v7 = vld [vmem:[%s11961_s7 + $0x4e4] ss:$16 sps:$4 sm:$0xff]   ;;  %v7960_v59 = vld [vmem:[%s11961_s7 + $0x2ec] ss:$16 sps:$4 sm:$0xff]  }
 0x50c   : > { %5162 = vmatprep.mubr.bf16.mxu0 %v7953_v58  ;;  %5579 = vmatprep.mubr.bf16.mxu1 %v7954_v0  ;;  %v10722_v37 = vpop.permute.xlu1 %3303 }
 0x50d   : > { %12127 = vst [vmem:[#allocation36_spill] sm:$0xff] %v10722_v37 }
 0x50e   : > { %v10714_v25 = vpop.f32.mrb[188].mxu0 }
 0x50f   : > { %v4950_v49 = vpop.f32.mrb[189].mxu0 }
 0x510   : > { %v10724_v24 = vpop.f32.mrb[190].mxu0  ;;  %v10732_v49 = vpop.permute.xlu0 %3298 }
 0x511   : > { %12128 = vst [vmem:[#allocation39_spill] sm:$0xff] %v10732_v49  ;;  %v4953_v58 = vpop.f32.mrb[191].mxu0  ;;  %v10734_v0 = vpop.permute.xlu1 %3313  ;;  %v7962_v49 = vld [vmem:[%s11961_s7 + $0x2e8] ss:$16 sps:$4 sm:$0xff]  }
 0x512   : > { %12129 = vst [vmem:[#allocation38_spill] sm:$0xff] %v10734_v0 }
 0x513   : > { %5163 = vmatmul.mubr.bf16.gmra.mrb[40].mxu0 %v7951_v10  ;;  %5580 = vmatmul.mubr.bf16.gmra.mrb[180].mxu1 %v7956_v54  ;;  %v7965_v54 = vld [vmem:[%s11961_s7 + $0x504] ss:$16 sps:$4 sm:$0xff]   ;;  %v7966_v10 = vld [vmem:[%s11961_s7 + $0x30c] ss:$16 sps:$4 sm:$0xff]  }
 0x514   : > { %5170 = vmatprep.mubr.bf16.mxu0 %v7959_v7  ;;  %5587 = vmatprep.mubr.bf16.mxu1 %v7960_v59  ;;  %v10738_v39 = vpop.permute.xlu0 %3308 }
 0x515   : > { %12130 = vst [vmem:[#allocation41_spill] sm:$0xff] %v10738_v39 }
 0x516   : > { %v10736_v37 = vpop.f32.mrb[192].mxu0 }
 0x517   : > { %v4958_v55 = vpop.f32.mrb[193].mxu0 }
 0x518   : > { %v10746_v58 = vpop.f32.mrb[194].mxu0  ;;  %v10754_v55 = vpop.permute.xlu1 %3323 }
 0x519   : > { %v4961_v7 = vpop.f32.mrb[195].mxu0  ;;  %12131 = vst [vmem:[#allocation40_spill] sm:$0xff] %v10754_v55  ;;  %v10756_v59 = vpop.permute.xlu0 %3318 }
 0x51a   : > { %12132 = vst [vmem:[#allocation43_spill] sm:$0xff] %v10756_v59 }
 0x51b   : > { %5171 = vmatmul.mubr.bf16.gmra.mrb[44].mxu0 %v7957_v18  ;;  %5588 = vmatmul.mubr.bf16.gmra.mrb[184].mxu1 %v7962_v49  ;;  %v7971_v18 = vld [vmem:[%s11961_s7 + $0x524] ss:$16 sps:$4 sm:$0xff]   ;;  %v7972_v49 = vld [vmem:[%s11961_s7 + $0x32c] ss:$16 sps:$4 sm:$0xff]  }
 0x51c   : > { %5178 = vmatprep.mubr.bf16.mxu0 %v7965_v54  ;;  %5595 = vmatprep.mubr.bf16.mxu1 %v7966_v10 }
 0x51d   : > { %v10776_v10 = vpop.permute.xlu0 %3328 }
 0x51e   : > { %v10758_v0 = vpop.f32.mrb[196].mxu0  ;;  %12134 = vst [vmem:[#allocation45_spill] sm:$0xff] %v10776_v10 }
 0x51f   : > { %v4966_v39 = vpop.f32.mrb[197].mxu0 }
 0x520   : > { %v10766_v7 = vpop.f32.mrb[198].mxu0  ;;  %v10774_v39 = vpop.permute.xlu1 %3333 }
 0x521   : > { %v4969_v54 = vpop.f32.mrb[199].mxu0  ;;  %12133 = vst [vmem:[#allocation42_spill] sm:$0xff] %v10774_v39 }
 0x523   : > { %5179 = vmatmul.mubr.bf16.gmra.mrb[48].mxu0 %v7963_v31  ;;  %5596 = vmatmul.mubr.bf16.gmra.mrb[188].mxu1 %v7968_v44  ;;  %v7977_v44 = vld [vmem:[%s11961_s7 + $0x544] ss:$16 sps:$4 sm:$0xff]   ;;  %v7978_v31 = vld [vmem:[%s11961_s7 + $0x34c] ss:$16 sps:$4 sm:$0xff]  }
 0x524   : > { %5186 = vmatprep.mubr.bf16.mxu0 %v7971_v18  ;;  %5603 = vmatprep.mubr.bf16.mxu1 %v7972_v49  ;;  %v10786_v54 = vpop.permute.xlu1 %3343 }
 0x525   : > { %12135 = vst [vmem:[#allocation44_spill] sm:$0xff] %v10786_v54 }
 0x526   : > { %v10778_v55 = vpop.f32.mrb[200].mxu0 }
 0x527   : > { %v4974_v59 = vpop.f32.mrb[201].mxu0 }
 0x528   : > { %v10788_v39 = vpop.f32.mrb[202].mxu0  ;;  %v10796_v59 = vpop.permute.xlu0 %3338 }
 0x529   : > { %12136 = vst [vmem:[#allocation47_spill] sm:$0xff] %v10796_v59  ;;  %v4977_v18 = vpop.f32.mrb[203].mxu0  ;;  %v10798_v49 = vpop.permute.xlu1 %3353  ;;  %v7980_v59 = vld [vmem:[%s11961_s7 + $0x348] ss:$16 sps:$4 sm:$0xff]  }
 0x52a   : > { %12137 = vst [vmem:[#allocation46_spill] sm:$0xff] %v10798_v49  ;;  %v12141_v49 = vld [vmem:[#allocation53_spill] sm:$0xff] }
 0x52b   : > { %5187 = vmatmul.mubr.bf16.gmra.mrb[52].mxu0 %v7969_v29  ;;  %5604 = vmatmul.mubr.bf16.gmra.mrb[192].mxu1 %v7974_v4  ;;  %v7983_v4 = vld [vmem:[%s11961_s7 + $0x564] ss:$16 sps:$4 sm:$0xff]   ;;  %v7984_v29 = vld [vmem:[%s11961_s7 + $0x36c] ss:$16 sps:$4 sm:$0xff]  }
 0x52c   : > { %5194 = vmatprep.mubr.bf16.mxu0 %v7977_v44  ;;  %5611 = vmatprep.mubr.bf16.mxu1 %v7978_v31  ;;  %v10802_v10 = vpop.permute.xlu0 %3348 }
 0x52d   : > { %12138 = vst [vmem:[#allocation49_spill] sm:$0xff] %v10802_v10  ;;  %v4861_v10 = vadd.f32 %v10480_v12, %v12141_v49  ;;  %v7989_v49 = vld [vmem:[%s11961_s7 + $0x584] ss:$16 sps:$4 sm:$0xff]  }
 0x52e   : > { %v10800_v54 = vpop.f32.mrb[204].mxu0 }
 0x52f   : > { %v4982_v17 = vpop.f32.mrb[205].mxu0 }
 0x530   : > { %v10810_v18 = vpop.f32.mrb[206].mxu0  ;;  %v10818_v17 = vpop.permute.xlu1 %3363 }
 0x531   : > { %v4985_v44 = vpop.f32.mrb[207].mxu0  ;;  %12139 = vst [vmem:[#allocation48_spill] sm:$0xff] %v10818_v17  ;;  %v10820_v31 = vpop.permute.xlu0 %3358 }
 0x532   : > { %12140 = vst [vmem:[#allocation51_spill] sm:$0xff] %v10820_v31  ;;  %v12145_v31 = vld [vmem:[#allocation55_spill] sm:$0xff] }
 0x533   : > { %5195 = vmatmul.mubr.bf16.gmra.mrb[56].mxu0 %v7975_v33  ;;  %5612 = vmatmul.mubr.bf16.gmra.mrb[196].mxu1 %v7980_v59  ;;  %v7981_v33 = vld [vmem:[%s11961_s7 + $0x560] ss:$16 sps:$4 sm:$0xff]   ;;  %v7986_v59 = vld [vmem:[%s11961_s7 + $0x368] ss:$16 sps:$4 sm:$0xff]   ;;  %v4869_v61 = vadd.f32 %v10502_v11, %v12145_v31 }
 0x534   : > { %5202 = vmatprep.mubr.bf16.mxu0 %v7983_v4  ;;  %5619 = vmatprep.mubr.bf16.mxu1 %v7984_v29 }
 0x535   : > { %v10844_v17 = vpop.permute.xlu0 %3368 }
 0x536   : > { %v10824_v32 = vpop.f32.mrb[208].mxu0  ;;  %v5405_v28 = vpop.f32.mrb[92].mxu1  ;;  %12144 = vst [vmem:[#allocation53_spill] sm:$0xff] %v10844_v17 }
 0x537   : > { %v5406_v46 = vadd.f32 %v5405_v28, %v4861_v10  ;;  %v4990_v5 = vpop.f32.mrb[209].mxu0  ;;  %v5407_v44 = vpop.f32.mrb[93].mxu1 }
 0x538   : > { %v10834_v4 = vpop.f32.mrb[210].mxu0  ;;  %v5408_v12 = vpop.f32.mrb[94].mxu1 }
 0x539   : > { %v5916_v29 = vmax.f32 %v5406_v46, 0.0  ;;  %v5409_v52 = vadd.f32 %v5408_v12, %v4864_v50  ;;  %v5410_v28 = vpop.f32.mrb[95].mxu1  ;;  %v4993_v5 = vpop.f32.mrb[211].mxu0  ;;  %v12146_v12 = vld [vmem:[#allocation54_spill] sm:$0xff] }
 0x53a   : > { %v10842_v44 = vpop.permute.xlu1 %3373  ;;  %v4872_v28 = vadd.f32 %v10510_v38, %v12146_v12  ;;  %v7995_v5 = vld [vmem:[%s11961_s7 + $0x5a4] ss:$16 sps:$4 sm:$0xff]  }
 0x53b   : > { %v5917_v10 = vmax.f32 %v5409_v52, 0.0  ;;  %5203 = vmatmul.mubr.bf16.gmra.mrb[60].mxu0 %v7981_v33  ;;  %5620 = vmatmul.mubr.bf16.gmra.mrb[200].mxu1 %v7986_v59  ;;  %12143 = vst [vmem:[#allocation50_spill] sm:$0xff] %v10842_v44 }
 0x53c   : > { %6172 = vadd.xlane.f32.xlu0 %v5916_v29  ;;  %5210 = vmatprep.mubr.bf16.mxu0 %v7989_v49  ;;  %v7987_v49 = vld [vmem:[%s11961_s7 + $0x580] ss:$16 sps:$4 sm:$0xff]   ;;  %v7992_v29 = vld [vmem:[%s11961_s7 + $0x388] ss:$16 sps:$4 sm:$0xff]  }
 0x53d   : > { %6174 = vadd.xlane.f32.xlu1 %v5917_v10  ;;  %5627 = vmatprep.mubr.bf16.mxu1 %v7990_v57 }
 0x53e   : > { %v10848_v50 = vpop.f32.mrb[212].mxu0  ;;  %v5413_v46 = vpop.f32.mrb[96].mxu1 }
 0x53f   : > { %v5414_v52 = vadd.f32 %v5413_v46, %v4869_v61  ;;  %v4998_v33 = vpop.f32.mrb[213].mxu0  ;;  %v5415_v59 = vpop.f32.mrb[97].mxu1  ;;  %v7996_v46 = vld [vmem:[%s11961_s7 + $0x3ac] ss:$16 sps:$4 sm:$0xff]  }
 0x540   : > { %v10858_v11 = vpop.f32.mrb[214].mxu0  ;;  %v5416_v31 = vpop.f32.mrb[98].mxu1  ;;  %v12149_v59 = vld [vmem:[#allocation57_spill] sm:$0xff] }
 0x541   : > { %v5918_v57 = vmax.f32 %v5414_v52, 0.0  ;;  %v5417_v38 = vadd.f32 %v5416_v31, %v4872_v28  ;;  %v5418_v61 = vpop.f32.mrb[99].mxu1  ;;  %v5001_v10 = vpop.f32.mrb[215].mxu0  ;;  %v4877_v44 = vadd.f32 %v10522_v43, %v12149_v59 }
 0x542   : > { %v10866_v12 = vpop.permute.xlu1 %3383  ;;  %v10868_v33 = vpop.permute.xlu0 %3378  ;;  %v12150_v61 = vld [vmem:[#allocation56_spill] sm:$0xff] }
 0x543   : > { %5211 = vmatmul.mubr.bf16.gmra.mrb[64].mxu0 %v7987_v49  ;;  %5628 = vmatmul.mubr.bf16.gmra.mrb[204].mxu1 %v7992_v29  ;;  %12147 = vst [vmem:[#allocation52_spill] sm:$0xff] %v10866_v12  ;;  %12148 = vst [vmem:[#allocation55_spill] sm:$0xff] %v10868_v33  ;;  %v5919_v52 = vmax.f32 %v5417_v38, 0.0  ;;  %v4880_v10 = vadd.f32 %v10532_v40, %v12150_v61  ;;  %v8002_v61 = vld [vmem:[%s11961_s7 + $0x3cc] ss:$16 sps:$4 sm:$0xff]   ;;  %v12153_v12 = vld [vmem:[#allocation59_spill] sm:$0xff] }
 0x544   : > { %6176 = vadd.xlane.f32.xlu0 %v5918_v57  ;;  %5218 = vmatprep.mubr.bf16.mxu0 %v7995_v5  ;;  %v7993_v5 = vld [vmem:[%s11961_s7 + $0x5a0] ss:$16 sps:$4 sm:$0xff]   ;;  %v7998_v57 = vld [vmem:[%s11961_s7 + $0x3a8] ss:$16 sps:$4 sm:$0xff]   ;;  %v4885_v33 = vadd.f32 %v10544_v42, %v12153_v12 }
 0x545   : > { %5635 = vmatprep.mubr.bf16.mxu1 %v7996_v46  ;;  %v8001_v46 = vld [vmem:[%s11961_s7 + $0x5c4] ss:$16 sps:$4 sm:$0xff]  }
 0x546   : > { %v10872_v28 = vpop.f32.mrb[216].mxu0  ;;  %v5421_v31 = vpop.f32.mrb[100].mxu1 }
 0x547   : > { %v5422_v17 = vadd.f32 %v5421_v31, %v4877_v44  ;;  %v5006_v49 = vpop.f32.mrb[217].mxu0  ;;  %v5423_v29 = vpop.f32.mrb[101].mxu1 }
 0x548   : > { %6178 = vadd.xlane.f32.xlu0 %v5919_v52  ;;  %v10882_v43 = vpop.f32.mrb[218].mxu0  ;;  %v5424_v38 = vpop.f32.mrb[102].mxu1 }
 0x549   : > { %v5920_v40 = vmax.f32 %v5422_v17, 0.0  ;;  %v5425_v44 = vadd.f32 %v5424_v38, %v4880_v10  ;;  %v5426_v59 = vpop.f32.mrb[103].mxu1  ;;  %v5009_v31 = vpop.f32.mrb[219].mxu0  ;;  %v12154_v38 = vld [vmem:[#allocation58_spill] sm:$0xff] }
 0x54a   : > { %v10890_v52 = vpop.permute.xlu1 %3393  ;;  %v10892_v29 = vpop.permute.xlu0 %3388  ;;  %v4888_v59 = vadd.f32 %v10554_v14, %v12154_v38  ;;  %v8007_v31 = vld [vmem:[%s11961_s7 + $0x5e4] ss:$16 sps:$4 sm:$0xff]  }
 0x54b   : > { %v5921_v49 = vmax.f32 %v5425_v44, 0.0  ;;  %5219 = vmatmul.mubr.bf16.gmra.mrb[68].mxu0 %v7993_v5  ;;  %5636 = vmatmul.mubr.bf16.gmra.mrb[208].mxu1 %v7998_v57  ;;  %12151 = vst [vmem:[#allocation54_spill] sm:$0xff] %v10890_v52  ;;  %12152 = vst [vmem:[#allocation57_spill] sm:$0xff] %v10892_v29  ;;  %v12157_v52 = vld [vmem:[#allocation61_spill] sm:$0xff] }
 0x54c   : > { %6180 = vadd.xlane.f32.xlu1 %v5920_v40  ;;  %5226 = vmatprep.mubr.bf16.mxu0 %v8001_v46  ;;  %v7999_v46 = vld [vmem:[%s11961_s7 + $0x5c0] ss:$16 sps:$4 sm:$0xff]   ;;  %v8004_v40 = vld [vmem:[%s11961_s7 + $0x3c8] ss:$16 sps:$4 sm:$0xff]   ;;  %v4893_v29 = vadd.f32 %v10566_v9, %v12157_v52 }
 0x54d   : > { %6182 = vadd.xlane.f32.xlu0 %v5921_v49  ;;  %5643 = vmatprep.mubr.bf16.mxu1 %v8002_v61 }
 0x54e   : > { %v10896_v17 = vpop.f32.mrb[220].mxu0  ;;  %v5429_v10 = vpop.f32.mrb[104].mxu1 }
 0x54f   : > { %v5430_v44 = vadd.f32 %v5429_v10, %v4885_v33  ;;  %v5014_v5 = vpop.f32.mrb[221].mxu0  ;;  %v5431_v57 = vpop.f32.mrb[105].mxu1  ;;  %v8008_v10 = vld [vmem:[%s11961_s7 + $0x3ec] ss:$16 sps:$4 sm:$0xff]  }
 0x550   : > { %v10906_v42 = vpop.f32.mrb[222].mxu0  ;;  %v5432_v12 = vpop.f32.mrb[106].mxu1 }
 0x551   : > { %v5922_v61 = vmax.f32 %v5430_v44, 0.0  ;;  %v5433_v14 = vadd.f32 %v5432_v12, %v4888_v59  ;;  %v5434_v33 = vpop.f32.mrb[107].mxu1  ;;  %v5017_v49 = vpop.f32.mrb[223].mxu0  ;;  %v12158_v12 = vld [vmem:[#allocation60_spill] sm:$0xff] }
 0x552   : > { %v10914_v5 = vpop.permute.xlu1 %3403  ;;  %v10916_v57 = vpop.permute.xlu0 %3398  ;;  %v4896_v33 = vadd.f32 %v10574_v27, %v12158_v12  ;;  %v8013_v49 = vld [vmem:[%s11961_s7 + $0x604] ss:$16 sps:$4 sm:$0xff]  }
 0x553   : > { %v5923_v38 = vmax.f32 %v5433_v14, 0.0  ;;  %5227 = vmatmul.mubr.bf16.gmra.mrb[72].mxu0 %v7999_v46  ;;  %5644 = vmatmul.mubr.bf16.gmra.mrb[212].mxu1 %v8004_v40  ;;  %12155 = vst [vmem:[#allocation56_spill] sm:$0xff] %v10914_v5  ;;  %12156 = vst [vmem:[#allocation59_spill] sm:$0xff] %v10916_v57  ;;  %v12161_v5 = vld [vmem:[#allocation63_spill] sm:$0xff] }
 0x554   : > { %6184 = vadd.xlane.f32.xlu1 %v5922_v61  ;;  %5234 = vmatprep.mubr.bf16.mxu0 %v8007_v31  ;;  %v8005_v31 = vld [vmem:[%s11961_s7 + $0x5e0] ss:$16 sps:$4 sm:$0xff]   ;;  %v8010_v61 = vld [vmem:[%s11961_s7 + $0x3e8] ss:$16 sps:$4 sm:$0xff]   ;;  %v4901_v57 = vadd.f32 %v10586_v45, %v12161_v5 }
 0x555   : > { %6186 = vadd.xlane.f32.xlu0 %v5923_v38  ;;  %5651 = vmatprep.mubr.bf16.mxu1 %v8008_v10 }
 0x556   : > { %v10920_v59 = vpop.f32.mrb[224].mxu0  ;;  %v5437_v44 = vpop.f32.mrb[108].mxu1 }
 0x557   : > { %v5438_v14 = vadd.f32 %v5437_v44, %v4893_v29  ;;  %v5022_v46 = vpop.f32.mrb[225].mxu0  ;;  %v5439_v40 = vpop.f32.mrb[109].mxu1  ;;  %v8014_v44 = vld [vmem:[%s11961_s7 + $0x40c] ss:$16 sps:$4 sm:$0xff]  }
 0x558   : > { %v10930_v9 = vpop.f32.mrb[226].mxu0  ;;  %v5440_v52 = vpop.f32.mrb[110].mxu1 }
 0x559   : > { %v5924_v10 = vmax.f32 %v5438_v14, 0.0  ;;  %v5441_v27 = vadd.f32 %v5440_v52, %v4896_v33  ;;  %v5442_v29 = vpop.f32.mrb[111].mxu1  ;;  %v5025_v38 = vpop.f32.mrb[227].mxu0  ;;  %v12162_v52 = vld [vmem:[#allocation62_spill] sm:$0xff] }
 0x55a   : > { %v10938_v46 = vpop.permute.xlu1 %3413  ;;  %v10940_v40 = vpop.permute.xlu0 %3408  ;;  %v4904_v29 = vadd.f32 %v10596_v47, %v12162_v52  ;;  %v8017_v38 = vld [vmem:[%s11961_s7 + $0x42c] ss:$16 sps:$4 sm:$0xff]  }
 0x55b   : > { %v5925_v12 = vmax.f32 %v5441_v27, 0.0  ;;  %5235 = vmatmul.mubr.bf16.gmra.mrb[76].mxu0 %v8005_v31  ;;  %5652 = vmatmul.mubr.bf16.gmra.mrb[216].mxu1 %v8010_v61  ;;  %12159 = vst [vmem:[#allocation58_spill] sm:$0xff] %v10938_v46  ;;  %12160 = vst [vmem:[#allocation61_spill] sm:$0xff] %v10940_v40 }
 0x55c   : > { %6188 = vadd.xlane.f32.xlu1 %v5924_v10  ;;  %5242 = vmatprep.mubr.bf16.mxu0 %v8013_v49  ;;  %v8011_v49 = vld [vmem:[%s11961_s7 + $0x600] ss:$16 sps:$4 sm:$0xff]   ;;  %v8016_v10 = vld [vmem:[%s11961_s7 + $0x408] ss:$16 sps:$4 sm:$0xff]  }
 0x55d   : > { %6190 = vadd.xlane.f32.xlu0 %v5925_v12  ;;  %5659 = vmatprep.mubr.bf16.mxu1 %v8014_v44 }
 0x55e   : > { %v10944_v33 = vpop.f32.mrb[228].mxu0  ;;  %v5445_v14 = vpop.f32.mrb[112].mxu1 }
 0x55f   : > { %v5446_v27 = vadd.f32 %v5445_v14, %v4901_v57  ;;  %v5030_v31 = vpop.f32.mrb[229].mxu0  ;;  %v5447_v61 = vpop.f32.mrb[113].mxu1 }
 0x560   : > { %v10954_v45 = vpop.f32.mrb[230].mxu0  ;;  %v5448_v5 = vpop.f32.mrb[114].mxu1  ;;  %v12166_v61 = vld [vmem:[#allocation65_spill] sm:$0xff] }
 0x561   : > { %12163 = vst [vmem:[#allocation60_spill] sm:$0xff] %v10954_v45  ;;  %v5926_v44 = vmax.f32 %v5446_v27, 0.0  ;;  %v5449_v47 = vadd.f32 %v5448_v5, %v4904_v29  ;;  %v5450_v57 = vpop.f32.mrb[115].mxu1  ;;  %v5033_v12 = vpop.f32.mrb[231].mxu0  ;;  %v4909_v46 = vadd.f32 %v10608_v56, %v12166_v61  ;;  %v12167_v27 = vld [vmem:[#allocation64_spill] sm:$0xff] }
 0x562   : > { %v10959_v52 = vpop.permute.xlu1 %3423  ;;  %v10961_v31 = vpop.permute.xlu0 %3418  ;;  %v4912_v29 = vadd.f32 %v10618_v36, %v12167_v27  ;;  %v8020_v56 = vld [vmem:[%s11961_s7 + $0x44c] ss:$16 sps:$4 sm:$0xff]  }
 0x563   : > { %v5927_v14 = vmax.f32 %v5449_v47, 0.0  ;;  %5243 = vmatmul.mubr.bf16.gmra.mrb[80].mxu0 %v8011_v49  ;;  %5660 = vmatmul.mubr.bf16.gmra.mrb[220].mxu1 %v8016_v10  ;;  %12164 = vst [vmem:[#allocation63_spill] sm:$0xff] %v10959_v52  ;;  %12165 = vst [vmem:[#allocation62_spill] sm:$0xff] %v10961_v31  ;;  %v8019_v10 = vld [vmem:[%s11961_s7 + $0x428] ss:$16 sps:$4 sm:$0xff]  }
 0x564   : > { %6192 = vadd.xlane.f32.xlu1 %v5926_v44  ;;  %5667 = vmatprep.mubr.bf16.mxu1 %v8017_v38  ;;  %v12171_v31 = vld [vmem:[#allocation66_spill] sm:$0xff] }
 0x565   : > { %6194 = vadd.xlane.f32.xlu0 %v5927_v14 }
 0x566   : > { %v10965_v40 = vpop.f32.mrb[232].mxu0  ;;  %v5453_v45 = vpop.f32.mrb[116].mxu1 }
 0x567   : > { %v5454_v5 = vadd.f32 %v5453_v45, %v4909_v46  ;;  %v5038_v47 = vpop.f32.mrb[233].mxu0  ;;  %v5455_v49 = vpop.f32.mrb[117].mxu1  ;;  %v12170_v45 = vld [vmem:[#allocation67_spill] sm:$0xff] }
 0x568   : > { %v10972_v38 = vpop.f32.mrb[234].mxu0  ;;  %v5456_v44 = vpop.f32.mrb[118].mxu1  ;;  %v4917_v27 = vadd.f32 %v10630_v60, %v12170_v45  ;;  %v8023_v60 = vld [vmem:[%s11961_s7 + $0x46c] ss:$16 sps:$4 sm:$0xff]  }
 0x569   : > { %v5928_v57 = vmax.f32 %v5454_v5, 0.0  ;;  %v5457_v12 = vadd.f32 %v5456_v44, %v4912_v29  ;;  %v5458_v14 = vpop.f32.mrb[119].mxu1  ;;  %v5041_v61 = vpop.f32.mrb[235].mxu0  ;;  %v4920_v29 = vadd.f32 %v10638_v8, %v12171_v31 }
 0x56a   : > { %v10977_v36 = vpop.permute.xlu1 %3433  ;;  %v10979_v46 = vpop.permute.xlu0 %3428 }
 0x56b   : > { %v5929_v52 = vmax.f32 %v5457_v12, 0.0  ;;  %5668 = vmatmul.mubr.bf16.gmra.mrb[224].mxu1 %v8019_v10  ;;  %6196 = vadd.xlane.f32.xlu1 %v5928_v57  ;;  %12168 = vst [vmem:[#allocation65_spill] sm:$0xff] %v10977_v36  ;;  %12169 = vst [vmem:[#allocation64_spill] sm:$0xff] %v10979_v46  ;;  %v8022_v10 = vld [vmem:[%s11961_s7 + $0x448] ss:$16 sps:$4 sm:$0xff]  }
 0x56c   : > { %5675 = vmatprep.mubr.bf16.mxu1 %v8020_v56  ;;  %v12175_v46 = vld [vmem:[#allocation68_spill] sm:$0xff] }
 0x56d   : > { %6198 = vadd.xlane.f32.xlu0 %v5929_v52 }
 0x56e   : > { %v10983_v47 = vpop.f32.mrb[236].mxu0  ;;  %v5461_v49 = vpop.f32.mrb[120].mxu1 }
 0x56f   : > { %v5462_v5 = vadd.f32 %v5461_v49, %v4917_v27  ;;  %v5046_v44 = vpop.f32.mrb[237].mxu0  ;;  %v5463_v12 = vpop.f32.mrb[121].mxu1  ;;  %v12174_v27 = vld [vmem:[#allocation69_spill] sm:$0xff] }
 0x570   : > { %v10990_v56 = vpop.f32.mrb[238].mxu0  ;;  %v5464_v57 = vpop.f32.mrb[122].mxu1  ;;  %v4925_v49 = vadd.f32 %v10650_v23, %v12174_v27  ;;  %v8026_v23 = vld [vmem:[%s11961_s7 + $0x48c] ss:$16 sps:$4 sm:$0xff]  }
 0x571   : > { %v5930_v52 = vmax.f32 %v5462_v5, 0.0  ;;  %v5465_v14 = vadd.f32 %v5464_v57, %v4920_v29  ;;  %v5466_v61 = vpop.f32.mrb[123].mxu1  ;;  %v5049_v45 = vpop.f32.mrb[239].mxu0  ;;  %v4928_v29 = vadd.f32 %v10660_v53, %v12175_v46 }
 0x572   : > { %v10995_v8 = vpop.permute.xlu1 %3443  ;;  %v10997_v31 = vpop.permute.xlu0 %3438 }
 0x573   : > { %v5931_v36 = vmax.f32 %v5465_v14, 0.0  ;;  %5676 = vmatmul.mubr.bf16.gmra.mrb[228].mxu1 %v8022_v10  ;;  %6200 = vadd.xlane.f32.xlu1 %v5930_v52  ;;  %12172 = vst [vmem:[#allocation67_spill] sm:$0xff] %v10995_v8  ;;  %12173 = vst [vmem:[#allocation66_spill] sm:$0xff] %v10997_v31  ;;  %v8025_v10 = vld [vmem:[%s11961_s7 + $0x468] ss:$16 sps:$4 sm:$0xff]  }
 0x574   : > { %5683 = vmatprep.mubr.bf16.mxu1 %v8023_v60  ;;  %v12179_v31 = vld [vmem:[#allocation70_spill] sm:$0xff] }
 0x575   : > { %6202 = vadd.xlane.f32.xlu0 %v5931_v36 }
 0x576   : > { %v11001_v44 = vpop.f32.mrb[240].mxu0  ;;  %v5469_v12 = vpop.f32.mrb[124].mxu1 }
 0x577   : > { %v5470_v5 = vadd.f32 %v5469_v12, %v4925_v49  ;;  %v5054_v57 = vpop.f32.mrb[241].mxu0  ;;  %v5471_v14 = vpop.f32.mrb[125].mxu1  ;;  %v12178_v49 = vld [vmem:[#allocation71_spill] sm:$0xff] }
 0x578   : > { %v11008_v60 = vpop.f32.mrb[242].mxu0  ;;  %v5472_v52 = vpop.f32.mrb[126].mxu1  ;;  %v4933_v12 = vadd.f32 %v10672_v26, %v12178_v49  ;;  %v8029_v26 = vld [vmem:[%s11961_s7 + $0x4ac] ss:$16 sps:$4 sm:$0xff]  }
 0x579   : > { %v5932_v36 = vmax.f32 %v5470_v5, 0.0  ;;  %v5473_v61 = vadd.f32 %v5472_v52, %v4928_v29  ;;  %v5474_v45 = vpop.f32.mrb[127].mxu1  ;;  %v5057_v27 = vpop.f32.mrb[243].mxu0  ;;  %v4936_v29 = vadd.f32 %v10682_v22, %v12179_v31 }
 0x57a   : > { %v11013_v53 = vpop.permute.xlu1 %3453  ;;  %v11015_v46 = vpop.permute.xlu0 %3448 }
 0x57b   : > { %v5933_v8 = vmax.f32 %v5473_v61, 0.0  ;;  %5684 = vmatmul.mubr.bf16.gmra.mrb[232].mxu1 %v8025_v10  ;;  %6204 = vadd.xlane.f32.xlu1 %v5932_v36  ;;  %12176 = vst [vmem:[#allocation69_spill] sm:$0xff] %v11013_v53  ;;  %12177 = vst [vmem:[#allocation68_spill] sm:$0xff] %v11015_v46  ;;  %v8028_v10 = vld [vmem:[%s11961_s7 + $0x488] ss:$16 sps:$4 sm:$0xff]  }
 0x57c   : > { %5691 = vmatprep.mubr.bf16.mxu1 %v8026_v23  ;;  %v12183_v46 = vld [vmem:[#allocation72_spill] sm:$0xff] }
 0x57d   : > { %6206 = vadd.xlane.f32.xlu0 %v5933_v8 }
 0x57e   : > { %v11019_v57 = vpop.f32.mrb[244].mxu0  ;;  %v5477_v14 = vpop.f32.mrb[128].mxu1 }
 0x57f   : > { %v5478_v5 = vadd.f32 %v5477_v14, %v4933_v12  ;;  %v5062_v52 = vpop.f32.mrb[245].mxu0  ;;  %v5479_v61 = vpop.f32.mrb[129].mxu1  ;;  %v12182_v12 = vld [vmem:[#allocation73_spill] sm:$0xff] }
 0x580   : > { %v11026_v23 = vpop.f32.mrb[246].mxu0  ;;  %v5480_v36 = vpop.f32.mrb[130].mxu1  ;;  %v4941_v14 = vadd.f32 %v10694_v35, %v12182_v12  ;;  %v8032_v35 = vld [vmem:[%s11961_s7 + $0x4cc] ss:$16 sps:$4 sm:$0xff]  }
 0x581   : > { %v5934_v8 = vmax.f32 %v5478_v5, 0.0  ;;  %v5481_v45 = vadd.f32 %v5480_v36, %v4936_v29  ;;  %v5482_v27 = vpop.f32.mrb[131].mxu1  ;;  %v5065_v49 = vpop.f32.mrb[247].mxu0  ;;  %v4944_v29 = vadd.f32 %v10702_v62, %v12183_v46 }
 0x582   : > { %v11031_v22 = vpop.permute.xlu1 %3463  ;;  %v11033_v31 = vpop.permute.xlu0 %3458 }
 0x583   : > { %v5935_v53 = vmax.f32 %v5481_v45, 0.0  ;;  %5692 = vmatmul.mubr.bf16.gmra.mrb[236].mxu1 %v8028_v10  ;;  %6208 = vadd.xlane.f32.xlu1 %v5934_v8  ;;  %12180 = vst [vmem:[#allocation71_spill] sm:$0xff] %v11031_v22  ;;  %12181 = vst [vmem:[#allocation70_spill] sm:$0xff] %v11033_v31  ;;  %v8031_v10 = vld [vmem:[%s11961_s7 + $0x4a8] ss:$16 sps:$4 sm:$0xff]  }
 0x584   : > { %5699 = vmatprep.mubr.bf16.mxu1 %v8029_v26  ;;  %v12187_v31 = vld [vmem:[#allocation74_spill] sm:$0xff] }
 0x585   : > { %6210 = vadd.xlane.f32.xlu0 %v5935_v53 }
 0x586   : > { %v11037_v52 = vpop.f32.mrb[248].mxu0  ;;  %v5485_v61 = vpop.f32.mrb[132].mxu1 }
 0x587   : > { %v5486_v5 = vadd.f32 %v5485_v61, %v4941_v14  ;;  %v5070_v36 = vpop.f32.mrb[249].mxu0  ;;  %v5487_v45 = vpop.f32.mrb[133].mxu1  ;;  %v12186_v14 = vld [vmem:[#allocation75_spill] sm:$0xff] }
 0x588   : > { %v11044_v26 = vpop.f32.mrb[250].mxu0  ;;  %v5488_v8 = vpop.f32.mrb[134].mxu1  ;;  %v4949_v61 = vadd.f32 %v10714_v25, %v12186_v14  ;;  %v8035_v25 = vld [vmem:[%s11961_s7 + $0x4ec] ss:$16 sps:$4 sm:$0xff]  }
 0x589   : > { %v5936_v53 = vmax.f32 %v5486_v5, 0.0  ;;  %v5489_v27 = vadd.f32 %v5488_v8, %v4944_v29  ;;  %v5490_v49 = vpop.f32.mrb[135].mxu1  ;;  %v5073_v12 = vpop.f32.mrb[251].mxu0  ;;  %v4952_v29 = vadd.f32 %v10724_v24, %v12187_v31 }
 0x58a   : > { %v11049_v62 = vpop.permute.xlu1 %3473  ;;  %v11051_v46 = vpop.permute.xlu0 %3468 }
 0x58b   : > { %v5937_v22 = vmax.f32 %v5489_v27, 0.0  ;;  %5700 = vmatmul.mubr.bf16.gmra.mrb[240].mxu1 %v8031_v10  ;;  %6212 = vadd.xlane.f32.xlu1 %v5936_v53  ;;  %12184 = vst [vmem:[#allocation73_spill] sm:$0xff] %v11049_v62  ;;  %12185 = vst [vmem:[#allocation72_spill] sm:$0xff] %v11051_v46  ;;  %v8034_v10 = vld [vmem:[%s11961_s7 + $0x4c8] ss:$16 sps:$4 sm:$0xff]  }
 0x58c   : > { %5707 = vmatprep.mubr.bf16.mxu1 %v8032_v35  ;;  %v12191_v46 = vld [vmem:[#allocation76_spill] sm:$0xff] }
 0x58d   : > { %6214 = vadd.xlane.f32.xlu0 %v5937_v22 }
 0x58e   : > { %v11055_v36 = vpop.f32.mrb[252].mxu0  ;;  %v5493_v45 = vpop.f32.mrb[136].mxu1 }
 0x58f   : > { %v5494_v5 = vadd.f32 %v5493_v45, %v4949_v61  ;;  %v5078_v8 = vpop.f32.mrb[253].mxu0  ;;  %v5495_v27 = vpop.f32.mrb[137].mxu1  ;;  %v12190_v61 = vld [vmem:[#allocation77_spill] sm:$0xff] }
 0x590   : > { %v11062_v35 = vpop.f32.mrb[254].mxu0  ;;  %v5496_v53 = vpop.f32.mrb[138].mxu1  ;;  %v4957_v45 = vadd.f32 %v10736_v37, %v12190_v61  ;;  %v8038_v37 = vld [vmem:[%s11961_s7 + $0x50c] ss:$16 sps:$4 sm:$0xff]  }
 0x591   : > { %v5938_v22 = vmax.f32 %v5494_v5, 0.0  ;;  %v5497_v49 = vadd.f32 %v5496_v53, %v4952_v29  ;;  %v5498_v12 = vpop.f32.mrb[139].mxu1  ;;  %v5081_v14 = vpop.f32.mrb[255].mxu0  ;;  %v4960_v29 = vadd.f32 %v10746_v58, %v12191_v46 }
 0x592   : > { %v11067_v24 = vpop.permute.xlu1 %3483  ;;  %v11069_v31 = vpop.permute.xlu0 %3478 }
 0x593   : > { %v5939_v62 = vmax.f32 %v5497_v49, 0.0  ;;  %5708 = vmatmul.mubr.bf16.gmra.mrb[244].mxu1 %v8034_v10  ;;  %6216 = vadd.xlane.f32.xlu1 %v5938_v22  ;;  %12188 = vst [vmem:[#allocation75_spill] sm:$0xff] %v11067_v24  ;;  %12189 = vst [vmem:[#allocation74_spill] sm:$0xff] %v11069_v31  ;;  %v8037_v10 = vld [vmem:[%s11961_s7 + $0x4e8] ss:$16 sps:$4 sm:$0xff]  }
 0x594   : > { %5715 = vmatprep.mubr.bf16.mxu1 %v8035_v25  ;;  %v12194_v31 = vld [vmem:[#allocation78_spill] sm:$0xff] }
 0x595   : > { %6218 = vadd.xlane.f32.xlu0 %v5939_v62 }
 0x596   : > { %v11073_v8 = vpop.f32.mrb[0].mxu0  ;;  %v5501_v27 = vpop.f32.mrb[140].mxu1 }
 0x597   : > { %v5502_v5 = vadd.f32 %v5501_v27, %v4957_v45  ;;  %v5086_v53 = vpop.f32.mrb[1].mxu0  ;;  %v5503_v49 = vpop.f32.mrb[141].mxu1  ;;  %v12193_v45 = vld [vmem:[#allocation79_spill] sm:$0xff] }
 0x598   : > { %v11080_v25 = vpop.f32.mrb[2].mxu0  ;;  %v5504_v22 = vpop.f32.mrb[142].mxu1  ;;  %v4965_v27 = vadd.f32 %v10758_v0, %v12193_v45  ;;  %v8043_v0 = vld [vmem:[%s11961_s7 + $0x52c] ss:$16 sps:$4 sm:$0xff]  }
 0x599   : > { %v5940_v62 = vmax.f32 %v5502_v5, 0.0  ;;  %v5505_v12 = vadd.f32 %v5504_v22, %v4960_v29  ;;  %v5506_v14 = vpop.f32.mrb[143].mxu1  ;;  %v5089_v61 = vpop.f32.mrb[3].mxu0  ;;  %v4968_v29 = vadd.f32 %v10766_v7, %v12194_v31 }
 0x59a   : > { %v11085_v58 = vpop.permute.xlu1 %3493  ;;  %v11087_v46 = vpop.permute.xlu0 %3488 }
 0x59b   : > { %v5941_v24 = vmax.f32 %v5505_v12, 0.0  ;;  %5716 = vmatmul.mubr.bf16.gmra.mrb[248].mxu1 %v8037_v10  ;;  %6220 = vadd.xlane.f32.xlu1 %v5940_v62  ;;  %12192 = vst [vmem:[#allocation77_spill] sm:$0xff] %v11085_v58  ;;  %v8040_v10 = vld [vmem:[%s11961_s7 + $0x508] ss:$16 sps:$4 sm:$0xff]  }
 0x59c   : > { %5723 = vmatprep.mubr.bf16.mxu1 %v8038_v37 }
 0x59d   : > { %6222 = vadd.xlane.f32.xlu0 %v5941_v24 }
 0x59e   : > { %v11091_v53 = vpop.f32.mrb[4].mxu0  ;;  %v5509_v49 = vpop.f32.mrb[144].mxu1 }
 0x59f   : > { %v5510_v5 = vadd.f32 %v5509_v49, %v4965_v27  ;;  %v5094_v22 = vpop.f32.mrb[5].mxu0  ;;  %v5511_v12 = vpop.f32.mrb[145].mxu1  ;;  %v4973_v27 = vadd.f32 %v10778_v55, %v9773_v30  ;;  %v8046_v30 = vld [vmem:[%s11961_s7 + $0x54c] ss:$16 sps:$4 sm:$0xff]  }
 0x5a0   : > { %v11098_v37 = vpop.f32.mrb[6].mxu0  ;;  %v5512_v62 = vpop.f32.mrb[146].mxu1 }
 0x5a1   : > { %v5942_v24 = vmax.f32 %v5510_v5, 0.0  ;;  %v5513_v14 = vadd.f32 %v5512_v62, %v4968_v29  ;;  %v5514_v61 = vpop.f32.mrb[147].mxu1  ;;  %v5097_v45 = vpop.f32.mrb[7].mxu0  ;;  %v4976_v29 = vadd.f32 %v10788_v39, %v9770_v20 }
 0x5a2   : > { %v11103_v7 = vpop.permute.xlu1 %3503  ;;  %v11105_v31 = vpop.permute.xlu0 %3498 }
 0x5a3   : > { %v5943_v58 = vmax.f32 %v5513_v14, 0.0  ;;  %5724 = vmatmul.mubr.bf16.gmra.mrb[252].mxu1 %v8040_v10  ;;  %6224 = vadd.xlane.f32.xlu1 %v5942_v24  ;;  %v8041_v10 = vld [vmem:[%s11961_s7 + $0x528] ss:$16 sps:$4 sm:$0xff]  }
 0x5a4   : > { %5731 = vmatprep.mubr.bf16.mxu1 %v8043_v0 }
 0x5a5   : > { %6226 = vadd.xlane.f32.xlu0 %v5943_v58 }
 0x5a6   : > { %v11109_v49 = vpop.f32.mrb[8].mxu0  ;;  %v5517_v22 = vpop.f32.mrb[148].mxu1 }
 0x5a7   : > { %v5518_v5 = vadd.f32 %v5517_v22, %v4973_v27  ;;  %v5102_v12 = vpop.f32.mrb[9].mxu0  ;;  %v5519_v62 = vpop.f32.mrb[149].mxu1  ;;  %v4981_v27 = vadd.f32 %v10800_v54, %v10372_v6  ;;  %v8049_v6 = vld [vmem:[%s11961_s7 + $0x56c] ss:$16 sps:$4 sm:$0xff]  }
 0x5a8   : > { %v11116_v0 = vpop.f32.mrb[10].mxu0  ;;  %v5520_v24 = vpop.f32.mrb[150].mxu1 }
 0x5a9   : > { %v5944_v55 = vmax.f32 %v5518_v5, 0.0  ;;  %v5521_v58 = vadd.f32 %v5520_v24, %v4976_v29  ;;  %v5522_v14 = vpop.f32.mrb[151].mxu1  ;;  %v5105_v61 = vpop.f32.mrb[11].mxu0  ;;  %v4984_v29 = vadd.f32 %v10810_v18, %v10364_v16 }
 0x5aa   : > { %v11121_v20 = vpop.permute.xlu1 %3513  ;;  %v11123_v39 = vpop.permute.xlu0 %3508 }
 0x5ab   : > { %v5945_v45 = vmax.f32 %v5521_v58, 0.0  ;;  %5732 = vmatmul.mubr.bf16.gmra.mrb[0].mxu1 %v8041_v10  ;;  %6228 = vadd.xlane.f32.xlu1 %v5944_v55  ;;  %v8044_v10 = vld [vmem:[%s11961_s7 + $0x548] ss:$16 sps:$4 sm:$0xff]  }
 0x5ac   : > { %5739 = vmatprep.mubr.bf16.mxu1 %v8046_v30 }
 0x5ad   : > { %6230 = vadd.xlane.f32.xlu0 %v5945_v45 }
 0x5ae   : > { %v11127_v22 = vpop.f32.mrb[12].mxu0  ;;  %v5525_v12 = vpop.f32.mrb[152].mxu1 }
 0x5af   : > { %v5526_v5 = vadd.f32 %v5525_v12, %v4981_v27  ;;  %v5110_v62 = vpop.f32.mrb[13].mxu0  ;;  %v5527_v24 = vpop.f32.mrb[153].mxu1  ;;  %v4989_v27 = vadd.f32 %v10824_v32, %v10376_v21  ;;  %v8052_v21 = vld [vmem:[%s11961_s7 + $0x58c] ss:$16 sps:$4 sm:$0xff]  }
 0x5b0   : > { %v11134_v30 = vpop.f32.mrb[14].mxu0  ;;  %v5528_v55 = vpop.f32.mrb[154].mxu1 }
 0x5b1   : > { %v5946_v54 = vmax.f32 %v5526_v5, 0.0  ;;  %v5529_v58 = vadd.f32 %v5528_v55, %v4984_v29  ;;  %v5530_v14 = vpop.f32.mrb[155].mxu1  ;;  %v5113_v61 = vpop.f32.mrb[15].mxu0  ;;  %v4992_v29 = vadd.f32 %v10834_v4, %v10374_v51 }
 0x5b2   : > { %v11139_v16 = vpop.permute.xlu1 %3523  ;;  %v11141_v18 = vpop.permute.xlu0 %3518 }
 0x5b3   : > { %v5947_v45 = vmax.f32 %v5529_v58, 0.0  ;;  %5740 = vmatmul.mubr.bf16.gmra.mrb[4].mxu1 %v8044_v10  ;;  %6232 = vadd.xlane.f32.xlu1 %v5946_v54  ;;  %v8047_v10 = vld [vmem:[%s11961_s7 + $0x568] ss:$16 sps:$4 sm:$0xff]  }
 0x5b4   : > { %5747 = vmatprep.mubr.bf16.mxu1 %v8049_v6 }
 0x5b5   : > { %6234 = vadd.xlane.f32.xlu0 %v5947_v45 }
 0x5b6   : > { %v11145_v12 = vpop.f32.mrb[16].mxu0  ;;  %v5533_v62 = vpop.f32.mrb[156].mxu1 }
 0x5b7   : > { %v5534_v5 = vadd.f32 %v5533_v62, %v4989_v27  ;;  %v5118_v24 = vpop.f32.mrb[17].mxu0  ;;  %v5535_v55 = vpop.f32.mrb[157].mxu1  ;;  %v4997_v27 = vadd.f32 %v10848_v50, %v10392_v34  ;;  %v8055_v34 = vld [vmem:[%s11961_s7 + $0x5ac] ss:$16 sps:$4 sm:$0xff]  }
 0x5b8   : > { %v11152_v6 = vpop.f32.mrb[18].mxu0  ;;  %v5536_v54 = vpop.f32.mrb[158].mxu1 }
 0x5b9   : > { %v5948_v32 = vmax.f32 %v5534_v5, 0.0  ;;  %v5537_v58 = vadd.f32 %v5536_v54, %v4992_v29  ;;  %v5538_v14 = vpop.f32.mrb[159].mxu1  ;;  %v5121_v61 = vpop.f32.mrb[19].mxu0  ;;  %v5000_v29 = vadd.f32 %v10858_v11, %v10390_v48 }
 0x5ba   : > { %v11157_v51 = vpop.permute.xlu1 %3533  ;;  %v11159_v4 = vpop.permute.xlu0 %3528 }
 0x5bb   : > { %v5949_v45 = vmax.f32 %v5537_v58, 0.0  ;;  %5748 = vmatmul.mubr.bf16.gmra.mrb[8].mxu1 %v8047_v10  ;;  %6236 = vadd.xlane.f32.xlu1 %v5948_v32  ;;  %v8050_v10 = vld [vmem:[%s11961_s7 + $0x588] ss:$16 sps:$4 sm:$0xff]  }
 0x5bc   : > { %5755 = vmatprep.mubr.bf16.mxu1 %v8052_v21 }
 0x5bd   : > { %6238 = vadd.xlane.f32.xlu0 %v5949_v45 }
 0x5be   : > { %v11163_v62 = vpop.f32.mrb[20].mxu0  ;;  %v5541_v24 = vpop.f32.mrb[160].mxu1 }
 0x5bf   : > { %v5542_v5 = vadd.f32 %v5541_v24, %v4997_v27  ;;  %v5126_v55 = vpop.f32.mrb[21].mxu0  ;;  %v5543_v54 = vpop.f32.mrb[161].mxu1  ;;  %v5005_v27 = vadd.f32 %v10872_v28, %v10408_v2  ;;  %v6045_v2 = vld [vmem:[%s8274_s26 + $0x8] sm:$0xff] }
 0x5c0   : > { %v11170_v21 = vpop.f32.mrb[22].mxu0  ;;  %v5544_v32 = vpop.f32.mrb[162].mxu1  ;;  %v8058_v28 = vld [vmem:[%s11961_s7 + $0x5cc] ss:$16 sps:$4 sm:$0xff]  }
 0x5c1   : > { %v5950_v50 = vmax.f32 %v5542_v5, 0.0  ;;  %v5545_v58 = vadd.f32 %v5544_v32, %v5000_v29  ;;  %v5546_v14 = vpop.f32.mrb[163].mxu1  ;;  %v5129_v61 = vpop.f32.mrb[23].mxu0  ;;  %v5008_v29 = vadd.f32 %v10882_v43, %v10406_v41  ;;  %v6044_v32 = vld [vmem:[%s8274_s26] sm:$0xff] }
 0x5c2   : > { %v11175_v11 = vpop.permute.xlu1 %3543  ;;  %v11177_v45 = vpop.permute.xlu0 %3538 }
 0x5c3   : > { %v5951_v48 = vmax.f32 %v5545_v58, 0.0  ;;  %5756 = vmatmul.mubr.bf16.gmra.mrb[12].mxu1 %v8050_v10  ;;  %6240 = vadd.xlane.f32.xlu1 %v5950_v50  ;;  %12195 = vst [vmem:[#allocation76_spill] sm:$0xff] %v11175_v11  ;;  %v5013_v11 = vadd.f32 %v10896_v17, %v10424_v15 }
 0x5c4   : > { %5763 = vmatprep.mubr.bf16.mxu1 %v8055_v34  ;;  %v8053_v34 = vld [vmem:[%s11961_s7 + $0x5a8] ss:$16 sps:$4 sm:$0xff]  }
 0x5c5   : > { %6242 = vadd.xlane.f32.xlu0 %v5951_v48 }
 0x5c6   : > { %v11181_v24 = vpop.f32.mrb[24].mxu0  ;;  %v5549_v5 = vpop.f32.mrb[164].mxu1 }
 0x5c7   : > { %v5550_v55 = vadd.f32 %v5549_v5, %v5005_v27  ;;  %v5134_v54 = vpop.f32.mrb[25].mxu0  ;;  %v5551_v10 = vpop.f32.mrb[165].mxu1 }
 0x5c8   : > { %v11189_v50 = vpop.f32.mrb[26].mxu0  ;;  %v5552_v58 = vpop.f32.mrb[166].mxu1 }
 0x5c9   : > { %v5952_v14 = vmax.f32 %v5550_v55, 0.0  ;;  %v5553_v41 = vadd.f32 %v5552_v58, %v5008_v29  ;;  %v6173_v43 = vpop.xlane.xlu0 %6172  ;;  %v5554_v61 = vpop.f32.mrb[167].mxu1 }
 0x5ca   : > { %v6428_v48 = vadd.f32 %v6173_v43, %v6044_v32  ;;  %v6175_v27 = vpop.xlane.xlu1 %6174  ;;  %v5137_v5 = vpop.f32.mrb[27].mxu0  ;;  %v5016_v32 = vadd.f32 %v10906_v42, %v10416_v19 }
 0x5cb   : > { %v5953_v54 = vmax.f32 %v5553_v41, 0.0  ;;  %v6429_v10 = vadd.f32 %v6175_v27, %v6045_v2  ;;  %5764 = vmatmul.mubr.bf16.gmra.mrb[16].mxu1 %v8053_v34  ;;  %6244 = vadd.xlane.f32.xlu1 %v5952_v14  ;;  %v6046_v2 = vld [vmem:[%s8274_s26 + $0x10] sm:$0xff]  ;;  %v8061_v14 = vld [vmem:[%s11961_s7 + $0x5ec] ss:$16 sps:$4 sm:$0xff]  }
 0x5cc   : > { %6557 = vst.msk [vmem:[%s8274_s26] sm:$0xff] %vm6556_vm4, %v6428_v48  ;;  %5771 = vmatprep.mubr.bf16.mxu1 %v8058_v28  ;;  %v8056_v28 = vld [vmem:[%s11961_s7 + $0x5c8] ss:$16 sps:$4 sm:$0xff]  }
 0x5cd   : > { %6558 = vst.msk [vmem:[%s8274_s26 + $0x8] sm:$0xff] %vm6556_vm4, %v6429_v10  ;;  %6246 = vadd.xlane.f32.xlu0 %v5953_v54  ;;  %v6047_v5 = vld [vmem:[%s8274_s26 + $0x18] sm:$0xff]  ;;  %v5021_v54 = vadd.f32 %v10920_v59, %v10428_v3 }
 0x5ce   : > { %v11201_v29 = vpop.f32.mrb[28].mxu0  ;;  %v5557_v55 = vpop.f32.mrb[168].mxu1 }
 0x5cf   : > { %v5558_v58 = vadd.f32 %v5557_v55, %v5013_v11  ;;  %v5142_v41 = vpop.f32.mrb[29].mxu0  ;;  %v5559_v34 = vpop.f32.mrb[169].mxu1 }
 0x5d0   : > { %v11209_v15 = vpop.f32.mrb[30].mxu0  ;;  %v5560_v17 = vpop.f32.mrb[170].mxu1  ;;  %v5024_v41 = vadd.f32 %v10930_v9, %v10426_v63  ;;  %v8064_v63 = vld [vmem:[%s11961_s7 + $0x60c] ss:$16 sps:$4 sm:$0xff]  }
 0x5d1   : > { %v5954_v43 = vmax.f32 %v5558_v58, 0.0  ;;  %v5561_v61 = vadd.f32 %v5560_v17, %v5016_v32  ;;  %v6177_v19 = vpop.xlane.xlu0 %6176  ;;  %v5562_v42 = vpop.f32.mrb[171].mxu1  ;;  %v6048_v17 = vld [vmem:[%s8274_s26 + $0x20] sm:$0xff] }
 0x5d2   : > { %v6430_v11 = vadd.f32 %v6177_v19, %v6046_v2  ;;  %v5145_v48 = vpop.f32.mrb[31].mxu0 }
 0x5d3   : > { %v5955_v27 = vmax.f32 %v5561_v61, 0.0  ;;  %5772 = vmatmul.mubr.bf16.gmra.mrb[20].mxu1 %v8056_v28  ;;  %6248 = vadd.xlane.f32.xlu1 %v5954_v43  ;;  %v6049_v43 = vld [vmem:[%s8274_s26 + $0x28] sm:$0xff] }
 0x5d4   : > { %6559 = vst.msk [vmem:[%s8274_s26 + $0x10] sm:$0xff] %vm6556_vm4, %v6430_v11  ;;  %5779 = vmatprep.mubr.bf16.mxu1 %v8061_v14  ;;  %v8059_v14 = vld [vmem:[%s11961_s7 + $0x5e8] ss:$16 sps:$4 sm:$0xff]  }
 0x5d5   : > { %v6179_v10 = vpop.xlane.xlu0 %6178  ;;  %6250 = vadd.xlane.f32.xlu0 %v5955_v27 }
 0x5d6   : > { %v6431_v55 = vadd.f32 %v6179_v10, %v6047_v5  ;;  %v11219_v32 = vpop.f32.mrb[32].mxu0  ;;  %v5565_v58 = vpop.f32.mrb[172].mxu1  ;;  %v5029_v10 = vadd.f32 %v10944_v33, %v10444_v13  ;;  %v6051_v33 = vld [vmem:[%s8274_s26 + $0x38] sm:$0xff] }
 0x5d7   : > { %v5566_v34 = vadd.f32 %v5565_v58, %v5021_v54  ;;  %v5150_v2 = vpop.f32.mrb[33].mxu0  ;;  %v5567_v28 = vpop.f32.mrb[173].mxu1 }
 0x5d8   : > { %6560 = vst.msk [vmem:[%s8274_s26 + $0x18] sm:$0xff] %vm6556_vm4, %v6431_v55  ;;  %v11229_v3 = vpop.f32.mrb[34].mxu0  ;;  %v5568_v59 = vpop.f32.mrb[174].mxu1 }
 0x5d9   : > { %v5956_v9 = vmax.f32 %v5566_v34, 0.0  ;;  %v5569_v61 = vadd.f32 %v5568_v59, %v5024_v41  ;;  %v6181_v19 = vpop.xlane.xlu1 %6180  ;;  %v5570_v42 = vpop.f32.mrb[175].mxu1  ;;  %v12196_v41 = vld [vmem:[#allocation60_spill] sm:$0xff] }
 0x5da   : > { %v6432_v11 = vadd.f32 %v6181_v19, %v6048_v17  ;;  %v6183_v48 = vpop.xlane.xlu0 %6182  ;;  %v5153_v27 = vpop.f32.mrb[35].mxu0  ;;  %v5032_v34 = vadd.f32 %v12196_v41, %v10442_v1  ;;  %v8062_v59 = vld [vmem:[%s11961_s7 + $0x608] ss:$16 sps:$4 sm:$0xff]  }
 0x5db   : > { %v5957_v5 = vmax.f32 %v5569_v61, 0.0  ;;  %v6433_v54 = vadd.f32 %v6183_v48, %v6049_v43  ;;  %5780 = vmatmul.mubr.bf16.gmra.mrb[24].mxu1 %v8059_v14  ;;  %6252 = vadd.xlane.f32.xlu1 %v5956_v9  ;;  %v6050_v14 = vld [vmem:[%s8274_s26 + $0x30] sm:$0xff] }
 0x5dc   : > { %6561 = vst.msk [vmem:[%s8274_s26 + $0x20] sm:$0xff] %vm6556_vm4, %v6432_v11  ;;  %5787 = vmatprep.mubr.bf16.mxu1 %v8064_v63  ;;  %v8065_v63 = vld [vmem:[%s11961_s7 + $0x62c] ss:$16 sps:$4 sm:$0xff]  }
 0x5dd   : > { %6562 = vst.msk [vmem:[%s8274_s26 + $0x28] sm:$0xff] %vm6556_vm4, %v6433_v54  ;;  %6254 = vadd.xlane.f32.xlu0 %v5957_v5  ;;  %v2719_v54 = vld [vmem:[%s11961_s7 + $0x628] sm:$0xff] }
 0x5de   : > { %v11241_v55 = vpop.f32.mrb[36].mxu0  ;;  %v5573_v58 = vpop.f32.mrb[176].mxu1 }
 0x5df   : > { %v5574_v2 = vadd.f32 %v5573_v58, %v5029_v10  ;;  %v5158_v28 = vpop.f32.mrb[37].mxu0  ;;  %v5575_v17 = vpop.f32.mrb[177].mxu1  ;;  %v2721_v10 = vld [vmem:[%s11961_s7 + $0x638] sm:$0xff]  ;;  %v12197_v58 = vld [vmem:[#allocation5_spill] sm:$0xff] }
 0x5e0   : > { %v11249_v43 = vpop.f32.mrb[38].mxu0  ;;  %v5576_v13 = vpop.f32.mrb[178].mxu1  ;;  %v5037_v41 = vadd.f32 %v10965_v40, %v12197_v58  ;;  %v12198_v28 = vld [vmem:[#allocation3_spill] sm:$0xff]  ;;  %v8067_v40 = vld [vmem:[%s11961_s7 + $0x64c] ss:$16 sps:$4 sm:$0xff]  }
 0x5e1   : > { %v5958_v9 = vmax.f32 %v5574_v2, 0.0  ;;  %v5577_v1 = vadd.f32 %v5576_v13, %v5032_v34  ;;  %v6185_v61 = vpop.xlane.xlu1 %6184  ;;  %v5578_v19 = vpop.f32.mrb[179].mxu1  ;;  %v5040_v17 = vadd.f32 %v10972_v38, %v12198_v28 }
 0x5e2   : > { %v6434_v42 = vadd.f32 %v6185_v61, %v6050_v14  ;;  %v6187_v11 = vpop.xlane.xlu0 %6186  ;;  %v5161_v48 = vpop.f32.mrb[39].mxu0  ;;  %v6053_v61 = vld [vmem:[%s8274_s26 + $0x48] sm:$0xff] }
 0x5e3   : > { %v5959_v27 = vmax.f32 %v5577_v1, 0.0  ;;  %v6435_v5 = vadd.f32 %v6187_v11, %v6051_v33  ;;  %5788 = vmatmul.mubr.bf16.gmra.mrb[28].mxu1 %v8062_v59  ;;  %6256 = vadd.xlane.f32.xlu1 %v5958_v9  ;;  %v6052_v33 = vld [vmem:[%s8274_s26 + $0x40] sm:$0xff]  ;;  %v7066_v9 = vcombine.low %v2719_v54, %v2721_v10  ;;  %v2723_v54 = vld [vmem:[%s11961_s7 + $0x648] sm:$0xff]  ;;  %v2725_v10 = vld [vmem:[%s11961_s7 + $0x658] sm:$0xff] }
 0x5e4   : > { %6563 = vst.msk [vmem:[%s8274_s26 + $0x30] sm:$0xff] %vm6556_vm4, %v6434_v42  ;;  %5795 = vmatprep.mubr.bf16.mxu1 %v8065_v63 }
 0x5e5   : > { %6564 = vst.msk [vmem:[%s8274_s26 + $0x38] sm:$0xff] %vm6556_vm4, %v6435_v5  ;;  %6258 = vadd.xlane.f32.xlu0 %v5959_v27 }
 0x5e6   : > { %v11267_v34 = vpop.f32.mrb[40].mxu0  ;;  %v5581_v2 = vpop.f32.mrb[180].mxu1 }
 0x5e7   : > { %v5582_v14 = vadd.f32 %v5581_v2, %v5037_v41  ;;  %v5166_v59 = vpop.f32.mrb[41].mxu0  ;;  %v5583_v13 = vpop.f32.mrb[181].mxu1  ;;  %v12199_v2 = vld [vmem:[#allocation7_spill] sm:$0xff] }
 0x5e8   : > { %v11272_v1 = vpop.f32.mrb[42].mxu0  ;;  %v5584_v63 = vpop.f32.mrb[182].mxu1  ;;  %v5045_v28 = vadd.f32 %v10983_v47, %v12199_v2  ;;  %v12200_v59 = vld [vmem:[#allocation4_spill] sm:$0xff] }
 0x5e9   : > { %v5960_v19 = vmax.f32 %v5582_v14, 0.0  ;;  %v5585_v42 = vadd.f32 %v5584_v63, %v5040_v17  ;;  %v6189_v11 = vpop.xlane.xlu1 %6188  ;;  %v5586_v48 = vpop.f32.mrb[183].mxu1  ;;  %v5048_v13 = vadd.f32 %v10990_v56, %v12200_v59  ;;  %v8069_v47 = vld [vmem:[%s11961_s7 + $0x66c] ss:$16 sps:$4 sm:$0xff]  }
 0x5ea   : > { %v6436_v38 = vadd.f32 %v6189_v11, %v6052_v33  ;;  %v6191_v27 = vpop.xlane.xlu0 %6190  ;;  %v5169_v5 = vpop.f32.mrb[43].mxu0  ;;  %v6055_v11 = vld [vmem:[%s8274_s26 + $0x58] sm:$0xff] }
 0x5eb   : > { %v5961_v58 = vmax.f32 %v5585_v42, 0.0  ;;  %v6437_v41 = vadd.f32 %v6191_v27, %v6053_v61  ;;  %5796 = vmatmul.mubr.bf16.gmra.mrb[32].mxu1 %v7066_v9  ;;  %6260 = vadd.xlane.f32.xlu1 %v5960_v19  ;;  %v6054_v61 = vld [vmem:[%s8274_s26 + $0x50] sm:$0xff]  ;;  %v7070_v19 = vcombine.low %v2723_v54, %v2725_v10  ;;  %v2727_v54 = vld [vmem:[%s11961_s7 + $0x668] sm:$0xff]  ;;  %v2729_v10 = vld [vmem:[%s11961_s7 + $0x678] sm:$0xff] }
 0x5ec   : > { %6565 = vst.msk [vmem:[%s8274_s26 + $0x40] sm:$0xff] %vm6556_vm4, %v6436_v38  ;;  %5803 = vmatprep.mubr.bf16.mxu1 %v8067_v40 }
 0x5ed   : > { %6566 = vst.msk [vmem:[%s8274_s26 + $0x48] sm:$0xff] %vm6556_vm4, %v6437_v41  ;;  %6262 = vadd.xlane.f32.xlu0 %v5961_v58 }
 0x5ee   : > { %v11290_v17 = vpop.f32.mrb[44].mxu0  ;;  %v5589_v14 = vpop.f32.mrb[184].mxu1 }
 0x5ef   : > { %v5590_v33 = vadd.f32 %v5589_v14, %v5045_v28  ;;  %v5174_v9 = vpop.f32.mrb[45].mxu0  ;;  %v5591_v63 = vpop.f32.mrb[185].mxu1  ;;  %v12201_v14 = vld [vmem:[#allocation9_spill] sm:$0xff] }
 0x5f0   : > { %v11295_v42 = vpop.f32.mrb[46].mxu0  ;;  %v5592_v40 = vpop.f32.mrb[186].mxu1  ;;  %v5053_v59 = vadd.f32 %v11001_v44, %v12201_v14  ;;  %v12202_v9 = vld [vmem:[#allocation6_spill] sm:$0xff] }
 0x5f1   : > { %v5962_v48 = vmax.f32 %v5590_v33, 0.0  ;;  %v5593_v38 = vadd.f32 %v5592_v40, %v5048_v13  ;;  %v6193_v27 = vpop.xlane.xlu1 %6192  ;;  %v5594_v5 = vpop.f32.mrb[187].mxu1  ;;  %v5056_v63 = vadd.f32 %v11008_v60, %v12202_v9  ;;  %v8071_v44 = vld [vmem:[%s11961_s7 + $0x68c] ss:$16 sps:$4 sm:$0xff]  }
 0x5f2   : > { %v6438_v56 = vadd.f32 %v6193_v27, %v6054_v61  ;;  %v6195_v58 = vpop.xlane.xlu0 %6194  ;;  %v5177_v41 = vpop.f32.mrb[47].mxu0  ;;  %v6057_v27 = vld [vmem:[%s8274_s26 + $0x68] sm:$0xff] }
 0x5f3   : > { %v5963_v2 = vmax.f32 %v5593_v38, 0.0  ;;  %v6439_v28 = vadd.f32 %v6195_v58, %v6055_v11  ;;  %5804 = vmatmul.mubr.bf16.gmra.mrb[36].mxu1 %v7070_v19  ;;  %6264 = vadd.xlane.f32.xlu1 %v5962_v48  ;;  %v6056_v11 = vld [vmem:[%s8274_s26 + $0x60] sm:$0xff]  ;;  %v7074_v48 = vcombine.low %v2727_v54, %v2729_v10  ;;  %v2731_v54 = vld [vmem:[%s11961_s7 + $0x688] sm:$0xff]  ;;  %v2733_v10 = vld [vmem:[%s11961_s7 + $0x698] sm:$0xff] }
 0x5f4   : > { %6567 = vst.msk [vmem:[%s8274_s26 + $0x50] sm:$0xff] %vm6556_vm4, %v6438_v56  ;;  %5811 = vmatprep.mubr.bf16.mxu1 %v8069_v47 }
 0x5f5   : > { %6568 = vst.msk [vmem:[%s8274_s26 + $0x58] sm:$0xff] %vm6556_vm4, %v6439_v28  ;;  %6266 = vadd.xlane.f32.xlu0 %v5963_v2 }
 0x5f6   : > { %v11313_v13 = vpop.f32.mrb[48].mxu0  ;;  %v5597_v33 = vpop.f32.mrb[188].mxu1 }
 0x5f7   : > { %v5598_v61 = vadd.f32 %v5597_v33, %v5053_v59  ;;  %v5182_v19 = vpop.f32.mrb[49].mxu0  ;;  %v5599_v40 = vpop.f32.mrb[189].mxu1  ;;  %v12203_v33 = vld [vmem:[#allocation11_spill] sm:$0xff] }
 0x5f8   : > { %v11318_v38 = vpop.f32.mrb[50].mxu0  ;;  %v5600_v47 = vpop.f32.mrb[190].mxu1  ;;  %v5061_v9 = vadd.f32 %v11019_v57, %v12203_v33  ;;  %v12204_v19 = vld [vmem:[#allocation8_spill] sm:$0xff] }
 0x5f9   : > { %v5964_v5 = vmax.f32 %v5598_v61, 0.0  ;;  %v5601_v56 = vadd.f32 %v5600_v47, %v5056_v63  ;;  %v6197_v58 = vpop.xlane.xlu1 %6196  ;;  %v5602_v41 = vpop.f32.mrb[191].mxu1  ;;  %v5064_v40 = vadd.f32 %v11026_v23, %v12204_v19  ;;  %v8073_v57 = vld [vmem:[%s11961_s7 + $0x6ac] ss:$16 sps:$4 sm:$0xff]  }
 0x5fa   : > { %v6440_v60 = vadd.f32 %v6197_v58, %v6056_v11  ;;  %v6199_v2 = vpop.xlane.xlu0 %6198  ;;  %v5185_v28 = vpop.f32.mrb[51].mxu0  ;;  %v6059_v58 = vld [vmem:[%s8274_s26 + $0x78] sm:$0xff] }
 0x5fb   : > { %v5965_v14 = vmax.f32 %v5601_v56, 0.0  ;;  %v6441_v59 = vadd.f32 %v6199_v2, %v6057_v27  ;;  %5812 = vmatmul.mubr.bf16.gmra.mrb[40].mxu1 %v7074_v48  ;;  %6268 = vadd.xlane.f32.xlu1 %v5964_v5  ;;  %v6058_v27 = vld [vmem:[%s8274_s26 + $0x70] sm:$0xff]  ;;  %v7078_v5 = vcombine.low %v2731_v54, %v2733_v10  ;;  %v2735_v54 = vld [vmem:[%s11961_s7 + $0x6a8] sm:$0xff]  ;;  %v2737_v10 = vld [vmem:[%s11961_s7 + $0x6b8] sm:$0xff] }
 0x5fc   : > { %6569 = vst.msk [vmem:[%s8274_s26 + $0x60] sm:$0xff] %vm6556_vm4, %v6440_v60  ;;  %5819 = vmatprep.mubr.bf16.mxu1 %v8071_v44 }
 0x5fd   : > { %6570 = vst.msk [vmem:[%s8274_s26 + $0x68] sm:$0xff] %vm6556_vm4, %v6441_v59  ;;  %6270 = vadd.xlane.f32.xlu0 %v5965_v14 }
 0x5fe   : > { %v11336_v63 = vpop.f32.mrb[52].mxu0  ;;  %v5605_v61 = vpop.f32.mrb[192].mxu1 }
 0x5ff   : > { %v5606_v11 = vadd.f32 %v5605_v61, %v5061_v9  ;;  %v5190_v48 = vpop.f32.mrb[53].mxu0  ;;  %v5607_v47 = vpop.f32.mrb[193].mxu1  ;;  %v12205_v61 = vld [vmem:[#allocation13_spill] sm:$0xff] }
 0x600   : > { %v11341_v56 = vpop.f32.mrb[54].mxu0  ;;  %v5608_v44 = vpop.f32.mrb[194].mxu1  ;;  %v5069_v19 = vadd.f32 %v11037_v52, %v12205_v61  ;;  %v12206_v48 = vld [vmem:[#allocation10_spill] sm:$0xff] }
 0x601   : > { %v5966_v41 = vmax.f32 %v5606_v11, 0.0  ;;  %v5609_v60 = vadd.f32 %v5608_v44, %v5064_v40  ;;  %v6201_v2 = vpop.xlane.xlu1 %6200  ;;  %v5610_v28 = vpop.f32.mrb[195].mxu1  ;;  %v5072_v47 = vadd.f32 %v11044_v26, %v12206_v48  ;;  %v8075_v52 = vld [vmem:[%s11961_s7 + $0x6cc] ss:$16 sps:$4 sm:$0xff]  }
 0x602   : > { %v6442_v23 = vadd.f32 %v6201_v2, %v6058_v27  ;;  %v6203_v14 = vpop.xlane.xlu0 %6202  ;;  %v5193_v59 = vpop.f32.mrb[55].mxu0  ;;  %v6061_v2 = vld [vmem:[%s8274_s26 + $0x88] sm:$0xff] }
 0x603   : > { %v5967_v33 = vmax.f32 %v5609_v60, 0.0  ;;  %v6443_v9 = vadd.f32 %v6203_v14, %v6059_v58  ;;  %5820 = vmatmul.mubr.bf16.gmra.mrb[44].mxu1 %v7078_v5  ;;  %6272 = vadd.xlane.f32.xlu1 %v5966_v41  ;;  %v6060_v58 = vld [vmem:[%s8274_s26 + $0x80] sm:$0xff]  ;;  %v7082_v41 = vcombine.low %v2735_v54, %v2737_v10  ;;  %v2739_v54 = vld [vmem:[%s11961_s7 + $0x6c8] sm:$0xff]  ;;  %v2741_v10 = vld [vmem:[%s11961_s7 + $0x6d8] sm:$0xff] }
 0x604   : > { %6571 = vst.msk [vmem:[%s8274_s26 + $0x70] sm:$0xff] %vm6556_vm4, %v6442_v23  ;;  %5827 = vmatprep.mubr.bf16.mxu1 %v8073_v57 }
 0x605   : > { %6572 = vst.msk [vmem:[%s8274_s26 + $0x78] sm:$0xff] %vm6556_vm4, %v6443_v9  ;;  %6274 = vadd.xlane.f32.xlu0 %v5967_v33 }
 0x606   : > { %v11359_v40 = vpop.f32.mrb[56].mxu0  ;;  %v5613_v11 = vpop.f32.mrb[196].mxu1 }
 0x607   : > { %v5614_v27 = vadd.f32 %v5613_v11, %v5069_v19  ;;  %v5198_v5 = vpop.f32.mrb[57].mxu0  ;;  %v5615_v44 = vpop.f32.mrb[197].mxu1  ;;  %v12207_v11 = vld [vmem:[#allocation15_spill] sm:$0xff] }
 0x608   : > { %v11364_v60 = vpop.f32.mrb[58].mxu0  ;;  %v5616_v57 = vpop.f32.mrb[198].mxu1  ;;  %v5077_v48 = vadd.f32 %v11055_v36, %v12207_v11  ;;  %v12208_v5 = vld [vmem:[#allocation12_spill] sm:$0xff] }
 0x609   : > { %v5968_v28 = vmax.f32 %v5614_v27, 0.0  ;;  %v5617_v23 = vadd.f32 %v5616_v57, %v5072_v47  ;;  %v6205_v14 = vpop.xlane.xlu1 %6204  ;;  %v5618_v59 = vpop.f32.mrb[199].mxu1  ;;  %v5080_v44 = vadd.f32 %v11062_v35, %v12208_v5  ;;  %v8077_v36 = vld [vmem:[%s11961_s7 + $0x6ec] ss:$16 sps:$4 sm:$0xff]  }
 0x60a   : > { %v6444_v26 = vadd.f32 %v6205_v14, %v6060_v58  ;;  %v6207_v33 = vpop.xlane.xlu0 %6206  ;;  %v5201_v9 = vpop.f32.mrb[59].mxu0  ;;  %v6063_v14 = vld [vmem:[%s8274_s26 + $0x98] sm:$0xff] }
 0x60b   : > { %v5969_v61 = vmax.f32 %v5617_v23, 0.0  ;;  %v6445_v19 = vadd.f32 %v6207_v33, %v6061_v2  ;;  %5828 = vmatmul.mubr.bf16.gmra.mrb[48].mxu1 %v7082_v41  ;;  %6276 = vadd.xlane.f32.xlu1 %v5968_v28  ;;  %v6062_v2 = vld [vmem:[%s8274_s26 + $0x90] sm:$0xff]  ;;  %v7086_v28 = vcombine.low %v2739_v54, %v2741_v10  ;;  %v2743_v54 = vld [vmem:[%s11961_s7 + $0x6e8] sm:$0xff]  ;;  %v2745_v10 = vld [vmem:[%s11961_s7 + $0x6f8] sm:$0xff] }
 0x60c   : > { %6573 = vst.msk [vmem:[%s8274_s26 + $0x80] sm:$0xff] %vm6556_vm4, %v6444_v26  ;;  %5835 = vmatprep.mubr.bf16.mxu1 %v8075_v52 }
 0x60d   : > { %6574 = vst.msk [vmem:[%s8274_s26 + $0x88] sm:$0xff] %vm6556_vm4, %v6445_v19  ;;  %6278 = vadd.xlane.f32.xlu0 %v5969_v61 }
 0x60e   : > { %v11382_v47 = vpop.f32.mrb[60].mxu0  ;;  %v5621_v27 = vpop.f32.mrb[200].mxu1 }
 0x60f   : > { %v5622_v58 = vadd.f32 %v5621_v27, %v5077_v48  ;;  %v5206_v41 = vpop.f32.mrb[61].mxu0  ;;  %v5623_v57 = vpop.f32.mrb[201].mxu1  ;;  %v12209_v27 = vld [vmem:[#allocation17_spill] sm:$0xff] }
 0x610   : > { %v11387_v23 = vpop.f32.mrb[62].mxu0  ;;  %v5624_v52 = vpop.f32.mrb[202].mxu1  ;;  %v5085_v5 = vadd.f32 %v11073_v8, %v12209_v27  ;;  %v12210_v41 = vld [vmem:[#allocation14_spill] sm:$0xff] }
 0x611   : > { %v5970_v59 = vmax.f32 %v5622_v58, 0.0  ;;  %v5625_v26 = vadd.f32 %v5624_v52, %v5080_v44  ;;  %v6209_v33 = vpop.xlane.xlu1 %6208  ;;  %v5626_v9 = vpop.f32.mrb[203].mxu1  ;;  %v5088_v57 = vadd.f32 %v11080_v25, %v12210_v41  ;;  %v8079_v8 = vld [vmem:[%s11961_s7 + $0x70c] ss:$16 sps:$4 sm:$0xff]  }
 0x612   : > { %v6446_v35 = vadd.f32 %v6209_v33, %v6062_v2  ;;  %v6211_v61 = vpop.xlane.xlu0 %6210  ;;  %v5209_v19 = vpop.f32.mrb[63].mxu0  ;;  %v6065_v33 = vld [vmem:[%s8274_s26 + $0xa8] sm:$0xff] }
 0x613   : > { %v5971_v11 = vmax.f32 %v5625_v26, 0.0  ;;  %v6447_v48 = vadd.f32 %v6211_v61, %v6063_v14  ;;  %5836 = vmatmul.mubr.bf16.gmra.mrb[52].mxu1 %v7086_v28  ;;  %6280 = vadd.xlane.f32.xlu1 %v5970_v59  ;;  %v6064_v14 = vld [vmem:[%s8274_s26 + $0xa0] sm:$0xff]  ;;  %v7090_v59 = vcombine.low %v2743_v54, %v2745_v10  ;;  %v2747_v54 = vld [vmem:[%s11961_s7 + $0x708] sm:$0xff]  ;;  %v2749_v10 = vld [vmem:[%s11961_s7 + $0x718] sm:$0xff] }
 0x614   : > { %6575 = vst.msk [vmem:[%s8274_s26 + $0x90] sm:$0xff] %vm6556_vm4, %v6446_v35  ;;  %5843 = vmatprep.mubr.bf16.mxu1 %v8077_v36 }
 0x615   : > { %6576 = vst.msk [vmem:[%s8274_s26 + $0x98] sm:$0xff] %vm6556_vm4, %v6447_v48  ;;  %6282 = vadd.xlane.f32.xlu0 %v5971_v11 }
 0x616   : > { %v11405_v44 = vpop.f32.mrb[64].mxu0  ;;  %v5629_v58 = vpop.f32.mrb[204].mxu1 }
 0x617   : > { %v5630_v2 = vadd.f32 %v5629_v58, %v5085_v5  ;;  %v5214_v28 = vpop.f32.mrb[65].mxu0  ;;  %v5631_v52 = vpop.f32.mrb[205].mxu1  ;;  %v12211_v58 = vld [vmem:[#allocation19_spill] sm:$0xff] }
 0x618   : > { %v11410_v26 = vpop.f32.mrb[66].mxu0  ;;  %v5632_v36 = vpop.f32.mrb[206].mxu1  ;;  %v5093_v41 = vadd.f32 %v11091_v53, %v12211_v58  ;;  %v12212_v28 = vld [vmem:[#allocation16_spill] sm:$0xff] }
 0x619   : > { %v5972_v9 = vmax.f32 %v5630_v2, 0.0  ;;  %v5633_v35 = vadd.f32 %v5632_v36, %v5088_v57  ;;  %v6213_v61 = vpop.xlane.xlu1 %6212  ;;  %v5634_v19 = vpop.f32.mrb[207].mxu1  ;;  %v5096_v52 = vadd.f32 %v11098_v37, %v12212_v28  ;;  %v8081_v53 = vld [vmem:[%s11961_s7 + $0x72c] ss:$16 sps:$4 sm:$0xff]  }
 0x61a   : > { %v6448_v25 = vadd.f32 %v6213_v61, %v6064_v14  ;;  %v6215_v11 = vpop.xlane.xlu0 %6214  ;;  %v5217_v48 = vpop.f32.mrb[67].mxu0  ;;  %v6067_v61 = vld [vmem:[%s8274_s26 + $0xb8] sm:$0xff] }
 0x61b   : > { %v5973_v27 = vmax.f32 %v5633_v35, 0.0  ;;  %v6449_v5 = vadd.f32 %v6215_v11, %v6065_v33  ;;  %5844 = vmatmul.mubr.bf16.gmra.mrb[56].mxu1 %v7090_v59  ;;  %6284 = vadd.xlane.f32.xlu1 %v5972_v9  ;;  %v6066_v33 = vld [vmem:[%s8274_s26 + $0xb0] sm:$0xff]  ;;  %v7094_v9 = vcombine.low %v2747_v54, %v2749_v10  ;;  %v2751_v54 = vld [vmem:[%s11961_s7 + $0x728] sm:$0xff]  ;;  %v2753_v10 = vld [vmem:[%s11961_s7 + $0x738] sm:$0xff] }
 0x61c   : > { %6577 = vst.msk [vmem:[%s8274_s26 + $0xa0] sm:$0xff] %vm6556_vm4, %v6448_v25  ;;  %5851 = vmatprep.mubr.bf16.mxu1 %v8079_v8 }
 0x61d   : > { %6578 = vst.msk [vmem:[%s8274_s26 + $0xa8] sm:$0xff] %vm6556_vm4, %v6449_v5  ;;  %6286 = vadd.xlane.f32.xlu0 %v5973_v27 }
 0x61e   : > { %v11428_v57 = vpop.f32.mrb[68].mxu0  ;;  %v5637_v2 = vpop.f32.mrb[208].mxu1 }
 0x61f   : > { %v5638_v14 = vadd.f32 %v5637_v2, %v5093_v41  ;;  %v5222_v59 = vpop.f32.mrb[69].mxu0  ;;  %v5639_v36 = vpop.f32.mrb[209].mxu1  ;;  %v12213_v2 = vld [vmem:[#allocation21_spill] sm:$0xff] }
 0x620   : > { %v11433_v35 = vpop.f32.mrb[70].mxu0  ;;  %v5640_v8 = vpop.f32.mrb[210].mxu1  ;;  %v5101_v28 = vadd.f32 %v11109_v49, %v12213_v2  ;;  %v12214_v59 = vld [vmem:[#allocation18_spill] sm:$0xff] }
 0x621   : > { %v5974_v19 = vmax.f32 %v5638_v14, 0.0  ;;  %v5641_v25 = vadd.f32 %v5640_v8, %v5096_v52  ;;  %v6217_v11 = vpop.xlane.xlu1 %6216  ;;  %v5642_v48 = vpop.f32.mrb[211].mxu1  ;;  %v5104_v36 = vadd.f32 %v11116_v0, %v12214_v59  ;;  %v8083_v49 = vld [vmem:[%s11961_s7 + $0x74c] ss:$16 sps:$4 sm:$0xff]  }
 0x622   : > { %v6450_v37 = vadd.f32 %v6217_v11, %v6066_v33  ;;  %v6219_v27 = vpop.xlane.xlu0 %6218  ;;  %v5225_v5 = vpop.f32.mrb[71].mxu0  ;;  %v6069_v11 = vld [vmem:[%s8274_s26 + $0xc8] sm:$0xff] }
 0x623   : > { %v5975_v58 = vmax.f32 %v5641_v25, 0.0  ;;  %v6451_v41 = vadd.f32 %v6219_v27, %v6067_v61  ;;  %5852 = vmatmul.mubr.bf16.gmra.mrb[60].mxu1 %v7094_v9  ;;  %6288 = vadd.xlane.f32.xlu1 %v5974_v19  ;;  %v6068_v61 = vld [vmem:[%s8274_s26 + $0xc0] sm:$0xff]  ;;  %v7098_v19 = vcombine.low %v2751_v54, %v2753_v10  ;;  %v2755_v54 = vld [vmem:[%s11961_s7 + $0x748] sm:$0xff]  ;;  %v2757_v10 = vld [vmem:[%s11961_s7 + $0x758] sm:$0xff] }
 0x624   : > { %6579 = vst.msk [vmem:[%s8274_s26 + $0xb0] sm:$0xff] %vm6556_vm4, %v6450_v37  ;;  %5859 = vmatprep.mubr.bf16.mxu1 %v8081_v53 }
 0x625   : > { %6580 = vst.msk [vmem:[%s8274_s26 + $0xb8] sm:$0xff] %vm6556_vm4, %v6451_v41  ;;  %6290 = vadd.xlane.f32.xlu0 %v5975_v58 }
 0x626   : > { %v11451_v52 = vpop.f32.mrb[72].mxu0  ;;  %v5645_v14 = vpop.f32.mrb[212].mxu1 }
 0x627   : > { %v5646_v33 = vadd.f32 %v5645_v14, %v5101_v28  ;;  %v5230_v9 = vpop.f32.mrb[73].mxu0  ;;  %v5647_v8 = vpop.f32.mrb[213].mxu1  ;;  %v12215_v14 = vld [vmem:[#allocation23_spill] sm:$0xff] }
 0x628   : > { %v11456_v25 = vpop.f32.mrb[74].mxu0  ;;  %v5648_v53 = vpop.f32.mrb[214].mxu1  ;;  %v5109_v59 = vadd.f32 %v11127_v22, %v12215_v14  ;;  %v12216_v9 = vld [vmem:[#allocation20_spill] sm:$0xff] }
 0x629   : > { %v5976_v48 = vmax.f32 %v5646_v33, 0.0  ;;  %v5649_v37 = vadd.f32 %v5648_v53, %v5104_v36  ;;  %v6221_v27 = vpop.xlane.xlu1 %6220  ;;  %v5650_v5 = vpop.f32.mrb[215].mxu1  ;;  %v5112_v8 = vadd.f32 %v11134_v30, %v12216_v9  ;;  %v8085_v22 = vld [vmem:[%s11961_s7 + $0x76c] ss:$16 sps:$4 sm:$0xff]  }
 0x62a   : > { %v6452_v0 = vadd.f32 %v6221_v27, %v6068_v61  ;;  %v6223_v58 = vpop.xlane.xlu0 %6222  ;;  %v5233_v41 = vpop.f32.mrb[75].mxu0  ;;  %v6071_v27 = vld [vmem:[%s8274_s26 + $0xd8] sm:$0xff] }
 0x62b   : > { %v5977_v2 = vmax.f32 %v5649_v37, 0.0  ;;  %v6453_v28 = vadd.f32 %v6223_v58, %v6069_v11  ;;  %5860 = vmatmul.mubr.bf16.gmra.mrb[64].mxu1 %v7098_v19  ;;  %6292 = vadd.xlane.f32.xlu1 %v5976_v48  ;;  %v6070_v11 = vld [vmem:[%s8274_s26 + $0xd0] sm:$0xff]  ;;  %v7102_v48 = vcombine.low %v2755_v54, %v2757_v10  ;;  %v2759_v54 = vld [vmem:[%s11961_s7 + $0x768] sm:$0xff]  ;;  %v2761_v10 = vld [vmem:[%s11961_s7 + $0x778] sm:$0xff] }
 0x62c   : > { %6581 = vst.msk [vmem:[%s8274_s26 + $0xc0] sm:$0xff] %vm6556_vm4, %v6452_v0  ;;  %5867 = vmatprep.mubr.bf16.mxu1 %v8083_v49 }
 0x62d   : > { %6582 = vst.msk [vmem:[%s8274_s26 + $0xc8] sm:$0xff] %vm6556_vm4, %v6453_v28  ;;  %6294 = vadd.xlane.f32.xlu0 %v5977_v2 }
 0x62e   : > { %v11474_v36 = vpop.f32.mrb[76].mxu0  ;;  %v5653_v33 = vpop.f32.mrb[216].mxu1 }
 0x62f   : > { %v5654_v61 = vadd.f32 %v5653_v33, %v5109_v59  ;;  %v5238_v19 = vpop.f32.mrb[77].mxu0  ;;  %v5655_v53 = vpop.f32.mrb[217].mxu1  ;;  %v12217_v33 = vld [vmem:[#allocation25_spill] sm:$0xff] }
 0x630   : > { %v11479_v37 = vpop.f32.mrb[78].mxu0  ;;  %v5656_v49 = vpop.f32.mrb[218].mxu1  ;;  %v5117_v9 = vadd.f32 %v11145_v12, %v12217_v33  ;;  %v12218_v19 = vld [vmem:[#allocation22_spill] sm:$0xff] }
 0x631   : > { %v5978_v5 = vmax.f32 %v5654_v61, 0.0  ;;  %v5657_v0 = vadd.f32 %v5656_v49, %v5112_v8  ;;  %v6225_v58 = vpop.xlane.xlu1 %6224  ;;  %v5658_v41 = vpop.f32.mrb[219].mxu1  ;;  %v5120_v53 = vadd.f32 %v11152_v6, %v12218_v19  ;;  %v8087_v12 = vld [vmem:[%s11961_s7 + $0x78c] ss:$16 sps:$4 sm:$0xff]  }
 0x632   : > { %v6454_v30 = vadd.f32 %v6225_v58, %v6070_v11  ;;  %v6227_v2 = vpop.xlane.xlu0 %6226  ;;  %v5241_v28 = vpop.f32.mrb[79].mxu0  ;;  %v6073_v58 = vld [vmem:[%s8274_s26 + $0xe8] sm:$0xff] }
 0x633   : > { %v5979_v14 = vmax.f32 %v5657_v0, 0.0  ;;  %v6455_v59 = vadd.f32 %v6227_v2, %v6071_v27  ;;  %5868 = vmatmul.mubr.bf16.gmra.mrb[68].mxu1 %v7102_v48  ;;  %6296 = vadd.xlane.f32.xlu1 %v5978_v5  ;;  %v6072_v27 = vld [vmem:[%s8274_s26 + $0xe0] sm:$0xff]  ;;  %v7106_v5 = vcombine.low %v2759_v54, %v2761_v10  ;;  %v2763_v10 = vld [vmem:[%s11961_s7 + $0x788] sm:$0xff] }
 0x634   : > { %6583 = vst.msk [vmem:[%s8274_s26 + $0xd0] sm:$0xff] %vm6556_vm4, %v6454_v30  ;;  %5875 = vmatprep.mubr.bf16.mxu1 %v8085_v22 }
 0x635   : > { %6584 = vst.msk [vmem:[%s8274_s26 + $0xd8] sm:$0xff] %vm6556_vm4, %v6455_v59  ;;  %6298 = vadd.xlane.f32.xlu0 %v5979_v14 }
 0x636   : > { %v11497_v8 = vpop.f32.mrb[80].mxu0  ;;  %v5661_v61 = vpop.f32.mrb[220].mxu1 }
 0x637   : > { %v5662_v11 = vadd.f32 %v5661_v61, %v5117_v9  ;;  %v5246_v48 = vpop.f32.mrb[81].mxu0  ;;  %v5663_v49 = vpop.f32.mrb[221].mxu1  ;;  %v2765_v9 = vld [vmem:[%s11961_s7 + $0x798] sm:$0xff]  ;;  %v12219_v61 = vld [vmem:[#allocation27_spill] sm:$0xff] }
 0x638   : > { %v11502_v0 = vpop.f32.mrb[82].mxu0  ;;  %v5664_v22 = vpop.f32.mrb[222].mxu1  ;;  %v5125_v19 = vadd.f32 %v11163_v62, %v12219_v61  ;;  %v12220_v48 = vld [vmem:[#allocation24_spill] sm:$0xff] }
 0x639   : > { %v5980_v41 = vmax.f32 %v5662_v11, 0.0  ;;  %v5665_v30 = vadd.f32 %v5664_v22, %v5120_v53  ;;  %v6229_v2 = vpop.xlane.xlu1 %6228  ;;  %v5666_v28 = vpop.f32.mrb[223].mxu1  ;;  %v6074_v11 = vld [vmem:[%s8274_s26 + $0xf0] sm:$0xff]  ;;  %v5128_v49 = vadd.f32 %v11170_v21, %v12220_v48  ;;  %v7110_v22 = vcombine.low %v2763_v10, %v2765_v9  ;;  %v8089_v62 = vld [vmem:[%s11961_s7 + $0x7ac] ss:$16 sps:$4 sm:$0xff]   ;;  %v12221_v10 = vld [vmem:[#allocation29_spill] sm:$0xff] }
 0x63a   : > { %v6456_v6 = vadd.f32 %v6229_v2, %v6072_v27  ;;  %v6231_v14 = vpop.xlane.xlu0 %6230  ;;  %v5249_v59 = vpop.f32.mrb[83].mxu0  ;;  %v5133_v9 = vadd.f32 %v11181_v24, %v12221_v10  ;;  %v8091_v24 = vld [vmem:[%s11961_s7 + $0x7cc] ss:$16 sps:$4 sm:$0xff]  }
 0x63b   : > { %v5981_v33 = vmax.f32 %v5665_v30, 0.0  ;;  %v6457_v54 = vadd.f32 %v6231_v14, %v6073_v58  ;;  %5876 = vmatmul.mubr.bf16.gmra.mrb[72].mxu1 %v7106_v5  ;;  %6300 = vadd.xlane.f32.xlu1 %v5980_v41  ;;  %v6075_v30 = vld [vmem:[%s8274_s26 + $0xf8] sm:$0xff] }
 0x63c   : > { %6585 = vst.msk [vmem:[%s8274_s26 + $0xe0] sm:$0xff] %vm6556_vm4, %v6456_v6  ;;  %5883 = vmatprep.mubr.bf16.mxu1 %v8087_v12  ;;  %v12224_v10 = vld [vmem:[#allocation28_spill] sm:$0xff] }
 0x63d   : > { %6586 = vst.msk [vmem:[%s8274_s26 + $0xe8] sm:$0xff] %vm6556_vm4, %v6457_v54  ;;  %6302 = vadd.xlane.f32.xlu0 %v5981_v33  ;;  %v2767_v33 = vld [vmem:[%s11961_s7 + $0x7a8] sm:$0xff]  ;;  %v2769_v54 = vld [vmem:[%s11961_s7 + $0x7b8] sm:$0xff] }
 0x63e   : > { %v5669_v53 = vpop.f32.mrb[224].mxu1 }
 0x63f   : > { %v5670_v27 = vadd.f32 %v5669_v53, %v5125_v19  ;;  %v5671_v5 = vpop.f32.mrb[225].mxu1  ;;  %v6076_v19 = vld [vmem:[%s8274_s26 + $0x100] sm:$0xff]  ;;  %v12222_v53 = vld [vmem:[#allocation26_spill] sm:$0xff] }
 0x640   : > { %v5672_v58 = vpop.f32.mrb[226].mxu1  ;;  %v6233_v41 = vpop.xlane.xlu1 %6232 }
 0x641   : > { %v5982_v12 = vmax.f32 %v5670_v27, 0.0  ;;  %v5673_v2 = vadd.f32 %v5672_v58, %v5128_v49  ;;  %v6458_v28 = vadd.f32 %v6233_v41, %v6074_v11  ;;  %v5674_v6 = vpop.f32.mrb[227].mxu1  ;;  %v5136_v11 = vadd.f32 %v11189_v50, %v12222_v53  ;;  %v6077_v58 = vld [vmem:[%s8274_s26 + $0x108] sm:$0xff] }
 0x642   : > { %v6235_v14 = vpop.xlane.xlu0 %6234  ;;  %v7114_v27 = vcombine.low %v2767_v33, %v2769_v54  ;;  %v2771_v6 = vld [vmem:[%s11961_s7 + $0x7c8] sm:$0xff]  ;;  %v6078_v54 = vld [vmem:[%s8274_s26 + $0x110] sm:$0xff] }
 0x643   : > { %v5983_v59 = vmax.f32 %v5673_v2, 0.0  ;;  %6587 = vst.msk [vmem:[%s8274_s26 + $0xf0] sm:$0xff] %vm6556_vm4, %v6458_v28  ;;  %v6459_v21 = vadd.f32 %v6235_v14, %v6075_v30  ;;  %5884 = vmatmul.mubr.bf16.gmra.mrb[76].mxu1 %v7110_v22  ;;  %6304 = vadd.xlane.f32.xlu1 %v5982_v12  ;;  %v2773_v14 = vld [vmem:[%s11961_s7 + $0x7d8] sm:$0xff] }
 0x644   : > { %5891 = vmatprep.mubr.bf16.mxu1 %v8089_v62  ;;  %v7118_v53 = vcombine.low %v2771_v6, %v2773_v14  ;;  %v12226_v6 = vld [vmem:[#allocation30_spill] sm:$0xff] }
 0x645   : > { %6588 = vst.msk [vmem:[%s8274_s26 + $0xf8] sm:$0xff] %vm6556_vm4, %v6459_v21  ;;  %6306 = vadd.xlane.f32.xlu0 %v5983_v59  ;;  %v12223_v59 = vld [vmem:[#allocation31_spill] sm:$0xff]  ;;  %v5152_v14 = vadd.f32 %v11229_v3, %v12226_v6 }
 0x646   : > { %v5677_v61 = vpop.f32.mrb[228].mxu1  ;;  %v5141_v21 = vadd.f32 %v11201_v29, %v12223_v59  ;;  %v8093_v29 = vld [vmem:[%s11961_s7 + $0x7ec] ss:$16 sps:$4 sm:$0xff]   ;;  %v12227_v3 = vld [vmem:[#allocation35_spill] sm:$0xff] }
 0x647   : > { %v5678_v48 = vadd.f32 %v5677_v61, %v5133_v9  ;;  %v5679_v49 = vpop.f32.mrb[229].mxu1  ;;  %v5144_v9 = vadd.f32 %v11209_v15, %v12224_v10 }
 0x648   : > { %v5680_v5 = vpop.f32.mrb[230].mxu1  ;;  %v6237_v22 = vpop.xlane.xlu1 %6236  ;;  %v6079_v49 = vld [vmem:[%s8274_s26 + $0x118] sm:$0xff] }
 0x649   : > { %v5984_v41 = vmax.f32 %v5678_v48, 0.0  ;;  %v5681_v30 = vadd.f32 %v5680_v5, %v5136_v11  ;;  %v6460_v62 = vadd.f32 %v6237_v22, %v6076_v19  ;;  %v5682_v12 = vpop.f32.mrb[231].mxu1 }
 0x64a   : > { %v6239_v2 = vpop.xlane.xlu0 %6238  ;;  %v12225_v12 = vld [vmem:[#allocation33_spill] sm:$0xff] }
 0x64b   : > { %v5985_v28 = vmax.f32 %v5681_v30, 0.0  ;;  %6589 = vst.msk [vmem:[%s8274_s26 + $0x100] sm:$0xff] %vm6556_vm4, %v6460_v62  ;;  %v6461_v50 = vadd.f32 %v6239_v2, %v6077_v58  ;;  %5892 = vmatmul.mubr.bf16.gmra.mrb[80].mxu1 %v7114_v27  ;;  %6308 = vadd.xlane.f32.xlu1 %v5984_v41  ;;  %v2775_v30 = vld [vmem:[%s11961_s7 + $0x7e8] sm:$0xff]  ;;  %v2777_v62 = vld [vmem:[%s11961_s7 + $0x7f8] sm:$0xff]  ;;  %v5149_v2 = vadd.f32 %v11219_v32, %v12225_v12 }
 0x64c   : > { %5899 = vmatprep.mubr.bf16.mxu1 %v8091_v24 }
 0x64d   : > { %6590 = vst.msk [vmem:[%s8274_s26 + $0x108] sm:$0xff] %vm6556_vm4, %v6461_v50  ;;  %6310 = vadd.xlane.f32.xlu0 %v5985_v28  ;;  %v6080_v50 = vld [vmem:[%s8274_s26 + $0x120] sm:$0xff] }
 0x64e   : > { %v5685_v33 = vpop.f32.mrb[232].mxu1 }
 0x64f   : > { %v5686_v61 = vadd.f32 %v5685_v33, %v5141_v21  ;;  %v5687_v19 = vpop.f32.mrb[233].mxu1  ;;  %v7122_v33 = vcombine.low %v2775_v30, %v2777_v62  ;;  %v6083_v62 = vld [vmem:[%s8274_s26 + $0x138] sm:$0xff] }
 0x650   : > { %v5688_v11 = vpop.f32.mrb[234].mxu1  ;;  %v6241_v48 = vpop.xlane.xlu1 %6240 }
 0x651   : > { %v5986_v27 = vmax.f32 %v5686_v61, 0.0  ;;  %v5689_v5 = vadd.f32 %v5688_v11, %v5144_v9  ;;  %v6462_v22 = vadd.f32 %v6241_v48, %v6078_v54  ;;  %v5690_v58 = vpop.f32.mrb[235].mxu1  ;;  %v6081_v9 = vld [vmem:[%s8274_s26 + $0x128] sm:$0xff] }
 0x652   : > { %v6243_v24 = vpop.xlane.xlu0 %6242 }
 0x653   : > { %v5987_v41 = vmax.f32 %v5689_v5, 0.0  ;;  %6591 = vst.msk [vmem:[%s8274_s26 + $0x110] sm:$0xff] %vm6556_vm4, %v6462_v22  ;;  %v6463_v15 = vadd.f32 %v6243_v24, %v6079_v49  ;;  %5900 = vmatmul.mubr.bf16.gmra.mrb[84].mxu1 %v7118_v53  ;;  %6312 = vadd.xlane.f32.xlu1 %v5986_v27  ;;  %v6082_v5 = vld [vmem:[%s8274_s26 + $0x130] sm:$0xff]  ;;  %v12228_v22 = vld [vmem:[#allocation32_spill] sm:$0xff] }
 0x654   : > { %5907 = vmatprep.mubr.bf16.mxu1 %v8093_v29  ;;  %v5157_v29 = vadd.f32 %v11241_v55, %v12227_v3  ;;  %v5160_v58 = vadd.f32 %v11249_v43, %v12228_v22 }
 0x655   : > { %6592 = vst.msk [vmem:[%s8274_s26 + $0x118] sm:$0xff] %vm6556_vm4, %v6463_v15  ;;  %6314 = vadd.xlane.f32.xlu0 %v5987_v41 }
 0x656   : > { %v5693_v28 = vpop.f32.mrb[236].mxu1 }
 0x657   : > { %v5694_v59 = vadd.f32 %v5693_v28, %v5149_v2  ;;  %v5695_v21 = vpop.f32.mrb[237].mxu1 }
 0x658   : > { %v5696_v54 = vpop.f32.mrb[238].mxu1  ;;  %v6245_v10 = vpop.xlane.xlu1 %6244 }
 0x659   : > { %v5988_v61 = vmax.f32 %v5694_v59, 0.0  ;;  %v5697_v19 = vadd.f32 %v5696_v54, %v5152_v14  ;;  %v6464_v32 = vadd.f32 %v6245_v10, %v6080_v50  ;;  %v5698_v53 = vpop.f32.mrb[239].mxu1  ;;  %v12229_v59 = vld [vmem:[#allocation37_spill] sm:$0xff]  ;;  %v12230_v54 = vld [vmem:[#allocation34_spill] sm:$0xff] }
 0x65a   : > { %v6247_v11 = vpop.xlane.xlu0 %6246  ;;  %v5165_v43 = vadd.f32 %v11267_v34, %v12229_v59  ;;  %v5168_v10 = vadd.f32 %v11272_v1, %v12230_v54  ;;  %v6085_v53 = vld [vmem:[%s8274_s26 + $0x148] sm:$0xff] }
 0x65b   : > { %v5989_v48 = vmax.f32 %v5697_v19, 0.0  ;;  %6593 = vst.msk [vmem:[%s8274_s26 + $0x120] sm:$0xff] %vm6556_vm4, %v6464_v32  ;;  %v6465_v49 = vadd.f32 %v6247_v11, %v6081_v9  ;;  %5908 = vmatmul.mubr.bf16.gmra.mrb[88].mxu1 %v7122_v33  ;;  %6316 = vadd.xlane.f32.xlu1 %v5988_v61  ;;  %v6084_v33 = vld [vmem:[%s8274_s26 + $0x140] sm:$0xff]  ;;  %v12234_v54 = vld [vmem:[#allocation38_spill] sm:$0xff] }
 0x65d   : > { %6594 = vst.msk [vmem:[%s8274_s26 + $0x128] sm:$0xff] %vm6556_vm4, %v6465_v49  ;;  %6318 = vadd.xlane.f32.xlu0 %v5989_v48 }
 0x65e   : > { %v5701_v27 = vpop.f32.mrb[240].mxu1 }
 0x65f   : > { %v5702_v24 = vadd.f32 %v5701_v27, %v5157_v29  ;;  %v5703_v41 = vpop.f32.mrb[241].mxu1 }
 0x660   : > { %v5704_v15 = vpop.f32.mrb[242].mxu1  ;;  %v6249_v30 = vpop.xlane.xlu1 %6248 }
 0x661   : > { %v5990_v12 = vmax.f32 %v5702_v24, 0.0  ;;  %v5705_v2 = vadd.f32 %v5704_v15, %v5160_v58  ;;  %v6466_v28 = vadd.f32 %v6249_v30, %v6082_v5  ;;  %v5706_v55 = vpop.f32.mrb[243].mxu1  ;;  %v12231_v5 = vld [vmem:[#allocation39_spill] sm:$0xff]  ;;  %v12232_v24 = vld [vmem:[#allocation36_spill] sm:$0xff] }
 0x662   : > { %v6251_v50 = vpop.xlane.xlu0 %6250  ;;  %v5173_v1 = vadd.f32 %v11290_v17, %v12231_v5  ;;  %v6086_v58 = vld [vmem:[%s8274_s26 + $0x150] sm:$0xff]  ;;  %v5176_v41 = vadd.f32 %v11295_v42, %v12232_v24 }
 0x663   : > { %v5991_v6 = vmax.f32 %v5705_v2, 0.0  ;;  %6595 = vst.msk [vmem:[%s8274_s26 + $0x130] sm:$0xff] %vm6556_vm4, %v6466_v28  ;;  %v6467_v14 = vadd.f32 %v6251_v50, %v6083_v62  ;;  %6320 = vadd.xlane.f32.xlu1 %v5990_v12  ;;  %v6087_v2 = vld [vmem:[%s8274_s26 + $0x158] sm:$0xff] }
 0x665   : > { %6596 = vst.msk [vmem:[%s8274_s26 + $0x138] sm:$0xff] %vm6556_vm4, %v6467_v14  ;;  %6322 = vadd.xlane.f32.xlu0 %v5991_v6 }
 0x666   : > { %v5709_v21 = vpop.f32.mrb[244].mxu1 }
 0x667   : > { %v5710_v9 = vadd.f32 %v5709_v21, %v5165_v43  ;;  %v5711_v61 = vpop.f32.mrb[245].mxu1  ;;  %v12233_v43 = vld [vmem:[#allocation41_spill] sm:$0xff] }
 0x668   : > { %v5712_v19 = vpop.f32.mrb[246].mxu1  ;;  %v6253_v32 = vpop.xlane.xlu1 %6252  ;;  %v5181_v42 = vadd.f32 %v11313_v13, %v12233_v43  ;;  %v12238_v43 = vld [vmem:[#allocation42_spill] sm:$0xff] }
 0x669   : > { %v5992_v11 = vmax.f32 %v5710_v9, 0.0  ;;  %v5713_v48 = vadd.f32 %v5712_v19, %v5168_v10  ;;  %v6468_v49 = vadd.f32 %v6253_v32, %v6084_v33  ;;  %v5714_v34 = vpop.f32.mrb[247].mxu1  ;;  %v6088_v33 = vld [vmem:[%s8274_s26 + $0x160] sm:$0xff]  ;;  %v5184_v10 = vadd.f32 %v11318_v38, %v12234_v54 }
 0x66a   : > { %v6255_v3 = vpop.xlane.xlu0 %6254 }
 0x66b   : > { %v5993_v29 = vmax.f32 %v5713_v48, 0.0  ;;  %6597 = vst.msk [vmem:[%s8274_s26 + $0x140] sm:$0xff] %vm6556_vm4, %v6468_v49  ;;  %v6469_v27 = vadd.f32 %v6255_v3, %v6085_v53  ;;  %6324 = vadd.xlane.f32.xlu1 %v5992_v11  ;;  %v6089_v53 = vld [vmem:[%s8274_s26 + $0x168] sm:$0xff] }
 0x66d   : > { %6598 = vst.msk [vmem:[%s8274_s26 + $0x148] sm:$0xff] %vm6556_vm4, %v6469_v27  ;;  %6326 = vadd.xlane.f32.xlu0 %v5993_v29  ;;  %v12235_v27 = vld [vmem:[#allocation43_spill] sm:$0xff] }
 0x66e   : > { %v5717_v22 = vpop.f32.mrb[248].mxu1  ;;  %v5189_v38 = vadd.f32 %v11336_v63, %v12235_v27 }
 0x66f   : > { %v5718_v15 = vadd.f32 %v5717_v22, %v5173_v1  ;;  %v5719_v30 = vpop.f32.mrb[249].mxu1  ;;  %v6090_v1 = vld [vmem:[%s8274_s26 + $0x170] sm:$0xff]  ;;  %v12236_v22 = vld [vmem:[#allocation40_spill] sm:$0xff] }
 0x670   : > { %v5720_v62 = vpop.f32.mrb[250].mxu1  ;;  %v6257_v12 = vpop.xlane.xlu1 %6256 }
 0x671   : > { %v5994_v28 = vmax.f32 %v5718_v15, 0.0  ;;  %v5721_v55 = vadd.f32 %v5720_v62, %v5176_v41  ;;  %v6470_v50 = vadd.f32 %v6257_v12, %v6086_v58  ;;  %v5722_v17 = vpop.f32.mrb[251].mxu1  ;;  %v5192_v58 = vadd.f32 %v11341_v56, %v12236_v22  ;;  %v6091_v62 = vld [vmem:[%s8274_s26 + $0x178] sm:$0xff] }
 0x672   : > { %v6259_v6 = vpop.xlane.xlu0 %6258  ;;  %v6095_v22 = vld [vmem:[%s8274_s26 + $0x198] sm:$0xff] }
 0x673   : > { %v5995_v14 = vmax.f32 %v5721_v55, 0.0  ;;  %6599 = vst.msk [vmem:[%s8274_s26 + $0x150] sm:$0xff] %vm6556_vm4, %v6470_v50  ;;  %v6471_v59 = vadd.f32 %v6259_v6, %v6087_v2  ;;  %6328 = vadd.xlane.f32.xlu1 %v5994_v28  ;;  %v12237_v6 = vld [vmem:[#allocation45_spill] sm:$0xff] }
 0x674   : > { %v5197_v56 = vadd.f32 %v11359_v40, %v12237_v6 }
 0x675   : > { %6600 = vst.msk [vmem:[%s8274_s26 + $0x158] sm:$0xff] %vm6556_vm4, %v6471_v59  ;;  %6330 = vadd.xlane.f32.xlu0 %v5995_v14  ;;  %v6092_v59 = vld [vmem:[%s8274_s26 + $0x180] sm:$0xff] }
 0x676   : > { %v5725_v21 = vpop.f32.mrb[252].mxu1 }
 0x677   : > { %v5726_v9 = vadd.f32 %v5725_v21, %v5181_v42  ;;  %v5727_v61 = vpop.f32.mrb[253].mxu1  ;;  %v5200_v42 = vadd.f32 %v11364_v60, %v12238_v43 }
 0x678   : > { %v5728_v19 = vpop.f32.mrb[254].mxu1  ;;  %v6261_v32 = vpop.xlane.xlu1 %6260 }
 0x679   : > { %v5996_v11 = vmax.f32 %v5726_v9, 0.0  ;;  %v5729_v48 = vadd.f32 %v5728_v19, %v5184_v10  ;;  %v6472_v49 = vadd.f32 %v6261_v32, %v6088_v33  ;;  %v5730_v13 = vpop.f32.mrb[255].mxu1  ;;  %v6093_v9 = vld [vmem:[%s8274_s26 + $0x188] sm:$0xff] }
 0x67a   : > { %v6263_v34 = vpop.xlane.xlu0 %6262 }
 0x67b   : > { %v5997_v3 = vmax.f32 %v5729_v48, 0.0  ;;  %6601 = vst.msk [vmem:[%s8274_s26 + $0x160] sm:$0xff] %vm6556_vm4, %v6472_v49  ;;  %v6473_v29 = vadd.f32 %v6263_v34, %v6089_v53  ;;  %6332 = vadd.xlane.f32.xlu1 %v5996_v11  ;;  %v12239_v49 = vld [vmem:[#allocation47_spill] sm:$0xff] }
 0x67c   : > { %v5205_v60 = vadd.f32 %v11382_v47, %v12239_v49  ;;  %v6094_v34 = vld [vmem:[%s8274_s26 + $0x190] sm:$0xff]  ;;  %v6099_v49 = vld [vmem:[%s8274_s26 + $0x1b8] sm:$0xff] }
 0x67d   : > { %6602 = vst.msk [vmem:[%s8274_s26 + $0x168] sm:$0xff] %vm6556_vm4, %v6473_v29  ;;  %6334 = vadd.xlane.f32.xlu0 %v5997_v3  ;;  %v12240_v3 = vld [vmem:[#allocation44_spill] sm:$0xff] }
 0x67e   : > { %v5733_v5 = vpop.f32.mrb[0].mxu1  ;;  %v5208_v29 = vadd.f32 %v11387_v23, %v12240_v3 }
 0x67f   : > { %v5734_v24 = vadd.f32 %v5733_v5, %v5189_v38  ;;  %v5735_v41 = vpop.f32.mrb[1].mxu1 }
 0x680   : > { %v5736_v15 = vpop.f32.mrb[2].mxu1  ;;  %v6265_v30 = vpop.xlane.xlu1 %6264 }
 0x681   : > { %v5998_v12 = vmax.f32 %v5734_v24, 0.0  ;;  %v5737_v2 = vadd.f32 %v5736_v15, %v5192_v58  ;;  %v6474_v28 = vadd.f32 %v6265_v30, %v6090_v1  ;;  %v5738_v63 = vpop.f32.mrb[3].mxu1 }
 0x682   : > { %v6267_v55 = vpop.xlane.xlu0 %6266  ;;  %v12242_v63 = vld [vmem:[#allocation46_spill] sm:$0xff] }
 0x683   : > { %v5999_v50 = vmax.f32 %v5737_v2, 0.0  ;;  %6603 = vst.msk [vmem:[%s8274_s26 + $0x170] sm:$0xff] %vm6556_vm4, %v6474_v28  ;;  %v6475_v17 = vadd.f32 %v6267_v55, %v6091_v62  ;;  %6336 = vadd.xlane.f32.xlu1 %v5998_v12  ;;  %v12241_v12 = vld [vmem:[#allocation49_spill] sm:$0xff]  ;;  %v5216_v55 = vadd.f32 %v11410_v26, %v12242_v63 }
 0x684   : > { %v5213_v23 = vadd.f32 %v11405_v44, %v12241_v12  ;;  %v6096_v28 = vld [vmem:[%s8274_s26 + $0x1a0] sm:$0xff] }
 0x685   : > { %6604 = vst.msk [vmem:[%s8274_s26 + $0x178] sm:$0xff] %vm6556_vm4, %v6475_v17  ;;  %6338 = vadd.xlane.f32.xlu0 %v5999_v50 }
 0x686   : > { %v5741_v14 = vpop.f32.mrb[4].mxu1 }
 0x687   : > { %v5742_v21 = vadd.f32 %v5741_v14, %v5197_v56  ;;  %v5743_v33 = vpop.f32.mrb[5].mxu1  ;;  %v6097_v14 = vld [vmem:[%s8274_s26 + $0x1a8] sm:$0xff] }
 0x688   : > { %v5744_v54 = vpop.f32.mrb[6].mxu1  ;;  %v6269_v10 = vpop.xlane.xlu1 %6268 }
 0x689   : > { %v6000_v61 = vmax.f32 %v5742_v21, 0.0  ;;  %v5745_v19 = vadd.f32 %v5744_v54, %v5200_v42  ;;  %v6476_v32 = vadd.f32 %v6269_v10, %v6092_v59  ;;  %v5746_v40 = vpop.f32.mrb[7].mxu1  ;;  %v12243_v10 = vld [vmem:[#allocation51_spill] sm:$0xff] }
 0x68a   : > { %v6271_v53 = vpop.xlane.xlu0 %6270  ;;  %v5221_v26 = vadd.f32 %v11428_v57, %v12243_v10 }
 0x68b   : > { %v6001_v11 = vmax.f32 %v5745_v19, 0.0  ;;  %6605 = vst.msk [vmem:[%s8274_s26 + $0x180] sm:$0xff] %vm6556_vm4, %v6476_v32  ;;  %v6477_v48 = vadd.f32 %v6271_v53, %v6093_v9  ;;  %6340 = vadd.xlane.f32.xlu1 %v6000_v61  ;;  %v6098_v61 = vld [vmem:[%s8274_s26 + $0x1b0] sm:$0xff]  ;;  %v12244_v19 = vld [vmem:[#allocation48_spill] sm:$0xff] }
 0x68c   : > { %v5224_v32 = vadd.f32 %v11433_v35, %v12244_v19 }
 0x68d   : > { %6606 = vst.msk [vmem:[%s8274_s26 + $0x188] sm:$0xff] %vm6556_vm4, %v6477_v48  ;;  %6342 = vadd.xlane.f32.xlu0 %v6001_v11 }
 0x68e   : > { %v5749_v13 = vpop.f32.mrb[8].mxu1 }
 0x68f   : > { %v5750_v27 = vadd.f32 %v5749_v13, %v5205_v60  ;;  %v5751_v38 = vpop.f32.mrb[9].mxu1 }
 0x690   : > { %v5752_v5 = vpop.f32.mrb[10].mxu1  ;;  %v6273_v1 = vpop.xlane.xlu1 %6272  ;;  %v12245_v38 = vld [vmem:[#allocation53_spill] sm:$0xff] }
 0x691   : > { %v6002_v58 = vmax.f32 %v5750_v27, 0.0  ;;  %v5753_v24 = vadd.f32 %v5752_v5, %v5208_v29  ;;  %v6478_v41 = vadd.f32 %v6273_v1, %v6094_v34  ;;  %v5754_v47 = vpop.f32.mrb[11].mxu1  ;;  %v5229_v35 = vadd.f32 %v11451_v52, %v12245_v38  ;;  %v6100_v1 = vld [vmem:[%s8274_s26 + $0x1c0] sm:$0xff] }
 0x692   : > { %v6275_v15 = vpop.xlane.xlu0 %6274 }
 0x693   : > { %v6003_v30 = vmax.f32 %v5753_v24, 0.0  ;;  %6607 = vst.msk [vmem:[%s8274_s26 + $0x190] sm:$0xff] %vm6556_vm4, %v6478_v41  ;;  %v6479_v62 = vadd.f32 %v6275_v15, %v6095_v22  ;;  %6344 = vadd.xlane.f32.xlu1 %v6002_v58  ;;  %v12246_v22 = vld [vmem:[#allocation50_spill] sm:$0xff] }
 0x694   : > { %v5232_v58 = vadd.f32 %v11456_v25, %v12246_v22 }
 0x695   : > { %6608 = vst.msk [vmem:[%s8274_s26 + $0x198] sm:$0xff] %vm6556_vm4, %v6479_v62  ;;  %6346 = vadd.xlane.f32.xlu0 %v6003_v30  ;;  %v6101_v30 = vld [vmem:[%s8274_s26 + $0x1c8] sm:$0xff] }
 0x696   : > { %v5757_v2 = vpop.f32.mrb[12].mxu1 }
 0x697   : > { %v5758_v50 = vadd.f32 %v5757_v2, %v5213_v23  ;;  %v5759_v17 = vpop.f32.mrb[13].mxu1 }
 0x698   : > { %v5760_v6 = vpop.f32.mrb[14].mxu1  ;;  %v6277_v56 = vpop.xlane.xlu1 %6276  ;;  %v6102_v17 = vld [vmem:[%s8274_s26 + $0x1d0] sm:$0xff] }
 0x699   : > { %v6004_v59 = vmax.f32 %v5758_v50, 0.0  ;;  %v5761_v43 = vadd.f32 %v5760_v6, %v5216_v55  ;;  %v6480_v42 = vadd.f32 %v6277_v56, %v6096_v28  ;;  %v5762_v44 = vpop.f32.mrb[15].mxu1  ;;  %v12247_v55 = vld [vmem:[#allocation55_spill] sm:$0xff]  ;;  %v12248_v6 = vld [vmem:[#allocation52_spill] sm:$0xff] }
 0x69a   : > { %v6279_v21 = vpop.xlane.xlu0 %6278  ;;  %v5237_v25 = vadd.f32 %v11474_v36, %v12247_v55  ;;  %v5240_v56 = vadd.f32 %v11479_v37, %v12248_v6  ;;  %v6103_v44 = vld [vmem:[%s8274_s26 + $0x1d8] sm:$0xff]  ;;  %v12253_v55 = vld [vmem:[#allocation61_spill] sm:$0xff] }
 0x69b   : > { %v6005_v33 = vmax.f32 %v5761_v43, 0.0  ;;  %6609 = vst.msk [vmem:[%s8274_s26 + $0x1a0] sm:$0xff] %vm6556_vm4, %v6480_v42  ;;  %v6481_v54 = vadd.f32 %v6279_v21, %v6097_v14  ;;  %6348 = vadd.xlane.f32.xlu1 %v6004_v59 }
 0x69d   : > { %6610 = vst.msk [vmem:[%s8274_s26 + $0x1a8] sm:$0xff] %vm6556_vm4, %v6481_v54  ;;  %6350 = vadd.xlane.f32.xlu0 %v6005_v33 }
 0x69e   : > { %v5765_v9 = vpop.f32.mrb[16].mxu1 }
 0x69f   : > { %v5766_v40 = vadd.f32 %v5765_v9, %v5221_v26  ;;  %v5767_v53 = vpop.f32.mrb[17].mxu1 }
 0x6a0   : > { %v5768_v11 = vpop.f32.mrb[18].mxu1  ;;  %v6281_v48 = vpop.xlane.xlu1 %6280 }
 0x6a1   : > { %v6006_v60 = vmax.f32 %v5766_v40, 0.0  ;;  %v5769_v13 = vadd.f32 %v5768_v11, %v5224_v32  ;;  %v6482_v34 = vadd.f32 %v6281_v48, %v6098_v61  ;;  %v5770_v57 = vpop.f32.mrb[19].mxu1  ;;  %v12249_v61 = vld [vmem:[#allocation57_spill] sm:$0xff]  ;;  %v12250_v40 = vld [vmem:[#allocation54_spill] sm:$0xff] }
 0x6a2   : > { %v6283_v3 = vpop.xlane.xlu0 %6282  ;;  %v5245_v37 = vadd.f32 %v11497_v8, %v12249_v61  ;;  %v6104_v32 = vld [vmem:[%s8274_s26 + $0x1e0] sm:$0xff]  ;;  %v5248_v53 = vadd.f32 %v11502_v0, %v12250_v40 }
 0x6a3   : > { %v6007_v29 = vmax.f32 %v5769_v13, 0.0  ;;  %6611 = vst.msk [vmem:[%s8274_s26 + $0x1b0] sm:$0xff] %vm6556_vm4, %v6482_v34  ;;  %v6483_v27 = vadd.f32 %v6283_v3, %v6099_v49  ;;  %6352 = vadd.xlane.f32.xlu1 %v6006_v60  ;;  %v6105_v13 = vld [vmem:[%s8274_s26 + $0x1e8] sm:$0xff] }
 0x6a5   : > { %6612 = vst.msk [vmem:[%s8274_s26 + $0x1b8] sm:$0xff] %vm6556_vm4, %v6483_v27  ;;  %6354 = vadd.xlane.f32.xlu0 %v6007_v29 }
 0x6a6   : > { %v5773_v5 = vpop.f32.mrb[20].mxu1 }
 0x6a7   : > { %v5774_v24 = vadd.f32 %v5773_v5, %v5229_v35  ;;  %v5775_v41 = vpop.f32.mrb[21].mxu1  ;;  %v6106_v35 = vld [vmem:[%s8274_s26 + $0x1f0] sm:$0xff] }
 0x6a8   : > { %v5776_v47 = vpop.f32.mrb[22].mxu1  ;;  %v6285_v15 = vpop.xlane.xlu1 %6284  ;;  %v12251_v5 = vld [vmem:[#allocation59_spill] sm:$0xff]  ;;  %v6107_v41 = vld [vmem:[%s8274_s26 + $0x1f8] sm:$0xff] }
 0x6a9   : > { %v6008_v62 = vmax.f32 %v5774_v24, 0.0  ;;  %v5777_v12 = vadd.f32 %v5776_v47, %v5232_v58  ;;  %v6484_v23 = vadd.f32 %v6285_v15, %v6100_v1  ;;  %v5778_v52 = vpop.f32.mrb[23].mxu1  ;;  %v12252_v15 = vld [vmem:[#allocation56_spill] sm:$0xff] }
 0x6aa   : > { %v6287_v2 = vpop.xlane.xlu0 %6286 }
 0x6ab   : > { %v6009_v28 = vmax.f32 %v5777_v12, 0.0  ;;  %6613 = vst.msk [vmem:[%s8274_s26 + $0x1c0] sm:$0xff] %vm6556_vm4, %v6484_v23  ;;  %v6485_v63 = vadd.f32 %v6287_v2, %v6101_v30  ;;  %6356 = vadd.xlane.f32.xlu1 %v6008_v62 }
 0x6ad   : > { %6614 = vst.msk [vmem:[%s8274_s26 + $0x1c8] sm:$0xff] %vm6556_vm4, %v6485_v63  ;;  %6358 = vadd.xlane.f32.xlu0 %v6009_v28  ;;  %v6108_v63 = vld [vmem:[%s8274_s26 + $0x200] sm:$0xff] }
 0x6ae   : > { %v5781_v50 = vpop.f32.mrb[24].mxu1 }
 0x6af   : > { %v5782_v14 = vadd.f32 %v5781_v50, %v5237_v25  ;;  %v5783_v59 = vpop.f32.mrb[25].mxu1 }
 0x6b0   : > { %v5784_v43 = vpop.f32.mrb[26].mxu1  ;;  %v6289_v42 = vpop.xlane.xlu1 %6288  ;;  %v12254_v59 = vld [vmem:[#allocation58_spill] sm:$0xff] }
 0x6b1   : > { %v6010_v21 = vmax.f32 %v5782_v14, 0.0  ;;  %v5785_v33 = vadd.f32 %v5784_v43, %v5240_v56  ;;  %v6486_v54 = vadd.f32 %v6289_v42, %v6102_v17  ;;  %v5786_v36 = vpop.f32.mrb[27].mxu1  ;;  %v6109_v56 = vld [vmem:[%s8274_s26 + $0x208] sm:$0xff] }
 0x6b2   : > { %v6291_v10 = vpop.xlane.xlu0 %6290 }
 0x6b3   : > { %v6011_v26 = vmax.f32 %v5785_v33, 0.0  ;;  %6615 = vst.msk [vmem:[%s8274_s26 + $0x1d0] sm:$0xff] %vm6556_vm4, %v6486_v54  ;;  %v6487_v9 = vadd.f32 %v6291_v10, %v6103_v44  ;;  %6360 = vadd.xlane.f32.xlu1 %v6010_v21  ;;  %v6110_v10 = vld [vmem:[%s8274_s26 + $0x210] sm:$0xff] }
 0x6b5   : > { %6616 = vst.msk [vmem:[%s8274_s26 + $0x1d8] sm:$0xff] %vm6556_vm4, %v6487_v9  ;;  %6362 = vadd.xlane.f32.xlu0 %v6011_v26  ;;  %v12255_v26 = vld [vmem:[#allocation62_spill] sm:$0xff] }
 0x6b6   : > { %v5789_v19 = vpop.f32.mrb[28].mxu1 }
 0x6b7   : > { %v5790_v11 = vadd.f32 %v5789_v19, %v5245_v37  ;;  %v5791_v48 = vpop.f32.mrb[29].mxu1 }
 0x6b8   : > { %v5792_v49 = vpop.f32.mrb[30].mxu1  ;;  %v6293_v60 = vpop.xlane.xlu1 %6292 }
 0x6b9   : > { %v6012_v34 = vmax.f32 %v5790_v11, 0.0  ;;  %v5793_v57 = vadd.f32 %v5792_v49, %v5248_v53  ;;  %v6488_v8 = vadd.f32 %v6293_v60, %v6104_v32  ;;  %v5794_v3 = vpop.f32.mrb[31].mxu1  ;;  %v6111_v32 = vld [vmem:[%s8274_s26 + $0x218] sm:$0xff]  ;;  %v12256_v53 = vld [vmem:[#allocation63_spill] sm:$0xff] }
 0x6ba   : > { %v6295_v29 = vpop.xlane.xlu0 %6294  ;;  %v12257_v3 = vld [vmem:[#allocation64_spill] sm:$0xff] }
 0x6bb   : > { %v6013_v27 = vmax.f32 %v5793_v57, 0.0  ;;  %6617 = vst.msk [vmem:[%s8274_s26 + $0x1e0] sm:$0xff] %vm6556_vm4, %v6488_v8  ;;  %v6489_v38 = vadd.f32 %v6295_v29, %v6105_v13  ;;  %6364 = vadd.xlane.f32.xlu1 %v6012_v34  ;;  %v6112_v8 = vld [vmem:[%s8274_s26 + $0x220] sm:$0xff] }
 0x6bd   : > { %6618 = vst.msk [vmem:[%s8274_s26 + $0x1e8] sm:$0xff] %vm6556_vm4, %v6489_v38  ;;  %6366 = vadd.xlane.f32.xlu0 %v6013_v27 }
 0x6be   : > { %v5797_v0 = vpop.f32.mrb[32].mxu1 }
 0x6bf   : > { %v7454_v1 = vadd.f32 %v5797_v0, %v12251_v5  ;;  %v5799_v22 = vpop.f32.mrb[33].mxu1 }
 0x6c0   : > { %v5800_v58 = vpop.f32.mrb[34].mxu1  ;;  %v6297_v24 = vpop.xlane.xlu1 %6296 }
 0x6c1   : > { %v6014_v47 = vmax.f32 %v7454_v1, 0.0  ;;  %v7455_v30 = vadd.f32 %v5800_v58, %v12252_v15  ;;  %v6490_v62 = vadd.f32 %v6297_v24, %v6106_v35  ;;  %v5802_v12 = vpop.f32.mrb[35].mxu1  ;;  %v6113_v35 = vld [vmem:[%s8274_s26 + $0x228] sm:$0xff]  ;;  %v12258_v1 = vld [vmem:[#allocation65_spill] sm:$0xff] }
 0x6c2   : > { %v6299_v23 = vpop.xlane.xlu0 %6298  ;;  %v12259_v12 = vld [vmem:[#allocation66_spill] sm:$0xff] }
 0x6c3   : > { %v6015_v52 = vmax.f32 %v7455_v30, 0.0  ;;  %6619 = vst.msk [vmem:[%s8274_s26 + $0x1f0] sm:$0xff] %vm6556_vm4, %v6490_v62  ;;  %v6491_v2 = vadd.f32 %v6299_v23, %v6107_v41  ;;  %6368 = vadd.xlane.f32.xlu1 %v6014_v47  ;;  %v6114_v62 = vld [vmem:[%s8274_s26 + $0x230] sm:$0xff] }
 0x6c5   : > { %6620 = vst.msk [vmem:[%s8274_s26 + $0x1f8] sm:$0xff] %vm6556_vm4, %v6491_v2  ;;  %6370 = vadd.xlane.f32.xlu0 %v6015_v52 }
 0x6c6   : > { %v5805_v28 = vpop.f32.mrb[36].mxu1 }
 0x6c7   : > { %v7456_v25 = vadd.f32 %v5805_v28, %v12253_v55  ;;  %v5807_v50 = vpop.f32.mrb[37].mxu1 }
 0x6c8   : > { %v5808_v17 = vpop.f32.mrb[38].mxu1  ;;  %v6301_v6 = vpop.xlane.xlu1 %6300 }
 0x6c9   : > { %v6016_v14 = vmax.f32 %v7456_v25, 0.0  ;;  %v7457_v43 = vadd.f32 %v5808_v17, %v12254_v59  ;;  %v6492_v42 = vadd.f32 %v6301_v6, %v6108_v63  ;;  %v5810_v44 = vpop.f32.mrb[39].mxu1  ;;  %v6115_v63 = vld [vmem:[%s8274_s26 + $0x238] sm:$0xff]  ;;  %v12260_v25 = vld [vmem:[#allocation67_spill] sm:$0xff] }
 0x6ca   : > { %v6303_v21 = vpop.xlane.xlu0 %6302  ;;  %v12261_v44 = vld [vmem:[#allocation68_spill] sm:$0xff] }
 0x6cb   : > { %v6017_v33 = vmax.f32 %v7457_v43, 0.0  ;;  %6621 = vst.msk [vmem:[%s8274_s26 + $0x200] sm:$0xff] %vm6556_vm4, %v6492_v42  ;;  %v6493_v54 = vadd.f32 %v6303_v21, %v6109_v56  ;;  %6372 = vadd.xlane.f32.xlu1 %v6016_v14  ;;  %v6116_v42 = vld [vmem:[%s8274_s26 + $0x240] sm:$0xff] }
 0x6cd   : > { %6622 = vst.msk [vmem:[%s8274_s26 + $0x208] sm:$0xff] %vm6556_vm4, %v6493_v54  ;;  %6374 = vadd.xlane.f32.xlu0 %v6017_v33 }
 0x6ce   : > { %v5813_v36 = vpop.f32.mrb[40].mxu1 }
 0x6cf   : > { %v7458_v9 = vadd.f32 %v5813_v36, %v12255_v26  ;;  %v5815_v61 = vpop.f32.mrb[41].mxu1 }
 0x6d0   : > { %v5816_v37 = vpop.f32.mrb[42].mxu1  ;;  %v6305_v19 = vpop.xlane.xlu1 %6304 }
 0x6d1   : > { %v6018_v40 = vmax.f32 %v7458_v9, 0.0  ;;  %v7459_v11 = vadd.f32 %v5816_v37, %v12256_v53  ;;  %v6494_v48 = vadd.f32 %v6305_v19, %v6110_v10  ;;  %v5818_v49 = vpop.f32.mrb[43].mxu1  ;;  %v6117_v10 = vld [vmem:[%s8274_s26 + $0x248] sm:$0xff]  ;;  %v12262_v9 = vld [vmem:[#allocation69_spill] sm:$0xff] }
 0x6d2   : > { %v6307_v60 = vpop.xlane.xlu0 %6306  ;;  %v12263_v49 = vld [vmem:[#allocation70_spill] sm:$0xff] }
 0x6d3   : > { %v6019_v13 = vmax.f32 %v7459_v11, 0.0  ;;  %6623 = vst.msk [vmem:[%s8274_s26 + $0x210] sm:$0xff] %vm6556_vm4, %v6494_v48  ;;  %v6495_v34 = vadd.f32 %v6307_v60, %v6111_v32  ;;  %6376 = vadd.xlane.f32.xlu1 %v6018_v40  ;;  %v6118_v48 = vld [vmem:[%s8274_s26 + $0x250] sm:$0xff] }
 0x6d5   : > { %6624 = vst.msk [vmem:[%s8274_s26 + $0x218] sm:$0xff] %vm6556_vm4, %v6495_v34  ;;  %6378 = vadd.xlane.f32.xlu0 %v6019_v13 }
 0x6d6   : > { %v5821_v57 = vpop.f32.mrb[44].mxu1 }
 0x6d7   : > { %v7460_v29 = vadd.f32 %v5821_v57, %v12257_v3  ;;  %v5823_v27 = vpop.f32.mrb[45].mxu1 }
 0x6d8   : > { %v5824_v38 = vpop.f32.mrb[46].mxu1  ;;  %v6309_v0 = vpop.xlane.xlu1 %6308 }
 0x6d9   : > { %v6020_v5 = vmax.f32 %v7460_v29, 0.0  ;;  %v7461_v22 = vadd.f32 %v5824_v38, %v12258_v1  ;;  %v6496_v58 = vadd.f32 %v6309_v0, %v6112_v8  ;;  %v5826_v24 = vpop.f32.mrb[47].mxu1  ;;  %v6119_v8 = vld [vmem:[%s8274_s26 + $0x258] sm:$0xff]  ;;  %v12264_v29 = vld [vmem:[#allocation71_spill] sm:$0xff] }
 0x6da   : > { %v6311_v41 = vpop.xlane.xlu0 %6310  ;;  %v12265_v24 = vld [vmem:[#allocation72_spill] sm:$0xff] }
 0x6db   : > { %v6021_v47 = vmax.f32 %v7461_v22, 0.0  ;;  %6625 = vst.msk [vmem:[%s8274_s26 + $0x220] sm:$0xff] %vm6556_vm4, %v6496_v58  ;;  %v6497_v15 = vadd.f32 %v6311_v41, %v6113_v35  ;;  %6380 = vadd.xlane.f32.xlu1 %v6020_v5  ;;  %v6120_v58 = vld [vmem:[%s8274_s26 + $0x260] sm:$0xff] }
 0x6dd   : > { %6626 = vst.msk [vmem:[%s8274_s26 + $0x228] sm:$0xff] %vm6556_vm4, %v6497_v15  ;;  %6382 = vadd.xlane.f32.xlu0 %v6021_v47 }
 0x6de   : > { %v5829_v30 = vpop.f32.mrb[48].mxu1 }
 0x6df   : > { %v7462_v23 = vadd.f32 %v5829_v30, %v12259_v12  ;;  %v5831_v52 = vpop.f32.mrb[49].mxu1 }
 0x6e0   : > { %v5832_v2 = vpop.f32.mrb[50].mxu1  ;;  %v6313_v28 = vpop.xlane.xlu1 %6312 }
 0x6e1   : > { %v6022_v55 = vmax.f32 %v7462_v23, 0.0  ;;  %v7463_v50 = vadd.f32 %v5832_v2, %v12260_v25  ;;  %v6498_v17 = vadd.f32 %v6313_v28, %v6114_v62  ;;  %v5834_v6 = vpop.f32.mrb[51].mxu1  ;;  %v6121_v62 = vld [vmem:[%s8274_s26 + $0x268] sm:$0xff]  ;;  %v12266_v23 = vld [vmem:[#allocation73_spill] sm:$0xff] }
 0x6e2   : > { %v6315_v56 = vpop.xlane.xlu0 %6314  ;;  %v12267_v6 = vld [vmem:[#allocation74_spill] sm:$0xff] }
 0x6e3   : > { %v6023_v14 = vmax.f32 %v7463_v50, 0.0  ;;  %6627 = vst.msk [vmem:[%s8274_s26 + $0x230] sm:$0xff] %vm6556_vm4, %v6498_v17  ;;  %v6499_v59 = vadd.f32 %v6315_v56, %v6115_v63  ;;  %6384 = vadd.xlane.f32.xlu1 %v6022_v55  ;;  %v6122_v17 = vld [vmem:[%s8274_s26 + $0x270] sm:$0xff] }
 0x6e5   : > { %6628 = vst.msk [vmem:[%s8274_s26 + $0x238] sm:$0xff] %vm6556_vm4, %v6499_v59  ;;  %6386 = vadd.xlane.f32.xlu0 %v6023_v14 }
 0x6e6   : > { %v5837_v43 = vpop.f32.mrb[52].mxu1 }
 0x6e7   : > { %v7464_v21 = vadd.f32 %v5837_v43, %v12261_v44  ;;  %v5839_v33 = vpop.f32.mrb[53].mxu1 }
 0x6e8   : > { %v5840_v54 = vpop.f32.mrb[54].mxu1  ;;  %v6317_v36 = vpop.xlane.xlu1 %6316 }
 0x6e9   : > { %v6024_v26 = vmax.f32 %v7464_v21, 0.0  ;;  %v7465_v61 = vadd.f32 %v5840_v54, %v12262_v9  ;;  %v6500_v37 = vadd.f32 %v6317_v36, %v6116_v42  ;;  %v5842_v19 = vpop.f32.mrb[55].mxu1  ;;  %v6123_v42 = vld [vmem:[%s8274_s26 + $0x278] sm:$0xff]  ;;  %v12268_v21 = vld [vmem:[#allocation75_spill] sm:$0xff] }
 0x6ea   : > { %v6319_v32 = vpop.xlane.xlu0 %6318 }
 0x6eb   : > { %v6025_v40 = vmax.f32 %v7465_v61, 0.0  ;;  %6629 = vst.msk [vmem:[%s8274_s26 + $0x240] sm:$0xff] %vm6556_vm4, %v6500_v37  ;;  %v6501_v53 = vadd.f32 %v6319_v32, %v6117_v10  ;;  %6388 = vadd.xlane.f32.xlu1 %v6024_v26  ;;  %v6124_v37 = vld [vmem:[%s8274_s26 + $0x280] sm:$0xff] }
 0x6ed   : > { %6630 = vst.msk [vmem:[%s8274_s26 + $0x248] sm:$0xff] %vm6556_vm4, %v6501_v53  ;;  %6390 = vadd.xlane.f32.xlu0 %v6025_v40 }
 0x6ee   : > { %v5845_v11 = vpop.f32.mrb[56].mxu1 }
 0x6ef   : > { %v7466_v60 = vadd.f32 %v5845_v11, %v12263_v49  ;;  %v5847_v13 = vpop.f32.mrb[57].mxu1  ;;  %v6125_v11 = vld [vmem:[%s8274_s26 + $0x288] sm:$0xff]  ;;  %v12269_v49 = vld [vmem:[#allocation77_spill] sm:$0xff] }
 0x6f0   : > { %v5848_v34 = vpop.f32.mrb[58].mxu1  ;;  %v6321_v57 = vpop.xlane.xlu1 %6320 }
 0x6f1   : > { %v6026_v3 = vmax.f32 %v7466_v60, 0.0  ;;  %v7467_v27 = vadd.f32 %v5848_v34, %v12264_v29  ;;  %v6502_v38 = vadd.f32 %v6321_v57, %v6118_v48  ;;  %v5850_v0 = vpop.f32.mrb[59].mxu1  ;;  %v6126_v29 = vld [vmem:[%s8274_s26 + $0x290] sm:$0xff] }
 0x6f2   : > { %v6323_v35 = vpop.xlane.xlu0 %6322 }
 0x6f3   : > { %v6027_v5 = vmax.f32 %v7467_v27, 0.0  ;;  %6631 = vst.msk [vmem:[%s8274_s26 + $0x250] sm:$0xff] %vm6556_vm4, %v6502_v38  ;;  %v6503_v1 = vadd.f32 %v6323_v35, %v6119_v8  ;;  %6392 = vadd.xlane.f32.xlu1 %v6026_v3 }
 0x6f5   : > { %6632 = vst.msk [vmem:[%s8274_s26 + $0x258] sm:$0xff] %vm6556_vm4, %v6503_v1  ;;  %6394 = vadd.xlane.f32.xlu0 %v6027_v5  ;;  %v6127_v5 = vld [vmem:[%s8274_s26 + $0x298] sm:$0xff] }
 0x6f6   : > { %v5853_v22 = vpop.f32.mrb[60].mxu1 }
 0x6f7   : > { %v7468_v41 = vadd.f32 %v5853_v22, %v12265_v24  ;;  %v5855_v47 = vpop.f32.mrb[61].mxu1 }
 0x6f8   : > { %v5856_v15 = vpop.f32.mrb[62].mxu1  ;;  %v6325_v30 = vpop.xlane.xlu1 %6324 }
 0x6f9   : > { %v6028_v12 = vmax.f32 %v7468_v41, 0.0  ;;  %v7469_v52 = vadd.f32 %v5856_v15, %v12266_v23  ;;  %v6504_v2 = vadd.f32 %v6325_v30, %v6120_v58  ;;  %v5858_v28 = vpop.f32.mrb[63].mxu1  ;;  %v6128_v30 = vld [vmem:[%s8274_s26 + $0x2a0] sm:$0xff] }
 0x6fa   : > { %v6327_v63 = vpop.xlane.xlu0 %6326 }
 0x6fb   : > { %v6029_v55 = vmax.f32 %v7469_v52, 0.0  ;;  %6633 = vst.msk [vmem:[%s8274_s26 + $0x260] sm:$0xff] %vm6556_vm4, %v6504_v2  ;;  %v6505_v25 = vadd.f32 %v6327_v63, %v6121_v62  ;;  %6396 = vadd.xlane.f32.xlu1 %v6028_v12  ;;  %v6129_v52 = vld [vmem:[%s8274_s26 + $0x2a8] sm:$0xff] }
 0x6fd   : > { %6634 = vst.msk [vmem:[%s8274_s26 + $0x268] sm:$0xff] %vm6556_vm4, %v6505_v25  ;;  %6398 = vadd.xlane.f32.xlu0 %v6029_v55 }
 0x6fe   : > { %v5861_v50 = vpop.f32.mrb[64].mxu1 }
 0x6ff   : > { %v7470_v56 = vadd.f32 %v5861_v50, %v12267_v6  ;;  %v5863_v14 = vpop.f32.mrb[65].mxu1  ;;  %v6130_v6 = vld [vmem:[%s8274_s26 + $0x2b0] sm:$0xff] }
 0x700   : > { %v5864_v59 = vpop.f32.mrb[66].mxu1  ;;  %v6329_v43 = vpop.xlane.xlu1 %6328 }
 0x701   : > { %v6030_v44 = vmax.f32 %v7470_v56, 0.0  ;;  %v7471_v33 = vadd.f32 %v5864_v59, %v12268_v21  ;;  %v6506_v54 = vadd.f32 %v6329_v43, %v6122_v17  ;;  %v5866_v36 = vpop.f32.mrb[67].mxu1  ;;  %v6131_v43 = vld [vmem:[%s8274_s26 + $0x2b8] sm:$0xff] }
 0x702   : > { %v6331_v10 = vpop.xlane.xlu0 %6330 }
 0x703   : > { %v6031_v26 = vmax.f32 %v7471_v33, 0.0  ;;  %6635 = vst.msk [vmem:[%s8274_s26 + $0x270] sm:$0xff] %vm6556_vm4, %v6506_v54  ;;  %v6507_v9 = vadd.f32 %v6331_v10, %v6123_v42  ;;  %6400 = vadd.xlane.f32.xlu1 %v6030_v44 }
 0x705   : > { %6636 = vst.msk [vmem:[%s8274_s26 + $0x278] sm:$0xff] %vm6556_vm4, %v6507_v9  ;;  %6402 = vadd.xlane.f32.xlu0 %v6031_v26  ;;  %v6132_v26 = vld [vmem:[%s8274_s26 + $0x2c0] sm:$0xff] }
 0x706   : > { %v5869_v61 = vpop.f32.mrb[68].mxu1 }
 0x707   : > { %v7472_v19 = vadd.f32 %v5869_v61, %v11087_v46  ;;  %v5871_v32 = vpop.f32.mrb[69].mxu1 }
 0x708   : > { %v5872_v40 = vpop.f32.mrb[70].mxu1  ;;  %v6333_v53 = vpop.xlane.xlu1 %6332 }
 0x709   : > { %v6032_v48 = vmax.f32 %v7472_v19, 0.0  ;;  %v7473_v60 = vadd.f32 %v5872_v40, %v12269_v49  ;;  %v6508_v13 = vadd.f32 %v6333_v53, %v6124_v37  ;;  %v5874_v34 = vpop.f32.mrb[71].mxu1  ;;  %v6133_v19 = vld [vmem:[%s8274_s26 + $0x2c8] sm:$0xff] }
 0x70a   : > { %v6335_v57 = vpop.xlane.xlu0 %6334 }
 0x70b   : > { %v6033_v8 = vmax.f32 %v7473_v60, 0.0  ;;  %6637 = vst.msk [vmem:[%s8274_s26 + $0x280] sm:$0xff] %vm6556_vm4, %v6508_v13  ;;  %v6509_v3 = vadd.f32 %v6335_v57, %v6125_v11  ;;  %6404 = vadd.xlane.f32.xlu1 %v6032_v48  ;;  %v6134_v13 = vld [vmem:[%s8274_s26 + $0x2d0] sm:$0xff] }
 0x70d   : > { %6638 = vst.msk [vmem:[%s8274_s26 + $0x288] sm:$0xff] %vm6556_vm4, %v6509_v3  ;;  %6406 = vadd.xlane.f32.xlu0 %v6033_v8  ;;  %v6135_v3 = vld [vmem:[%s8274_s26 + $0x2d8] sm:$0xff] }
 0x70e   : > { %v5877_v46 = vpop.f32.mrb[72].mxu1 }
 0x70f   : > { %v7474_v27 = vadd.f32 %v5877_v46, %v11105_v31  ;;  %v5879_v38 = vpop.f32.mrb[73].mxu1 }
 0x710   : > { %v5880_v0 = vpop.f32.mrb[74].mxu1  ;;  %v6337_v35 = vpop.xlane.xlu1 %6336 }
 0x711   : > { %v6034_v1 = vmax.f32 %v7474_v27, 0.0  ;;  %v7475_v22 = vadd.f32 %v5880_v0, %v11103_v7  ;;  %v6510_v58 = vadd.f32 %v6337_v35, %v6126_v29  ;;  %v5882_v24 = vpop.f32.mrb[75].mxu1  ;;  %v12270_v29 = vld [vmem:[#allocation76_spill] sm:$0xff] }
 0x712   : > { %v6339_v41 = vpop.xlane.xlu0 %6338 }
 0x713   : > { %v6035_v47 = vmax.f32 %v7475_v22, 0.0  ;;  %6639 = vst.msk [vmem:[%s8274_s26 + $0x290] sm:$0xff] %vm6556_vm4, %v6510_v58  ;;  %v6511_v15 = vadd.f32 %v6339_v41, %v6127_v5  ;;  %6408 = vadd.xlane.f32.xlu1 %v6034_v1  ;;  %v6136_v1 = vld [vmem:[%s8274_s26 + $0x2e0] sm:$0xff]  ;;  %v6137_v58 = vld [vmem:[%s8274_s26 + $0x2e8] sm:$0xff] }
 0x715   : > { %6640 = vst.msk [vmem:[%s8274_s26 + $0x298] sm:$0xff] %vm6556_vm4, %v6511_v15  ;;  %6410 = vadd.xlane.f32.xlu0 %v6035_v47  ;;  %v6138_v15 = vld [vmem:[%s8274_s26 + $0x2f0] sm:$0xff] }
 0x716   : > { %v5885_v31 = vpop.f32.mrb[76].mxu1 }
 0x717   : > { %v7476_v62 = vadd.f32 %v5885_v31, %v11123_v39  ;;  %v5887_v12 = vpop.f32.mrb[77].mxu1 }
 0x718   : > { %v5888_v7 = vpop.f32.mrb[78].mxu1  ;;  %v6341_v23 = vpop.xlane.xlu1 %6340 }
 0x719   : > { %v6036_v2 = vmax.f32 %v7476_v62, 0.0  ;;  %v7477_v28 = vadd.f32 %v5888_v7, %v11121_v20  ;;  %v6512_v63 = vadd.f32 %v6341_v23, %v6128_v30  ;;  %v5890_v55 = vpop.f32.mrb[79].mxu1  ;;  %v6139_v30 = vld [vmem:[%s8274_s26 + $0x2f8] sm:$0xff]  ;;  %v6140_v23 = vld [vmem:[%s8274_s26 + $0x300] sm:$0xff] }
 0x71a   : > { %v6343_v25 = vpop.xlane.xlu0 %6342 }
 0x71b   : > { %v6037_v50 = vmax.f32 %v7477_v28, 0.0  ;;  %6641 = vst.msk [vmem:[%s8274_s26 + $0x2a0] sm:$0xff] %vm6556_vm4, %v6512_v63  ;;  %v6513_v17 = vadd.f32 %v6343_v25, %v6129_v52  ;;  %6412 = vadd.xlane.f32.xlu1 %v6036_v2  ;;  %v6141_v2 = vld [vmem:[%s8274_s26 + $0x308] sm:$0xff]  ;;  %v6142_v25 = vld [vmem:[%s8274_s26 + $0x310] sm:$0xff] }
 0x71d   : > { %6642 = vst.msk [vmem:[%s8274_s26 + $0x2a8] sm:$0xff] %vm6556_vm4, %v6513_v17  ;;  %6414 = vadd.xlane.f32.xlu0 %v6037_v50  ;;  %v6143_v17 = vld [vmem:[%s8274_s26 + $0x318] sm:$0xff] }
 0x71e   : > { %v5893_v39 = vpop.f32.mrb[80].mxu1 }
 0x71f   : > { %v7478_v56 = vadd.f32 %v5893_v39, %v11141_v18  ;;  %v5895_v14 = vpop.f32.mrb[81].mxu1 }
 0x720   : > { %v5896_v20 = vpop.f32.mrb[82].mxu1  ;;  %v6345_v59 = vpop.xlane.xlu1 %6344  ;;  %v6144_v14 = vld [vmem:[%s8274_s26 + $0x320] sm:$0xff] }
 0x721   : > { %v6038_v42 = vmax.f32 %v7478_v56, 0.0  ;;  %v7479_v44 = vadd.f32 %v5896_v20, %v11139_v16  ;;  %v6514_v21 = vadd.f32 %v6345_v59, %v6130_v6  ;;  %v5898_v33 = vpop.f32.mrb[83].mxu1  ;;  %v6145_v59 = vld [vmem:[%s8274_s26 + $0x328] sm:$0xff] }
 0x722   : > { %v6347_v54 = vpop.xlane.xlu0 %6346 }
 0x723   : > { %v6039_v36 = vmax.f32 %v7479_v44, 0.0  ;;  %6643 = vst.msk [vmem:[%s8274_s26 + $0x2b0] sm:$0xff] %vm6556_vm4, %v6514_v21  ;;  %v6515_v10 = vadd.f32 %v6347_v54, %v6131_v43  ;;  %6416 = vadd.xlane.f32.xlu1 %v6038_v42  ;;  %v6146_v21 = vld [vmem:[%s8274_s26 + $0x330] sm:$0xff]  ;;  %v6147_v54 = vld [vmem:[%s8274_s26 + $0x338] sm:$0xff] }
 0x725   : > { %6644 = vst.msk [vmem:[%s8274_s26 + $0x2b8] sm:$0xff] %vm6556_vm4, %v6515_v10  ;;  %6418 = vadd.xlane.f32.xlu0 %v6039_v36 }
 0x726   : > { %v5901_v18 = vpop.f32.mrb[84].mxu1 }
 0x727   : > { %v7480_v9 = vadd.f32 %v5901_v18, %v11159_v4  ;;  %v5903_v61 = vpop.f32.mrb[85].mxu1 }
 0x728   : > { %v5904_v16 = vpop.f32.mrb[86].mxu1  ;;  %v6349_v37 = vpop.xlane.xlu1 %6348  ;;  %v6149_v61 = vld [vmem:[%s8274_s26 + $0x348] sm:$0xff] }
 0x729   : > { %v6040_v32 = vmax.f32 %v7480_v9, 0.0  ;;  %v7481_v40 = vadd.f32 %v5904_v16, %v11157_v51  ;;  %v6516_v53 = vadd.f32 %v6349_v37, %v6132_v26  ;;  %v5906_v11 = vpop.f32.mrb[87].mxu1  ;;  %v6148_v26 = vld [vmem:[%s8274_s26 + $0x340] sm:$0xff] }
 0x72a   : > { %v6351_v48 = vpop.xlane.xlu0 %6350 }
 0x72b   : > { %v6041_v49 = vmax.f32 %v7481_v40, 0.0  ;;  %6645 = vst.msk [vmem:[%s8274_s26 + $0x2c0] sm:$0xff] %vm6556_vm4, %v6516_v53  ;;  %v6517_v60 = vadd.f32 %v6351_v48, %v6133_v19  ;;  %6420 = vadd.xlane.f32.xlu1 %v6040_v32  ;;  %v6150_v32 = vld [vmem:[%s8274_s26 + $0x350] sm:$0xff]  ;;  %v6151_v53 = vld [vmem:[%s8274_s26 + $0x358] sm:$0xff] }
 0x72d   : > { %6646 = vst.msk [vmem:[%s8274_s26 + $0x2c8] sm:$0xff] %vm6556_vm4, %v6517_v60  ;;  %6422 = vadd.xlane.f32.xlu0 %v6041_v49  ;;  %v6152_v60 = vld [vmem:[%s8274_s26 + $0x360] sm:$0xff] }
 0x72e   : > { %v5909_v4 = vpop.f32.mrb[88].mxu1 }
 0x72f   : > { %v7482_v34 = vadd.f32 %v5909_v4, %v11177_v45  ;;  %v5911_v51 = vpop.f32.mrb[89].mxu1 }
 0x730   : > { %v5912_v57 = vpop.f32.mrb[90].mxu1  ;;  %v6353_v8 = vpop.xlane.xlu1 %6352 }
 0x731   : > { %v6042_v46 = vmax.f32 %v7482_v34, 0.0  ;;  %v7483_v27 = vadd.f32 %v5912_v57, %v12270_v29  ;;  %v6518_v38 = vadd.f32 %v6353_v8, %v6134_v13  ;;  %v5914_v0 = vpop.f32.mrb[91].mxu1  ;;  %v6153_v13 = vld [vmem:[%s8274_s26 + $0x368] sm:$0xff]  ;;  %v6154_v8 = vld [vmem:[%s8274_s26 + $0x370] sm:$0xff] }
 0x732   : > { %v6355_v35 = vpop.xlane.xlu0 %6354  ;;  %v6156_v0 = vld [vmem:[%s8274_s26 + $0x380] sm:$0xff] }
 0x733   : > { %v6043_v5 = vmax.f32 %v7483_v27, 0.0  ;;  %6647 = vst.msk [vmem:[%s8274_s26 + $0x2d0] sm:$0xff] %vm6556_vm4, %v6518_v38  ;;  %v6519_v45 = vadd.f32 %v6355_v35, %v6135_v3  ;;  %6424 = vadd.xlane.f32.xlu1 %v6042_v46  ;;  %v6155_v46 = vld [vmem:[%s8274_s26 + $0x378] sm:$0xff] }
 0x735   : > { %6648 = vst.msk [vmem:[%s8274_s26 + $0x2d8] sm:$0xff] %vm6556_vm4, %v6519_v45  ;;  %6426 = vadd.xlane.f32.xlu0 %v6043_v5  ;;  %v6157_v5 = vld [vmem:[%s8274_s26 + $0x388] sm:$0xff] }
 0x738   : > { %v6357_v22 = vpop.xlane.xlu1 %6356 }
 0x739   : > { %v6520_v24 = vadd.f32 %v6357_v22, %v6136_v1 }
 0x73a   : > { %v6359_v41 = vpop.xlane.xlu0 %6358 }
 0x73b   : > { %6649 = vst.msk [vmem:[%s8274_s26 + $0x2e0] sm:$0xff] %vm6556_vm4, %v6520_v24  ;;  %v6521_v47 = vadd.f32 %v6359_v41, %v6137_v58  ;;  %v6158_v58 = vld [vmem:[%s8274_s26 + $0x390] sm:$0xff]  ;;  %v6159_v41 = vld [vmem:[%s8274_s26 + $0x398] sm:$0xff] }
 0x73d   : > { %6650 = vst.msk [vmem:[%s8274_s26 + $0x2e8] sm:$0xff] %vm6556_vm4, %v6521_v47 }
 0x740   : > { %v6361_v31 = vpop.xlane.xlu1 %6360 }
 0x741   : > { %v6522_v62 = vadd.f32 %v6361_v31, %v6138_v15 }
 0x742   : > { %v6363_v12 = vpop.xlane.xlu0 %6362 }
 0x743   : > { %6651 = vst.msk [vmem:[%s8274_s26 + $0x2f0] sm:$0xff] %vm6556_vm4, %v6522_v62  ;;  %v6523_v7 = vadd.f32 %v6363_v12, %v6139_v30  ;;  %v6160_v30 = vld [vmem:[%s8274_s26 + $0x3a0] sm:$0xff]  ;;  %v6161_v12 = vld [vmem:[%s8274_s26 + $0x3a8] sm:$0xff] }
 0x745   : > { %6652 = vst.msk [vmem:[%s8274_s26 + $0x2f8] sm:$0xff] %vm6556_vm4, %v6523_v7 }
 0x748   : > { %v6365_v52 = vpop.xlane.xlu1 %6364 }
 0x749   : > { %v6524_v28 = vadd.f32 %v6365_v52, %v6140_v23 }
 0x74a   : > { %v6367_v63 = vpop.xlane.xlu0 %6366 }
 0x74b   : > { %6653 = vst.msk [vmem:[%s8274_s26 + $0x300] sm:$0xff] %vm6556_vm4, %v6524_v28  ;;  %v6525_v55 = vadd.f32 %v6367_v63, %v6141_v2  ;;  %v6162_v2 = vld [vmem:[%s8274_s26 + $0x3b0] sm:$0xff]  ;;  %v6163_v63 = vld [vmem:[%s8274_s26 + $0x3b8] sm:$0xff] }
 0x74d   : > { %6654 = vst.msk [vmem:[%s8274_s26 + $0x308] sm:$0xff] %vm6556_vm4, %v6525_v55 }
 0x750   : > { %v6369_v50 = vpop.xlane.xlu1 %6368 }
 0x751   : > { %v6526_v39 = vadd.f32 %v6369_v50, %v6142_v25 }
 0x752   : > { %v6371_v6 = vpop.xlane.xlu0 %6370 }
 0x753   : > { %6655 = vst.msk [vmem:[%s8274_s26 + $0x310] sm:$0xff] %vm6556_vm4, %v6526_v39  ;;  %v6527_v56 = vadd.f32 %v6371_v6, %v6143_v17  ;;  %v6164_v17 = vld [vmem:[%s8274_s26 + $0x3c0] sm:$0xff]  ;;  %v6165_v6 = vld [vmem:[%s8274_s26 + $0x3c8] sm:$0xff] }
 0x755   : > { %6656 = vst.msk [vmem:[%s8274_s26 + $0x318] sm:$0xff] %vm6556_vm4, %v6527_v56 }
 0x758   : > { %v6373_v20 = vpop.xlane.xlu1 %6372 }
 0x759   : > { %v6528_v43 = vadd.f32 %v6373_v20, %v6144_v14 }
 0x75a   : > { %v6375_v42 = vpop.xlane.xlu0 %6374 }
 0x75b   : > { %6657 = vst.msk [vmem:[%s8274_s26 + $0x320] sm:$0xff] %vm6556_vm4, %v6528_v43  ;;  %v6529_v44 = vadd.f32 %v6375_v42, %v6145_v59  ;;  %v6166_v59 = vld [vmem:[%s8274_s26 + $0x3d0] sm:$0xff]  ;;  %v6167_v42 = vld [vmem:[%s8274_s26 + $0x3d8] sm:$0xff] }
 0x75d   : > { %6658 = vst.msk [vmem:[%s8274_s26 + $0x328] sm:$0xff] %vm6556_vm4, %v6529_v44 }
 0x760   : > { %v6377_v33 = vpop.xlane.xlu1 %6376 }
 0x761   : > { %v6530_v36 = vadd.f32 %v6377_v33, %v6146_v21 }
 0x762   : > { %v6379_v10 = vpop.xlane.xlu0 %6378 }
 0x763   : > { %6659 = vst.msk [vmem:[%s8274_s26 + $0x330] sm:$0xff] %vm6556_vm4, %v6530_v36  ;;  %v6531_v18 = vadd.f32 %v6379_v10, %v6147_v54  ;;  %v6168_v54 = vld [vmem:[%s8274_s26 + $0x3e0] sm:$0xff]  ;;  %v6169_v10 = vld [vmem:[%s8274_s26 + $0x3e8] sm:$0xff] }
 0x765   : > { %6660 = vst.msk [vmem:[%s8274_s26 + $0x338] sm:$0xff] %vm6556_vm4, %v6531_v18 }
 0x768   : > { %v6381_v9 = vpop.xlane.xlu1 %6380 }
 0x769   : > { %v6532_v16 = vadd.f32 %v6381_v9, %v6148_v26 }
 0x76a   : > { %v6383_v37 = vpop.xlane.xlu0 %6382 }
 0x76b   : > { %6661 = vst.msk [vmem:[%s8274_s26 + $0x340] sm:$0xff] %vm6556_vm4, %v6532_v16  ;;  %v6533_v19 = vadd.f32 %v6383_v37, %v6149_v61  ;;  %v6170_v61 = vld [vmem:[%s8274_s26 + $0x3f0] sm:$0xff]  ;;  %v6171_v37 = vld [vmem:[%s8274_s26 + $0x3f8] sm:$0xff] }
 0x76d   : > { %6662 = vst.msk [vmem:[%s8274_s26 + $0x348] sm:$0xff] %vm6556_vm4, %v6533_v19 }
 0x770   : > { %v6385_v40 = vpop.xlane.xlu1 %6384 }
 0x771   : > { %v6534_v11 = vadd.f32 %v6385_v40, %v6150_v32 }
 0x772   : > { %v6387_v48 = vpop.xlane.xlu0 %6386 }
 0x773   : > { %6663 = vst.msk [vmem:[%s8274_s26 + $0x350] sm:$0xff] %vm6556_vm4, %v6534_v11  ;;  %v6535_v49 = vadd.f32 %v6387_v48, %v6151_v53 }
 0x775   : > { %6664 = vst.msk [vmem:[%s8274_s26 + $0x358] sm:$0xff] %vm6556_vm4, %v6535_v49 }
 0x778   : > { %v6389_v4 = vpop.xlane.xlu1 %6388 }
 0x779   : > { %v6536_v34 = vadd.f32 %v6389_v4, %v6152_v60 }
 0x77a   : > { %v6391_v51 = vpop.xlane.xlu0 %6390 }
 0x77b   : > { %6665 = vst.msk [vmem:[%s8274_s26 + $0x360] sm:$0xff] %vm6556_vm4, %v6536_v34  ;;  %v6537_v57 = vadd.f32 %v6391_v51, %v6153_v13 }
 0x77d   : > { %6666 = vst.msk [vmem:[%s8274_s26 + $0x368] sm:$0xff] %vm6556_vm4, %v6537_v57 }
 0x780   : > { %v6393_v3 = vpop.xlane.xlu1 %6392 }
 0x781   : > { %v6538_v29 = vadd.f32 %v6393_v3, %v6154_v8 }
 0x782   : > { %v6395_v27 = vpop.xlane.xlu0 %6394 }
 0x783   : > { %6667 = vst.msk [vmem:[%s8274_s26 + $0x370] sm:$0xff] %vm6556_vm4, %v6538_v29  ;;  %v6539_v38 = vadd.f32 %v6395_v27, %v6155_v46 }
 0x785   : > { %6668 = vst.msk [vmem:[%s8274_s26 + $0x378] sm:$0xff] %vm6556_vm4, %v6539_v38 }
 0x788   : > { %v6397_v35 = vpop.xlane.xlu1 %6396 }
 0x789   : > { %v6540_v45 = vadd.f32 %v6397_v35, %v6156_v0 }
 0x78a   : > { %v6399_v1 = vpop.xlane.xlu0 %6398 }
 0x78b   : > { %6669 = vst.msk [vmem:[%s8274_s26 + $0x380] sm:$0xff] %vm6556_vm4, %v6540_v45  ;;  %v6541_v22 = vadd.f32 %v6399_v1, %v6157_v5 }
 0x78d   : > { %6670 = vst.msk [vmem:[%s8274_s26 + $0x388] sm:$0xff] %vm6556_vm4, %v6541_v22 }
 0x790   : > { %v6401_v24 = vpop.xlane.xlu1 %6400 }
 0x791   : > { %v6542_v47 = vadd.f32 %v6401_v24, %v6158_v58 }
 0x792   : > { %v6403_v15 = vpop.xlane.xlu0 %6402 }
 0x793   : > { %6671 = vst.msk [vmem:[%s8274_s26 + $0x390] sm:$0xff] %vm6556_vm4, %v6542_v47  ;;  %v6543_v31 = vadd.f32 %v6403_v15, %v6159_v41 }
 0x795   : > { %6672 = vst.msk [vmem:[%s8274_s26 + $0x398] sm:$0xff] %vm6556_vm4, %v6543_v31 }
 0x798   : > { %v6405_v62 = vpop.xlane.xlu1 %6404 }
 0x799   : > { %v6544_v7 = vadd.f32 %v6405_v62, %v6160_v30 }
 0x79a   : > { %v6407_v23 = vpop.xlane.xlu0 %6406 }
 0x79b   : > { %6673 = vst.msk [vmem:[%s8274_s26 + $0x3a0] sm:$0xff] %vm6556_vm4, %v6544_v7  ;;  %v6545_v52 = vadd.f32 %v6407_v23, %v6161_v12 }
 0x79d   : > { %6674 = vst.msk [vmem:[%s8274_s26 + $0x3a8] sm:$0xff] %vm6556_vm4, %v6545_v52 }
 0x7a0   : > { %v6409_v28 = vpop.xlane.xlu1 %6408 }
 0x7a1   : > { %v6546_v55 = vadd.f32 %v6409_v28, %v6162_v2 }
 0x7a2   : > { %v6411_v25 = vpop.xlane.xlu0 %6410 }
 0x7a3   : > { %6675 = vst.msk [vmem:[%s8274_s26 + $0x3b0] sm:$0xff] %vm6556_vm4, %v6546_v55  ;;  %v6547_v50 = vadd.f32 %v6411_v25, %v6163_v63 }
 0x7a5   : > { %6676 = vst.msk [vmem:[%s8274_s26 + $0x3b8] sm:$0xff] %vm6556_vm4, %v6547_v50 }
 0x7a8   : > { %v6413_v39 = vpop.xlane.xlu1 %6412 }
 0x7a9   : > { %v6548_v56 = vadd.f32 %v6413_v39, %v6164_v17 }
 0x7aa   : > { %v6415_v14 = vpop.xlane.xlu0 %6414 }
 0x7ab   : > { %6677 = vst.msk [vmem:[%s8274_s26 + $0x3c0] sm:$0xff] %vm6556_vm4, %v6548_v56  ;;  %v6549_v20 = vadd.f32 %v6415_v14, %v6165_v6 }
 0x7ad   : > { %6678 = vst.msk [vmem:[%s8274_s26 + $0x3c8] sm:$0xff] %vm6556_vm4, %v6549_v20 }
 0x7b0   : > { %v6417_v43 = vpop.xlane.xlu1 %6416 }
 0x7b1   : > { %v6550_v44 = vadd.f32 %v6417_v43, %v6166_v59 }
 0x7b2   : > { %v6419_v21 = vpop.xlane.xlu0 %6418 }
 0x7b3   : > { %6679 = vst.msk [vmem:[%s8274_s26 + $0x3d0] sm:$0xff] %vm6556_vm4, %v6550_v44  ;;  %v6551_v33 = vadd.f32 %v6419_v21, %v6167_v42 }
 0x7b5   : > { %6680 = vst.msk [vmem:[%s8274_s26 + $0x3d8] sm:$0xff] %vm6556_vm4, %v6551_v33 }
 0x7b8   : > { %v6421_v36 = vpop.xlane.xlu1 %6420 }
 0x7b9   : > { %v6552_v18 = vadd.f32 %v6421_v36, %v6168_v54 }
 0x7ba   : > { %v6423_v26 = vpop.xlane.xlu0 %6422 }
 0x7bb   : > { %6681 = vst.msk [vmem:[%s8274_s26 + $0x3e0] sm:$0xff] %vm6556_vm4, %v6552_v18  ;;  %v6553_v9 = vadd.f32 %v6423_v26, %v6169_v10 }
 0x7bd   : > { %6682 = vst.msk [vmem:[%s8274_s26 + $0x3e8] sm:$0xff] %vm6556_vm4, %v6553_v9 }
 0x7c0   : > { %v6425_v16 = vpop.xlane.xlu1 %6424 }
 0x7c1   : > { %v6554_v19 = vadd.f32 %v6425_v16, %v6170_v61 }
 0x7c2   : > { %v6427_v32 = vpop.xlane.xlu0 %6426 }
 0x7c3   : > { %6683 = vst.msk [vmem:[%s8274_s26 + $0x3f0] sm:$0xff] %vm6556_vm4, %v6554_v19  ;;  %v6555_v40 = vadd.f32 %v6427_v32, %v6171_v37 }
 0x7c5   : > { %6684 = vst.msk [vmem:[%s8274_s26 + $0x3f8] sm:$0xff] %vm6556_vm4, %v6555_v40 }
 0x7c6 PF: > { %s19_s15 = sadd.s32 1, %s8149_s15   ;;  %s12271_s30 = smov %s8129_s10 }
 0x7c7   : > { %p16_p12 = scmp.ge.s32.totalorder %s19_s15, 10   ;;  %s12272_s10 = smov %s8255_s22 }
 0x7c8   : > { %s12273_s11 = smov %s8141_s13  ;;  %s12274_s12 = smov %s8145_s14 }
 0x7c9   : > { %s12275_s13 = smov %s12278_s16  ;;  %s12276_s14 = smov %s12282_s17 }
 0x7ca   :  { %18 = sbr.rel (!%p16_p12) target bundleno = 4 (0x4), region = 136 }

// kernel: modelfeat_forward.3
= control target key start
LH: loop header
LB: loop body
LE: loop exit
PB: predicated region body
PF: predicated region fallthrough
CT: control target
= control target key end

     0   :  { %s5086_s0 = inlined_call_operand.vmem [shape: bf16[2,9,512], index: 0, kind: input, shape index: {}]   ;;  %s5087_s1 = inlined_call_operand.vmem [shape: f32[2,512,1], index: 1, kind: input, shape index: {}]   ;;  %s5088_s2 = inlined_call_operand.vmem [shape: bf16[128,9], index: 2, kind: input, shape index: {}]   ;;  %s5089_s3 = inlined_call_operand.vmem [shape: f32[128,1], index: 3, kind: input, shape index: {}]   ;;  %s5090_s4 = inlined_call_operand.vmem [shape: bf16[256,128], index: 4, kind: input, shape index: {}]   ;;  %s5091_s5 = inlined_call_operand.vmem [shape: f32[256,1], index: 5, kind: input, shape index: {}]   ;;  %s5092_s6 = inlined_call_operand.vmem [shape: bf16[512,128], index: 6, kind: input, shape index: {}]   ;;  %s5093_s7 = inlined_call_operand.vmem [shape: bf16[512,256], index: 7, kind: input, shape index: {}]   ;;  %s5094_s8 = inlined_call_operand.hbm [shape: f32[2,512,512], index: 8, kind: output, shape index: {}]  }
   0x1   :  { %5097 = sst [smem:[#allocation17_spill]] %s5086_s0 }
   0x2   :  { %13 = vsyncpa [#allocation4], 0 }
   0x3   :  { %15 = vsyncpa [#allocation4 + $0x1], 0  ;;  %s3909_s27 = smov 0   ;;  %s3911_s28 = smov 0  }
   0x4   :  { %s3913_s29 = smov 0   ;;  %s3915_s30 = smov 0  }
   0x5   :  { %s3917_s9 = smov 0   ;;  %s3919_s10 = smov 0  }
   0x6   :  { %s3921_s11 = smov 0   ;;  %s3923_s12 = smov 0  }
   0x7 LB: > { %s3133_s13 = sadd.s32 4294967295, %s3856_s12   ;;  %s3134_s14 = sadd.s32 4294967294, %s3856_s12   ;;  %s3856_s12 = sphi %s3923_s12, %s21_s12   ;;  %s3852_s11 = sphi %s3921_s11, %s5130_s11   ;;  %s3848_s10 = sphi %s3919_s10, %s5129_s10   ;;  %s3844_s9 = sphi %s3917_s9, %s5128_s9   ;;  %s3840_s30 = sphi %s3915_s30, %s5127_s30   ;;  %s3836_s29 = sphi %s3913_s29, %s5126_s29   ;;  %s3832_s28 = sphi %s3911_s28, %s5125_s28   ;;  %s3828_s27 = sphi %s3909_s27, %s5124_s27  }
   0x8   : > { %s30_s15 = sadd.s32 1, %s3848_s10  ;;  %s33_s16 = sadd.s32 1, %s3852_s11 }
   0x9   : > { %p31_p0 = scmp.ge.s32.totalorder %s30_s15, 4  ;;  %p49_p1 = scmp.ne.s32.totalorder %s3836_s29, %s3832_s28 }
   0xa   : > { %p50_p2 = scmp.eq.s32.totalorder %s3856_s12, 0  ;;  %p233_p5 = scmp.eq.s32.totalorder %s3133_s13, 7 }
   0xb   : > { %s5132_s15 = smov (%p31_p0, %s30_s15), 0  ;;  %s5134_s16 = smov (!%p31_p0, %s33_s16), %s3852_s11 }
   0xc   : > { %5098 = sst [smem:[#allocation6_spill]] %s5132_s15  ;;  %s38_s17 = ssub.s32 %s3848_s10, %s5132_s15 }
   0xd   : > { %p3961_p3 = por %p50_p2, %p49_p1  ;;  %p35_p4 = scmp.ge.s32.totalorder %s5134_s16, 2 }
   0xe   : > { %p238_p6 = scmp.ne.s32.totalorder %s3832_s28, %s3828_s27  ;;  %p239_p7 = scmp.eq.s32.totalorder %s3134_s14, 7 }
   0xf   : > { %s5136_s16 = smov (%p35_p4, %s5134_s16), 0  ;;  %p3969_p8 = por %p233_p5, %p49_p1 }
  0x10   : > { %5100 = sst [smem:[#allocation7_spill]] %s5136_s16  ;;  %p3973_p9 = por %p239_p7, %p238_p6 }
  0x11   : > { %s37_s21 = ssub.s32 %s3852_s11, %s5136_s16  ;;  %s42_s23 = sadd.s32 1, %s3836_s29 }
  0x12   : > { %s39_s22 = sor.u32 %s38_s17, %s37_s21  ;;  %p3136_p11 = scmp.ge.s32.totalorder %s3856_s12, 8 }
  0x13   : > { %p40_p10 = scmp.eq.s32.totalorder %s39_s22, 0 }
  0x14   : > { %273 = sbr.rel (%p3136_p11) target bundleno = 38 (0x26), region = 40 }
  0x15   : > { %s3981_s24 = scalar_select %p40_p10, %s3836_s29, %s42_s23  }
  0x1b   : > { %276 = sbr.rel (!%p3961_p3) target bundleno = 38 (0x26), region = 44  ;;  %s278_s25 = sand.u32 (%p3961_p3), 1, %s3836_s29  }
  0x1c   : > { %s3138_s26 = sshll.u32 (%p3961_p3), %s3852_s11, 3  ;;  %s3137_s13 = sshll.u32 (%p3961_p3), %s278_s25, 3 }
  0x1d   : > { %s282_s14 = sadd.s32 (%p3961_p3), %s3848_s10, %s3138_s26  ;;  %s5103_s0 = sld [smem:[#allocation17_spill]] (%p3961_p3) }
  0x1e   : > { %s3139_s15 = sshll.u32 (%p3961_p3), %s282_s14, 2  ;;  %s280_s22 = scalar_lea.vmem (%p3961_p3), [#allocation2], %s3137_s13 }
  0x23   : > { %s284_s21 = scalar_lea.vmem %s5103_s0, %s3139_s15 }
  0x24   : > { %v300_v0 = vld [vmem:[%s284_s21] sm:$0xf]  ;;  %v302_v1 = vld [vmem:[%s284_s21 + $0x10] sm:$0xf] }
  0x25   : > { %301 = vst [vmem:[%s280_s22] sm:$0xf] %v300_v0  ;;  %303 = vst [vmem:[%s280_s22 + $0x4] sm:$0xf] %v302_v1 }
  0x26 PF: > { %p3140_p12 = scmp.ge.s32.totalorder %s3856_s12, 1  ;;  %p337_p13 = scmp.lt.s32.totalorder %s3856_s12, 9 }
  0x28   : > { %p338_p0 = pnand %p3140_p12, %p337_p13 }
  0x2a   : > { %341 = sbr.rel (%p338_p0) target bundleno = 1033 (0x409), region = 89 }
  0x31   : > { %v408_v2 = vld [vmem:[%s5089_s3 + $0x10] sm:$0xff]  ;;  %v406_v3 = vld [vmem:[%s5089_s3] sm:$0xff]  ;;  %s4001_s25 = sand.u32 1, %s3832_s28   ;;  %vm572_vm0 = vcmask 1043456   ;;  %v3858_v4 = vmov 0   ;;  %vm573_vm1 = vcmask 1044480  }
  0x32   : > { %3608 = vset.pattern.permute.xlu1 %v3858_v4  ;;  %3607 = vset.pattern.permute.xlu0 %v3858_v4  ;;  %s3141_s26 = sshll.u32 %s4001_s25, 3  ;;  %v409_v5 = vld [vmem:[%s5089_s3 + $0x18] sm:$0xff]  ;;  %v407_v6 = vld [vmem:[%s5089_s3 + $0x8] sm:$0xff]  ;;  %v3859_v7 = vmov 65535   ;;  %v3610_v11 = vld [vmem:[%s5088_s2] sm:$0xff]   ;;  %vm547_vm2 = vcmask 72704  }
  0x33   : > { %434 = vperm.xlu1 %3608, %v408_v2   ;;  %424 = vperm.xlu0 %3607, %v406_v3   ;;  %v574_v8 = vsel %vm572_vm0, 4294967295, %v3859_v7  ;;  %s346_s22 = scalar_lea.vmem [#allocation2], %s3141_s26  ;;  %v411_v13 = vld [vmem:[%s5089_s3 + $0x28] sm:$0xff]  ;;  %v410_v14 = vld [vmem:[%s5089_s3 + $0x20] sm:$0xff]  ;;  %v3612_v16 = vld [vmem:[%s5088_s2 + $0x10] sm:$0xff]   ;;  %p382_p1 = scmp.lt.s32.totalorder %s3844_s9, 1 }
  0x34   : > { %v3609_v9 = vld [vmem:[%s346_s22] sm:$0x1f]   ;;  %v575_v10 = vsel %vm573_vm1, %v574_v8, 0  ;;  %3355 = vmatprep.mubr.msk.bf16.mxu0 %vm547_vm2, %v3610_v11  ;;  %v413_v17 = vld [vmem:[%s5089_s3 + $0x38] sm:$0xff]  ;;  %v412_v18 = vld [vmem:[%s5089_s3 + $0x30] sm:$0xff]  ;;  %s3275_s15 = sshll.u32 %s3844_s9, 8 }
  0x35   : > { %v577_v12 = vand.u32 %v3609_v9, %v575_v10  ;;  %v3611_v15 = vld [vmem:[%s5088_s2 + $0x8] sm:$0xff]   ;;  %v414_v20 = vld [vmem:[%s5089_s3 + $0x40] sm:$0xff]  ;;  %v3613_v21 = vld [vmem:[%s5088_s2 + $0x18] sm:$0xff]   ;;  %s383_s26 = scalar_select %p382_p1, %s3844_s9, 1 }
  0x36   : > { %v415_v19 = vld [vmem:[%s5089_s3 + $0x48] sm:$0xff]  ;;  %v3614_v22 = vld [vmem:[%s5088_s2 + $0x20] sm:$0xff]   ;;  %v417_v23 = vld [vmem:[%s5089_s3 + $0x58] sm:$0xff]  ;;  %s3035_s13 = sadd.s32 %s3840_s30, %s3275_s15  ;;  %s3024_s0 = scalar_lea.sflag [#allocation4], %s4001_s25 }
  0x37   : > { %439 = vperm.xlu1 %3608, %v409_v5   ;;  %429 = vperm.xlu0 %3607, %v407_v6   ;;  %v416_v24 = vld [vmem:[%s5089_s3 + $0x50] sm:$0xff]  ;;  %v419_v25 = vld [vmem:[%s5089_s3 + $0x68] sm:$0xff]  ;;  %v418_v26 = vld [vmem:[%s5089_s3 + $0x60] sm:$0xff]  ;;  %s3279_s23 = sshll.u32 %s383_s26, 9  ;;  %s3276_s14 = sshll.u32 %s3035_s13, 7 }
  0x38   : > { %3353 = vmatprep.subr.bf16.mxu0 %v577_v12  ;;  %v3615_v27 = vld [vmem:[%s5088_s2 + $0x28] sm:$0xff]   ;;  %v3616_v28 = vld [vmem:[%s5088_s2 + $0x30] sm:$0xff]   ;;  %v421_v29 = vld [vmem:[%s5089_s3 + $0x78] sm:$0xff]  ;;  %s4182_s21 = scalar_lea.vmem %s5087_s1, %s3279_s23  ;;  %s3142_s23 = sshll.u32 %s4001_s25, 9 }
  0x39   : > { %3354 = vmatpush3.bf16.msra.mxu0 %v577_v12  ;;  %v420_v30 = vld [vmem:[%s5089_s3 + $0x70] sm:$0xff]  ;;  %v733_v31 = vld [vmem:[%s5091_s5 + $0x8] sm:$0xff]  ;;  %v732_v32 = vld [vmem:[%s5091_s5] sm:$0xff]  ;;  %s4804_s16 = scalar_lea.vmem [#allocation3], %s3142_s23  ;;  %s3860_s22 = smov [#allocation3]  }
  0x3a   : > { %1677 = vmatprep.subr.bf16.mxu0 %v3858_v4  ;;  %v3617_v33 = vld [vmem:[%s5088_s2 + $0x38] sm:$0xff]   ;;  %v734_v35 = vld [vmem:[%s5091_s5 + $0x10] sm:$0xff]  ;;  %v737_v36 = vld [vmem:[%s5091_s5 + $0x28] sm:$0xff]  ;;  %s3038_s9 = sshll.u32 %s4804_s16, 4  ;;  %s3766_s18 = sshll.u32 %s3860_s22, 4  ;;  %s5030_s9 = int_to_ptr.vmem [resolvable:$true] %s3038_s9  ;;  %s3767_s18 = int_to_ptr.vmem [resolvable:$false] %s3766_s18 }
  0x3b   : > { %449 = vperm.xlu1 %3608, %v411_v13   ;;  %444 = vperm.xlu0 %3607, %v410_v14   ;;  %v735_v34 = vld [vmem:[%s5091_s5 + $0x18] sm:$0xff]  ;;  %v736_v37 = vld [vmem:[%s5091_s5 + $0x20] sm:$0xff]  ;;  %v738_v39 = vld [vmem:[%s5091_s5 + $0x30] sm:$0xff]  ;;  %s3762_s26 = scalar_lea.vmem %s5030_s9, 8192  ;;  %s3768_s23 = scalar_lea.vmem %s3767_s18, 16384 }
  0x3c   : > { %3356 = vmatmul.mubr.msk.bf16.vlgmr.msra.gmra.mrb[0].mxu0 %vm547_vm2, %v3611_v15  ;;  %v739_v38 = vld [vmem:[%s5091_s5 + $0x38] sm:$0xff]  ;;  %v741_v40 = vld [vmem:[%s5091_s5 + $0x48] sm:$0xff]  ;;  %v740_v41 = vld [vmem:[%s5091_s5 + $0x40] sm:$0xff]  ;;  %p3763_p2 = scmp.ne.s32.totalorder %s5030_s9, %s3762_s26  ;;  %p3769_p5 = scmp.lt.s32.totalorder %s5030_s9, %s3767_s18 }
  0x3d   : > { %3359 = vmatprep.mubr.msk.bf16.mxu0 %vm547_vm2, %v3612_v16  ;;  %v743_v42 = vld [vmem:[%s5091_s5 + $0x58] sm:$0xff]  ;;  %v742_v43 = vld [vmem:[%s5091_s5 + $0x50] sm:$0xff]  ;;  %v745_v44 = vld [vmem:[%s5091_s5 + $0x68] sm:$0xff]  ;;  %p3770_p6 = scmp.lt.s32.totalorder %s3768_s23, %s3762_s26 }
  0x3e   : > { %v744_v45 = vld [vmem:[%s5091_s5 + $0x60] sm:$0xff]  ;;  %v747_v46 = vld [vmem:[%s5091_s5 + $0x78] sm:$0xff]  ;;  %v746_v47 = vld [vmem:[%s5091_s5 + $0x70] sm:$0xff]  ;;  %p3764_p3 = pnand %p3763_p2, %p3969_p8 }
  0x3f   : > { %459 = vperm.xlu1 %3608, %v413_v17   ;;  %454 = vperm.xlu0 %3607, %v412_v18   ;;  %v749_v48 = vld [vmem:[%s5091_s5 + $0x88] sm:$0xff]  ;;  %v748_v49 = vld [vmem:[%s5091_s5 + $0x80] sm:$0xff]  ;;  %v751_v50 = vld [vmem:[%s5091_s5 + $0x98] sm:$0xff]  ;;  %p3771_p7 = por %p3770_p6, %p3769_p5 }
  0x40   : > { %v750_v51 = vld [vmem:[%s5091_s5 + $0x90] sm:$0xff]  ;;  %v753_v52 = vld [vmem:[%s5091_s5 + $0xa8] sm:$0xff]  ;;  %v752_v53 = vld [vmem:[%s5091_s5 + $0xa0] sm:$0xff]  ;;  %p3765_p4 = pneg %p3764_p3 }
  0x41   : > { %v755_v54 = vld [vmem:[%s5091_s5 + $0xb8] sm:$0xff]  ;;  %v754_v55 = vld [vmem:[%s5091_s5 + $0xb0] sm:$0xff]  ;;  %v757_v56 = vld [vmem:[%s5091_s5 + $0xc8] sm:$0xff] }
  0x42   : > { %v756_v57 = vld [vmem:[%s5091_s5 + $0xc0] sm:$0xff]  ;;  %v759_v58 = vld [vmem:[%s5091_s5 + $0xd8] sm:$0xff]  ;;  %v758_v59 = vld [vmem:[%s5091_s5 + $0xd0] sm:$0xff]  ;;  %p3772_p10 = pnand %p3771_p7, %p3765_p4 }
  0x43   : > { %469 = vperm.xlu1 %3608, %v415_v19   ;;  %464 = vperm.xlu0 %3607, %v414_v20   ;;  %v761_v60 = vld [vmem:[%s5091_s5 + $0xe8] sm:$0xff]  ;;  %v760_v61 = vld [vmem:[%s5091_s5 + $0xe0] sm:$0xff]  ;;  %v763_v62 = vld [vmem:[%s5091_s5 + $0xf8] sm:$0xff] }
  0x44   : > { %3360 = vmatmul.mubr.msk.bf16.gmra.mrb[4].mxu0 %vm547_vm2, %v3613_v21  ;;  %v762_v63 = vld [vmem:[%s5091_s5 + $0xf0] sm:$0xff]  ;;  %v2448_v0 = vld [vmem:[%s4182_s21 + $0x8] sm:$0xff]  ;;  %v2447_v1 = vld [vmem:[%s4182_s21] sm:$0xff] }
  0x45   : > { %3363 = vmatprep.mubr.msk.bf16.mxu0 %vm547_vm2, %v3614_v22  ;;  %v2450_v2 = vld [vmem:[%s4182_s21 + $0x18] sm:$0xff]  ;;  %v2449_v3 = vld [vmem:[%s4182_s21 + $0x10] sm:$0xff]  ;;  %v2452_v5 = vld [vmem:[%s4182_s21 + $0x28] sm:$0xff] }
  0x46   : > { %v2451_v6 = vld [vmem:[%s4182_s21 + $0x20] sm:$0xff]  ;;  %v2454_v7 = vld [vmem:[%s4182_s21 + $0x38] sm:$0xff]  ;;  %v2453_v8 = vld [vmem:[%s4182_s21 + $0x30] sm:$0xff] }
  0x47   : > { %479 = vperm.xlu1 %3608, %v417_v23   ;;  %474 = vperm.xlu0 %3607, %v416_v24   ;;  %v2456_v9 = vld [vmem:[%s4182_s21 + $0x48] sm:$0xff]  ;;  %v2455_v10 = vld [vmem:[%s4182_s21 + $0x40] sm:$0xff]  ;;  %v2458_v11 = vld [vmem:[%s4182_s21 + $0x58] sm:$0xff] }
  0x48   : > { %v2457_v12 = vld [vmem:[%s4182_s21 + $0x50] sm:$0xff]  ;;  %v2460_v13 = vld [vmem:[%s4182_s21 + $0x68] sm:$0xff]  ;;  %v2459_v14 = vld [vmem:[%s4182_s21 + $0x60] sm:$0xff] }
  0x49   : > { %v2462_v15 = vld [vmem:[%s4182_s21 + $0x78] sm:$0xff]  ;;  %v2461_v16 = vld [vmem:[%s4182_s21 + $0x70] sm:$0xff]  ;;  %v2464_v17 = vld [vmem:[%s4182_s21 + $0x88] sm:$0xff] }
  0x4a   : > { %v2463_v18 = vld [vmem:[%s4182_s21 + $0x80] sm:$0xff]  ;;  %v2466_v19 = vld [vmem:[%s4182_s21 + $0x98] sm:$0xff]  ;;  %v2465_v20 = vld [vmem:[%s4182_s21 + $0x90] sm:$0xff] }
  0x4b   : > { %489 = vperm.xlu1 %3608, %v419_v25   ;;  %484 = vperm.xlu0 %3607, %v418_v26   ;;  %v3618_v21 = vld [vmem:[%s5090_s4] sm:$0xff]   ;;  %v2468_v22 = vld [vmem:[%s4182_s21 + $0xa8] sm:$0xff]  ;;  %v2470_v24 = vld [vmem:[%s4182_s21 + $0xb8] sm:$0xff] }
  0x4c   : > { %3364 = vmatmul.mubr.msk.bf16.gmra.mrb[8].mxu0 %vm547_vm2, %v3615_v27  ;;  %v2467_v23 = vld [vmem:[%s4182_s21 + $0xa0] sm:$0xff]  ;;  %3387 = vmatprep.mubr.bf16.mxu1 %v3618_v21  ;;  %v2469_v25 = vld [vmem:[%s4182_s21 + $0xb0] sm:$0xff]  ;;  %v2472_v26 = vld [vmem:[%s4182_s21 + $0xc8] sm:$0xff] }
  0x4d   : > { %3367 = vmatprep.mubr.msk.bf16.mxu0 %vm547_vm2, %v3616_v28  ;;  %v2471_v27 = vld [vmem:[%s4182_s21 + $0xc0] sm:$0xff]  ;;  %v2474_v28 = vld [vmem:[%s4182_s21 + $0xd8] sm:$0xff] }
  0x4f   : > { %499 = vperm.xlu1 %3608, %v421_v29   ;;  %494 = vperm.xlu0 %3607, %v420_v30   ;;  %v2473_v29 = vld [vmem:[%s4182_s21 + $0xd0] sm:$0xff]  ;;  %v2476_v30 = vld [vmem:[%s4182_s21 + $0xe8] sm:$0xff] }
  0x53   : > { %771 = vperm.xlu1 %3608, %v733_v31   ;;  %766 = vperm.xlu0 %3607, %v732_v32   ;;  %v2475_v31 = vld [vmem:[%s4182_s21 + $0xe0] sm:$0xff]  ;;  %v2478_v32 = vld [vmem:[%s4182_s21 + $0xf8] sm:$0xff] }
  0x54   : > { %3368 = vmatmul.mubr.msk.bf16.gmra.mrb[12].mxu0 %vm547_vm2, %v3617_v33  ;;  %v2477_v33 = vld [vmem:[%s4182_s21 + $0xf0] sm:$0xff] }
  0x57   : > { %781 = vperm.xlu1 %3608, %v735_v34   ;;  %776 = vperm.xlu0 %3607, %v734_v35   ;;  %v2480_v34 = vld [vmem:[%s4182_s21 + $0x108] sm:$0xff]  ;;  %v2479_v35 = vld [vmem:[%s4182_s21 + $0x100] sm:$0xff] }
  0x5b   : > { %791 = vperm.xlu1 %3608, %v737_v36   ;;  %786 = vperm.xlu0 %3607, %v736_v37   ;;  %v2482_v36 = vld [vmem:[%s4182_s21 + $0x118] sm:$0xff]  ;;  %v2481_v37 = vld [vmem:[%s4182_s21 + $0x110] sm:$0xff] }
  0x5f   : > { %801 = vperm.xlu1 %3608, %v739_v38   ;;  %796 = vperm.xlu0 %3607, %v738_v39   ;;  %v2484_v38 = vld [vmem:[%s4182_s21 + $0x128] sm:$0xff]  ;;  %v2483_v39 = vld [vmem:[%s4182_s21 + $0x120] sm:$0xff] }
  0x63   : > { %811 = vperm.xlu1 %3608, %v741_v40   ;;  %806 = vperm.xlu0 %3607, %v740_v41   ;;  %v2486_v40 = vld [vmem:[%s4182_s21 + $0x138] sm:$0xff]  ;;  %v2485_v41 = vld [vmem:[%s4182_s21 + $0x130] sm:$0xff] }
  0x67   : > { %821 = vperm.xlu1 %3608, %v743_v42   ;;  %816 = vperm.xlu0 %3607, %v742_v43   ;;  %v2488_v42 = vld [vmem:[%s4182_s21 + $0x148] sm:$0xff]  ;;  %v2487_v43 = vld [vmem:[%s4182_s21 + $0x140] sm:$0xff] }
  0x6b   : > { %831 = vperm.xlu1 %3608, %v745_v44   ;;  %826 = vperm.xlu0 %3607, %v744_v45   ;;  %v2490_v44 = vld [vmem:[%s4182_s21 + $0x158] sm:$0xff]  ;;  %v2489_v45 = vld [vmem:[%s4182_s21 + $0x150] sm:$0xff] }
  0x6f   : > { %841 = vperm.xlu1 %3608, %v747_v46   ;;  %836 = vperm.xlu0 %3607, %v746_v47   ;;  %v2492_v46 = vld [vmem:[%s4182_s21 + $0x168] sm:$0xff]  ;;  %v2491_v47 = vld [vmem:[%s4182_s21 + $0x160] sm:$0xff] }
  0x73   : > { %851 = vperm.xlu1 %3608, %v749_v48   ;;  %846 = vperm.xlu0 %3607, %v748_v49  }
  0x77   : > { %861 = vperm.xlu1 %3608, %v751_v50   ;;  %856 = vperm.xlu0 %3607, %v750_v51   ;;  %v2494_v50 = vld [vmem:[%s4182_s21 + $0x178] sm:$0xff]  ;;  %v2493_v51 = vld [vmem:[%s4182_s21 + $0x170] sm:$0xff] }
  0x7b   : > { %871 = vperm.xlu1 %3608, %v753_v52   ;;  %866 = vperm.xlu0 %3607, %v752_v53   ;;  %v2496_v53 = vld [vmem:[%s4182_s21 + $0x188] sm:$0xff] }
  0x7f   : > { %881 = vperm.xlu1 %3608, %v755_v54   ;;  %876 = vperm.xlu0 %3607, %v754_v55   ;;  %v2495_v54 = vld [vmem:[%s4182_s21 + $0x180] sm:$0xff] }
  0x83   : > { %891 = vperm.xlu1 %3608, %v757_v56   ;;  %886 = vperm.xlu0 %3607, %v756_v57   ;;  %v2498_v56 = vld [vmem:[%s4182_s21 + $0x198] sm:$0xff]  ;;  %v2497_v57 = vld [vmem:[%s4182_s21 + $0x190] sm:$0xff] }
  0x87   : > { %901 = vperm.xlu1 %3608, %v759_v58   ;;  %896 = vperm.xlu0 %3607, %v758_v59  }
  0x8b   : > { %911 = vperm.xlu1 %3608, %v761_v60   ;;  %906 = vperm.xlu0 %3607, %v760_v61   ;;  %v2500_v60 = vld [vmem:[%s4182_s21 + $0x1a8] sm:$0xff]  ;;  %v2499_v61 = vld [vmem:[%s4182_s21 + $0x1a0] sm:$0xff] }
  0x8f   : > { %921 = vperm.xlu1 %3608, %v763_v62   ;;  %916 = vperm.xlu0 %3607, %v762_v63   ;;  %v2502_v63 = vld [vmem:[%s4182_s21 + $0x1b8] sm:$0xff] }
  0x93   : > { %2518 = vperm.xlu1 %3608, %v2448_v0   ;;  %2513 = vperm.xlu0 %3607, %v2447_v1   ;;  %v2501_v0 = vld [vmem:[%s4182_s21 + $0x1b0] sm:$0xff] }
  0x97   : > { %2528 = vperm.xlu1 %3608, %v2450_v2   ;;  %2523 = vperm.xlu0 %3607, %v2449_v3   ;;  %v2504_v2 = vld [vmem:[%s4182_s21 + $0x1c8] sm:$0xff]  ;;  %v2503_v3 = vld [vmem:[%s4182_s21 + $0x1c0] sm:$0xff] }
  0x9b   : > { %2538 = vperm.xlu1 %3608, %v2452_v5   ;;  %2533 = vperm.xlu0 %3607, %v2451_v6  }
  0x9f   : > { %2548 = vperm.xlu1 %3608, %v2454_v7   ;;  %2543 = vperm.xlu0 %3607, %v2453_v8   ;;  %v2506_v7 = vld [vmem:[%s4182_s21 + $0x1d8] sm:$0xff]  ;;  %v2505_v8 = vld [vmem:[%s4182_s21 + $0x1d0] sm:$0xff] }
  0xa3   : > { %2558 = vperm.xlu1 %3608, %v2456_v9   ;;  %2553 = vperm.xlu0 %3607, %v2455_v10   ;;  %v2508_v10 = vld [vmem:[%s4182_s21 + $0x1e8] sm:$0xff] }
  0xa7   : > { %2568 = vperm.xlu1 %3608, %v2458_v11   ;;  %2563 = vperm.xlu0 %3607, %v2457_v12   ;;  %v2507_v11 = vld [vmem:[%s4182_s21 + $0x1e0] sm:$0xff] }
  0xab   : > { %2578 = vperm.xlu1 %3608, %v2460_v13   ;;  %2573 = vperm.xlu0 %3607, %v2459_v14   ;;  %v2510_v13 = vld [vmem:[%s4182_s21 + $0x1f8] sm:$0xff]  ;;  %v2509_v14 = vld [vmem:[%s4182_s21 + $0x1f0] sm:$0xff]  ;;  %s5028_s21 = scalar_lea.hbm %s5094_s8, %s3276_s14 }
  0xaf   : > { %2588 = vperm.xlu1 %3608, %v2462_v15   ;;  %2583 = vperm.xlu0 %3607, %v2461_v16  }
  0xb2   : > { %v435_v48 = vpop.permute.xlu1 %434  ;;  %v425_v49 = vpop.permute.xlu0 %424 }
  0xb3   : > { %2598 = vperm.xlu1 %3608, %v2464_v17   ;;  %2593 = vperm.xlu0 %3607, %v2463_v18  }
  0xb6   : > { %v440_v52 = vpop.permute.xlu1 %439  ;;  %v430_v55 = vpop.permute.xlu0 %429 }
  0xb7   : > { %2608 = vperm.xlu1 %3608, %v2466_v19   ;;  %2603 = vperm.xlu0 %3607, %v2465_v20  }
  0xba   : > { %v450_v58 = vpop.permute.xlu1 %449  ;;  %v445_v59 = vpop.permute.xlu0 %444 }
  0xbb   : > { %2618 = vperm.xlu1 %3608, %v2468_v22   ;;  %2613 = vperm.xlu0 %3607, %v2467_v23  }
  0xbe   : > { %v460_v62 = vpop.permute.xlu1 %459  ;;  %v455_v1 = vpop.permute.xlu0 %454 }
  0xbf   : > { %2628 = vperm.xlu1 %3608, %v2470_v24   ;;  %2623 = vperm.xlu0 %3607, %v2469_v25  }
  0xc2   : > { %v4245_v5 = vpop.permute.xlu1 %469  ;;  %v465_v6 = vpop.permute.xlu0 %464 }
  0xc3   : > { %2638 = vperm.xlu1 %3608, %v2472_v26   ;;  %2633 = vperm.xlu0 %3607, %v2471_v27  }
  0xc6   : > { %v480_v9 = vpop.permute.xlu1 %479  ;;  %v475_v12 = vpop.permute.xlu0 %474 }
  0xc7   : > { %2648 = vperm.xlu1 %3608, %v2474_v28   ;;  %2643 = vperm.xlu0 %3607, %v2473_v29  }
  0xca   : > { %v4253_v15 = vpop.permute.xlu1 %489  ;;  %v485_v16 = vpop.permute.xlu0 %484 }
  0xcb   : > { %2658 = vperm.xlu1 %3608, %v2476_v30   ;;  %2653 = vperm.xlu0 %3607, %v2475_v31  }
  0xcf   : > { %2668 = vperm.xlu1 %3608, %v2478_v32   ;;  %2663 = vperm.xlu0 %3607, %v2477_v33  }
  0xd3   : > { %2678 = vperm.xlu1 %3608, %v2480_v34   ;;  %2673 = vperm.xlu0 %3607, %v2479_v35  }
  0xd7   : > { %2688 = vperm.xlu1 %3608, %v2482_v36   ;;  %2683 = vperm.xlu0 %3607, %v2481_v37  }
  0xdb   : > { %2698 = vperm.xlu1 %3608, %v2484_v38   ;;  %2693 = vperm.xlu0 %3607, %v2483_v39  }
  0xdf   : > { %2708 = vperm.xlu1 %3608, %v2486_v40   ;;  %2703 = vperm.xlu0 %3607, %v2485_v41  }
  0xe3   : > { %2718 = vperm.xlu1 %3608, %v2488_v42   ;;  %2713 = vperm.xlu0 %3607, %v2487_v43  }
  0xe7   : > { %2728 = vperm.xlu1 %3608, %v2490_v44   ;;  %2723 = vperm.xlu0 %3607, %v2489_v45  }
  0xeb   : > { %2738 = vperm.xlu1 %3608, %v2492_v46   ;;  %2733 = vperm.xlu0 %3607, %v2491_v47  }
  0xef   : > { %2748 = vperm.xlu1 %3608, %v2494_v50   ;;  %2743 = vperm.xlu0 %3607, %v2493_v51  }
  0xf3   : > { %2758 = vperm.xlu1 %3608, %v2496_v53   ;;  %2753 = vperm.xlu0 %3607, %v2495_v54  }
  0xf7   : > { %2768 = vperm.xlu1 %3608, %v2498_v56   ;;  %2763 = vperm.xlu0 %3607, %v2497_v57  }
  0xfb   : > { %2778 = vperm.xlu1 %3608, %v2500_v60   ;;  %2773 = vperm.xlu0 %3607, %v2499_v61  }
  0xff   : > { %2788 = vperm.xlu1 %3608, %v2502_v63   ;;  %2783 = vperm.xlu0 %3607, %v2501_v0   ;;  %v500_v63 = vpop.permute.xlu1 %499 }
 0x103   : > { %2798 = vperm.xlu1 %3608, %v2504_v2   ;;  %2793 = vperm.xlu0 %3607, %v2503_v3  }
 0x107   : > { %2808 = vperm.xlu1 %3608, %v2506_v7   ;;  %2803 = vperm.xlu0 %3607, %v2505_v8  }
 0x10b   : > { %2818 = vperm.xlu1 %3608, %v2508_v10   ;;  %2813 = vperm.xlu0 %3607, %v2507_v11  }
 0x10f   : > { %2828 = vperm.xlu1 %3608, %v2510_v13   ;;  %2823 = vperm.xlu0 %3607, %v2509_v14   ;;  %v3357_v17 = vpop.f32.mrb[0].mxu0  ;;  %v3620_v13 = vld [vmem:[%s5090_s4 + $0x10] sm:$0xff]   ;;  %v3621_v14 = vld [vmem:[%s5090_s4 + $0x18] sm:$0xff]  }
 0x110   : > { %v622_v18 = vadd.f32 %v3357_v17, %v435_v48  ;;  %v613_v19 = vpop.f32.mrb[1].mxu0  ;;  %v3624_v17 = vld [vmem:[%s5090_s4 + $0x30] sm:$0xff]  }
 0x111   : > { %v3358_v20 = vpop.f32.mrb[2].mxu0  ;;  %v614_v21 = vadd.f32 %v613_v19, %v425_v49  ;;  %v3626_v19 = vld [vmem:[%s5090_s4 + $0x40] sm:$0xff]  }
 0x112   : > { %v625_v22 = vadd.f32 %v3358_v20, %v440_v52  ;;  %v616_v23 = vpop.f32.mrb[3].mxu0  ;;  %v678_v24 = vmax.f32 %v622_v18, 0.0  ;;  %v3625_v18 = vld [vmem:[%s5090_s4 + $0x38] sm:$0xff]   ;;  %v3627_v20 = vld [vmem:[%s5090_s4 + $0x48] sm:$0xff]  }
 0x113   : > { %v617_v26 = vadd.f32 %v616_v23, %v430_v55  ;;  %v676_v27 = vmax.f32 %v614_v21, 0.0  ;;  %v3628_v21 = vld [vmem:[%s5090_s4 + $0x50] sm:$0xff]   ;;  %v3630_v23 = vld [vmem:[%s5090_s4 + $0x60] sm:$0xff]  }
 0x114   : > { %v679_v25 = vmax.f32 %v625_v22, 0.0  ;;  %v3629_v22 = vld [vmem:[%s5090_s4 + $0x58] sm:$0xff]  }
 0x115   : > { %v677_v29 = vmax.f32 %v617_v26, 0.0  ;;  %v3633_v26 = vld [vmem:[%s5090_s4 + $0x78] sm:$0xff]  }
 0x116   : > { %v4255_v28 = vpack.c.bf16 %v679_v25, %v678_v24  ;;  %v3631_v24 = vld [vmem:[%s5090_s4 + $0x68] sm:$0xff]   ;;  %v3632_v25 = vld [vmem:[%s5090_s4 + $0x70] sm:$0xff]  }
 0x117   : > { %v3361_v30 = vpop.f32.mrb[4].mxu0  ;;  %v4257_v31 = vpack.c.bf16 %v677_v29, %v676_v27  ;;  %v3636_v27 = vld [vmem:[%s5093_s7 + $0x4] ss:$8 sps:$4 sm:$0xff]  }
 0x118   : > { %v638_v32 = vadd.f32 %v3361_v30, %v455_v1  ;;  %v629_v33 = vpop.f32.mrb[5].mxu0  ;;  %v3639_v29 = vld [vmem:[%s5093_s7 + $0x1a4] ss:$8 sps:$4 sm:$0xff]   ;;  %1709 = vmatprep.mubr.bf16.mxu0 %v3636_v27 }
 0x119   : > { %v3362_v34 = vpop.f32.mrb[6].mxu0  ;;  %v630_v35 = vadd.f32 %v629_v33, %v445_v59  ;;  %3371 = vmatprep.subr.bf16.mxu1 %v4257_v31 }
 0x11a   : > { %v641_v36 = vadd.f32 %v3362_v34, %v460_v62  ;;  %v632_v37 = vpop.f32.mrb[7].mxu0  ;;  %3372 = vmatpush3.bf16.msra.mxu1 %v4257_v31  ;;  %v682_v38 = vmax.f32 %v638_v32, 0.0  ;;  %v772_v32 = vpop.permute.xlu1 %771 }
 0x11b   : > { %v633_v40 = vadd.f32 %v632_v37, %v450_v58  ;;  %3373 = vmatprep.subr.bf16.mxu1 %v4255_v28  ;;  %v680_v41 = vmax.f32 %v630_v35, 0.0  ;;  %v495_v58 = vpop.permute.xlu0 %494 }
 0x11c   : > { %v683_v39 = vmax.f32 %v641_v36, 0.0 }
 0x11d   : > { %v681_v43 = vmax.f32 %v633_v40, 0.0 }
 0x11e   : > { %v4262_v42 = vpack.c.bf16 %v683_v39, %v682_v38  ;;  %3374 = vmatpush3.bf16.msra.mxu1 %v4255_v28  ;;  %v782_v34 = vpop.permute.xlu1 %781 }
 0x11f   : > { %v3365_v44 = vpop.f32.mrb[8].mxu0  ;;  %v4265_v45 = vpack.c.bf16 %v681_v43, %v680_v41  ;;  %v767_v30 = vpop.permute.xlu0 %766 }
 0x120   : > { %v654_v46 = vadd.f32 %v3365_v44, %v475_v12  ;;  %v645_v47 = vpop.f32.mrb[9].mxu0  ;;  %v3619_v12 = vld [vmem:[%s5090_s4 + $0x8] sm:$0xff]  }
 0x121   : > { %v3366_v48 = vpop.f32.mrb[10].mxu0  ;;  %v646_v49 = vadd.f32 %v645_v47, %v465_v6  ;;  %3375 = vmatprep.subr.bf16.mxu1 %v4265_v45 }
 0x122   : > { %v657_v50 = vadd.f32 %v3366_v48, %v480_v9  ;;  %v648_v51 = vpop.f32.mrb[11].mxu0  ;;  %3376 = vmatpush3.bf16.msra.mxu1 %v4265_v45  ;;  %v686_v52 = vmax.f32 %v654_v46, 0.0  ;;  %v792_v36 = vpop.permute.xlu1 %791 }
 0x123   : > { %v649_v54 = vadd.f32 %v648_v51, %v4245_v5  ;;  %3377 = vmatprep.subr.bf16.mxu1 %v4262_v42  ;;  %v684_v55 = vmax.f32 %v646_v49, 0.0  ;;  %v777_v33 = vpop.permute.xlu0 %776 }
 0x124   : > { %v687_v53 = vmax.f32 %v657_v50, 0.0 }
 0x125   : > { %v685_v57 = vmax.f32 %v649_v54, 0.0 }
 0x126   : > { %v4271_v56 = vpack.c.bf16 %v687_v53, %v686_v52  ;;  %3378 = vmatpush3.bf16.msra.mxu1 %v4262_v42  ;;  %v802_v38 = vpop.permute.xlu1 %801 }
 0x127   : > { %v3369_v59 = vpop.f32.mrb[12].mxu0  ;;  %v4274_v60 = vpack.c.bf16 %v685_v57, %v684_v55  ;;  %v787_v35 = vpop.permute.xlu0 %786 }
 0x128   : > { %v670_v61 = vadd.f32 %v3369_v59, %v495_v58  ;;  %v661_v62 = vpop.f32.mrb[13].mxu0 }
 0x129   : > { %v3370_v0 = vpop.f32.mrb[14].mxu0  ;;  %v662_v1 = vadd.f32 %v661_v62, %v485_v16  ;;  %3379 = vmatprep.subr.bf16.mxu1 %v4274_v60  ;;  %v3623_v16 = vld [vmem:[%s5090_s4 + $0x28] sm:$0xff]  }
 0x12a   : > { %v673_v2 = vadd.f32 %v3370_v0, %v500_v63  ;;  %v664_v3 = vpop.f32.mrb[15].mxu0  ;;  %3380 = vmatpush3.bf16.msra.mxu1 %v4274_v60  ;;  %v690_v5 = vmax.f32 %v670_v61, 0.0  ;;  %v812_v40 = vpop.permute.xlu1 %811 }
 0x12b   : > { %v665_v7 = vadd.f32 %v664_v3, %v4253_v15  ;;  %3381 = vmatprep.subr.bf16.mxu1 %v4271_v56  ;;  %v688_v8 = vmax.f32 %v662_v1, 0.0  ;;  %v3622_v15 = vld [vmem:[%s5090_s4 + $0x20] sm:$0xff]   ;;  %v797_v37 = vpop.permute.xlu0 %796 }
 0x12c   : > { %v691_v6 = vmax.f32 %v673_v2, 0.0 }
 0x12d   : > { %v689_v10 = vmax.f32 %v665_v7, 0.0 }
 0x12e   : > { %v4280_v9 = vpack.c.bf16 %v691_v6, %v690_v5  ;;  %3382 = vmatpush3.bf16.msra.mxu1 %v4271_v56  ;;  %v822_v43 = vpop.permute.xlu1 %821 }
 0x12f   : > { %v4283_v11 = vpack.c.bf16 %v689_v10, %v688_v8  ;;  %v807_v39 = vpop.permute.xlu0 %806 }
 0x131   : > { %3383 = vmatprep.subr.bf16.mxu1 %v4283_v11 }
 0x132   : > { %3384 = vmatpush3.bf16.msra.mxu1 %v4283_v11  ;;  %v4343_v53 = vpop.permute.xlu1 %831 }
 0x133   : > { %3385 = vmatprep.subr.bf16.mxu1 %v4280_v9  ;;  %v817_v41 = vpop.permute.xlu0 %816 }
 0x136   : > { %3386 = vmatpush3.bf16.msra.mxu1 %v4280_v9  ;;  %v842_v3 = vpop.permute.xlu1 %841 }
 0x137   : > { %3499 = vmatprep.subr.bf16.mxu1 %v3858_v4  ;;  %v4341_v48 = vpop.permute.xlu0 %826 }
 0x139   : > { %3388 = vmatmul.mubr.bf16.vlgmr.msra.gmra.mrb[0].mxu1 %v3619_v12 }
 0x13a   : > { %3391 = vmatprep.mubr.bf16.mxu1 %v3620_v13 }
 0x13b   : > { %v837_v62 = vpop.permute.xlu0 %836 }
 0x141   : > { %3392 = vmatmul.mubr.bf16.gmra.mrb[4].mxu1 %v3621_v14  ;;  %v4347_v14 = vpop.permute.xlu0 %846 }
 0x142   : > { %3395 = vmatprep.mubr.bf16.mxu1 %v3622_v15 }
 0x145   : > { %v857_v27 = vpop.permute.xlu0 %856 }
 0x149   : > { %3396 = vmatmul.mubr.bf16.gmra.mrb[8].mxu1 %v3623_v16 }
 0x14a   : > { %3399 = vmatprep.mubr.bf16.mxu1 %v3624_v17 }
 0x151   : > { %3400 = vmatmul.mubr.bf16.gmra.mrb[12].mxu1 %v3625_v18  ;;  %v4351_v18 = vpop.permute.xlu1 %851 }
 0x152   : > { %3403 = vmatprep.mubr.bf16.mxu1 %v3626_v19 }
 0x159   : > { %3404 = vmatmul.mubr.bf16.gmra.mrb[16].mxu1 %v3627_v20 }
 0x15a   : > { %3407 = vmatprep.mubr.bf16.mxu1 %v3628_v21 }
 0x161   : > { %3408 = vmatmul.mubr.bf16.gmra.mrb[20].mxu1 %v3629_v22 }
 0x162   : > { %3411 = vmatprep.mubr.bf16.mxu1 %v3630_v23 }
 0x169   : > { %3412 = vmatmul.mubr.bf16.gmra.mrb[24].mxu1 %v3631_v24 }
 0x16a   : > { %3415 = vmatprep.mubr.bf16.mxu1 %v3632_v25 }
 0x171   : > { %3416 = vmatmul.mubr.bf16.gmra.mrb[28].mxu1 %v3633_v26 }
 0x172   : > { %1917 = vmatprep.mubr.bf16.mxu1 %v3639_v29 }
 0x20c   : > { %v3389_v44 = vpop.f32.mrb[0].mxu1 }
 0x20d   : > { %v1063_v46 = vadd.f32 %v3389_v44, %v777_v33  ;;  %v1054_v47 = vpop.f32.mrb[1].mxu1  ;;  %v862_v33 = vpop.permute.xlu1 %861 }
 0x20e   : > { %v1055_v49 = vadd.f32 %v1054_v47, %v767_v30  ;;  %v3390_v50 = vpop.f32.mrb[2].mxu1 }
 0x20f   : > { %v1066_v51 = vadd.f32 %v3390_v50, %v782_v34  ;;  %v1057_v52 = vpop.f32.mrb[3].mxu1  ;;  %v1183_v55 = vmax.f32 %v1063_v46, 0.0 }
 0x210   : > { %v1058_v54 = vadd.f32 %v1057_v52, %v772_v32  ;;  %v1181_v58 = vmax.f32 %v1055_v49, 0.0 }
 0x211   : > { %v1184_v57 = vmax.f32 %v1066_v51, 0.0  ;;  %v872_v49 = vpop.permute.xlu1 %871 }
 0x212   : > { %v1182_v59 = vmax.f32 %v1058_v54, 0.0 }
 0x213   : > { %v1214_v61 = vpack.c.bf16 %v1184_v57, %v1183_v55 }
 0x214   : > { %v1213_v63 = vpack.c.bf16 %v1182_v59, %v1181_v58  ;;  %v3393_v0 = vpop.f32.mrb[4].mxu1 }
 0x215   : > { %v1079_v1 = vadd.f32 %v3393_v0, %v797_v37  ;;  %v1070_v2 = vpop.f32.mrb[5].mxu1 }
 0x216   : > { %v1071_v5 = vadd.f32 %v1070_v2, %v787_v35  ;;  %v3394_v6 = vpop.f32.mrb[6].mxu1  ;;  %1678 = vmatpush1.bf16.msra.mxu0 %v1213_v63  ;;  %3515 = vmatpush1.bf16.msra.mxu1 %v1213_v63  ;;  %v882_v63 = vpop.permute.xlu1 %881 }
 0x217   : > { %v1082_v7 = vadd.f32 %v3394_v6, %v802_v38  ;;  %v1073_v8 = vpop.f32.mrb[7].mxu1  ;;  %1679 = vmatprep.subr.bf16.mxu0 %v3858_v4  ;;  %3500 = vmatprep.subr.bf16.mxu1 %v3858_v4  ;;  %v1187_v12 = vmax.f32 %v1079_v1, 0.0 }
 0x218   : > { %v1074_v10 = vadd.f32 %v1073_v8, %v792_v36  ;;  %v1185_v15 = vmax.f32 %v1071_v5, 0.0 }
 0x219   : > { %v1188_v13 = vmax.f32 %v1082_v7, 0.0 }
 0x21a   : > { %v1186_v16 = vmax.f32 %v1074_v10, 0.0  ;;  %1680 = vmatpush1.bf16.msra.mxu0 %v1214_v61  ;;  %3516 = vmatpush1.bf16.msra.mxu1 %v1214_v61 }
 0x21b   : > { %v1216_v17 = vpack.c.bf16 %v1188_v13, %v1187_v12  ;;  %1681 = vmatprep.subr.bf16.mxu0 %v3858_v4  ;;  %3501 = vmatprep.subr.bf16.mxu1 %v3858_v4  ;;  %v892_v13 = vpop.permute.xlu1 %891 }
 0x21c   : > { %v1215_v19 = vpack.c.bf16 %v1186_v16, %v1185_v15  ;;  %v3397_v20 = vpop.f32.mrb[8].mxu1 }
 0x21d   : > { %v1095_v21 = vadd.f32 %v3397_v20, %v817_v41  ;;  %v1086_v22 = vpop.f32.mrb[9].mxu1 }
 0x21e   : > { %v1087_v23 = vadd.f32 %v1086_v22, %v807_v39  ;;  %v3398_v24 = vpop.f32.mrb[10].mxu1  ;;  %1682 = vmatpush1.bf16.msra.mxu0 %v1215_v19  ;;  %3517 = vmatpush1.bf16.msra.mxu1 %v1215_v19 }
 0x21f   : > { %v1098_v25 = vadd.f32 %v3398_v24, %v822_v43  ;;  %v1089_v26 = vpop.f32.mrb[11].mxu1  ;;  %1683 = vmatprep.subr.bf16.mxu0 %v3858_v4  ;;  %3502 = vmatprep.subr.bf16.mxu1 %v3858_v4  ;;  %v1191_v30 = vmax.f32 %v1095_v21, 0.0  ;;  %v867_v43 = vpop.permute.xlu0 %866 }
 0x220   : > { %v1090_v29 = vadd.f32 %v1089_v26, %v812_v40  ;;  %v1189_v34 = vmax.f32 %v1087_v23, 0.0  ;;  %v902_v26 = vpop.permute.xlu1 %901 }
 0x221   : > { %v1192_v32 = vmax.f32 %v1098_v25, 0.0 }
 0x222   : > { %v1190_v35 = vmax.f32 %v1090_v29, 0.0  ;;  %1684 = vmatpush1.bf16.msra.mxu0 %v1216_v17  ;;  %3518 = vmatpush1.bf16.msra.mxu1 %v1216_v17 }
 0x223   : > { %v1218_v36 = vpack.c.bf16 %v1192_v32, %v1191_v30  ;;  %1685 = vmatprep.subr.bf16.mxu0 %v3858_v4  ;;  %3503 = vmatprep.subr.bf16.mxu1 %v3858_v4 }
 0x224   : > { %v1217_v37 = vpack.c.bf16 %v1190_v35, %v1189_v34  ;;  %v3401_v38 = vpop.f32.mrb[12].mxu1 }
 0x225   : > { %v1111_v39 = vadd.f32 %v3401_v38, %v837_v62  ;;  %v1102_v41 = vpop.f32.mrb[13].mxu1 }
 0x226   : > { %v1103_v44 = vadd.f32 %v1102_v41, %v4341_v48  ;;  %v3402_v40 = vpop.f32.mrb[14].mxu1  ;;  %1686 = vmatpush1.bf16.msra.mxu0 %v1217_v37  ;;  %3519 = vmatpush1.bf16.msra.mxu1 %v1217_v37  ;;  %v877_v48 = vpop.permute.xlu0 %876 }
 0x227   : > { %v1114_v46 = vadd.f32 %v3402_v40, %v842_v3  ;;  %v1105_v47 = vpop.f32.mrb[15].mxu1  ;;  %1687 = vmatprep.subr.bf16.mxu0 %v3858_v4  ;;  %3504 = vmatprep.subr.bf16.mxu1 %v3858_v4  ;;  %v1195_v51 = vmax.f32 %v1111_v39, 0.0 }
 0x228   : > { %v1106_v50 = vadd.f32 %v1105_v47, %v4343_v53  ;;  %v1193_v54 = vmax.f32 %v1103_v44, 0.0 }
 0x229   : > { %v1196_v52 = vmax.f32 %v1114_v46, 0.0 }
 0x22a   : > { %v1194_v55 = vmax.f32 %v1106_v50, 0.0  ;;  %1688 = vmatpush1.bf16.msra.mxu0 %v1218_v36  ;;  %3520 = vmatpush1.bf16.msra.mxu1 %v1218_v36  ;;  %v887_v7 = vpop.permute.xlu0 %886 }
 0x22b   : > { %v1220_v57 = vpack.c.bf16 %v1196_v52, %v1195_v51  ;;  %1689 = vmatprep.subr.bf16.mxu0 %v3858_v4  ;;  %3505 = vmatprep.subr.bf16.mxu1 %v3858_v4 }
 0x22c   : > { %v1219_v58 = vpack.c.bf16 %v1194_v55, %v1193_v54  ;;  %v3405_v59 = vpop.f32.mrb[16].mxu1 }
 0x22d   : > { %v1127_v61 = vadd.f32 %v3405_v59, %v857_v27  ;;  %v1118_v62 = vpop.f32.mrb[17].mxu1 }
 0x22e   : > { %v1119_v0 = vadd.f32 %v1118_v62, %v4347_v14  ;;  %v3406_v53 = vpop.f32.mrb[18].mxu1  ;;  %1690 = vmatpush1.bf16.msra.mxu0 %v1219_v58  ;;  %3521 = vmatpush1.bf16.msra.mxu1 %v1219_v58  ;;  %v897_v22 = vpop.permute.xlu0 %896 }
 0x22f   : > { %v1130_v1 = vadd.f32 %v3406_v53, %v862_v33  ;;  %v1121_v2 = vpop.f32.mrb[19].mxu1  ;;  %1691 = vmatprep.subr.bf16.mxu0 %v3858_v4  ;;  %3506 = vmatprep.subr.bf16.mxu1 %v3858_v4  ;;  %v1199_v5 = vmax.f32 %v1127_v61, 0.0 }
 0x230   : > { %v1122_v3 = vadd.f32 %v1121_v2, %v4351_v18  ;;  %v1197_v8 = vmax.f32 %v1119_v0, 0.0 }
 0x231   : > { %v1200_v6 = vmax.f32 %v1130_v1, 0.0 }
 0x232   : > { %v1198_v10 = vmax.f32 %v1122_v3, 0.0  ;;  %1692 = vmatpush1.bf16.msra.mxu0 %v1220_v57  ;;  %3522 = vmatpush1.bf16.msra.mxu1 %v1220_v57  ;;  %v907_v36 = vpop.permute.xlu0 %906 }
 0x233   : > { %v1222_v12 = vpack.c.bf16 %v1200_v6, %v1199_v5  ;;  %1693 = vmatprep.subr.bf16.mxu0 %v3858_v4  ;;  %3507 = vmatprep.subr.bf16.mxu1 %v3858_v4  ;;  %v3634_v6 = vld [vmem:[%s5093_s7] ss:$8 sps:$4 sm:$0xff]  }
 0x234   : > { %v1221_v14 = vpack.c.bf16 %v1198_v10, %v1197_v8  ;;  %v3409_v15 = vpop.f32.mrb[20].mxu1  ;;  %v3640_v8 = vld [vmem:[%s5093_s7 + $0x14] ss:$8 sps:$4 sm:$0xff]   ;;  %v3644_v10 = vld [vmem:[%s5093_s7 + $0x10] ss:$8 sps:$4 sm:$0xff]  }
 0x235   : > { %v1143_v16 = vadd.f32 %v3409_v15, %v877_v48  ;;  %v1134_v17 = vpop.f32.mrb[21].mxu1  ;;  %v3652_v15 = vld [vmem:[%s5093_s7 + $0x34] ss:$8 sps:$4 sm:$0xff]  }
 0x236   : > { %v1135_v19 = vadd.f32 %v1134_v17, %v867_v43  ;;  %v3410_v20 = vpop.f32.mrb[22].mxu1  ;;  %1694 = vmatpush1.bf16.msra.mxu0 %v1221_v14  ;;  %3523 = vmatpush1.bf16.msra.mxu1 %v1221_v14  ;;  %v912_v43 = vpop.permute.xlu1 %911  ;;  %v3651_v14 = vld [vmem:[%s5093_s7 + $0x1c0] ss:$8 sps:$4 sm:$0xff]   ;;  %v3658_v17 = vld [vmem:[%s5093_s7 + $0x44] ss:$8 sps:$4 sm:$0xff]  }
 0x237   : > { %v1146_v18 = vadd.f32 %v3410_v20, %v882_v63  ;;  %v1137_v21 = vpop.f32.mrb[23].mxu1  ;;  %1695 = vmatprep.subr.bf16.mxu0 %v3858_v4  ;;  %3508 = vmatprep.subr.bf16.mxu1 %v3858_v4  ;;  %v1203_v24 = vmax.f32 %v1143_v16, 0.0  ;;  %v917_v51 = vpop.permute.xlu0 %916  ;;  %v3657_v16 = vld [vmem:[%s5093_s7 + $0x1d0] ss:$8 sps:$4 sm:$0xff]   ;;  %v3664_v20 = vld [vmem:[%s5093_s7 + $0x54] ss:$8 sps:$4 sm:$0xff]  }
 0x238   : > { %v1138_v23 = vadd.f32 %v1137_v21, %v872_v49  ;;  %v1201_v27 = vmax.f32 %v1135_v19, 0.0  ;;  %v3663_v19 = vld [vmem:[%s5093_s7 + $0x1e0] ss:$8 sps:$4 sm:$0xff]   ;;  %v3670_v21 = vld [vmem:[%s5093_s7 + $0x64] ss:$8 sps:$4 sm:$0xff]  }
 0x239   : > { %v1204_v25 = vmax.f32 %v1146_v18, 0.0  ;;  %v3668_v18 = vld [vmem:[%s5093_s7 + $0x50] ss:$8 sps:$4 sm:$0xff]  }
 0x23a   : > { %v1202_v29 = vmax.f32 %v1138_v23, 0.0  ;;  %1696 = vmatpush1.bf16.msra.mxu0 %v1222_v12  ;;  %3524 = vmatpush1.bf16.msra.mxu1 %v1222_v12  ;;  %v922_v48 = vpop.permute.xlu1 %921  ;;  %v3645_v12 = vld [vmem:[%s5093_s7 + $0x1b0] ss:$8 sps:$4 sm:$0xff]   ;;  %v3673_v23 = vld [vmem:[%s5093_s7 + $0x60] ss:$8 sps:$4 sm:$0xff]  }
 0x23b   : > { %v1224_v30 = vpack.c.bf16 %v1204_v25, %v1203_v24  ;;  %1697 = vmatprep.subr.bf16.mxu0 %v3858_v4  ;;  %3509 = vmatprep.subr.bf16.mxu1 %v3858_v4  ;;  %v3674_v24 = vld [vmem:[%s5092_s6 + $0x8] sm:$0xff]   ;;  %v3675_v25 = vld [vmem:[%s5093_s7 + $0x74] ss:$8 sps:$4 sm:$0xff]  }
 0x23c   : > { %v1223_v32 = vpack.c.bf16 %v1202_v29, %v1201_v27  ;;  %v3413_v33 = vpop.f32.mrb[24].mxu1  ;;  %v3678_v27 = vld [vmem:[%s5093_s7 + $0x70] ss:$8 sps:$4 sm:$0xff]  }
 0x23d   : > { %v1159_v34 = vadd.f32 %v3413_v33, %v897_v22  ;;  %v1150_v35 = vpop.f32.mrb[25].mxu1  ;;  %v3672_v22 = vld [vmem:[%s5092_s6] sm:$0xff]   ;;  %v3679_v29 = vld [vmem:[%s5092_s6 + $0x18] sm:$0xff]  }
 0x23e   : > { %v1151_v37 = vadd.f32 %v1150_v35, %v887_v7  ;;  %v3414_v38 = vpop.f32.mrb[26].mxu1  ;;  %1698 = vmatpush1.bf16.msra.mxu0 %v1223_v32  ;;  %3525 = vmatpush1.bf16.msra.mxu1 %v1223_v32  ;;  %v3637_v7 = vld [vmem:[%s5093_s7 + $0x1a0] ss:$8 sps:$4 sm:$0xff]   ;;  %v3685_v35 = vld [vmem:[%s5093_s7 + $0x94] ss:$8 sps:$4 sm:$0xff]  }
 0x23f   : > { %v1162_v39 = vadd.f32 %v3414_v38, %v902_v26  ;;  %v1153_v41 = vpop.f32.mrb[27].mxu1  ;;  %1699 = vmatprep.subr.bf16.mxu0 %v3858_v4  ;;  %3510 = vmatprep.subr.bf16.mxu1 %v3858_v4  ;;  %v1207_v40 = vmax.f32 %v1159_v34, 0.0  ;;  %v3677_v26 = vld [vmem:[%s5092_s6 + $0x10] sm:$0xff]   ;;  %v3682_v32 = vld [vmem:[%s5092_s6 + $0x20] sm:$0xff]   ;;  %v3684_v34 = vld [vmem:[%s5092_s6 + $0x28] sm:$0xff]  }
 0x240   : > { %v1154_v44 = vadd.f32 %v1153_v41, %v892_v13  ;;  %v1205_v47 = vmax.f32 %v1151_v37, 0.0  ;;  %v3646_v13 = vld [vmem:[%s5093_s7 + $0x24] ss:$8 sps:$4 sm:$0xff]   ;;  %v3683_v33 = vld [vmem:[%s5093_s7 + $0x80] ss:$8 sps:$4 sm:$0xff]   ;;  %v3689_v38 = vld [vmem:[%s5092_s6 + $0x38] sm:$0xff]  }
 0x241   : > { %v1208_v46 = vmax.f32 %v1162_v39, 0.0  ;;  %v3688_v37 = vld [vmem:[%s5093_s7 + $0x90] ss:$8 sps:$4 sm:$0xff]   ;;  %v3690_v39 = vld [vmem:[%s5093_s7 + $0xa4] ss:$8 sps:$4 sm:$0xff]  }
 0x242   : > { %v1206_v49 = vmax.f32 %v1154_v44, 0.0  ;;  %1700 = vmatpush1.bf16.msra.mxu0 %v1224_v30  ;;  %3526 = vmatpush1.bf16.msra.mxu1 %v1224_v30  ;;  %v3680_v30 = vld [vmem:[%s5093_s7 + $0x84] ss:$8 sps:$4 sm:$0xff]  }
 0x243   : > { %v1226_v50 = vpack.c.bf16 %v1208_v46, %v1207_v40  ;;  %1701 = vmatprep.subr.bf16.mxu0 %v3858_v4  ;;  %3511 = vmatprep.subr.bf16.mxu1 %v3858_v4  ;;  %v3692_v41 = vld [vmem:[%s5092_s6 + $0x40] sm:$0xff]   ;;  %v3694_v44 = vld [vmem:[%s5092_s6 + $0x48] sm:$0xff]   ;;  %v3695_v40 = vld [vmem:[%s5093_s7 + $0xb4] ss:$8 sps:$4 sm:$0xff]  }
 0x244   : > { %v1225_v52 = vpack.c.bf16 %v1206_v49, %v1205_v47  ;;  %v3417_v54 = vpop.f32.mrb[28].mxu1  ;;  %v3697_v46 = vld [vmem:[%s5092_s6 + $0x50] sm:$0xff]   ;;  %v3699_v49 = vld [vmem:[%s5092_s6 + $0x58] sm:$0xff]  }
 0x245   : > { %v1175_v55 = vadd.f32 %v3417_v54, %v917_v51  ;;  %v1166_v57 = vpop.f32.mrb[29].mxu1  ;;  %v3698_v47 = vld [vmem:[%s5093_s7 + $0xb0] ss:$8 sps:$4 sm:$0xff]   ;;  %v3702_v51 = vld [vmem:[%s5092_s6 + $0x60] sm:$0xff]   ;;  %v3704_v54 = vld [vmem:[%s5092_s6 + $0x68] sm:$0xff]  }
 0x246   : > { %v1167_v58 = vadd.f32 %v1166_v57, %v907_v36  ;;  %v3418_v59 = vpop.f32.mrb[30].mxu1  ;;  %1702 = vmatpush1.bf16.msra.mxu0 %v1225_v52  ;;  %3527 = vmatpush1.bf16.msra.mxu1 %v1225_v52  ;;  %v3687_v36 = vld [vmem:[%s5092_s6 + $0x30] sm:$0xff]   ;;  %v3703_v52 = vld [vmem:[%s5093_s7 + $0xc0] ss:$8 sps:$4 sm:$0xff]  }
 0x247   : > { %v1178_v61 = vadd.f32 %v3418_v59, %v922_v48  ;;  %v1169_v62 = vpop.f32.mrb[31].mxu1  ;;  %1703 = vmatprep.subr.bf16.mxu0 %v3858_v4  ;;  %3512 = vmatprep.subr.bf16.mxu1 %v3858_v4  ;;  %v1211_v0 = vmax.f32 %v1175_v55, 0.0  ;;  %v3705_v55 = vld [vmem:[%s5093_s7 + $0xd4] ss:$8 sps:$4 sm:$0xff]   ;;  %v3708_v48 = vld [vmem:[%s5093_s7 + $0xd0] ss:$8 sps:$4 sm:$0xff]  }
 0x248   : > { %v1170_v63 = vadd.f32 %v1169_v62, %v912_v43  ;;  %v1209_v1 = vmax.f32 %v1167_v58, 0.0  ;;  %v3693_v43 = vld [vmem:[%s5093_s7 + $0xa0] ss:$8 sps:$4 sm:$0xff]   ;;  %v3707_v57 = vld [vmem:[%s5092_s6 + $0x70] sm:$0xff]   ;;  %v3709_v58 = vld [vmem:[%s5092_s6 + $0x78] sm:$0xff]  }
 0x249   : > { %v1212_v53 = vmax.f32 %v1178_v61, 0.0  ;;  %v3710_v59 = vld [vmem:[%s5093_s7 + $0xe4] ss:$8 sps:$4 sm:$0xff]   ;;  %v3713_v62 = vld [vmem:[%s5093_s7 + $0xe0] ss:$8 sps:$4 sm:$0xff]  }
 0x24a   : > { %v1210_v2 = vmax.f32 %v1170_v63, 0.0  ;;  %1704 = vmatpush1.bf16.msra.mxu0 %v1226_v50  ;;  %3528 = vmatpush1.bf16.msra.mxu1 %v1226_v50  ;;  %v3700_v50 = vld [vmem:[%s5093_s7 + $0xc4] ss:$8 sps:$4 sm:$0xff]  }
 0x24b   : > { %v1228_v3 = vpack.c.bf16 %v1212_v53, %v1211_v0  ;;  %1705 = vmatprep.subr.bf16.mxu0 %v3858_v4  ;;  %3513 = vmatprep.subr.bf16.mxu1 %v3858_v4  ;;  %v3712_v61 = vld [vmem:[%s5092_s6 + $0x80] sm:$0xff]   ;;  %v3714_v63 = vld [vmem:[%s5092_s6 + $0x88] sm:$0xff]   ;;  %v3715_v0 = vld [vmem:[%s5093_s7 + $0xf4] ss:$8 sps:$4 sm:$0xff]  }
 0x24c   : > { %v1227_v5 = vpack.c.bf16 %v1210_v2, %v1209_v1  ;;  %v3717_v53 = vld [vmem:[%s5092_s6 + $0x90] sm:$0xff]   ;;  %v3719_v2 = vld [vmem:[%s5092_s6 + $0x98] sm:$0xff]  }
 0x24d   : > { %v3718_v1 = vld [vmem:[%s5093_s7 + $0xf0] ss:$8 sps:$4 sm:$0xff]  }
 0x24e   : > { %1706 = vmatpush1.bf16.msra.mxu0 %v1227_v5  ;;  %3529 = vmatpush1.bf16.msra.mxu1 %v1227_v5  ;;  %v3722_v5 = vld [vmem:[%s5092_s6 + $0xa0] sm:$0xff]  }
 0x24f   : > { %1707 = vmatprep.subr.bf16.mxu0 %v3858_v4  ;;  %3514 = vmatprep.subr.bf16.mxu1 %v3858_v4  ;;  %v3642_v4 = vld [vmem:[%s5093_s7 + $0x1b4] ss:$8 sps:$4 sm:$0xff]  }
 0x252   : > { %1708 = vmatpush1.bf16.msra.mxu0 %v1228_v3  ;;  %3530 = vmatpush1.bf16.msra.mxu1 %v1228_v3  ;;  %v3720_v3 = vld [vmem:[%s5093_s7 + $0x104] ss:$8 sps:$4 sm:$0xff]  }
 0x253   : > { %3419 = vmatprep.subr.bf16.mxu1 %v4257_v31 }
 0x255   : > { %1710 = vmatmul.mubr.bf16.vlgmr.msra.gmra.mrb[16].mxu0 %v3634_v6  ;;  %1918 = vmatmul.mubr.bf16.vlgmr.msra.gmra.mrb[32].mxu1 %v3637_v7  ;;  %v3723_v6 = vld [vmem:[%s5093_s7 + $0x100] ss:$8 sps:$4 sm:$0xff]  }
 0x256   : > { %3420 = vmatpush3.bf16.msra.mxu1 %v4257_v31  ;;  %1717 = vmatprep.mubr.bf16.mxu0 %v3640_v8  ;;  %v3648_v31 = vld [vmem:[%s5093_s7 + $0x1c4] ss:$8 sps:$4 sm:$0xff]   ;;  %v3725_v8 = vld [vmem:[%s5093_s7 + $0x114] ss:$8 sps:$4 sm:$0xff]  }
 0x257   : > { %3421 = vmatprep.subr.bf16.mxu1 %v4255_v28  ;;  %1925 = vmatprep.mubr.bf16.mxu1 %v3642_v4  ;;  %v3724_v7 = vld [vmem:[%s5092_s6 + $0xa8] sm:$0xff]   ;;  %v3727_v4 = vld [vmem:[%s5092_s6 + $0xb0] sm:$0xff]  }
 0x25a   : > { %3422 = vmatpush3.bf16.msra.mxu1 %v4255_v28  ;;  %v3650_v28 = vld [vmem:[%s5093_s7 + $0x20] ss:$8 sps:$4 sm:$0xff]  }
 0x25b   : > { %3423 = vmatprep.subr.bf16.mxu1 %v4265_v45 }
 0x25d   : > { %1718 = vmatmul.mubr.bf16.gmra.mrb[20].mxu0 %v3644_v10  ;;  %1926 = vmatmul.mubr.bf16.gmra.mrb[36].mxu1 %v3645_v12  ;;  %v3728_v10 = vld [vmem:[%s5093_s7 + $0x110] ss:$8 sps:$4 sm:$0xff]  }
 0x25e   : > { %3424 = vmatpush3.bf16.msra.mxu1 %v4265_v45  ;;  %1725 = vmatprep.mubr.bf16.mxu0 %v3646_v13  ;;  %v3654_v45 = vld [vmem:[%s5093_s7 + $0x1d4] ss:$8 sps:$4 sm:$0xff]   ;;  %v3730_v13 = vld [vmem:[%s5093_s7 + $0x124] ss:$8 sps:$4 sm:$0xff]  }
 0x25f   : > { %3425 = vmatprep.subr.bf16.mxu1 %v4262_v42  ;;  %1933 = vmatprep.mubr.bf16.mxu1 %v3648_v31  ;;  %v3729_v12 = vld [vmem:[%s5092_s6 + $0xb8] sm:$0xff]   ;;  %v3732_v31 = vld [vmem:[%s5092_s6 + $0xc0] sm:$0xff]  }
 0x262   : > { %3426 = vmatpush3.bf16.msra.mxu1 %v4262_v42  ;;  %v3656_v42 = vld [vmem:[%s5093_s7 + $0x30] ss:$8 sps:$4 sm:$0xff]  }
 0x263   : > { %3427 = vmatprep.subr.bf16.mxu1 %v4274_v60 }
 0x265   : > { %1726 = vmatmul.mubr.bf16.gmra.mrb[24].mxu0 %v3650_v28  ;;  %1934 = vmatmul.mubr.bf16.gmra.mrb[40].mxu1 %v3651_v14  ;;  %v3733_v28 = vld [vmem:[%s5093_s7 + $0x120] ss:$8 sps:$4 sm:$0xff]  }
 0x266   : > { %3428 = vmatpush3.bf16.msra.mxu1 %v4274_v60  ;;  %1733 = vmatprep.mubr.bf16.mxu0 %v3652_v15  ;;  %v3660_v60 = vld [vmem:[%s5093_s7 + $0x1e4] ss:$8 sps:$4 sm:$0xff]   ;;  %v3735_v15 = vld [vmem:[%s5093_s7 + $0x134] ss:$8 sps:$4 sm:$0xff]  }
 0x267   : > { %3429 = vmatprep.subr.bf16.mxu1 %v4271_v56  ;;  %1941 = vmatprep.mubr.bf16.mxu1 %v3654_v45  ;;  %v3734_v14 = vld [vmem:[%s5092_s6 + $0xc8] sm:$0xff]   ;;  %v3737_v45 = vld [vmem:[%s5092_s6 + $0xd0] sm:$0xff]  }
 0x26a   : > { %3430 = vmatpush3.bf16.msra.mxu1 %v4271_v56  ;;  %v3662_v56 = vld [vmem:[%s5093_s7 + $0x40] ss:$8 sps:$4 sm:$0xff]  }
 0x26b   : > { %3431 = vmatprep.subr.bf16.mxu1 %v4283_v11 }
 0x26d   : > { %1734 = vmatmul.mubr.bf16.gmra.mrb[28].mxu0 %v3656_v42  ;;  %1942 = vmatmul.mubr.bf16.gmra.mrb[44].mxu1 %v3657_v16  ;;  %v3738_v42 = vld [vmem:[%s5093_s7 + $0x130] ss:$8 sps:$4 sm:$0xff]  }
 0x26e   : > { %3432 = vmatpush3.bf16.msra.mxu1 %v4283_v11  ;;  %1741 = vmatprep.mubr.bf16.mxu0 %v3658_v17  ;;  %v3666_v11 = vld [vmem:[%s5093_s7 + $0x1f4] ss:$8 sps:$4 sm:$0xff]   ;;  %v3740_v17 = vld [vmem:[%s5093_s7 + $0x144] ss:$8 sps:$4 sm:$0xff]  }
 0x26f   : > { %3433 = vmatprep.subr.bf16.mxu1 %v4280_v9  ;;  %1949 = vmatprep.mubr.bf16.mxu1 %v3660_v60  ;;  %v3739_v16 = vld [vmem:[%s5092_s6 + $0xd8] sm:$0xff]   ;;  %v3742_v60 = vld [vmem:[%s5092_s6 + $0xe0] sm:$0xff]  }
 0x272   : > { %3434 = vmatpush3.bf16.msra.mxu1 %v4280_v9  ;;  %v3669_v9 = vld [vmem:[%s5093_s7 + $0x1f0] ss:$8 sps:$4 sm:$0xff]  }
 0x275   : > { %1742 = vmatmul.mubr.bf16.gmra.mrb[32].mxu0 %v3662_v56  ;;  %1950 = vmatmul.mubr.bf16.gmra.mrb[48].mxu1 %v3663_v19  ;;  %v4639_v56 = vpop.permute.xlu0 %2513  ;;  %v4641_v19 = vpop.permute.xlu1 %2518 }
 0x276   : > { %1749 = vmatprep.mubr.bf16.mxu0 %v3664_v20  ;;  %1957 = vmatprep.mubr.bf16.mxu1 %v3666_v11  ;;  %v3743_v11 = vld [vmem:[%s5093_s7 + $0x140] ss:$8 sps:$4 sm:$0xff]  }
 0x279   : > { %v4643_v20 = vpop.permute.xlu0 %2523 }
 0x27d   : > { %1750 = vmatmul.mubr.bf16.gmra.mrb[36].mxu0 %v3668_v18  ;;  %1958 = vmatmul.mubr.bf16.gmra.mrb[52].mxu1 %v3669_v9  ;;  %v3744_v18 = vld [vmem:[%s5092_s6 + $0xe8] sm:$0xff]   ;;  %v3745_v9 = vld [vmem:[%s5093_s7 + $0x154] ss:$8 sps:$4 sm:$0xff]  }
 0x27e   : > { %1757 = vmatprep.mubr.bf16.mxu0 %v3670_v21  ;;  %3435 = vmatprep.mubr.bf16.mxu1 %v3672_v22  ;;  %v3747_v21 = vld [vmem:[%s5092_s6 + $0xf0] sm:$0xff]   ;;  %v4657_v22 = vpop.permute.xlu1 %2528 }
 0x285   : > { %1758 = vmatmul.mubr.bf16.gmra.mrb[40].mxu0 %v3673_v23  ;;  %3436 = vmatmul.mubr.bf16.vlgmr.msra.gmra.mrb[56].mxu1 %v3674_v24  ;;  %v4659_v23 = vpop.permute.xlu0 %2533  ;;  %v3748_v24 = vld [vmem:[%s5093_s7 + $0x150] ss:$8 sps:$4 sm:$0xff]  }
 0x286   : > { %1765 = vmatprep.mubr.bf16.mxu0 %v3675_v25  ;;  %3439 = vmatprep.mubr.bf16.mxu1 %v3677_v26  ;;  %v3749_v25 = vld [vmem:[%s5092_s6 + $0xf8] sm:$0xff]   ;;  %v3750_v26 = vld [vmem:[%s5093_s7 + $0x164] ss:$8 sps:$4 sm:$0xff]  }
 0x28d   : > { %1766 = vmatmul.mubr.bf16.gmra.mrb[44].mxu0 %v3678_v27  ;;  %3440 = vmatmul.mubr.bf16.gmra.mrb[60].mxu1 %v3679_v29  ;;  %v4670_v27 = vpop.permute.xlu1 %2538  ;;  %v4672_v29 = vpop.permute.xlu0 %2543 }
 0x28e   : > { %1773 = vmatprep.mubr.bf16.mxu0 %v3680_v30  ;;  %3443 = vmatprep.mubr.bf16.mxu1 %v3682_v32  ;;  %v3752_v30 = vld [vmem:[%s5093_s7 + $0x160] ss:$8 sps:$4 sm:$0xff]   ;;  %v3753_v32 = vld [vmem:[%s5093_s7 + $0x174] ss:$8 sps:$4 sm:$0xff]  }
 0x295   : > { %1774 = vmatmul.mubr.bf16.gmra.mrb[48].mxu0 %v3683_v33  ;;  %3444 = vmatmul.mubr.bf16.gmra.mrb[64].mxu1 %v3684_v34  ;;  %v4680_v33 = vpop.permute.xlu1 %2548  ;;  %v4682_v34 = vpop.permute.xlu0 %2553 }
 0x296   : > { %1781 = vmatprep.mubr.bf16.mxu0 %v3685_v35  ;;  %3447 = vmatprep.mubr.bf16.mxu1 %v3687_v36 }
 0x299   : > { %v4684_v35 = vpop.permute.xlu1 %2558  ;;  %v4686_v36 = vpop.permute.xlu0 %2563 }
 0x29d   : > { %1782 = vmatmul.mubr.bf16.gmra.mrb[52].mxu0 %v3688_v37  ;;  %3448 = vmatmul.mubr.bf16.gmra.mrb[68].mxu1 %v3689_v38  ;;  %v3755_v37 = vld [vmem:[%s5093_s7 + $0x170] ss:$8 sps:$4 sm:$0xff]   ;;  %v3756_v38 = vld [vmem:[%s5093_s7 + $0x184] ss:$8 sps:$4 sm:$0xff]  }
 0x29e   : > { %1789 = vmatprep.mubr.bf16.mxu0 %v3690_v39  ;;  %3451 = vmatprep.mubr.bf16.mxu1 %v3692_v41  ;;  %v4694_v39 = vpop.permute.xlu1 %2568  ;;  %v4696_v41 = vpop.permute.xlu0 %2573 }
 0x2a5   : > { %1790 = vmatmul.mubr.bf16.gmra.mrb[56].mxu0 %v3693_v43  ;;  %3452 = vmatmul.mubr.bf16.gmra.mrb[72].mxu1 %v3694_v44  ;;  %v3758_v43 = vld [vmem:[%s5093_s7 + $0x180] ss:$8 sps:$4 sm:$0xff]   ;;  %v3759_v44 = vld [vmem:[%s5093_s7 + $0x194] ss:$8 sps:$4 sm:$0xff]  }
 0x2a6   : > { %1797 = vmatprep.mubr.bf16.mxu0 %v3695_v40  ;;  %3455 = vmatprep.mubr.bf16.mxu1 %v3697_v46  ;;  %v4704_v40 = vpop.permute.xlu1 %2578  ;;  %v4706_v46 = vpop.permute.xlu0 %2583 }
 0x2ad   : > { %1798 = vmatmul.mubr.bf16.gmra.mrb[60].mxu0 %v3698_v47  ;;  %3456 = vmatmul.mubr.bf16.gmra.mrb[76].mxu1 %v3699_v49  ;;  %v3761_v47 = vld [vmem:[%s5093_s7 + $0x190] ss:$8 sps:$4 sm:$0xff]   ;;  %v4711_v49 = vpop.permute.xlu1 %2588 }
 0x2ae   : > { %1805 = vmatprep.mubr.bf16.mxu0 %v3700_v50  ;;  %3459 = vmatprep.mubr.bf16.mxu1 %v3702_v51  ;;  %v4713_v50 = vpop.permute.xlu0 %2593 }
 0x2b1   : > { %v4715_v51 = vpop.permute.xlu1 %2598 }
 0x2b5   : > { %1806 = vmatmul.mubr.bf16.gmra.mrb[64].mxu0 %v3703_v52  ;;  %3460 = vmatmul.mubr.bf16.gmra.mrb[80].mxu1 %v3704_v54  ;;  %v4717_v52 = vpop.permute.xlu0 %2603  ;;  %v4719_v54 = vpop.permute.xlu1 %2608 }
 0x2b6   : > { %1813 = vmatprep.mubr.bf16.mxu0 %v3705_v55  ;;  %3463 = vmatprep.mubr.bf16.mxu1 %v3707_v57 }
 0x2b9   : > { %v4721_v55 = vpop.permute.xlu0 %2613 }
 0x2bd   : > { %1814 = vmatmul.mubr.bf16.gmra.mrb[68].mxu0 %v3708_v48  ;;  %3464 = vmatmul.mubr.bf16.gmra.mrb[84].mxu1 %v3709_v58 }
 0x2be   : > { %1821 = vmatprep.mubr.bf16.mxu0 %v3710_v59  ;;  %3467 = vmatprep.mubr.bf16.mxu1 %v3712_v61 }
 0x2c5   : > { %1822 = vmatmul.mubr.bf16.gmra.mrb[72].mxu0 %v3713_v62  ;;  %3468 = vmatmul.mubr.bf16.gmra.mrb[88].mxu1 %v3714_v63 }
 0x2c6   : > { %1829 = vmatprep.mubr.bf16.mxu0 %v3715_v0  ;;  %3471 = vmatprep.mubr.bf16.mxu1 %v3717_v53  ;;  %v4731_v53 = vpop.permute.xlu1 %2618 }
 0x2cd   : > { %1830 = vmatmul.mubr.bf16.gmra.mrb[76].mxu0 %v3718_v1  ;;  %3472 = vmatmul.mubr.bf16.gmra.mrb[92].mxu1 %v3719_v2  ;;  %v4733_v1 = vpop.permute.xlu0 %2623 }
 0x2ce   : > { %1837 = vmatprep.mubr.bf16.mxu0 %v3720_v3  ;;  %3475 = vmatprep.mubr.bf16.mxu1 %v3722_v5 }
 0x2d5   : > { %1838 = vmatmul.mubr.bf16.gmra.mrb[80].mxu0 %v3723_v6  ;;  %3476 = vmatmul.mubr.bf16.gmra.mrb[96].mxu1 %v3724_v7 }
 0x2d6   : > { %1845 = vmatprep.mubr.bf16.mxu0 %v3725_v8  ;;  %3479 = vmatprep.mubr.bf16.mxu1 %v3727_v4 }
 0x2dd   : > { %1846 = vmatmul.mubr.bf16.gmra.mrb[84].mxu0 %v3728_v10  ;;  %3480 = vmatmul.mubr.bf16.gmra.mrb[100].mxu1 %v3729_v12  ;;  %v4739_v12 = vpop.permute.xlu1 %2628 }
 0x2de   : > { %1853 = vmatprep.mubr.bf16.mxu0 %v3730_v13  ;;  %3483 = vmatprep.mubr.bf16.mxu1 %v3732_v31  ;;  %v4741_v13 = vpop.permute.xlu0 %2633 }
 0x2e5   : > { %1854 = vmatmul.mubr.bf16.gmra.mrb[88].mxu0 %v3733_v28  ;;  %3484 = vmatmul.mubr.bf16.gmra.mrb[104].mxu1 %v3734_v14 }
 0x2e6   : > { %1861 = vmatprep.mubr.bf16.mxu0 %v3735_v15  ;;  %3487 = vmatprep.mubr.bf16.mxu1 %v3737_v45 }
 0x2ed   : > { %1862 = vmatmul.mubr.bf16.gmra.mrb[92].mxu0 %v3738_v42  ;;  %3488 = vmatmul.mubr.bf16.gmra.mrb[108].mxu1 %v3739_v16 }
 0x2ee   : > { %1869 = vmatprep.mubr.bf16.mxu0 %v3740_v17  ;;  %3491 = vmatprep.mubr.bf16.mxu1 %v3742_v60  ;;  %v4751_v60 = vpop.permute.xlu1 %2638 }
 0x2f5   : > { %1870 = vmatmul.mubr.bf16.gmra.mrb[96].mxu0 %v3743_v11  ;;  %3492 = vmatmul.mubr.bf16.gmra.mrb[112].mxu1 %v3744_v18  ;;  %v4753_v11 = vpop.permute.xlu0 %2643 }
 0x2f6   : > { %1877 = vmatprep.mubr.bf16.mxu0 %v3745_v9  ;;  %3495 = vmatprep.mubr.bf16.mxu1 %v3747_v21 }
 0x2fd   : > { %1878 = vmatmul.mubr.bf16.gmra.mrb[100].mxu0 %v3748_v24  ;;  %3496 = vmatmul.mubr.bf16.gmra.mrb[116].mxu1 %v3749_v25 }
 0x2fe   : > { %1885 = vmatprep.mubr.bf16.mxu0 %v3750_v26 }
 0x305   : > { %1886 = vmatmul.mubr.bf16.gmra.mrb[104].mxu0 %v3752_v30 }
 0x306   : > { %1893 = vmatprep.mubr.bf16.mxu0 %v3753_v32 }
 0x30d   : > { %1894 = vmatmul.mubr.bf16.gmra.mrb[108].mxu0 %v3755_v37  ;;  %v4761_v37 = vpop.permute.xlu1 %2648 }
 0x30e   : > { %1901 = vmatprep.mubr.bf16.mxu0 %v3756_v38  ;;  %v4763_v38 = vpop.permute.xlu0 %2653 }
 0x315   : > { %1902 = vmatmul.mubr.bf16.gmra.mrb[112].mxu0 %v3758_v43 }
 0x316   : > { %1909 = vmatprep.mubr.bf16.mxu0 %v3759_v44 }
 0x31d   : > { %1910 = vmatmul.mubr.bf16.gmra.mrb[116].mxu0 %v3761_v47 }
 0x328   : > { %v4723_v57 = vpop.f32.mrb[16].mxu0  ;;  %v4725_v48 = vpop.f32.mrb[32].mxu1 }
 0x329   : > { %v1713_v58 = vpop.f32.mrb[17].mxu0  ;;  %v1921_v59 = vpop.f32.mrb[33].mxu1 }
 0x32a   : > { %v4727_v61 = vpop.f32.mrb[18].mxu0  ;;  %v4729_v62 = vpop.f32.mrb[34].mxu1 }
 0x32b   : > { %5104 = vst [vmem:[#allocation8_spill] sm:$0xff] %v4729_v62  ;;  %v1716_v63 = vpop.f32.mrb[19].mxu0  ;;  %v1924_v0 = vpop.f32.mrb[35].mxu1 }
 0x330   : > { %v1719_v2 = vpop.f32.mrb[20].mxu0  ;;  %v4735_v3 = vpop.f32.mrb[36].mxu1 }
 0x331   : > { %v1721_v5 = vpop.f32.mrb[21].mxu0  ;;  %v1929_v6 = vpop.f32.mrb[37].mxu1 }
 0x332   : > { %v1722_v7 = vpop.f32.mrb[22].mxu0  ;;  %v4737_v8 = vpop.f32.mrb[38].mxu1 }
 0x333   : > { %v1724_v4 = vpop.f32.mrb[23].mxu0  ;;  %v1932_v10 = vpop.f32.mrb[39].mxu1 }
 0x334   : > { %v4773_v6 = vpop.permute.xlu1 %2658  ;;  %v4775_v4 = vpop.permute.xlu0 %2663 }
 0x338   : > { %v4743_v31 = vpop.f32.mrb[24].mxu0  ;;  %v4745_v28 = vpop.f32.mrb[40].mxu1 }
 0x339   : > { %5105 = vst [vmem:[#allocation9_spill] sm:$0xff] %v4745_v28  ;;  %v1729_v14 = vpop.f32.mrb[25].mxu0  ;;  %v1937_v15 = vpop.f32.mrb[41].mxu1 }
 0x33a   : > { %v4747_v45 = vpop.f32.mrb[26].mxu0  ;;  %v4749_v42 = vpop.f32.mrb[42].mxu1 }
 0x33b   : > { %5106 = vst [vmem:[#allocation10_spill] sm:$0xff] %v4749_v42  ;;  %v1732_v16 = vpop.f32.mrb[27].mxu0  ;;  %v1940_v17 = vpop.f32.mrb[43].mxu1 }
 0x340   : > { %v1735_v18 = vpop.f32.mrb[28].mxu0  ;;  %v4755_v9 = vpop.f32.mrb[44].mxu1 }
 0x341   : > { %5107 = vst [vmem:[#allocation11_spill] sm:$0xff] %v4755_v9  ;;  %v1737_v21 = vpop.f32.mrb[29].mxu0  ;;  %v1945_v24 = vpop.f32.mrb[45].mxu1 }
 0x342   : > { %v4757_v25 = vpop.f32.mrb[30].mxu0  ;;  %v4759_v26 = vpop.f32.mrb[46].mxu1 }
 0x343   : > { %5108 = vst [vmem:[#allocation12_spill] sm:$0xff] %v4759_v26  ;;  %v1740_v30 = vpop.f32.mrb[31].mxu0  ;;  %v1948_v32 = vpop.f32.mrb[47].mxu1 }
 0x344   : > { %v4785_v32 = vpop.permute.xlu1 %2668 }
 0x348   : > { %v4765_v43 = vpop.f32.mrb[32].mxu0  ;;  %v4767_v44 = vpop.f32.mrb[48].mxu1 }
 0x349   : > { %5109 = vst [vmem:[#allocation13_spill] sm:$0xff] %v4767_v44  ;;  %v1745_v47 = vpop.f32.mrb[33].mxu0  ;;  %v1953_v58 = vpop.f32.mrb[49].mxu1 }
 0x34a   : > { %v4769_v59 = vpop.f32.mrb[34].mxu0  ;;  %v4771_v63 = vpop.f32.mrb[50].mxu1 }
 0x34b   : > { %5110 = vst [vmem:[#allocation14_spill] sm:$0xff] %v4771_v63  ;;  %v1748_v0 = vpop.f32.mrb[35].mxu0  ;;  %v1956_v5 = vpop.f32.mrb[51].mxu1 }
 0x34c   : > { %v4787_v47 = vpop.permute.xlu0 %2673 }
 0x350   : > { %v4777_v10 = vpop.f32.mrb[36].mxu0  ;;  %v4779_v14 = vpop.f32.mrb[52].mxu1 }
 0x351   : > { %5111 = vst [vmem:[#allocation15_spill] sm:$0xff] %v4779_v14  ;;  %v1753_v15 = vpop.f32.mrb[37].mxu0  ;;  %v1961_v16 = vpop.f32.mrb[53].mxu1 }
 0x352   : > { %v4781_v17 = vpop.f32.mrb[38].mxu0  ;;  %v4783_v21 = vpop.f32.mrb[54].mxu1 }
 0x353   : > { %5112 = vst [vmem:[#allocation16_spill] sm:$0xff] %v4783_v21  ;;  %v1756_v24 = vpop.f32.mrb[39].mxu0  ;;  %v1964_v30 = vpop.f32.mrb[55].mxu1 }
 0x358   : > { %v4789_v58 = vpop.f32.mrb[40].mxu0  ;;  %v3437_v0 = vpop.f32.mrb[56].mxu1 }
 0x359   : > { %v2201_v5 = vadd.f32 %v3437_v0, %v1719_v2  ;;  %v1761_v63 = vpop.f32.mrb[41].mxu0  ;;  %v2192_v44 = vpop.f32.mrb[57].mxu1 }
 0x35a   : > { %v2193_v15 = vadd.f32 %v2192_v44, %v4723_v57  ;;  %v4793_v16 = vpop.f32.mrb[42].mxu0  ;;  %v3438_v14 = vpop.f32.mrb[58].mxu1 }
 0x35b   : > { %v2833_v21 = vadd.f32 %v4643_v20, %v2201_v5  ;;  %v2204_v24 = vadd.f32 %v3438_v14, %v1722_v7  ;;  %v1764_v30 = vpop.f32.mrb[43].mxu0  ;;  %v2195_v42 = vpop.f32.mrb[59].mxu1 }
 0x35c   : > { %v2831_v26 = vadd.f32 %v4639_v56, %v2193_v15  ;;  %v2196_v28 = vadd.f32 %v2195_v42, %v4727_v61  ;;  %v4800_v0 = vpop.permute.xlu1 %2678  ;;  %v4802_v57 = vpop.permute.xlu0 %2683 }
 0x35d   : > { %v2897_v9 = vmax.f32 %v2833_v21, 0.0  ;;  %v2834_v62 = vadd.f32 %v4657_v22, %v2204_v24 }
 0x35e   : > { %v2895_v2 = vmax.f32 %v2831_v26, 0.0  ;;  %v2832_v63 = vadd.f32 %v4641_v19, %v2196_v28 }
 0x35f   : > { %2961 = vst [vmem:[%s4804_s16 + $0x10] sm:$0xff] %v2897_v9  ;;  %v2898_v56 = vmax.f32 %v2834_v62, 0.0 }
 0x360   : > { %2959 = vst [vmem:[%s4804_s16] sm:$0xff] %v2895_v2  ;;  %v2896_v20 = vmax.f32 %v2832_v63, 0.0  ;;  %v1767_v61 = vpop.f32.mrb[44].mxu0  ;;  %v3441_v7 = vpop.f32.mrb[60].mxu1 }
 0x361   : > { %2962 = vst [vmem:[%s4804_s16 + $0x18] sm:$0xff] %v2898_v56  ;;  %v2217_v22 = vadd.f32 %v3441_v7, %v1735_v18  ;;  %v1769_v42 = vpop.f32.mrb[45].mxu0  ;;  %v2208_v19 = vpop.f32.mrb[61].mxu1 }
 0x362   : > { %2960 = vst [vmem:[%s4804_s16 + $0x8] sm:$0xff] %v2896_v20  ;;  %v2209_v28 = vadd.f32 %v2208_v19, %v4743_v31  ;;  %v1770_v26 = vpop.f32.mrb[46].mxu0  ;;  %v3442_v44 = vpop.f32.mrb[62].mxu1 }
 0x363   : > { %v2837_v14 = vadd.f32 %v4672_v29, %v2217_v22  ;;  %v2220_v9 = vadd.f32 %v3442_v44, %v4757_v25  ;;  %v1772_v62 = vpop.f32.mrb[47].mxu0  ;;  %v2211_v21 = vpop.f32.mrb[63].mxu1 }
 0x364   : > { %v2835_v5 = vadd.f32 %v4659_v23, %v2209_v28  ;;  %v2212_v18 = vadd.f32 %v2211_v21, %v4747_v45  ;;  %v4817_v2 = vpop.permute.xlu1 %2688  ;;  %v4819_v63 = vpop.permute.xlu0 %2693 }
 0x365   : > { %v2901_v15 = vmax.f32 %v2837_v14, 0.0  ;;  %v2838_v24 = vadd.f32 %v4680_v33, %v2220_v9 }
 0x366   : > { %v2899_v30 = vmax.f32 %v2835_v5, 0.0  ;;  %v2836_v31 = vadd.f32 %v4670_v27, %v2212_v18 }
 0x367   : > { %2965 = vst [vmem:[%s4804_s16 + $0x30] sm:$0xff] %v2901_v15  ;;  %v2902_v29 = vmax.f32 %v2838_v24, 0.0 }
 0x368   : > { %2963 = vst [vmem:[%s4804_s16 + $0x20] sm:$0xff] %v2899_v30  ;;  %v2900_v25 = vmax.f32 %v2836_v31, 0.0  ;;  %v1775_v56 = vpop.f32.mrb[48].mxu0  ;;  %v3445_v20 = vpop.f32.mrb[64].mxu1 }
 0x369   : > { %2966 = vst [vmem:[%s4804_s16 + $0x38] sm:$0xff] %v2902_v29  ;;  %v2233_v23 = vadd.f32 %v3445_v20, %v4777_v10  ;;  %v1777_v45 = vpop.f32.mrb[49].mxu0  ;;  %v2224_v7 = vpop.f32.mrb[65].mxu1 }
 0x36a   : > { %2964 = vst [vmem:[%s4804_s16 + $0x28] sm:$0xff] %v2900_v25  ;;  %v2225_v33 = vadd.f32 %v2224_v7, %v4765_v43  ;;  %v1778_v27 = vpop.f32.mrb[50].mxu0  ;;  %v3446_v22 = vpop.f32.mrb[66].mxu1 }
 0x36b   : > { %v2841_v42 = vadd.f32 %v4686_v36, %v2233_v23  ;;  %v2236_v19 = vadd.f32 %v3446_v22, %v4781_v17  ;;  %v1780_v28 = vpop.f32.mrb[51].mxu0  ;;  %v2227_v44 = vpop.f32.mrb[67].mxu1 }
 0x36c   : > { %v2839_v14 = vadd.f32 %v4682_v34, %v2225_v33  ;;  %v2228_v10 = vadd.f32 %v2227_v44, %v4769_v59  ;;  %v4833_v5 = vpop.permute.xlu1 %2698  ;;  %v4835_v18 = vpop.permute.xlu0 %2703 }
 0x36d   : > { %v2905_v9 = vmax.f32 %v2841_v42, 0.0  ;;  %v2842_v62 = vadd.f32 %v4694_v39, %v2236_v19 }
 0x36e   : > { %v2903_v21 = vmax.f32 %v2839_v14, 0.0  ;;  %v2840_v43 = vadd.f32 %v4684_v35, %v2228_v10 }
 0x36f   : > { %2969 = vst [vmem:[%s4804_s16 + $0x50] sm:$0xff] %v2905_v9  ;;  %v2906_v36 = vmax.f32 %v2842_v62, 0.0 }
 0x370   : > { %2967 = vst [vmem:[%s4804_s16 + $0x40] sm:$0xff] %v2903_v21  ;;  %v2904_v17 = vmax.f32 %v2840_v43, 0.0  ;;  %v1783_v15 = vpop.f32.mrb[52].mxu0  ;;  %v3449_v24 = vpop.f32.mrb[68].mxu1 }
 0x371   : > { %2970 = vst [vmem:[%s4804_s16 + $0x58] sm:$0xff] %v2906_v36  ;;  %v2249_v34 = vadd.f32 %v3449_v24, %v1767_v61  ;;  %v1785_v59 = vpop.f32.mrb[53].mxu0  ;;  %v2240_v30 = vpop.f32.mrb[69].mxu1 }
 0x372   : > { %2968 = vst [vmem:[%s4804_s16 + $0x48] sm:$0xff] %v2904_v17  ;;  %v2241_v39 = vadd.f32 %v2240_v30, %v4789_v58  ;;  %v1786_v31 = vpop.f32.mrb[54].mxu0  ;;  %v3450_v35 = vpop.f32.mrb[70].mxu1 }
 0x373   : > { %v2845_v29 = vadd.f32 %v4706_v46, %v2249_v34  ;;  %v2252_v25 = vadd.f32 %v3450_v35, %v1770_v26  ;;  %v1788_v20 = vpop.f32.mrb[55].mxu0  ;;  %v2243_v23 = vpop.f32.mrb[71].mxu1 }
 0x374   : > { %v2843_v45 = vadd.f32 %v4696_v41, %v2241_v39  ;;  %v2244_v7 = vadd.f32 %v2243_v23, %v4793_v16  ;;  %v4847_v42 = vpop.permute.xlu1 %2708  ;;  %v4849_v19 = vpop.permute.xlu0 %2713 }
 0x375   : > { %v2909_v61 = vmax.f32 %v2845_v29, 0.0  ;;  %v2846_v33 = vadd.f32 %v4711_v49, %v2252_v25 }
 0x376   : > { %v2907_v22 = vmax.f32 %v2843_v45, 0.0  ;;  %v2844_v58 = vadd.f32 %v4704_v40, %v2244_v7 }
 0x377   : > { %2973 = vst [vmem:[%s4804_s16 + $0x70] sm:$0xff] %v2909_v61  ;;  %v2910_v46 = vmax.f32 %v2846_v33, 0.0 }
 0x378   : > { %2971 = vst [vmem:[%s4804_s16 + $0x60] sm:$0xff] %v2907_v22  ;;  %v2908_v26 = vmax.f32 %v2844_v58, 0.0  ;;  %v1791_v28 = vpop.f32.mrb[56].mxu0  ;;  %v3453_v44 = vpop.f32.mrb[72].mxu1 }
 0x379   : > { %2974 = vst [vmem:[%s4804_s16 + $0x78] sm:$0xff] %v2910_v46  ;;  %v2265_v41 = vadd.f32 %v3453_v44, %v1783_v15  ;;  %v1793_v16 = vpop.f32.mrb[57].mxu0  ;;  %v2256_v14 = vpop.f32.mrb[73].mxu1 }
 0x37a   : > { %2972 = vst [vmem:[%s4804_s16 + $0x68] sm:$0xff] %v2908_v26  ;;  %v2257_v49 = vadd.f32 %v2256_v14, %v1775_v56  ;;  %v1794_v10 = vpop.f32.mrb[58].mxu0  ;;  %v3454_v40 = vpop.f32.mrb[74].mxu1 }
 0x37b   : > { %v2849_v9 = vadd.f32 %v4717_v52, %v2265_v41  ;;  %v2268_v62 = vadd.f32 %v3454_v40, %v1786_v31  ;;  %v1796_v21 = vpop.f32.mrb[59].mxu0  ;;  %v2259_v43 = vpop.f32.mrb[75].mxu1 }
 0x37c   : > { %v2847_v36 = vadd.f32 %v4713_v50, %v2257_v49  ;;  %v2260_v17 = vadd.f32 %v2259_v43, %v1778_v27  ;;  %v4859_v56 = vpop.permute.xlu1 %2718  ;;  %v4861_v30 = vpop.permute.xlu0 %2723 }
 0x37d   : > { %v2913_v24 = vmax.f32 %v2849_v9, 0.0  ;;  %v2850_v15 = vadd.f32 %v4719_v54, %v2268_v62 }
 0x37e   : > { %v2911_v34 = vmax.f32 %v2847_v36, 0.0  ;;  %v2848_v59 = vadd.f32 %v4715_v51, %v2260_v17 }
 0x37f   : > { %2977 = vst [vmem:[%s4804_s16 + $0x90] sm:$0xff] %v2913_v24  ;;  %v2914_v52 = vmax.f32 %v2850_v15, 0.0 }
 0x380   : > { %2975 = vst [vmem:[%s4804_s16 + $0x80] sm:$0xff] %v2911_v34  ;;  %v2912_v39 = vmax.f32 %v2848_v59, 0.0  ;;  %v1799_v31 = vpop.f32.mrb[60].mxu0  ;;  %v3457_v35 = vpop.f32.mrb[76].mxu1 }
 0x381   : > { %2978 = vst [vmem:[%s4804_s16 + $0x98] sm:$0xff] %v2914_v52  ;;  %v2281_v50 = vadd.f32 %v3457_v35, %v1799_v31  ;;  %v1801_v27 = vpop.f32.mrb[61].mxu0  ;;  %v2272_v29 = vpop.f32.mrb[77].mxu1 }
 0x382   : > { %2976 = vst [vmem:[%s4804_s16 + $0x88] sm:$0xff] %v2912_v39  ;;  %v2273_v54 = vadd.f32 %v2272_v29, %v1791_v28  ;;  %v1802_v25 = vpop.f32.mrb[62].mxu0  ;;  %v3458_v51 = vpop.f32.mrb[78].mxu1 }
 0x383   : > { %v2853_v20 = vadd.f32 %v4733_v1, %v2281_v50  ;;  %v2284_v23 = vadd.f32 %v3458_v51, %v1802_v25  ;;  %v1804_v45 = vpop.f32.mrb[63].mxu0  ;;  %v2275_v7 = vpop.f32.mrb[79].mxu1 }
 0x384   : > { %v2851_v61 = vadd.f32 %v4721_v55, %v2273_v54  ;;  %v2276_v33 = vadd.f32 %v2275_v7, %v1794_v10  ;;  %v4871_v28 = vpop.permute.xlu1 %2728  ;;  %v4873_v44 = vpop.permute.xlu0 %2733 }
 0x385   : > { %v2917_v22 = vmax.f32 %v2853_v20, 0.0  ;;  %v2854_v58 = vadd.f32 %v4739_v12, %v2284_v23 }
 0x386   : > { %v2915_v46 = vmax.f32 %v2851_v61, 0.0  ;;  %v2852_v26 = vadd.f32 %v4731_v53, %v2276_v33 }
 0x387   : > { %2981 = vst [vmem:[%s4804_s16 + $0xb0] sm:$0xff] %v2917_v22  ;;  %v2918_v1 = vmax.f32 %v2854_v58, 0.0 }
 0x388   : > { %2979 = vst [vmem:[%s4804_s16 + $0xa0] sm:$0xff] %v2915_v46  ;;  %v2916_v41 = vmax.f32 %v2852_v26, 0.0  ;;  %v1807_v16 = vpop.f32.mrb[64].mxu0  ;;  %v3461_v14 = vpop.f32.mrb[80].mxu1 }
 0x389   : > { %2982 = vst [vmem:[%s4804_s16 + $0xb8] sm:$0xff] %v2918_v1  ;;  %v1809_v55 = vpop.f32.mrb[65].mxu0  ;;  %v2288_v49 = vpop.f32.mrb[81].mxu1 }
 0x38a   : > { %2980 = vst [vmem:[%s4804_s16 + $0xa8] sm:$0xff] %v2916_v41  ;;  %v2289_v10 = vadd.f32 %v2288_v49, %v1807_v16  ;;  %v1810_v12 = vpop.f32.mrb[66].mxu0  ;;  %v3462_v40 = vpop.f32.mrb[82].mxu1 }
 0x38b   : > { %v1812_v53 = vpop.f32.mrb[67].mxu0  ;;  %v2291_v9 = vpop.f32.mrb[83].mxu1 }
 0x38c   : > { %v2855_v62 = vadd.f32 %v4741_v13, %v2289_v10  ;;  %v2292_v21 = vadd.f32 %v2291_v9, %v1810_v12  ;;  %v4881_v17 = vpop.permute.xlu1 %2738  ;;  %v4883_v24 = vpop.permute.xlu0 %2743 }
 0x38e   : > { %v2919_v43 = vmax.f32 %v2855_v62, 0.0  ;;  %v2856_v36 = vadd.f32 %v4751_v60, %v2292_v21 }
 0x390   : > { %2983 = vst [vmem:[%s4804_s16 + $0xc0] sm:$0xff] %v2919_v43  ;;  %v2920_v15 = vmax.f32 %v2856_v36, 0.0  ;;  %v1815_v34 = vpop.f32.mrb[68].mxu0  ;;  %v3465_v59 = vpop.f32.mrb[84].mxu1 }
 0x391   : > { %v2297_v52 = vadd.f32 %v3461_v14, %v1815_v34  ;;  %v1817_v39 = vpop.f32.mrb[69].mxu0  ;;  %v2304_v31 = vpop.f32.mrb[85].mxu1 }
 0x392   : > { %2984 = vst [vmem:[%s4804_s16 + $0xc8] sm:$0xff] %v2920_v15  ;;  %v1818_v35 = vpop.f32.mrb[70].mxu0  ;;  %v3466_v13 = vpop.f32.mrb[86].mxu1 }
 0x393   : > { %v2857_v50 = vadd.f32 %v4753_v11, %v2297_v52  ;;  %v2300_v27 = vadd.f32 %v3462_v40, %v1818_v35  ;;  %v1820_v60 = vpop.f32.mrb[71].mxu0  ;;  %v2307_v29 = vpop.f32.mrb[87].mxu1 }
 0x394   : > { %v4889_v51 = vpop.permute.xlu1 %2748  ;;  %v4891_v20 = vpop.permute.xlu0 %2753 }
 0x395   : > { %v2921_v54 = vmax.f32 %v2857_v50, 0.0  ;;  %v2858_v25 = vadd.f32 %v4761_v37, %v2300_v27 }
 0x397   : > { %2985 = vst [vmem:[%s4804_s16 + $0xd0] sm:$0xff] %v2921_v54  ;;  %v2922_v23 = vmax.f32 %v2858_v25, 0.0 }
 0x398   : > { %v1823_v45 = vpop.f32.mrb[72].mxu0  ;;  %v3469_v7 = vpop.f32.mrb[88].mxu1 }
 0x399   : > { %2986 = vst [vmem:[%s4804_s16 + $0xd8] sm:$0xff] %v2922_v23  ;;  %v2305_v61 = vadd.f32 %v2304_v31, %v1823_v45  ;;  %v1825_v33 = vpop.f32.mrb[73].mxu0  ;;  %v2320_v11 = vpop.f32.mrb[89].mxu1 }
 0x39a   : > { %v1826_v22 = vpop.f32.mrb[74].mxu0  ;;  %v3470_v58 = vpop.f32.mrb[90].mxu1 }
 0x39b   : > { %v2859_v46 = vadd.f32 %v4763_v38, %v2305_v61  ;;  %v2308_v26 = vadd.f32 %v2307_v29, %v1826_v22  ;;  %v1828_v37 = vpop.f32.mrb[75].mxu0  ;;  %v2323_v1 = vpop.f32.mrb[91].mxu1 }
 0x39c   : > { %v4897_v14 = vpop.permute.xlu1 %2758  ;;  %v4899_v55 = vpop.permute.xlu0 %2763 }
 0x39d   : > { %v2923_v41 = vmax.f32 %v2859_v46, 0.0  ;;  %v2860_v16 = vadd.f32 %v4773_v6, %v2308_v26 }
 0x39f   : > { %2987 = vst [vmem:[%s4804_s16 + $0xe0] sm:$0xff] %v2923_v41  ;;  %v2924_v49 = vmax.f32 %v2860_v16, 0.0 }
 0x3a0   : > { %v1831_v10 = vpop.f32.mrb[76].mxu0  ;;  %v4902_v12 = vpop.f32.mrb[92].mxu1 }
 0x3a1   : > { %2988 = vst [vmem:[%s4804_s16 + $0xe8] sm:$0xff] %v2924_v49  ;;  %v2313_v40 = vadd.f32 %v3465_v59, %v1831_v10  ;;  %v1833_v53 = vpop.f32.mrb[77].mxu0  ;;  %v2336_v38 = vpop.f32.mrb[93].mxu1 }
 0x3a2   : > { %v1834_v9 = vpop.f32.mrb[78].mxu0  ;;  %v4905_v62 = vpop.f32.mrb[94].mxu1 }
 0x3a3   : > { %v2861_v6 = vadd.f32 %v4775_v4, %v2313_v40  ;;  %v2316_v21 = vadd.f32 %v3466_v13, %v1834_v9  ;;  %v1836_v43 = vpop.f32.mrb[79].mxu0  ;;  %v2339_v36 = vpop.f32.mrb[95].mxu1 }
 0x3a4   : > { %v4909_v52 = vpop.permute.xlu1 %2768  ;;  %v4911_v39 = vpop.permute.xlu0 %2773 }
 0x3a5   : > { %v2925_v15 = vmax.f32 %v2861_v6, 0.0  ;;  %v2862_v34 = vadd.f32 %v4785_v32, %v2316_v21 }
 0x3a7   : > { %2989 = vst [vmem:[%s4804_s16 + $0xf0] sm:$0xff] %v2925_v15  ;;  %v2926_v59 = vmax.f32 %v2862_v34, 0.0 }
 0x3a8   : > { %v1839_v31 = vpop.f32.mrb[80].mxu0  ;;  %v4914_v35 = vpop.f32.mrb[96].mxu1 }
 0x3a9   : > { %2990 = vst [vmem:[%s4804_s16 + $0xf8] sm:$0xff] %v2926_v59  ;;  %v2321_v50 = vadd.f32 %v2320_v11, %v1839_v31  ;;  %v1841_v27 = vpop.f32.mrb[81].mxu0  ;;  %v4917_v4 = vpop.f32.mrb[97].mxu1 }
 0x3aa   : > { %v1842_v13 = vpop.f32.mrb[82].mxu0  ;;  %v4919_v60 = vpop.f32.mrb[98].mxu1 }
 0x3ab   : > { %v2863_v32 = vadd.f32 %v4787_v47, %v2321_v50  ;;  %v2324_v29 = vadd.f32 %v2323_v1, %v1842_v13  ;;  %v1844_v54 = vpop.f32.mrb[83].mxu0  ;;  %v4922_v25 = vpop.f32.mrb[99].mxu1 }
 0x3ac   : > { %v4925_v61 = vpop.permute.xlu1 %2778  ;;  %v2784_v33 = vpop.permute.xlu0 %2783 }
 0x3ad   : > { %v2927_v23 = vmax.f32 %v2863_v32, 0.0  ;;  %v2864_v45 = vadd.f32 %v4800_v0, %v2324_v29 }
 0x3af   : > { %2991 = vst [vmem:[%s4804_s16 + $0x100] sm:$0xff] %v2927_v23  ;;  %v2928_v11 = vmax.f32 %v2864_v45, 0.0 }
 0x3b0   : > { %v1847_v22 = vpop.f32.mrb[84].mxu0  ;;  %v4928_v46 = vpop.f32.mrb[100].mxu1 }
 0x3b1   : > { %2992 = vst [vmem:[%s4804_s16 + $0x108] sm:$0xff] %v2928_v11  ;;  %v2329_v26 = vadd.f32 %v3469_v7, %v1847_v22  ;;  %v1849_v37 = vpop.f32.mrb[85].mxu0  ;;  %v4931_v47 = vpop.f32.mrb[101].mxu1 }
 0x3b2   : > { %v1850_v1 = vpop.f32.mrb[86].mxu0  ;;  %v4933_v41 = vpop.f32.mrb[102].mxu1 }
 0x3b3   : > { %v2865_v0 = vadd.f32 %v4802_v57, %v2329_v26  ;;  %v2332_v16 = vadd.f32 %v3470_v58, %v1850_v1  ;;  %v1852_v49 = vpop.f32.mrb[87].mxu0  ;;  %v4936_v10 = vpop.f32.mrb[103].mxu1 }
 0x3b4   : > { %v2789_v9 = vpop.permute.xlu1 %2788  ;;  %v4939_v6 = vpop.permute.xlu0 %2793 }
 0x3b5   : > { %v2929_v40 = vmax.f32 %v2865_v0, 0.0  ;;  %v2866_v53 = vadd.f32 %v4817_v2, %v2332_v16 }
 0x3b7   : > { %2993 = vst [vmem:[%s4804_s16 + $0x110] sm:$0xff] %v2929_v40  ;;  %v2930_v7 = vmax.f32 %v2866_v53, 0.0  ;;  %v5113_v53 = vld [vmem:[#allocation8_spill] sm:$0xff] }
 0x3b8   : > { %v1855_v21 = vpop.f32.mrb[88].mxu0  ;;  %v4942_v43 = vpop.f32.mrb[104].mxu1 }
 0x3b9   : > { %2994 = vst [vmem:[%s4804_s16 + $0x118] sm:$0xff] %v2930_v7  ;;  %v2337_v15 = vadd.f32 %v2336_v38, %v1855_v21  ;;  %v1857_v34 = vpop.f32.mrb[89].mxu0  ;;  %v4945_v57 = vpop.f32.mrb[105].mxu1 }
 0x3ba   : > { %v1858_v58 = vpop.f32.mrb[90].mxu0  ;;  %v4947_v59 = vpop.f32.mrb[106].mxu1 }
 0x3bb   : > { %v2867_v2 = vadd.f32 %v4819_v63, %v2337_v15  ;;  %v2340_v31 = vadd.f32 %v2339_v36, %v1858_v58  ;;  %v1860_v50 = vpop.f32.mrb[91].mxu0  ;;  %v4950_v27 = vpop.f32.mrb[107].mxu1 }
 0x3bc   : > { %v2799_v29 = vpop.permute.xlu1 %2798  ;;  %v2804_v54 = vpop.permute.xlu0 %2803 }
 0x3bd   : > { %v2931_v13 = vmax.f32 %v2867_v2, 0.0  ;;  %v2868_v32 = vadd.f32 %v4833_v5, %v2340_v31 }
 0x3bf   : > { %2995 = vst [vmem:[%s4804_s16 + $0x120] sm:$0xff] %v2931_v13  ;;  %v2932_v38 = vmax.f32 %v2868_v32, 0.0 }
 0x3c0   : > { %v1863_v23 = vpop.f32.mrb[92].mxu0  ;;  %v3489_v45 = vpop.f32.mrb[108].mxu1 }
 0x3c1   : > { %2996 = vst [vmem:[%s4804_s16 + $0x128] sm:$0xff] %v2932_v38  ;;  %v2345_v11 = vadd.f32 %v4902_v12, %v1863_v23  ;;  %v2409_v22 = vadd.f32 %v3489_v45, %v4735_v3  ;;  %v1865_v26 = vpop.f32.mrb[93].mxu0  ;;  %v2400_v63 = vpop.f32.mrb[109].mxu1 }
 0x3c2   : > { %v2401_v36 = vadd.f32 %v2400_v63, %v4725_v48  ;;  %v1866_v37 = vpop.f32.mrb[94].mxu0  ;;  %v3490_v1 = vpop.f32.mrb[110].mxu1 }
 0x3c3   : > { %v2869_v0 = vadd.f32 %v4835_v18, %v2345_v11  ;;  %v2885_v5 = vadd.f32 %v2784_v33, %v2409_v22  ;;  %v2348_v16 = vadd.f32 %v4905_v62, %v1866_v37  ;;  %v2412_v49 = vadd.f32 %v3490_v1, %v4737_v8  ;;  %v1868_v40 = vpop.f32.mrb[95].mxu0  ;;  %v2403_v12 = vpop.f32.mrb[111].mxu1 }
 0x3c4   : > { %v2883_v3 = vadd.f32 %v4911_v39, %v2401_v36  ;;  %v2404_v7 = vadd.f32 %v2403_v12, %v5113_v53  ;;  %v2809_v62 = vpop.permute.xlu1 %2808  ;;  %v2814_v8 = vpop.permute.xlu0 %2813  ;;  %v5116_v36 = vld [vmem:[#allocation12_spill] sm:$0xff] }
 0x3c5   : > { %v2933_v21 = vmax.f32 %v2869_v0, 0.0  ;;  %v2949_v48 = vmax.f32 %v2885_v5, 0.0  ;;  %v2870_v18 = vadd.f32 %v4847_v42, %v2348_v16  ;;  %v2886_v15 = vadd.f32 %v2789_v9, %v2412_v49  ;;  %v5114_v42 = vld [vmem:[#allocation11_spill] sm:$0xff]  ;;  %v5117_v5 = vld [vmem:[#allocation10_spill] sm:$0xff] }
 0x3c6   : > { %v2947_v33 = vmax.f32 %v2883_v3, 0.0  ;;  %v2884_v34 = vadd.f32 %v4925_v61, %v2404_v7  ;;  %v5115_v61 = vld [vmem:[#allocation9_spill] sm:$0xff] }
 0x3c7   : > { %2997 = vst [vmem:[%s4804_s16 + $0x130] sm:$0xff] %v2933_v21  ;;  %3013 = vst [vmem:[%s4804_s16 + $0x1b0] sm:$0xff] %v2949_v48  ;;  %v2934_v58 = vmax.f32 %v2870_v18, 0.0  ;;  %v2950_v2 = vmax.f32 %v2886_v15, 0.0 }
 0x3c8   : > { %3011 = vst [vmem:[%s4804_s16 + $0x1a0] sm:$0xff] %v2947_v33  ;;  %v2948_v39 = vmax.f32 %v2884_v34, 0.0  ;;  %v1871_v31 = vpop.f32.mrb[96].mxu0  ;;  %v3493_v50 = vpop.f32.mrb[112].mxu1  ;;  %v5118_v33 = vld [vmem:[#allocation15_spill] sm:$0xff] }
 0x3c9   : > { %2998 = vst [vmem:[%s4804_s16 + $0x138] sm:$0xff] %v2934_v58  ;;  %3014 = vst [vmem:[%s4804_s16 + $0x1b8] sm:$0xff] %v2950_v2  ;;  %v2353_v13 = vadd.f32 %v4917_v4, %v1871_v31  ;;  %v2425_v9 = vadd.f32 %v3493_v50, %v5114_v42  ;;  %v1873_v32 = vpop.f32.mrb[97].mxu0  ;;  %v2416_v38 = vpop.f32.mrb[113].mxu1  ;;  %v5120_v42 = vld [vmem:[#allocation16_spill] sm:$0xff] }
 0x3ca   : > { %3012 = vst [vmem:[%s4804_s16 + $0x1a8] sm:$0xff] %v2948_v39  ;;  %v2417_v23 = vadd.f32 %v2416_v38, %v5115_v61  ;;  %v1874_v45 = vpop.f32.mrb[98].mxu0  ;;  %v3494_v11 = vpop.f32.mrb[114].mxu1 }
 0x3cb   : > { %v2871_v22 = vadd.f32 %v4849_v19, %v2353_v13  ;;  %v2889_v26 = vadd.f32 %v2804_v54, %v2425_v9  ;;  %v2356_v63 = vadd.f32 %v4922_v25, %v1874_v45  ;;  %v2428_v37 = vadd.f32 %v3494_v11, %v5116_v36  ;;  %v1876_v1 = vpop.f32.mrb[99].mxu0  ;;  %v2419_v4 = vpop.f32.mrb[115].mxu1 }
 0x3cc   : > { %v2887_v0 = vadd.f32 %v4939_v6, %v2417_v23  ;;  %v2420_v16 = vadd.f32 %v2419_v4, %v5117_v5  ;;  %v2819_v54 = vpop.permute.xlu1 %2818  ;;  %v2824_v25 = vpop.permute.xlu0 %2823  ;;  %v5121_v23 = vld [vmem:[#allocation14_spill] sm:$0xff] }
 0x3cd   : > { %v2935_v49 = vmax.f32 %v2871_v22, 0.0  ;;  %v2953_v40 = vmax.f32 %v2889_v26, 0.0  ;;  %v2872_v19 = vadd.f32 %v4859_v56, %v2356_v63  ;;  %v2890_v12 = vadd.f32 %v2809_v62, %v2428_v37 }
 0x3ce   : > { %v2951_v3 = vmax.f32 %v2887_v0, 0.0  ;;  %v2888_v53 = vadd.f32 %v2799_v29, %v2420_v16  ;;  %v5119_v29 = vld [vmem:[#allocation13_spill] sm:$0xff] }
 0x3cf   : > { %2999 = vst [vmem:[%s4804_s16 + $0x140] sm:$0xff] %v2935_v49  ;;  %3017 = vst [vmem:[%s4804_s16 + $0x1d0] sm:$0xff] %v2953_v40  ;;  %v2936_v7 = vmax.f32 %v2872_v19, 0.0  ;;  %v2954_v21 = vmax.f32 %v2890_v12, 0.0 }
 0x3d0   : > { %3015 = vst [vmem:[%s4804_s16 + $0x1c0] sm:$0xff] %v2951_v3  ;;  %v2952_v6 = vmax.f32 %v2888_v53, 0.0  ;;  %v1879_v48 = vpop.f32.mrb[100].mxu0  ;;  %v3497_v18 = vpop.f32.mrb[116].mxu1 }
 0x3d1   : > { %3000 = vst [vmem:[%s4804_s16 + $0x148] sm:$0xff] %v2936_v7  ;;  %3018 = vst [vmem:[%s4804_s16 + $0x1d8] sm:$0xff] %v2954_v21  ;;  %v2361_v15 = vadd.f32 %v4914_v35, %v1879_v48  ;;  %v2441_v56 = vadd.f32 %v3497_v18, %v5118_v33  ;;  %v1881_v34 = vpop.f32.mrb[101].mxu0  ;;  %v2432_v62 = vpop.f32.mrb[117].mxu1 }
 0x3d2   : > { %3016 = vst [vmem:[%s4804_s16 + $0x1c8] sm:$0xff] %v2952_v6  ;;  %v2433_v58 = vadd.f32 %v2432_v62, %v5119_v29  ;;  %v1882_v2 = vpop.f32.mrb[102].mxu0  ;;  %v3498_v39 = vpop.f32.mrb[118].mxu1 }
 0x3d3   : > { %v2873_v31 = vadd.f32 %v4861_v30, %v2361_v15  ;;  %v2893_v50 = vadd.f32 %v2824_v25, %v2441_v56  ;;  %v2364_v13 = vadd.f32 %v4919_v60, %v1882_v2  ;;  %v2444_v9 = vadd.f32 %v3498_v39, %v5120_v42  ;;  %v1884_v35 = vpop.f32.mrb[103].mxu0  ;;  %v2435_v32 = vpop.f32.mrb[119].mxu1 }
 0x3d4   : > { %v2829_v38 = vpop.permute.xlu1 %2828  ;;  %v2891_v61 = vadd.f32 %v2814_v8, %v2433_v58  ;;  %v2436_v45 = vadd.f32 %v2435_v32, %v5121_v23 }
 0x3d5   : > { %v2937_v11 = vmax.f32 %v2873_v31, 0.0  ;;  %v2957_v22 = vmax.f32 %v2893_v50, 0.0  ;;  %v2874_v30 = vadd.f32 %v4871_v28, %v2364_v13  ;;  %v2894_v26 = vadd.f32 %v2829_v38, %v2444_v9 }
 0x3d6   : > { %v2955_v63 = vmax.f32 %v2891_v61, 0.0  ;;  %v2892_v36 = vadd.f32 %v2819_v54, %v2436_v45 }
 0x3d7   : > { %3001 = vst [vmem:[%s4804_s16 + $0x150] sm:$0xff] %v2937_v11  ;;  %3021 = vst [vmem:[%s4804_s16 + $0x1f0] sm:$0xff] %v2957_v22  ;;  %v2938_v60 = vmax.f32 %v2874_v30, 0.0  ;;  %v2958_v37 = vmax.f32 %v2894_v26, 0.0 }
 0x3d8   : > { %3019 = vst [vmem:[%s4804_s16 + $0x1e0] sm:$0xff] %v2955_v63  ;;  %v2956_v1 = vmax.f32 %v2892_v36, 0.0  ;;  %v1887_v8 = vpop.f32.mrb[104].mxu0 }
 0x3d9   : > { %3002 = vst [vmem:[%s4804_s16 + $0x158] sm:$0xff] %v2938_v60  ;;  %3022 = vst [vmem:[%s4804_s16 + $0x1f8] sm:$0xff] %v2958_v37  ;;  %v2369_v4 = vadd.f32 %v4931_v47, %v1887_v8  ;;  %v1889_v0 = vpop.f32.mrb[105].mxu0 }
 0x3da   : > { %3020 = vst [vmem:[%s4804_s16 + $0x1e8] sm:$0xff] %v2956_v1  ;;  %v1890_v5 = vpop.f32.mrb[106].mxu0 }
 0x3db   : > { %v2875_v28 = vadd.f32 %v4873_v44, %v2369_v4  ;;  %v2372_v16 = vadd.f32 %v4936_v10, %v1890_v5  ;;  %v1892_v49 = vpop.f32.mrb[107].mxu0 }
 0x3dd   : > { %v2939_v40 = vmax.f32 %v2875_v28, 0.0  ;;  %v2876_v19 = vadd.f32 %v4881_v17, %v2372_v16 }
 0x3df   : > { %3003 = vst [vmem:[%s4804_s16 + $0x160] sm:$0xff] %v2939_v40  ;;  %v2940_v12 = vmax.f32 %v2876_v19, 0.0 }
 0x3e0   : > { %v1895_v54 = vpop.f32.mrb[108].mxu0 }
 0x3e1   : > { %3004 = vst [vmem:[%s4804_s16 + $0x168] sm:$0xff] %v2940_v12  ;;  %v2377_v3 = vadd.f32 %v4928_v46, %v1895_v54  ;;  %v1897_v47 = vpop.f32.mrb[109].mxu0 }
 0x3e2   : > { %v1898_v53 = vpop.f32.mrb[110].mxu0 }
 0x3e3   : > { %v2877_v25 = vadd.f32 %v4883_v24, %v2377_v3  ;;  %v2380_v44 = vadd.f32 %v4933_v41, %v1898_v53  ;;  %v1900_v10 = vpop.f32.mrb[111].mxu0 }
 0x3e5   : > { %v2941_v7 = vmax.f32 %v2877_v25, 0.0  ;;  %v2878_v21 = vadd.f32 %v4889_v51, %v2380_v44 }
 0x3e7   : > { %3005 = vst [vmem:[%s4804_s16 + $0x170] sm:$0xff] %v2941_v7  ;;  %v2942_v17 = vmax.f32 %v2878_v21, 0.0 }
 0x3e8   : > { %v1903_v6 = vpop.f32.mrb[112].mxu0 }
 0x3e9   : > { %3006 = vst [vmem:[%s4804_s16 + $0x178] sm:$0xff] %v2942_v17  ;;  %v2385_v46 = vadd.f32 %v4945_v57, %v1903_v6  ;;  %v1905_v48 = vpop.f32.mrb[113].mxu0 }
 0x3ea   : > { %v1906_v18 = vpop.f32.mrb[114].mxu0 }
 0x3eb   : > { %v2879_v15 = vadd.f32 %v4891_v20, %v2385_v46  ;;  %v2388_v24 = vadd.f32 %v4950_v27, %v1906_v18  ;;  %v1908_v41 = vpop.f32.mrb[115].mxu0 }
 0x3ed   : > { %v2943_v33 = vmax.f32 %v2879_v15, 0.0  ;;  %v2880_v51 = vadd.f32 %v4897_v14, %v2388_v24 }
 0x3ef   : > { %3007 = vst [vmem:[%s4804_s16 + $0x180] sm:$0xff] %v2943_v33  ;;  %v2944_v56 = vmax.f32 %v2880_v51, 0.0 }
 0x3f0   : > { %v1911_v34 = vpop.f32.mrb[116].mxu0 }
 0x3f1   : > { %3008 = vst [vmem:[%s4804_s16 + $0x188] sm:$0xff] %v2944_v56  ;;  %v2393_v57 = vadd.f32 %v4942_v43, %v1911_v34  ;;  %v1913_v62 = vpop.f32.mrb[117].mxu0 }
 0x3f2   : > { %v1914_v20 = vpop.f32.mrb[118].mxu0 }
 0x3f3   : > { %v2881_v27 = vadd.f32 %v4899_v55, %v2393_v57  ;;  %v2396_v29 = vadd.f32 %v4947_v59, %v1914_v20  ;;  %v1916_v58 = vpop.f32.mrb[119].mxu0 }
 0x3f5   : > { %v2945_v14 = vmax.f32 %v2881_v27, 0.0  ;;  %v2882_v2 = vadd.f32 %v4909_v52, %v2396_v29 }
 0x3f7   : > { %3009 = vst [vmem:[%s4804_s16 + $0x190] sm:$0xff] %v2945_v14  ;;  %v2946_v43 = vmax.f32 %v2882_v2, 0.0 }
 0x3f9   : > { %3010 = vst [vmem:[%s4804_s16 + $0x198] sm:$0xff] %v2946_v43 }
 0x3fa   : > { %3775 = shalt.err (!%p3772_p10)
}
 0x3fb   : > { %s3776_s16 = scalar_lea.hbm %s5028_s21, 8192  ;;  %s3780_s14 = scalar_lea.hbm %s5094_s8, 65536 }
 0x3fc   : > { %p3777_p11 = scmp.ne.s32.totalorder %s5028_s21, %s3776_s16  ;;  %p3781_p0 = scmp.lt.u32.totalorder %s5028_s21, %s5094_s8 }
 0x3fd   : > { %p3782_p1 = scmp.lt.u32.totalorder %s3780_s14, %s3776_s16  ;;  %p3784_p3 = scmp.lt.u32.totalorder %s3776_s16, %s5028_s21 }
 0x3fe   : > { %p3778_p12 = pnand %p3777_p11, %p3969_p8 }
 0x3ff   : > { %p3783_p2 = por %p3782_p1, %p3781_p0 }
 0x400   : > { %p3779_p13 = pneg %p3778_p12 }
 0x401   : > { %p3785_p4 = por %p3784_p3, %p3783_p2 }
 0x403   : > { %p3786_p5 = pnand %p3785_p4, %p3779_p13 }
 0x405   : > { %3789 = shalt.err (!%p3786_p5)
}
 0x406   : > { %s3861_s26 = smov 128   ;;  %s3862_s22 = smov 512  }
 0x407   : > { %s3863_s18 = smov 8  }
 0x408   : > { %3531 = dma.vmem_to_hbm [thread:$0]  (%p3969_p8), %s5030_s9, 8192, %s5028_s21, %s3024_s0, %s3861_s26, %s3862_s22, %s3863_s18  }
 0x409 PF: > { %p3537_p6 = scmp.ge.s32.totalorder %s3856_s12, 2  ;;  %s3053_s23 = sand.u32 1, %s3828_s27  }
 0x40a   : > { %s3054_s16 = scalar_lea.sflag [#allocation4], %s3053_s23 }
 0x40b   : > { %p3534_p7 = pnand %p3537_p6, %p3973_p9 }
 0x40d   : > { %3823 = dma.done.wait (!%p3534_p7), %s3054_s16, 8192  }
 0x40e   : > { %3825 = vsyncadd (!%p3534_p7), %s3054_s16, 4294959104  ;;  %s21_s12 = sadd.s32 1, %s3856_s12   ;;  %s5122_s19 = sld [smem:[#allocation6_spill]] }
 0x40f   : > { %p18_p10 = scmp.ge.s32.totalorder %s21_s12, 10   ;;  %s5123_s25 = sld [smem:[#allocation7_spill]] }
 0x410   : > { %s5124_s27 = smov %s3832_s28  ;;  %s5125_s28 = smov %s3836_s29 }
 0x411   : > { %s5126_s29 = smov %s3981_s24  ;;  %s5127_s30 = smov %s3848_s10 }
 0x412   : > { %s5128_s9 = smov %s3852_s11  ;;  %20 = sbr.rel (!%p18_p10) target bundleno = 7 (0x7), region = 136 }
 0x414   : > { %s5129_s10 = smov %s5122_s19 }
 0x415   : > { %s5130_s11 = smov %s5123_s25 }
 0x419   :  { %3059 = vsyncpa [#allocation4], 1 }
 0x41a   :  { %3061 = vsyncpa [#allocation4 + $0x1], 1 }

</bundles_post_ra>
